<compile_context>
chip_gen: v5e
topology: v5e:2x2
jax: 0.10.0
libtpu: 0.0.40
codegen_flags: <defaults>
</compile_context>

<pallas_src>
import jax
import jax.numpy as jnp
from jax.experimental import pallas as pl
from jax.experimental.pallas import tpu as pltpu

HIDDEN = 768      # Linear(768, 768) for q, k
SEQ_E = 577       # Linear(768, 577) for v  => e must have 577 tokens
SEQ_B = 1         # pooled token


def head_kernel(kq_ref, sb_ref, vb_ref, e_ref, out_ref):
    """Per grid step (block of batch items):
         kq_ref : (B_pad, 768)        bf16  resident  = q(b) @ Wk
         sb_ref : (B_pad, 1)          f32   resident  = q(b) . bk
         vb_ref : (B_pad, 577)        f32   resident  = v(b)
         e_ref  : (bb, 577, 768)      bf16/f32 streamed (the only big HBM operand)
         out    : (bb, 1)             f32
    """
    bb = e_ref.shape[0]
    start = pl.multiple_of(pl.program_id(0) * bb, bb)

    kq = kq_ref[pl.ds(start, bb), :]          # (bb, 768)
    sb = sb_ref[pl.ds(start, bb), :]          # (bb, 1)
    vb = vb_ref[pl.ds(start, bb), :]          # (bb, 577)

    e = e_ref[...]
    if e.dtype != jnp.bfloat16:
        # Producer should emit bf16; if it handed us f32 we cast per-tile here
        # instead of doing an extra HBM read/write pass in the wrapper.
        e = e.astype(jnp.bfloat16)

    # e is the dot LHS in its stored (token, hidden) orientation, contracting over
    # its last (lane) dim -> no transpose/relayout of the big tile on the MXU path.
    scores = jnp.einsum('btd,bqd->btq', e, kq[:, None, :],
                        preferred_element_type=jnp.float32)        # (bb, 577, 1)
    # The cheap relayout now happens on the tiny score matrix, not on e.
    att = jnp.tanh(scores[..., 0] + sb)                            # (bb, 577)
    # attention @ v(b)^T  ==  weighted sum over the 577 tokens (lane reduce).
    out_ref[...] = jnp.sum(att * vb, axis=-1, keepdims=True)       # (bb, 1)


def _tpu_vmem_capacity_bytes():
    try:
        return int(pltpu.get_tpu_info().vmem_capacity_bytes)
    except Exception:
        return 64 << 20        # conservative fallback == v7x per-TC VMEM


def _tile_plan(batch, e_itemsize, vmem_cap):
    """Pick (block_b, num_steps) per TPU generation.
    Single-TC generations (v5e/v6e, 128 MiB VMEM): big blocks, no step-count constraint.
    v7x (2 TCs, 64 MiB VMEM/TC): cap the double-buffered e tile and prefer an even
    number of grid steps so both TensorCores get balanced work."""
    two_tc = vmem_cap < (100 << 20)                    # 64 MiB/TC => v7x-like
    tile_budget = (16 << 20) if two_tc else (32 << 20)  # per e tile (double-buffered)
    e_item_bytes = SEQ_E * HIDDEN * e_itemsize
    max_block = max(1, tile_budget // e_item_bytes)
    if max_block >= 8:
        max_block -= max_block % 8                     # keep 8-aligned block sizes
    max_block = min(32, max_block)

    num_steps = -(-batch // max_block)                 # cdiv
    if two_tc and num_steps > 1 and num_steps % 2 == 1:
        num_steps += 1                                 # balance the two TensorCores
    block_b = -(-batch // num_steps)
    if num_steps > 1:
        block_b = ((block_b + 7) // 8) * 8             # out-block sublane dim alignment
    num_steps = -(-batch // block_b)
    return block_b, num_steps


def attention_head(b, e, params):
    """b: (B, 1, 768), e: (B, 577, 768) -> squeeze of (B, 1, 1) (matches torch .squeeze())."""
    B = b.shape[0]
    wq_t, bq, wk_t, bk, wv_t, bv = params

    # ---- wrapper-side fold (tiny XLA work, only touches b and the weights) ----
    # scores = q(b) @ k(e)^T = (q(b) @ Wk) @ e^T + q(b).bk
    b2 = b.reshape(B, HIDDEN).astype(jnp.float32)
    qb = b2 @ wq_t + bq                                  # (B, 768)  = q(b)
    kq = (qb @ wk_t.T).astype(jnp.bfloat16)              # (B, 768)  = q(b) @ Wk
    sbias = qb @ bk.reshape(HIDDEN, 1)                   # (B, 1)    = q(b) . bk
    vb = b2 @ wv_t + bv                                  # (B, 577)  = v(b)

    # `e` is streamed in its producer dtype (blip_proxy emits bf16, so there is no
    # extra HBM cast pass on the dominant operand).
    e_itemsize = jnp.dtype(e.dtype).itemsize
    vmem_cap = _tpu_vmem_capacity_bytes()
    block_b, num_steps = _tile_plan(B, e_itemsize, vmem_cap)
    b_pad = num_steps * block_b

    if b_pad > B:
        # Pad only the tiny per-item operands (padded rows produce discarded outputs).
        # The big `e` is NOT padded/copied: its last partial block is a bounded DMA.
        pad = ((0, b_pad - B), (0, 0))
        kq = jnp.pad(kq, pad)
        sbias = jnp.pad(sbias, pad)
        vb = jnp.pad(vb, pad)

    # VMEM budget: double-buffered e block + resident small operands + headroom.
    e_block_bytes = block_b * SEQ_E * HIDDEN * e_itemsize
    resident_bytes = b_pad * (HIDDEN * 2 + SEQ_E * 4 + 4)
    vmem_limit = 2 * e_block_bytes + 2 * resident_bytes + (8 << 20)
    vmem_limit = int(max(16 << 20, min(vmem_limit, (vmem_cap * 3) // 4)))

    out = pl.pallas_call(
        head_kernel,
        out_shape=jax.ShapeDtypeStruct((B, 1), jnp.float32),
        grid_spec=pltpu.PrefetchScalarGridSpec(
            num_scalar_prefetch=0,
            grid=(num_steps,),
            in_specs=[
                # Tiny per-item operands: resident across the whole grid (one DMA),
                # sliced inside the kernel with pl.ds; batch maps to sublanes.
                pl.BlockSpec((b_pad, HIDDEN), lambda i: (0, 0)),            # q(b)@Wk
                pl.BlockSpec((b_pad, 1), lambda i: (0, 0)),                 # q(b).bk
                pl.BlockSpec((b_pad, SEQ_E), lambda i: (0, 0)),             # v(b)
                # The only big operand: streamed per step, natural orientation.
                pl.BlockSpec((block_b, SEQ_E, HIDDEN), lambda i: (i, 0, 0)),  # e
            ],
            out_specs=pl.BlockSpec((block_b, 1), lambda i: (i, 0)),
        ),
        compiler_params=pltpu.CompilerParams(
            dimension_semantics=("parallel",),
            vmem_limit_bytes=vmem_limit,
        ),
    )(kq, sbias, vb, e)

    # torch: attention.squeeze() on (B, 1, 1) -> (B,)  (0-d scalar when B == 1)
    return jnp.squeeze(out)


def init_params(key):
    """Deterministic init matching nn.Linear shapes: q(768,768), k(768,768), v(768,577).
    Weights are stored pre-transposed as (in, out)."""
    ks = jax.random.split(key, 6)
    scale = 1.0 / jnp.sqrt(HIDDEN)
    wq_t = jax.random.uniform(ks[0], (HIDDEN, HIDDEN), jnp.float32, -scale, scale)   # Wq^T
    bq = jax.random.uniform(ks[1], (1, HIDDEN), jnp.float32, -scale, scale)
    wk_t = jax.random.uniform(ks[2], (HIDDEN, HIDDEN), jnp.float32, -scale, scale)   # Wk^T
    bk = jax.random.uniform(ks[3], (1, HIDDEN), jnp.float32, -scale, scale)
    wv_t = jax.random.uniform(ks[4], (HIDDEN, SEQ_E), jnp.float32, -scale, scale)    # Wv^T
    bv = jax.random.uniform(ks[5], (1, SEQ_E), jnp.float32, -scale, scale)
    return (wq_t, bq, wk_t, bk, wv_t, bv)


def blip_proxy(pixel_values, key):
    """Deterministic stand-in for the frozen BLIP vision encoder.
    Emits `e` directly in bf16 (the cast fuses into the producing elementwise op),
    so the attention-head kernel's dominant HBM operand is written once at 2 B/elem.
    pixel_values: (B, 3, H, W) NCHW -> b (B, 1, 768) f32, e (B, 577, 768) bf16."""
    # TODO(synk): real Blippa(blip_config) backbone not available; proxy projection only.
    B = pixel_values.shape[0]
    xf = pixel_values.reshape(B, -1).astype(jnp.float32)                # (B, 3*H*W)
    k1, k2 = jax.random.split(key)
    p1 = jax.random.normal(k1, (xf.shape[1], HIDDEN), jnp.float32) * 0.02
    p2 = jax.random.normal(k2, (xf.shape[1], SEQ_E), jnp.float32) * 0.02
    h = jnp.tanh(xf @ p1)                                               # (B, 768)
    t = jnp.tanh(xf @ p2)                                               # (B, 577)
    e_f32 = 0.1 * t[:, :, None] * h[:, None, :]                         # (B, 577, 768)
    b = jnp.mean(e_f32, axis=1, keepdims=True)                          # (B, 1, 768) f32
    e = e_f32.astype(jnp.bfloat16)                                      # bf16 at the producer
    return b, e


def model_forward(pixel_values, params, proxy_key):
    b, e = blip_proxy(pixel_values, proxy_key)
    # dropout1 / dropout2 are identity in eval mode; GELU `self.act` is unused in forward.
    return attention_head(b, e, params)


if __name__ == "__main__":
    key = jax.random.PRNGKey(0)
    k_pix, k_param, k_proxy = jax.random.split(key, 3)

    # small NCHW pixel input consistent with an image-model forward
    pixel_values = jax.random.normal(k_pix, (2, 3, 16, 16), jnp.float32)
    params = init_params(k_param)

    fwd = jax.jit(model_forward)
    out = fwd(pixel_values, params, k_proxy)
    jax.block_until_ready(out)
    assert out.shape == (2,), f"unexpected output shape {out.shape}"

    # Light correctness check of the attention head against plain XLA on the same
    # (bf16-rounded) operands.  Note: bf16 e/kq differ from an all-f32 PyTorch
    # reference by ~1e-2 relative; this check isolates the kernel itself.
    b, e = blip_proxy(pixel_values, k_proxy)
    wq_t, bq, wk_t, bk, wv_t, bv = params
    b2 = b.reshape(2, HIDDEN)
    qb = b2 @ wq_t + bq
    kq_ref = (qb @ wk_t.T).astype(jnp.bfloat16).astype(jnp.float32)
    scores_ref = jnp.einsum('bd,btd->bt', kq_ref, e.astype(jnp.float32)) \
        + qb @ bk.reshape(HIDDEN, 1)
    ref = jnp.sum(jnp.tanh(scores_ref) * (b2 @ wv_t + bv), axis=-1)
    assert jnp.allclose(out, ref, rtol=1e-2, atol=1e-3), (out, ref)

    print("KERNEL_OK")
</pallas_src>

<mosaic_0001>
module attributes {stable_mosaic.version = 11 : i64} {
  func.func @head_kernel(%arg0: i32, %arg1: memref<2x768xbf16, #tpu.memory_space<vmem>>, %arg2: memref<2x1xf32, #tpu.memory_space<vmem>>, %arg3: memref<2x577xf32, #tpu.memory_space<vmem>>, %arg4: memref<2x577x768xbf16, #tpu.memory_space<vmem>>, %arg5: memref<2x1xf32, #tpu.memory_space<vmem>>) attributes {dimension_semantics = [#tpu.dimension_semantics<parallel>], iteration_bounds = array<i64: 1>, scalar_prefetch = 0 : i64, scratch_operands = 0 : i64, tpu.core_type = #tpu.core_type<tc>, window_params = [{pipeline_mode = #tpu.pipeline_mode<synchronous>, transform_indices = @transform_0, window_bounds = array<i64: 2, 768>}, {pipeline_mode = #tpu.pipeline_mode<synchronous>, transform_indices = @transform_1, window_bounds = array<i64: 2, 1>}, {pipeline_mode = #tpu.pipeline_mode<synchronous>, transform_indices = @transform_2, window_bounds = array<i64: 2, 577>}, {transform_indices = @transform_3, window_bounds = array<i64: 2, 577, 768>}, {transform_indices = @transform_4, window_bounds = array<i64: 2, 1>}]} {
    %c2_i32 = arith.constant 2 : i32
    %0 = arith.muli %arg0, %c2_i32 : i32
    %1 = tpu.assume_multiple %0, 2 : i32
    %2 = arith.index_cast %1 : i32 to index
    %c0 = arith.constant 0 : index
    %3 = vector.load %arg1[%2, %c0] : memref<2x768xbf16, #tpu.memory_space<vmem>>, vector<2x768xbf16>
    %4 = arith.index_cast %1 : i32 to index
    %c0_0 = arith.constant 0 : index
    %5 = vector.load %arg2[%4, %c0_0] : memref<2x1xf32, #tpu.memory_space<vmem>>, vector<2x1xf32>
    %6 = arith.index_cast %1 : i32 to index
    %c0_1 = arith.constant 0 : index
    %7 = vector.load %arg3[%6, %c0_1] : memref<2x577xf32, #tpu.memory_space<vmem>>, vector<2x577xf32>
    %c0_2 = arith.constant 0 : index
    %c0_3 = arith.constant 0 : index
    %c0_4 = arith.constant 0 : index
    %8 = vector.load %arg4[%c0_2, %c0_3, %c0_4] : memref<2x577x768xbf16, #tpu.memory_space<vmem>>, vector<2x577x768xbf16>
    %9 = vector.shape_cast %3 : vector<2x768xbf16> to vector<2x1x768xbf16>
    "tpu.trace_start"() <{level = 10 : i32, message = "btd,bqd->btq"}> : () -> ()
    %cst = arith.constant dense<0.000000e+00> : vector<2x577x1xf32>
    %10 = tpu.matmul %8, %9, %cst {dimension_numbers = #tpu.dot_dimension_numbers<[2], [2], [1], [1], [0, 0, 0, 1, 1, 1], [0], [0]>} : vector<2x577x768xbf16>, vector<2x1x768xbf16>, vector<2x577x1xf32> -> vector<2x577x1xf32>
    "tpu.trace_stop"() : () -> ()
    %11 = vector.shape_cast %10 : vector<2x577x1xf32> to vector<2x577xf32>
    %12 = vector.broadcast %5 : vector<2x1xf32> to vector<2x577xf32>
    %13 = arith.addf %11, %12 : vector<2x577xf32>
    %14 = math.tanh %13 : vector<2x577xf32>
    %15 = arith.mulf %14, %7 : vector<2x577xf32>
    %cst_5 = arith.constant dense<0.000000e+00> : vector<2xf32>
    %16 = vector.multi_reduction <add>, %15, %cst_5 [1] : vector<2x577xf32> to vector<2xf32>
    %17 = vector.shape_cast %16 : vector<2xf32> to vector<2x1xf32>
    %c0_6 = arith.constant 0 : index
    %c0_7 = arith.constant 0 : index
    %18 = vector.load %arg5[%c0_6, %c0_7] : memref<2x1xf32, #tpu.memory_space<vmem>>, vector<2x1xf32>
    tpu.vector_store %arg5[%c0_6, %c0_7], %17 {strides = array<i32>} : memref<2x1xf32, #tpu.memory_space<vmem>>, vector<2x1xf32>,
    return
  }
  func.func @transform_0(%arg0: i32) -> (i32, i32) {
    %c0_i32 = arith.constant 0 : i32
    %c0_i32_0 = arith.constant 0 : i32
    %c0_i32_1 = arith.constant 0 : i32
    return %c0_i32, %c0_i32_0 : i32, i32
  }
  func.func @transform_1(%arg0: i32) -> (i32, i32) {
    %c0_i32 = arith.constant 0 : i32
    %c0_i32_0 = arith.constant 0 : i32
    %c0_i32_1 = arith.constant 0 : i32
    return %c0_i32, %c0_i32_0 : i32, i32
  }
  func.func @transform_2(%arg0: i32) -> (i32, i32) {
    %c0_i32 = arith.constant 0 : i32
    %c0_i32_0 = arith.constant 0 : i32
    %c0_i32_1 = arith.constant 0 : i32
    return %c0_i32, %c0_i32_0 : i32, i32
  }
  func.func @transform_3(%arg0: i32) -> (i32, i32, i32) {
    %c0_i32 = arith.constant 0 : i32
    %c0_i32_0 = arith.constant 0 : i32
    %c0_i32_1 = arith.constant 0 : i32
    return %arg0, %c0_i32, %c0_i32_0 : i32, i32, i32
  }
  func.func @transform_4(%arg0: i32) -> (i32, i32) {
    %c0_i32 = arith.constant 0 : i32
    %c0_i32_0 = arith.constant 0 : i32
    return %arg0, %c0_i32 : i32, i32
  }
}

</mosaic_0001>

<bundles_post_ra>
// kernel: model_forward.1
= control target key start
LH: loop header
LB: loop body
LE: loop exit
PB: predicated region body
PF: predicated region fallthrough
CT: control target
= control target key end

     0   :  { %v14738_v0 = vlaneseq  ;;  %vm7093_vm0 = vcmask 130112   ;;  %vm7097_vm1 = vcmask 195712   ;;  %vm7101_vm2 = vcmask 261312   ;;  %s14733_s0 = inlined_call_operand.vmem [shape: bf16[2,768], index: 0, kind: input, shape index: {}]   ;;  %s14734_s3 = inlined_call_operand.vmem [shape: bf16[2,577,768], index: 3, kind: input, shape index: {}]   ;;  %s14735_s2 = inlined_call_operand.vmem [shape: f32[2,577], index: 2, kind: input, shape index: {}]   ;;  %s14736_s1 = inlined_call_operand.vmem [shape: f32[2,1], index: 1, kind: input, shape index: {}]   ;;  %s14737_s4 = inlined_call_operand.vmem [shape: f32[2,1], index: 4, kind: output, shape index: {}]  }
   0x1   :  { %v23_v1 = vld [vmem:[%s14733_s0] sm:$0x3f]  ;;  %v9168_v12 = vld [vmem:[%s14734_s3 + $0x14] sm:$0xf0]  ;;  %v7440_v18 = vld [vmem:[%s14734_s3 + $0x18] sm:$0xf0] }
   0x2   :  { %v10056_v2 = vshrl.u32 %v14738_v0, 7  ;;  %v8300_v3 = vpack.i.b16 %v23_v1, %v23_v1  ;;  %v471_v4 = vunpack.i.h.s16 %v23_v1  ;;  %v7438_v11 = vld [vmem:[%s14734_s3] sm:$0xf]  ;;  %v9165_v14 = vld [vmem:[%s14734_s3 + $0x4] sm:$0xf]  ;;  %vm7105_vm3 = vcmask 326912  }
   0x3   :  { %v29_v13 = vld [vmem:[%s14735_s2] sm:$0xff]  ;;  %v7446_v19 = vld [vmem:[%s14734_s3 + $0x8] sm:$0xf]  ;;  %v9166_v21 = vld [vmem:[%s14734_s3 + $0xc] sm:$0xf]  ;;  %v7439_v25 = vor.u32 %v9168_v12, %v7438_v11  ;;  %v7443_v26 = vor.u32 %v9165_v14, %v7440_v18  ;;  %vm7109_vm4 = vcmask 392512  }
   0x4   :  { %v10059_v5 = vadd.s32 24, %v10056_v2  ;;  %v10062_v6 = vadd.s32 8, %v10056_v2  ;;  %v1574_v7 = vperm.slane %v8300_v3, 0  ;;  %v1575_v8 = vperm.slane %v8300_v3, 1  ;;  %5318 = vst [vmem:[#allocation1] ss:$4 sm:$0xff] %v29_v13 }
   0x5   :  { %v1576_v9 = vperm.slane %v8300_v3, 2  ;;  %v1577_v10 = vperm.slane %v8300_v3, 3  ;;  %v10078_v15 = vpack.i.b16 %v471_v4, %v471_v4  ;;  %v1578_v16 = vperm.slane %v8300_v3, 4  ;;  %v9169_v20 = vld [vmem:[%s14734_s3 + $0x1c] sm:$0xf0] }
   0x6   :  { %9600 = vset.pattern.permute.xlu2 %v10059_v5  ;;  %9598 = vset.pattern.permute.xlu1 %v10062_v6  ;;  %v1579_v17 = vperm.slane %v8300_v3, 5  ;;  %v7448_v22 = vld [vmem:[%s14734_s3 + $0x20] sm:$0xf0]  ;;  %v7447_v27 = vor.u32 %v9169_v20, %v7446_v19  ;;  %v10105_v31 = vadd.s32 32, %v10056_v2  ;;  %v10108_v32 = vadd.s32 16, %v10056_v2 }
   0x7   :  { %1593 = vmatpush.bf16.xpose.msra.mxu0 %v1574_v7  ;;  %1786 = vmatpush.bf16.xpose.msra.mxu1 %v1575_v8  ;;  %v3846_v23 = vperm.slane %v10078_v15, 0  ;;  %v3847_v24 = vperm.slane %v10078_v15, 1  ;;  %v7451_v28 = vor.u32 %v9166_v21, %v7448_v22  ;;  %v7462_v33 = vld [vmem:[%s14734_s3 + $0x30] sm:$0xf]  ;;  %v9174_v34 = vld [vmem:[%s14734_s3 + $0x44] sm:$0xf0] }
   0x8   :  { %1979 = vmatpush.bf16.xpose.msra.mxu2 %v1576_v9  ;;  %2172 = vmatpush.bf16.xpose.msra.mxu3 %v1577_v10  ;;  %v9171_v35 = vld [vmem:[%s14734_s3 + $0x34] sm:$0xf]  ;;  %v7464_v36 = vld [vmem:[%s14734_s3 + $0x48] sm:$0xf0]  ;;  %v7470_v37 = vld [vmem:[%s14734_s3 + $0x38] sm:$0xf]  ;;  %v7463_v41 = vor.u32 %v9174_v34, %v7462_v33 }
   0x9   :  { %v9175_v38 = vld [vmem:[%s14734_s3 + $0x4c] sm:$0xf0]  ;;  %v9172_v39 = vld [vmem:[%s14734_s3 + $0x3c] sm:$0xf]  ;;  %v7472_v40 = vld [vmem:[%s14734_s3 + $0x50] sm:$0xf0]  ;;  %v7467_v42 = vor.u32 %v9171_v35, %v7464_v36 }
   0xa   :  { %v7471_v43 = vor.u32 %v9175_v38, %v7470_v37  ;;  %v7475_v44 = vor.u32 %v9172_v39, %v7472_v40  ;;  %v10139_v45 = vadd.s32 48, %v10056_v2  ;;  %v10142_v46 = vadd.s32 40, %v10056_v2  ;;  %v7486_v47 = vld [vmem:[%s14734_s3 + $0x60] sm:$0xf]  ;;  %v9180_v48 = vld [vmem:[%s14734_s3 + $0x74] sm:$0xf0] }
   0xb   :  { %v10097_v29 = vld.sshfl [vmem:[#allocation1] sm:$0xff pattern:$0x73625140]  ;;  %v7488_v50 = vld [vmem:[%s14734_s3 + $0x78] sm:$0xf0]  ;;  %v10160_v52 = vadd.s32 80, %v10056_v2  ;;  %v7487_v56 = vor.u32 %v9180_v48, %v7486_v47 }
   0xc   :  { %v10100_v30 = vperm.slane %v10097_v29, 0  ;;  %v9177_v49 = vld [vmem:[%s14734_s3 + $0x64] sm:$0xf]  ;;  %v7494_v51 = vld [vmem:[%s14734_s3 + $0x68] sm:$0xf]  ;;  %v10177_v60 = vadd.s32 72, %v10056_v2 }
   0xd   :  { %v9181_v53 = vld [vmem:[%s14734_s3 + $0x7c] sm:$0xf0]  ;;  %v9178_v54 = vld [vmem:[%s14734_s3 + $0x6c] sm:$0xf]  ;;  %v7496_v55 = vld [vmem:[%s14734_s3 + $0x80] sm:$0xf0]  ;;  %9632 = vset.pattern.permute.xlu0 %v10160_v52  ;;  %v7491_v57 = vor.u32 %v9177_v49, %v7488_v50 }
   0xe   :  { %1594 = vmatmul.bf16.vlgmr.msra.gmra.mxu0 %v7439_v25  ;;  %1787 = vmatmul.bf16.vlgmr.msra.gmra.mxu1 %v7443_v26  ;;  %v7495_v58 = vor.u32 %v9181_v53, %v7494_v51  ;;  %v7499_v59 = vor.u32 %v9178_v54, %v7496_v55  ;;  %v10180_v61 = vadd.s32 64, %v10056_v2  ;;  %v7510_v62 = vld [vmem:[%s14734_s3 + $0x90] sm:$0xf]  ;;  %v9186_v63 = vld [vmem:[%s14734_s3 + $0xa4] sm:$0xf0]  ;;  %v10211_v14 = vadd.s32 88, %v10056_v2 }
   0xf   :  { %2365 = vmatpush.bf16.xpose.msrb.mxu0 %v1578_v16  ;;  %2558 = vmatpush.bf16.xpose.msrb.mxu1 %v1579_v17  ;;  %v9183_v1 = vld [vmem:[%s14734_s3 + $0x94] sm:$0xf]  ;;  %v7512_v3 = vld [vmem:[%s14734_s3 + $0xa8] sm:$0xf0]  ;;  %v7518_v4 = vld [vmem:[%s14734_s3 + $0x98] sm:$0xf]  ;;  %v7511_v10 = vor.u32 %v9186_v63, %v7510_v62 }
  0x10   :  { %3865 = vmatpush.bf16.xpose.msrb.mxu2 %v3846_v23  ;;  %4058 = vmatpush.bf16.xpose.msrb.mxu3 %v3847_v24  ;;  %v9187_v7 = vld [vmem:[%s14734_s3 + $0xac] sm:$0xf0]  ;;  %v9184_v8 = vld [vmem:[%s14734_s3 + $0x9c] sm:$0xf]  ;;  %v7520_v9 = vld [vmem:[%s14734_s3 + $0xb0] sm:$0xf0]  ;;  %v7515_v11 = vor.u32 %v9183_v1, %v7512_v3 }
  0x11   :  { %1980 = vmatmul.bf16.vlgmr.msra.gmra.mxu2 %v7447_v27  ;;  %2173 = vmatmul.bf16.vlgmr.msra.gmra.mxu3 %v7451_v28  ;;  %v7519_v12 = vor.u32 %v9187_v7, %v7518_v4  ;;  %v7523_v13 = vor.u32 %v9184_v8, %v7520_v9  ;;  %v7534_v16 = vld [vmem:[%s14734_s3 + $0xc0] sm:$0xf]  ;;  %v9192_v17 = vld [vmem:[%s14734_s3 + $0xd4] sm:$0xf0]  ;;  %v9189_v18 = vld [vmem:[%s14734_s3 + $0xc4] sm:$0xf] }
  0x12   :  { %5349 = vperm.xlu2 %9600, %v10100_v30   ;;  %5337 = vperm.xlu1 %9598, %v10100_v30   ;;  %v7536_v19 = vld [vmem:[%s14734_s3 + $0xd8] sm:$0xf0]  ;;  %v7542_v20 = vld [vmem:[%s14734_s3 + $0xc8] sm:$0xf]  ;;  %v9193_v21 = vld [vmem:[%s14734_s3 + $0xdc] sm:$0xf0]  ;;  %v7535_v24 = vor.u32 %v9192_v17, %v7534_v16 }
  0x13   :  { %v9190_v22 = vld [vmem:[%s14734_s3 + $0xcc] sm:$0xf]  ;;  %v7544_v23 = vld [vmem:[%s14734_s3 + $0xe0] sm:$0xf0]  ;;  %v7539_v25 = vor.u32 %v9189_v18, %v7536_v19  ;;  %v7543_v26 = vor.u32 %v9193_v21, %v7542_v20  ;;  %v10242_v28 = vadd.s32 112, %v10056_v2  ;;  %v10245_v33 = vadd.s32 104, %v10056_v2 }
  0x14   :  { %v7547_v27 = vor.u32 %v9190_v22, %v7544_v23  ;;  %v7558_v34 = vld [vmem:[%s14734_s3 + $0xf0] sm:$0xf]  ;;  %v9198_v35 = vld [vmem:[%s14734_s3 + $0x104] sm:$0xf0]  ;;  %v9195_v36 = vld [vmem:[%s14734_s3 + $0xf4] sm:$0xf] }
  0x15   :  { %v7560_v37 = vld [vmem:[%s14734_s3 + $0x108] sm:$0xf0]  ;;  %v7566_v38 = vld [vmem:[%s14734_s3 + $0xf8] sm:$0xf]  ;;  %v9199_v39 = vld [vmem:[%s14734_s3 + $0x10c] sm:$0xf0] }
  0x16   :  { %v9196_v40 = vld [vmem:[%s14734_s3 + $0xfc] sm:$0xf]  ;;  %v10276_v48 = vadd.s32 120, %v10056_v2  ;;  %v7582_v49 = vld [vmem:[%s14734_s3 + $0x120] sm:$0xf]  ;;  %vm7113_vm5 = vcmask 458112  }
  0x17   :  { %v9204_v50 = vld [vmem:[%s14734_s3 + $0x134] sm:$0xf0]  ;;  %v9201_v51 = vld [vmem:[%s14734_s3 + $0x124] sm:$0xf]  ;;  %v7584_v53 = vld [vmem:[%s14734_s3 + $0x138] sm:$0xf0] }
  0x18   :  { %v7590_v54 = vld [vmem:[%s14734_s3 + $0x128] sm:$0xf]  ;;  %v9205_v55 = vld [vmem:[%s14734_s3 + $0x13c] sm:$0xf0]  ;;  %v7587_v62 = vor.u32 %v9201_v51, %v7584_v53  ;;  %v7606_v4 = vld [vmem:[%s14734_s3 + $0x150] sm:$0xf] }
  0x19   :  { %v7591_v63 = vor.u32 %v9205_v55, %v7590_v54  ;;  %v9210_v7 = vld [vmem:[%s14734_s3 + $0x164] sm:$0xf0]  ;;  %v9207_v8 = vld [vmem:[%s14734_s3 + $0x154] sm:$0xf]  ;;  %v7608_v9 = vld [vmem:[%s14734_s3 + $0x168] sm:$0xf0] }
  0x1a   :  { %9601 = vset.pattern.permute.xlu2 %v10105_v31  ;;  %9599 = vset.pattern.permute.xlu1 %v10108_v32  ;;  %v7607_v16 = vor.u32 %v9210_v7, %v7606_v4  ;;  %v7611_v17 = vor.u32 %v9207_v8, %v7608_v9  ;;  %v7630_v20 = vld [vmem:[%s14734_s3 + $0x180] sm:$0xf]  ;;  %v9216_v21 = vld [vmem:[%s14734_s3 + $0x194] sm:$0xf0]  ;;  %v9213_v22 = vld [vmem:[%s14734_s3 + $0x184] sm:$0xf] }
  0x1b   :  { %v7632_v23 = vld [vmem:[%s14734_s3 + $0x198] sm:$0xf0]  ;;  %v7654_v53 = vld [vmem:[%s14734_s3 + $0x1b0] sm:$0xf]  ;;  %v9222_v54 = vld [vmem:[%s14734_s3 + $0x1c4] sm:$0xf0] }
  0x1c   :  { %v9219_v55 = vld [vmem:[%s14734_s3 + $0x1b4] sm:$0xf]  ;;  %v7655_v7 = vor.u32 %v9222_v54, %v7654_v53  ;;  %vm14744_vm6 = vcmask 523712   ;;  %vm7121_vm7 = vcmask 589312   ;;  %vm7125_vm8 = vcmask 654912  }
  0x1d   :  { %vm7129_vm9 = vcmask 720512   ;;  %vm14743_vm10 = vcmask 786112   ;;  %vm14742_vm11 = vcmask 851712   ;;  %vm7141_vm12 = vcmask 917312  }
  0x1e   :  { %1599 = vmatmul.bf16.gmra.mxu0 %v7463_v41  ;;  %1792 = vmatmul.bf16.gmra.mxu1 %v7467_v42  ;;  %v7568_v41 = vld [vmem:[%s14734_s3 + $0x110] sm:$0xf0]  ;;  %v7559_v42 = vor.u32 %v9198_v35, %v7558_v34  ;;  %v7631_v34 = vor.u32 %v9216_v21, %v7630_v20  ;;  %v7635_v35 = vor.u32 %v9213_v22, %v7632_v23  ;;  %vm7145_vm13 = vcmask 982912  }
  0x1f   :  { %v7571_v47 = vor.u32 %v9196_v40, %v7568_v41  ;;  %vm7149_vm14 = vcmask 1048512   ;;  %vm7402_vm15 = vcmask 1041409  }
  0x21   :  { %1985 = vmatmul.bf16.gmra.mxu2 %v7471_v43  ;;  %2178 = vmatmul.bf16.gmra.mxu3 %v7475_v44  ;;  %v7563_v43 = vor.u32 %v9195_v36, %v7560_v37  ;;  %v7567_v44 = vor.u32 %v9199_v39, %v7566_v38 }
  0x22   :  { %5355 = vperm.xlu2 %9601, %v10100_v30   ;;  %5343 = vperm.xlu1 %9599, %v10100_v30  }
  0x2a   :  { %9603 = vset.pattern.permute.xlu2 %v10139_v45  ;;  %9602 = vset.pattern.permute.xlu1 %v10142_v46 }
  0x2e   :  { %1604 = vmatmul.bf16.gmra.mxu0 %v7487_v56  ;;  %1797 = vmatmul.bf16.gmra.mxu1 %v7491_v57  ;;  %v9202_v56 = vld [vmem:[%s14734_s3 + $0x12c] sm:$0xf]  ;;  %v7592_v57 = vld [vmem:[%s14734_s3 + $0x140] sm:$0xf0] }
  0x2f   :  { %v7595_v1 = vor.u32 %v9202_v56, %v7592_v57  ;;  %v7656_v56 = vld [vmem:[%s14734_s3 + $0x1c8] sm:$0xf0]  ;;  %v7662_v57 = vld [vmem:[%s14734_s3 + $0x1b8] sm:$0xf] }
  0x30   :  { %v7659_v8 = vor.u32 %v9219_v55, %v7656_v56 }
  0x31   :  { %1990 = vmatmul.bf16.gmra.mxu2 %v7495_v58  ;;  %2183 = vmatmul.bf16.gmra.mxu3 %v7499_v59  ;;  %v10304_v58 = vld.sshfl [vmem:[#allocation1 + $0x8] sm:$0xff pattern:$0x73625140]  ;;  %v7583_v59 = vor.u32 %v9204_v50, %v7582_v49  ;;  %v10368_v50 = vadd.s32 56, %v10056_v2 }
  0x32   :  { %5367 = vperm.xlu2 %9603, %v10100_v30   ;;  %5361 = vperm.xlu1 %9602, %v10100_v30   ;;  %v10307_v3 = vperm.slane %v10304_v58, 0 }
  0x3a   :  { %9605 = vset.pattern.permute.xlu2 %v10177_v60  ;;  %9604 = vset.pattern.permute.xlu1 %v10180_v61 }
  0x3e   :  { %1609 = vmatmul.bf16.gmra.mxu0 %v7511_v10  ;;  %1802 = vmatmul.bf16.gmra.mxu1 %v7515_v11  ;;  %v7614_v10 = vld [vmem:[%s14734_s3 + $0x158] sm:$0xf]  ;;  %v9211_v11 = vld [vmem:[%s14734_s3 + $0x16c] sm:$0xf0] }
  0x3f   :  { %v7615_v18 = vor.u32 %v9211_v11, %v7614_v10 }
  0x41   :  { %1995 = vmatmul.bf16.gmra.mxu2 %v7519_v12  ;;  %2188 = vmatmul.bf16.gmra.mxu3 %v7523_v13  ;;  %v9208_v12 = vld [vmem:[%s14734_s3 + $0x15c] sm:$0xf]  ;;  %v7616_v13 = vld [vmem:[%s14734_s3 + $0x170] sm:$0xf0] }
  0x42   :  { %5385 = vperm.xlu2 %9605, %v10100_v30   ;;  %5379 = vperm.xlu1 %9604, %v10100_v30   ;;  %v7619_v19 = vor.u32 %v9208_v12, %v7616_v13 }
  0x4a   :  { %9607 = vset.pattern.permute.xlu2 %v10211_v14  ;;  %9606 = vset.pattern.permute.xlu1 %v10160_v52 }
  0x4e   :  { %1614 = vmatmul.bf16.gmra.mxu0 %v7535_v24  ;;  %1807 = vmatmul.bf16.gmra.mxu1 %v7539_v25  ;;  %v7638_v24 = vld [vmem:[%s14734_s3 + $0x188] sm:$0xf]  ;;  %v9217_v25 = vld [vmem:[%s14734_s3 + $0x19c] sm:$0xf0] }
  0x4f   :  { %v7639_v38 = vor.u32 %v9217_v25, %v7638_v24  ;;  %v7678_v25 = vld [vmem:[%s14734_s3 + $0x1e0] sm:$0xf] }
  0x51   :  { %2000 = vmatmul.bf16.gmra.mxu2 %v7543_v26  ;;  %2193 = vmatmul.bf16.gmra.mxu3 %v7547_v27  ;;  %v9214_v26 = vld [vmem:[%s14734_s3 + $0x18c] sm:$0xf]  ;;  %v7640_v27 = vld [vmem:[%s14734_s3 + $0x1a0] sm:$0xf0] }
  0x52   :  { %5397 = vperm.xlu2 %9607, %v10100_v30   ;;  %5391 = vperm.xlu1 %9606, %v10100_v30   ;;  %v7643_v39 = vor.u32 %v9214_v26, %v7640_v27  ;;  %v9228_v26 = vld [vmem:[%s14734_s3 + $0x1f4] sm:$0xf0]  ;;  %v9225_v27 = vld [vmem:[%s14734_s3 + $0x1e4] sm:$0xf] }
  0x5a   :  { %9609 = vset.pattern.permute.xlu2 %v10242_v28  ;;  %9608 = vset.pattern.permute.xlu1 %v10245_v33 }
  0x5e   :  { %1619 = vmatmul.bf16.gmra.mxu0 %v7559_v42  ;;  %1812 = vmatmul.bf16.gmra.mxu1 %v7563_v43 }
  0x61   :  { %2005 = vmatmul.bf16.gmra.mxu2 %v7567_v44  ;;  %2198 = vmatmul.bf16.gmra.mxu3 %v7571_v47 }
  0x62   :  { %5415 = vperm.xlu2 %9609, %v10100_v30   ;;  %5409 = vperm.xlu1 %9608, %v10100_v30  }
  0x6a   :  { %9611 = vset.pattern.permute.xlu2 %v10056_v2  ;;  %9610 = vset.pattern.permute.xlu1 %v10276_v48 }
  0x6e   :  { %1624 = vmatmul.bf16.gmra.mxu0 %v7583_v59  ;;  %1817 = vmatmul.bf16.gmra.mxu1 %v7587_v62  ;;  %v9223_v59 = vld [vmem:[%s14734_s3 + $0x1cc] sm:$0xf0]  ;;  %v9220_v62 = vld [vmem:[%s14734_s3 + $0x1bc] sm:$0xf] }
  0x6f   :  { %v7663_v12 = vor.u32 %v9223_v59, %v7662_v57 }
  0x71   :  { %2010 = vmatmul.bf16.gmra.mxu2 %v7591_v63  ;;  %2203 = vmatmul.bf16.gmra.mxu3 %v7595_v1  ;;  %v7664_v63 = vld [vmem:[%s14734_s3 + $0x1d0] sm:$0xf0] }
  0x72   :  { %5428 = vperm.xlu2 %9611, %v10307_v3   ;;  %5421 = vperm.xlu1 %9610, %v10100_v30   ;;  %v7667_v13 = vor.u32 %v9220_v62, %v7664_v63 }
  0x7a   :  { %9613 = vset.pattern.permute.xlu2 %v10059_v5  ;;  %9612 = vset.pattern.permute.xlu1 %v10108_v32 }
  0x7e   :  { %1629 = vmatmul.bf16.gmra.mxu0 %v7607_v16  ;;  %1822 = vmatmul.bf16.gmra.mxu1 %v7611_v17 }
  0x81   :  { %2015 = vmatmul.bf16.gmra.mxu2 %v7615_v18  ;;  %2208 = vmatmul.bf16.gmra.mxu3 %v7619_v19 }
  0x82   :  { %5446 = vperm.xlu2 %9613, %v10307_v3   ;;  %5440 = vperm.xlu1 %9612, %v10307_v3  }
  0x8a   :  { %9615 = vset.pattern.permute.xlu2 %v10142_v46  ;;  %9614 = vset.pattern.permute.xlu1 %v10105_v31 }
  0x8b   :  { %v1595_v36 = vpop.f32.mrf.mxu0  ;;  %v1788_v37 = vpop.f32.mrf.mxu1 }
  0x8c   :  { %v1789_v40 = vadd.f32 %v1788_v37, %v1595_v36  ;;  %v9229_v36 = vld [vmem:[%s14734_s3 + $0x1fc] sm:$0xf0]  ;;  %v9226_v37 = vld [vmem:[%s14734_s3 + $0x1ec] sm:$0xf] }
  0x8e   :  { %1634 = vmatmul.bf16.gmra.mxu0 %v7631_v34  ;;  %1827 = vmatmul.bf16.gmra.mxu1 %v7635_v35  ;;  %v7680_v34 = vld [vmem:[%s14734_s3 + $0x1f8] sm:$0xf0]  ;;  %v7686_v35 = vld [vmem:[%s14734_s3 + $0x1e8] sm:$0xf] }
  0x91   :  { %2020 = vmatmul.bf16.gmra.mxu2 %v7639_v38  ;;  %2213 = vmatmul.bf16.gmra.mxu3 %v7643_v39  ;;  %v7688_v38 = vld [vmem:[%s14734_s3 + $0x200] sm:$0xf0] }
  0x92   :  { %5458 = vperm.xlu2 %9615, %v10307_v3   ;;  %5452 = vperm.xlu1 %9614, %v10307_v3   ;;  %v7691_v53 = vor.u32 %v9226_v37, %v7688_v38  ;;  %v10467_v37 = vld.sshfl [vmem:[#allocation1 + $0x10] sm:$0xff pattern:$0x73625140] }
  0x93   :  { %v1597_v44 = vpop.f32.mrf.mxu0  ;;  %v1790_v47 = vpop.f32.mrf.mxu1  ;;  %v10472_v38 = vperm.slane %v10467_v37, 0 }
  0x94   :  { %v1981_v41 = vpop.f32.mrf.mxu2  ;;  %v2174_v42 = vpop.f32.mrf.mxu3  ;;  %v1791_v49 = vadd.f32 %v1790_v47, %v1597_v44 }
  0x95   :  { %v1982_v43 = vadd.f32 %v1981_v41, %v1789_v40  ;;  %v7679_v41 = vor.u32 %v9228_v26, %v7678_v25  ;;  %5585 = vperm.xlu0 %9632, %v10472_v38  }
  0x97   :  { %v10370_v51 = vadd.f32 %v2174_v42, %v1982_v43  ;;  %v7683_v42 = vor.u32 %v9225_v27, %v7680_v34 }
  0x9a   :  { %9617 = vset.pattern.permute.xlu2 %v10180_v61  ;;  %9616 = vset.pattern.permute.xlu1 %v10368_v50 }
  0x9b   :  { %v1600_v10 = vpop.f32.mrf.mxu0  ;;  %v1793_v11 = vpop.f32.mrf.mxu1 }
  0x9c   :  { %v1983_v1 = vpop.f32.mrf.mxu2  ;;  %v2176_v4 = vpop.f32.mrf.mxu3  ;;  %v1794_v16 = vadd.f32 %v1793_v11, %v1600_v10  ;;  %v9231_v10 = vld [vmem:[%s14734_s3 + $0x214] sm:$0xf]  ;;  %v7704_v11 = vld [vmem:[%s14734_s3 + $0x228] sm:$0xf0] }
  0x9d   :  { %v1984_v9 = vadd.f32 %v1983_v1, %v1791_v49  ;;  %v7687_v49 = vor.u32 %v9229_v36, %v7686_v35  ;;  %9637 = vset.pattern.permute.xlu0 %v10276_v48 }
  0x9e   :  { %1639 = vmatmul.bf16.gmra.mxu0 %v7655_v7  ;;  %1832 = vmatmul.bf16.gmra.mxu1 %v7659_v8  ;;  %v7702_v8 = vld [vmem:[%s14734_s3 + $0x210] sm:$0xf] }
  0x9f   :  { %v10398_v17 = vadd.f32 %v2176_v4, %v1984_v9  ;;  %v10435_v4 = vadd.s32 96, %v10056_v2  ;;  %v9234_v9 = vld [vmem:[%s14734_s3 + $0x224] sm:$0xf0] }
  0xa1   :  { %2025 = vmatmul.bf16.gmra.mxu2 %v7663_v12  ;;  %2218 = vmatmul.bf16.gmra.mxu3 %v7667_v13  ;;  %v7710_v12 = vld [vmem:[%s14734_s3 + $0x218] sm:$0xf]  ;;  %v9235_v13 = vld [vmem:[%s14734_s3 + $0x22c] sm:$0xf0] }
  0xa2   :  { %5476 = vperm.xlu2 %9617, %v10307_v3   ;;  %5470 = vperm.xlu1 %9616, %v10307_v3   ;;  %v7711_v27 = vor.u32 %v9235_v13, %v7710_v12 }
  0xa3   :  { %v1602_v21 = vpop.f32.mrf.mxu0  ;;  %v1795_v22 = vpop.f32.mrf.mxu1 }
  0xa4   :  { %v1986_v18 = vpop.f32.mrf.mxu2  ;;  %v2179_v19 = vpop.f32.mrf.mxu3  ;;  %v1796_v23 = vadd.f32 %v1795_v22, %v1602_v21  ;;  %v7703_v21 = vor.u32 %v9234_v9, %v7702_v8  ;;  %v7707_v22 = vor.u32 %v9231_v10, %v7704_v11 }
  0xa5   :  { %v1987_v20 = vadd.f32 %v1986_v18, %v1794_v16  ;;  %v9232_v16 = vld [vmem:[%s14734_s3 + $0x21c] sm:$0xf]  ;;  %v7712_v18 = vld [vmem:[%s14734_s3 + $0x230] sm:$0xf0]  ;;  %5615 = vperm.xlu0 %9637, %v10472_v38  }
  0xa6   :  { %v7715_v34 = vor.u32 %v9232_v16, %v7712_v18 }
  0xa7   :  { %v10402_v24 = vadd.f32 %v2179_v19, %v1987_v20 }
  0xaa   :  { %9619 = vset.pattern.permute.xlu2 %v10160_v52  ;;  %9618 = vset.pattern.permute.xlu1 %v10177_v60 }
  0xab   :  { %v1605_v44 = vpop.f32.mrf.mxu0  ;;  %v1798_v47 = vpop.f32.mrf.mxu1 }
  0xac   :  { %v1988_v39 = vpop.f32.mrf.mxu2  ;;  %v2181_v40 = vpop.f32.mrf.mxu3  ;;  %v1799_v54 = vadd.f32 %v1798_v47, %v1605_v44 }
  0xad   :  { %v1989_v43 = vadd.f32 %v1988_v39, %v1796_v23  ;;  %9642 = vset.pattern.permute.xlu0 %v10105_v31 }
  0xae   :  { %1644 = vmatmul.bf16.gmra.mxu0 %v7679_v41  ;;  %1837 = vmatmul.bf16.gmra.mxu1 %v7683_v42 }
  0xaf   :  { %v10430_v55 = vadd.f32 %v2181_v40, %v1989_v43 }
  0xb1   :  { %2030 = vmatmul.bf16.gmra.mxu2 %v7687_v49  ;;  %2223 = vmatmul.bf16.gmra.mxu3 %v7691_v53  ;;  %v7726_v49 = vld [vmem:[%s14734_s3 + $0x240] sm:$0xf]  ;;  %v9240_v53 = vld [vmem:[%s14734_s3 + $0x254] sm:$0xf0] }
  0xb2   :  { %5488 = vperm.xlu2 %9619, %v10307_v3   ;;  %5482 = vperm.xlu1 %9618, %v10307_v3   ;;  %v7727_v9 = vor.u32 %v9240_v53, %v7726_v49  ;;  %v7760_v49 = vld [vmem:[%s14734_s3 + $0x290] sm:$0xf0] }
  0xb3   :  { %v1607_v62 = vpop.f32.mrf.mxu0  ;;  %v1800_v63 = vpop.f32.mrf.mxu1 }
  0xb4   :  { %v1991_v56 = vpop.f32.mrf.mxu2  ;;  %v2184_v57 = vpop.f32.mrf.mxu3  ;;  %v1801_v1 = vadd.f32 %v1800_v63, %v1607_v62  ;;  %v9238_v62 = vld [vmem:[%s14734_s3 + $0x24c] sm:$0xf]  ;;  %v7736_v63 = vld [vmem:[%s14734_s3 + $0x260] sm:$0xf0] }
  0xb5   :  { %v1992_v59 = vadd.f32 %v1991_v56, %v1799_v54  ;;  %v9237_v54 = vld [vmem:[%s14734_s3 + $0x244] sm:$0xf]  ;;  %v7728_v56 = vld [vmem:[%s14734_s3 + $0x258] sm:$0xf0]  ;;  %v7739_v18 = vor.u32 %v9238_v62, %v7736_v63 }
  0xb6   :  { %v7731_v10 = vor.u32 %v9237_v54, %v7728_v56 }
  0xb7   :  { %v10437_v7 = vadd.f32 %v2184_v57, %v1992_v59  ;;  %v7734_v57 = vld [vmem:[%s14734_s3 + $0x248] sm:$0xf]  ;;  %v9241_v59 = vld [vmem:[%s14734_s3 + $0x25c] sm:$0xf0] }
  0xb8   :  { %v7735_v16 = vor.u32 %v9241_v59, %v7734_v57 }
  0xba   :  { %9621 = vset.pattern.permute.xlu2 %v10245_v33  ;;  %9620 = vset.pattern.permute.xlu1 %v10435_v4 }
  0xbb   :  { %v1610_v25 = vpop.f32.mrf.mxu0  ;;  %v1803_v26 = vpop.f32.mrf.mxu1 }
  0xbc   :  { %v1993_v19 = vpop.f32.mrf.mxu2  ;;  %v2186_v20 = vpop.f32.mrf.mxu3  ;;  %v1804_v35 = vadd.f32 %v1803_v26, %v1610_v25 }
  0xbd   :  { %v1994_v23 = vadd.f32 %v1993_v19, %v1801_v1 }
  0xbe   :  { %1649 = vmatmul.bf16.gmra.mxu0 %v7703_v21  ;;  %1842 = vmatmul.bf16.gmra.mxu1 %v7707_v22 }
  0xbf   :  { %v10465_v36 = vadd.f32 %v2186_v20, %v1994_v23 }
  0xc1   :  { %2035 = vmatmul.bf16.gmra.mxu2 %v7711_v27  ;;  %2228 = vmatmul.bf16.gmra.mxu3 %v7715_v34 }
  0xc2   :  { %5506 = vperm.xlu2 %9621, %v10307_v3   ;;  %5500 = vperm.xlu1 %9620, %v10307_v3  }
  0xc3   :  { %v1612_v42 = vpop.f32.mrf.mxu0  ;;  %v1805_v43 = vpop.f32.mrf.mxu1 }
  0xc4   :  { %v1996_v39 = vpop.f32.mrf.mxu2  ;;  %v2189_v40 = vpop.f32.mrf.mxu3  ;;  %v1806_v44 = vadd.f32 %v1805_v43, %v1612_v42  ;;  %v7758_v42 = vld [vmem:[%s14734_s3 + $0x278] sm:$0xf]  ;;  %v9247_v43 = vld [vmem:[%s14734_s3 + $0x28c] sm:$0xf0] }
  0xc5   :  { %v1997_v41 = vadd.f32 %v1996_v39, %v1804_v35  ;;  %v7750_v35 = vld [vmem:[%s14734_s3 + $0x270] sm:$0xf]  ;;  %v9246_v39 = vld [vmem:[%s14734_s3 + $0x284] sm:$0xf0] }
  0xc6   :  { %v7751_v56 = vor.u32 %v9246_v39, %v7750_v35  ;;  %v9253_v35 = vld [vmem:[%s14734_s3 + $0x2bc] sm:$0xf0]  ;;  %v9250_v39 = vld [vmem:[%s14734_s3 + $0x2ac] sm:$0xf] }
  0xc7   :  { %v10475_v47 = vadd.f32 %v2189_v40, %v1997_v41  ;;  %v9243_v40 = vld [vmem:[%s14734_s3 + $0x274] sm:$0xf]  ;;  %v7752_v41 = vld [vmem:[%s14734_s3 + $0x288] sm:$0xf0] }
  0xc8   :  { %v7755_v57 = vor.u32 %v9243_v40, %v7752_v41  ;;  %v7784_v40 = vld [vmem:[%s14734_s3 + $0x2c0] sm:$0xf0] }
  0xca   :  { %9623 = vset.pattern.permute.xlu2 %v10276_v48  ;;  %9622 = vset.pattern.permute.xlu1 %v10242_v28 }
  0xcb   :  { %v1615_v12 = vpop.f32.mrf.mxu0  ;;  %v1808_v13 = vpop.f32.mrf.mxu1 }
  0xcc   :  { %v1998_v1 = vpop.f32.mrf.mxu2  ;;  %v2191_v8 = vpop.f32.mrf.mxu3  ;;  %v1809_v19 = vadd.f32 %v1808_v13, %v1615_v12 }
  0xcd   :  { %v1999_v11 = vadd.f32 %v1998_v1, %v1806_v44  ;;  %v9244_v44 = vld [vmem:[%s14734_s3 + $0x27c] sm:$0xf]  ;;  %v7759_v1 = vor.u32 %v9247_v43, %v7758_v42 }
  0xce   :  { %1654 = vmatmul.bf16.gmra.mxu0 %v7727_v9  ;;  %1847 = vmatmul.bf16.gmra.mxu1 %v7731_v10 }
  0xcf   :  { %v10504_v20 = vadd.f32 %v2191_v8, %v1999_v11  ;;  %v7763_v8 = vor.u32 %v9244_v44, %v7760_v49 }
  0xd1   :  { %2040 = vmatmul.bf16.gmra.mxu2 %v7735_v16  ;;  %2233 = vmatmul.bf16.gmra.mxu3 %v7739_v18 }
  0xd2   :  { %5518 = vperm.xlu2 %9623, %v10307_v3   ;;  %5512 = vperm.xlu1 %9622, %v10307_v3  }
  0xd3   :  { %v1617_v25 = vpop.f32.mrf.mxu0  ;;  %v1810_v26 = vpop.f32.mrf.mxu1 }
  0xd4   :  { %v2001_v21 = vpop.f32.mrf.mxu2  ;;  %v2194_v22 = vpop.f32.mrf.mxu3  ;;  %v1811_v27 = vadd.f32 %v1810_v26, %v1617_v25  ;;  %v9249_v25 = vld [vmem:[%s14734_s3 + $0x2a4] sm:$0xf]  ;;  %v7776_v26 = vld [vmem:[%s14734_s3 + $0x2b8] sm:$0xf0] }
  0xd5   :  { %v2002_v23 = vadd.f32 %v2001_v21, %v1809_v19  ;;  %v7779_v44 = vor.u32 %v9249_v25, %v7776_v26  ;;  %v9259_v25 = vld [vmem:[%s14734_s3 + $0x2ec] sm:$0xf0]  ;;  %v9256_v26 = vld [vmem:[%s14734_s3 + $0x2dc] sm:$0xf] }
  0xd7   :  { %v10509_v34 = vadd.f32 %v2194_v22, %v2002_v23  ;;  %v7774_v22 = vld [vmem:[%s14734_s3 + $0x2a0] sm:$0xf]  ;;  %v9252_v23 = vld [vmem:[%s14734_s3 + $0x2b4] sm:$0xf0] }
  0xd8   :  { %v7775_v43 = vor.u32 %v9252_v23, %v7774_v22  ;;  %v7800_v22 = vld [vmem:[%s14734_s3 + $0x2e8] sm:$0xf0]  ;;  %v7806_v23 = vld [vmem:[%s14734_s3 + $0x2d8] sm:$0xf] }
  0xda   :  { %9625 = vset.pattern.permute.xlu2 %v10108_v32  ;;  %9624 = vset.pattern.permute.xlu1 %v10062_v6 }
  0xdb   :  { %v1620_v62 = vpop.f32.mrf.mxu0  ;;  %v1813_v63 = vpop.f32.mrf.mxu1 }
  0xdc   :  { %v2003_v53 = vpop.f32.mrf.mxu2  ;;  %v2196_v54 = vpop.f32.mrf.mxu3  ;;  %v1814_v9 = vadd.f32 %v1813_v63, %v1620_v62 }
  0xdd   :  { %v2004_v59 = vadd.f32 %v2003_v53, %v1811_v27  ;;  %v7782_v27 = vld [vmem:[%s14734_s3 + $0x2a8] sm:$0xf] }
  0xde   :  { %1659 = vmatmul.bf16.gmra.mxu0 %v7751_v56  ;;  %1852 = vmatmul.bf16.gmra.mxu1 %v7755_v57  ;;  %v7783_v56 = vor.u32 %v9253_v35, %v7782_v27  ;;  %v7787_v57 = vor.u32 %v9250_v39, %v7784_v40  ;;  %v7808_v27 = vld [vmem:[%s14734_s3 + $0x2f0] sm:$0xf0] }
  0xdf   :  { %v10538_v10 = vadd.f32 %v2196_v54, %v2004_v59 }
  0xe1   :  { %2045 = vmatmul.bf16.gmra.mxu2 %v7759_v1  ;;  %2238 = vmatmul.bf16.gmra.mxu3 %v7763_v8 }
  0xe2   :  { %5537 = vperm.xlu2 %9625, %v10472_v38   ;;  %5531 = vperm.xlu1 %9624, %v10472_v38  }
  0xe3   :  { %v1622_v16 = vpop.f32.mrf.mxu0  ;;  %v1815_v18 = vpop.f32.mrf.mxu1 }
  0xe4   :  { %v2006_v11 = vpop.f32.mrf.mxu2  ;;  %v2199_v12 = vpop.f32.mrf.mxu3  ;;  %v1816_v19 = vadd.f32 %v1815_v18, %v1622_v16  ;;  %v7798_v16 = vld [vmem:[%s14734_s3 + $0x2d0] sm:$0xf]  ;;  %v9258_v18 = vld [vmem:[%s14734_s3 + $0x2e4] sm:$0xf0] }
  0xe5   :  { %v2007_v13 = vadd.f32 %v2006_v11, %v1814_v9  ;;  %v7799_v40 = vor.u32 %v9258_v18, %v7798_v16  ;;  %v9264_v16 = vld [vmem:[%s14734_s3 + $0x314] sm:$0xf0]  ;;  %v9261_v18 = vld [vmem:[%s14734_s3 + $0x304] sm:$0xf] }
  0xe7   :  { %v10542_v21 = vadd.f32 %v2199_v12, %v2007_v13 }
  0xea   :  { %9627 = vset.pattern.permute.xlu2 %v10105_v31  ;;  %9626 = vset.pattern.permute.xlu1 %v10059_v5 }
  0xeb   :  { %v1625_v53 = vpop.f32.mrf.mxu0  ;;  %v1818_v54 = vpop.f32.mrf.mxu1 }
  0xec   :  { %v2008_v41 = vpop.f32.mrf.mxu2  ;;  %v2201_v42 = vpop.f32.mrf.mxu3  ;;  %v1819_v59 = vadd.f32 %v1818_v54, %v1625_v53  ;;  %v7811_v53 = vor.u32 %v9256_v26, %v7808_v27  ;;  %v7832_v26 = vld [vmem:[%s14734_s3 + $0x320] sm:$0xf0]  ;;  %v10634_v27 = vld.sshfl [vmem:[#allocation1 + $0x18] sm:$0xff pattern:$0x73625140] }
  0xed   :  { %v2009_v49 = vadd.f32 %v2008_v41, %v1816_v19  ;;  %v9255_v19 = vld [vmem:[%s14734_s3 + $0x2d4] sm:$0xf] }
  0xee   :  { %1664 = vmatmul.bf16.gmra.mxu0 %v7775_v43  ;;  %1857 = vmatmul.bf16.gmra.mxu1 %v7779_v44  ;;  %v7803_v41 = vor.u32 %v9255_v19, %v7800_v22  ;;  %v7824_v19 = vld [vmem:[%s14734_s3 + $0x318] sm:$0xf0]  ;;  %v7830_v22 = vld [vmem:[%s14734_s3 + $0x308] sm:$0xf] }
  0xef   :  { %v10570_v62 = vadd.f32 %v2201_v42, %v2009_v49  ;;  %v7807_v49 = vor.u32 %v9259_v25, %v7806_v23  ;;  %v9265_v23 = vld [vmem:[%s14734_s3 + $0x31c] sm:$0xf0]  ;;  %v9262_v25 = vld [vmem:[%s14734_s3 + $0x30c] sm:$0xf] }
  0xf1   :  { %2050 = vmatmul.bf16.gmra.mxu2 %v7783_v56  ;;  %2243 = vmatmul.bf16.gmra.mxu3 %v7787_v57 }
  0xf2   :  { %5549 = vperm.xlu2 %9627, %v10472_v38   ;;  %5543 = vperm.xlu1 %9626, %v10472_v38  }
  0xf3   :  { %v1627_v9 = vpop.f32.mrf.mxu0  ;;  %v1820_v11 = vpop.f32.mrf.mxu1 }
  0xf4   :  { %v2011_v63 = vpop.f32.mrf.mxu2  ;;  %v2204_v1 = vpop.f32.mrf.mxu3  ;;  %v1821_v12 = vadd.f32 %v1820_v11, %v1627_v9 }
  0xf5   :  { %v2012_v8 = vadd.f32 %v2011_v63, %v1819_v59 }
  0xf7   :  { %v10574_v13 = vadd.f32 %v2204_v1, %v2012_v8 }
  0xfa   :  { %9629 = vset.pattern.permute.xlu2 %v10368_v50  ;;  %9628 = vset.pattern.permute.xlu1 %v10139_v45 }
  0xfb   :  { %v1630_v43 = vpop.f32.mrf.mxu0  ;;  %v1823_v44 = vpop.f32.mrf.mxu1 }
  0xfc   :  { %v2013_v35 = vpop.f32.mrf.mxu2  ;;  %v2206_v39 = vpop.f32.mrf.mxu3  ;;  %v1824_v54 = vadd.f32 %v1823_v44, %v1630_v43 }
  0xfd   :  { %v2014_v42 = vadd.f32 %v2013_v35, %v1821_v12  ;;  %v7822_v12 = vld [vmem:[%s14734_s3 + $0x300] sm:$0xf]  ;;  %v10637_v35 = vperm.slane %v10634_v27, 0 }
  0xfe   :  { %1669 = vmatmul.bf16.gmra.mxu0 %v7799_v40  ;;  %1862 = vmatmul.bf16.gmra.mxu1 %v7803_v41  ;;  %v7823_v41 = vor.u32 %v9264_v16, %v7822_v12 }
  0xff   :  { %v10602_v56 = vadd.f32 %v2206_v39, %v2014_v42  ;;  %v7827_v42 = vor.u32 %v9261_v18, %v7824_v19  ;;  %5646 = vperm.xlu0 %9642, %v10637_v35  }
 0x101   :  { %2055 = vmatmul.bf16.gmra.mxu2 %v7807_v49  ;;  %2248 = vmatmul.bf16.gmra.mxu3 %v7811_v53  ;;  %v7831_v53 = vor.u32 %v9265_v23, %v7830_v22  ;;  %v7846_v22 = vld [vmem:[%s14734_s3 + $0x330] sm:$0xf]  ;;  %v9270_v23 = vld [vmem:[%s14734_s3 + $0x344] sm:$0xf0] }
 0x102   :  { %5567 = vperm.xlu2 %9629, %v10472_v38   ;;  %5561 = vperm.xlu1 %9628, %v10472_v38  }
 0x103   :  { %v1632_v1 = vpop.f32.mrf.mxu0  ;;  %v1825_v8 = vpop.f32.mrf.mxu1 }
 0x104   :  { %v2016_v57 = vpop.f32.mrf.mxu2  ;;  %v2209_v59 = vpop.f32.mrf.mxu3  ;;  %v1826_v9 = vadd.f32 %v1825_v8, %v1632_v1 }
 0x105   :  { %v2017_v63 = vadd.f32 %v2016_v57, %v1824_v54  ;;  %v7835_v54 = vor.u32 %v9262_v25, %v7832_v26  ;;  %v7848_v25 = vld [vmem:[%s14734_s3 + $0x348] sm:$0xf0]  ;;  %v7854_v26 = vld [vmem:[%s14734_s3 + $0x338] sm:$0xf] }
 0x107   :  { %v10606_v11 = vadd.f32 %v2209_v59, %v2017_v63  ;;  %v10645_v63 = vperm.slane %v10097_v29, 1  ;;  %v9267_v29 = vld [vmem:[%s14734_s3 + $0x334] sm:$0xf] }
 0x109   :  { %5798 = vperm.xlu0 %9642, %v10645_v63  }
 0x10a   :  { %9631 = vset.pattern.permute.xlu2 %v10177_v60  ;;  %9630 = vset.pattern.permute.xlu1 %v10180_v61 }
 0x10b   :  { %v1635_v44 = vpop.f32.mrf.mxu0  ;;  %v1828_v49 = vpop.f32.mrf.mxu1 }
 0x10c   :  { %v2018_v39 = vpop.f32.mrf.mxu2  ;;  %v2211_v40 = vpop.f32.mrf.mxu3  ;;  %v1829_v57 = vadd.f32 %v1828_v49, %v1635_v44  ;;  %v7847_v44 = vor.u32 %v9270_v23, %v7846_v22  ;;  %v7851_v49 = vor.u32 %v9267_v29, %v7848_v25 }
 0x10d   :  { %v2019_v43 = vadd.f32 %v2018_v39, %v1826_v9  ;;  %v9271_v39 = vld [vmem:[%s14734_s3 + $0x34c] sm:$0xf0] }
 0x10e   :  { %1674 = vmatmul.bf16.gmra.mxu0 %v7823_v41  ;;  %1867 = vmatmul.bf16.gmra.mxu1 %v7827_v42  ;;  %v7856_v41 = vld [vmem:[%s14734_s3 + $0x350] sm:$0xf0] }
 0x10f   :  { %v10640_v59 = vadd.f32 %v2211_v40, %v2019_v43  ;;  %v9268_v40 = vld [vmem:[%s14734_s3 + $0x33c] sm:$0xf] }
 0x111   :  { %14745 = vst [vmem:[#allocation2_spill] sm:$0xff] %v10640_v59  ;;  %2060 = vmatmul.bf16.gmra.mxu2 %v7831_v53  ;;  %2253 = vmatmul.bf16.gmra.mxu3 %v7835_v54 }
 0x112   :  { %5579 = vperm.xlu2 %9631, %v10472_v38   ;;  %5573 = vperm.xlu1 %9630, %v10472_v38  }
 0x113   :  { %v1637_v12 = vpop.f32.mrf.mxu0  ;;  %v1830_v16 = vpop.f32.mrf.mxu1  ;;  %9663 = vset.pattern.permute.xlu0 %v10177_v60 }
 0x114   :  { %v2021_v1 = vpop.f32.mrf.mxu2  ;;  %v2214_v8 = vpop.f32.mrf.mxu3  ;;  %v1831_v18 = vadd.f32 %v1830_v16, %v1637_v12 }
 0x115   :  { %v2022_v9 = vadd.f32 %v2021_v1, %v1829_v57  ;;  %v7855_v1 = vor.u32 %v9271_v39, %v7854_v26  ;;  %v7870_v39 = vld [vmem:[%s14734_s3 + $0x360] sm:$0xf] }
 0x117   :  { %v10648_v19 = vadd.f32 %v2214_v8, %v2022_v9  ;;  %v7859_v8 = vor.u32 %v9268_v40, %v7856_v41  ;;  %v9276_v40 = vld [vmem:[%s14734_s3 + $0x374] sm:$0xf0]  ;;  %v9273_v41 = vld [vmem:[%s14734_s3 + $0x364] sm:$0xf] }
 0x119   :  { %14746 = vst [vmem:[#allocation3_spill] sm:$0xff] %v10648_v19 }
 0x11a   :  { %9634 = vset.pattern.permute.xlu2 %v10435_v4  ;;  %9633 = vset.pattern.permute.xlu1 %v10211_v14 }
 0x11b   :  { %v1640_v54 = vpop.f32.mrf.mxu0  ;;  %v1833_v57 = vpop.f32.mrf.mxu1  ;;  %5676 = vperm.xlu0 %9663, %v10637_v35  }
 0x11c   :  { %v2023_v42 = vpop.f32.mrf.mxu2  ;;  %v2216_v43 = vpop.f32.mrf.mxu3  ;;  %v1834_v9 = vadd.f32 %v1833_v57, %v1640_v54 }
 0x11d   :  { %v2024_v53 = vadd.f32 %v2023_v42, %v1831_v18  ;;  %v7872_v42 = vld [vmem:[%s14734_s3 + $0x378] sm:$0xf0] }
 0x11e   :  { %1679 = vmatmul.bf16.gmra.mxu0 %v7847_v44  ;;  %1872 = vmatmul.bf16.gmra.mxu1 %v7851_v49  ;;  %v9277_v44 = vld [vmem:[%s14734_s3 + $0x37c] sm:$0xf0]  ;;  %v9274_v49 = vld [vmem:[%s14734_s3 + $0x36c] sm:$0xf] }
 0x11f   :  { %v10677_v12 = vadd.f32 %v2216_v43, %v2024_v53  ;;  %v7878_v43 = vld [vmem:[%s14734_s3 + $0x368] sm:$0xf]  ;;  %v7880_v53 = vld [vmem:[%s14734_s3 + $0x380] sm:$0xf0] }
 0x121   :  { %14747 = vst [vmem:[#allocation4_spill] sm:$0xff] %v10677_v12  ;;  %2065 = vmatmul.bf16.gmra.mxu2 %v7855_v1  ;;  %2258 = vmatmul.bf16.gmra.mxu3 %v7859_v8  ;;  %v7871_v1 = vor.u32 %v9276_v40, %v7870_v39  ;;  %v7875_v8 = vor.u32 %v9273_v41, %v7872_v42 }
 0x122   :  { %5597 = vperm.xlu2 %9634, %v10472_v38   ;;  %5591 = vperm.xlu1 %9633, %v10472_v38  }
 0x123   :  { %v1642_v23 = vpop.f32.mrf.mxu0  ;;  %v1835_v29 = vpop.f32.mrf.mxu1  ;;  %5828 = vperm.xlu0 %9663, %v10645_v63  }
 0x124   :  { %v2026_v16 = vpop.f32.mrf.mxu2  ;;  %v2219_v22 = vpop.f32.mrf.mxu3  ;;  %v1836_v25 = vadd.f32 %v1835_v29, %v1642_v23  ;;  %v7883_v23 = vor.u32 %v9274_v49, %v7880_v53  ;;  %v7894_v49 = vld [vmem:[%s14734_s3 + $0x390] sm:$0xf]  ;;  %v9282_v53 = vld [vmem:[%s14734_s3 + $0x3a4] sm:$0xf0] }
 0x125   :  { %v2027_v18 = vadd.f32 %v2026_v16, %v1834_v9 }
 0x127   :  { %v10682_v26 = vadd.f32 %v2219_v22, %v2027_v18  ;;  %v7879_v18 = vor.u32 %v9277_v44, %v7878_v43 }
 0x129   :  { %14748 = vst [vmem:[#allocation5_spill] sm:$0xff] %v10682_v26 }
 0x12a   :  { %9636 = vset.pattern.permute.xlu2 %v10242_v28  ;;  %9635 = vset.pattern.permute.xlu1 %v10245_v33 }
 0x12b   :  { %v1645_v16 = vpop.f32.mrf.mxu0  ;;  %v1838_v22 = vpop.f32.mrf.mxu1  ;;  %9668 = vset.pattern.permute.xlu0 %v10242_v28 }
 0x12c   :  { %v2028_v54 = vpop.f32.mrf.mxu2  ;;  %v2221_v57 = vpop.f32.mrf.mxu3  ;;  %v1839_v29 = vadd.f32 %v1838_v22, %v1645_v16  ;;  %v7904_v16 = vld [vmem:[%s14734_s3 + $0x3b0] sm:$0xf0] }
 0x12d   :  { %v2029_v9 = vadd.f32 %v2028_v54, %v1836_v25  ;;  %v9279_v54 = vld [vmem:[%s14734_s3 + $0x394] sm:$0xf] }
 0x12e   :  { %1684 = vmatmul.bf16.gmra.mxu0 %v7871_v1  ;;  %1877 = vmatmul.bf16.gmra.mxu1 %v7875_v8  ;;  %v7902_v1 = vld [vmem:[%s14734_s3 + $0x398] sm:$0xf]  ;;  %v9283_v8 = vld [vmem:[%s14734_s3 + $0x3ac] sm:$0xf0] }
 0x12f   :  { %v10711_v0 = vadd.f32 %v2221_v57, %v2029_v9  ;;  %v7896_v57 = vld [vmem:[%s14734_s3 + $0x3a8] sm:$0xf0]  ;;  %v9280_v9 = vld [vmem:[%s14734_s3 + $0x39c] sm:$0xf] }
 0x131   :  { %14749 = vst [vmem:[#allocation6_spill] sm:$0xff] %v10711_v0  ;;  %2070 = vmatmul.bf16.gmra.mxu2 %v7879_v18  ;;  %2263 = vmatmul.bf16.gmra.mxu3 %v7883_v23  ;;  %v7895_v23 = vor.u32 %v9282_v53, %v7894_v49 }
 0x132   :  { %5609 = vperm.xlu2 %9636, %v10472_v38   ;;  %5603 = vperm.xlu1 %9635, %v10472_v38  }
 0x133   :  { %v1647_v41 = vpop.f32.mrf.mxu0  ;;  %v1840_v42 = vpop.f32.mrf.mxu1  ;;  %5706 = vperm.xlu0 %9668, %v10637_v35  }
 0x134   :  { %v2031_v39 = vpop.f32.mrf.mxu2  ;;  %v2224_v40 = vpop.f32.mrf.mxu3  ;;  %v1841_v43 = vadd.f32 %v1840_v42, %v1647_v41  ;;  %v7903_v41 = vor.u32 %v9283_v8, %v7902_v1  ;;  %v7907_v42 = vor.u32 %v9280_v9, %v7904_v16  ;;  %v7918_v9 = vld [vmem:[%s14734_s3 + $0x3c0] sm:$0xf]  ;;  %v9288_v16 = vld [vmem:[%s14734_s3 + $0x3d4] sm:$0xf0] }
 0x135   :  { %v2032_v25 = vadd.f32 %v2031_v39, %v1839_v29  ;;  %v7899_v29 = vor.u32 %v9279_v54, %v7896_v57 }
 0x137   :  { %v10716_v44 = vadd.f32 %v2224_v40, %v2032_v25 }
 0x139   :  { %14750 = vst [vmem:[#allocation7_spill] sm:$0xff] %v10716_v44 }
 0x13a   :  { %9639 = vset.pattern.permute.xlu2 %v10062_v6  ;;  %9638 = vset.pattern.permute.xlu1 %v10056_v2 }
 0x13b   :  { %v1650_v40 = vpop.f32.mrf.mxu0  ;;  %v1843_v25 = vpop.f32.mrf.mxu1  ;;  %5858 = vperm.xlu0 %9668, %v10645_v63  }
 0x13c   :  { %v2033_v22 = vpop.f32.mrf.mxu2  ;;  %v2226_v18 = vpop.f32.mrf.mxu3  ;;  %v1844_v44 = vadd.f32 %v1843_v25, %v1650_v40  ;;  %v30_v40 = vld [vmem:[%s14735_s2 + $0x8] sm:$0x3] }
 0x13d   :  { %v2034_v39 = vadd.f32 %v2033_v22, %v1841_v43  ;;  %v9285_v22 = vld [vmem:[%s14734_s3 + $0x3c4] sm:$0xf]  ;;  %5320 = vst [vmem:[#allocation1 + $0x20] ss:$4 sm:$0xff] %v30_v40  ;;  %v9294_v40 = vld [vmem:[%s14734_s3 + $0x404] sm:$0xf0] }
 0x13e   :  { %1689 = vmatmul.bf16.gmra.mxu0 %v7895_v23  ;;  %1882 = vmatmul.bf16.gmra.mxu1 %v7899_v29  ;;  %v9289_v23 = vld [vmem:[%s14734_s3 + $0x3dc] sm:$0xf0]  ;;  %v9286_v29 = vld [vmem:[%s14734_s3 + $0x3cc] sm:$0xf] }
 0x13f   :  { %v10745_v0 = vadd.f32 %v2226_v18, %v2034_v39  ;;  %v7926_v18 = vld [vmem:[%s14734_s3 + $0x3c8] sm:$0xf]  ;;  %v7928_v39 = vld [vmem:[%s14734_s3 + $0x3e0] sm:$0xf0] }
 0x141   :  { %14751 = vst [vmem:[#allocation8_spill] sm:$0xff] %v10745_v0  ;;  %2075 = vmatmul.bf16.gmra.mxu2 %v7903_v41  ;;  %2268 = vmatmul.bf16.gmra.mxu3 %v7907_v42  ;;  %v7919_v42 = vor.u32 %v9288_v16, %v7918_v9 }
 0x142   :  { %5628 = vperm.xlu2 %9639, %v10637_v35   ;;  %5622 = vperm.xlu1 %9638, %v10637_v35  }
 0x143   :  { %v1652_v54 = vpop.f32.mrf.mxu0  ;;  %v1845_v57 = vpop.f32.mrf.mxu1  ;;  %9673 = vset.pattern.permute.xlu0 %v10059_v5 }
 0x144   :  { %v2036_v49 = vpop.f32.mrf.mxu2  ;;  %v2229_v53 = vpop.f32.mrf.mxu3  ;;  %v1846_v1 = vadd.f32 %v1845_v57, %v1652_v54  ;;  %v7927_v57 = vor.u32 %v9289_v23, %v7926_v18  ;;  %v10786_v9 = vld.sshfl [vmem:[#allocation1 + $0x20] sm:$0xff pattern:$0x73625140] }
 0x145   :  { %v2037_v43 = vadd.f32 %v2036_v49, %v1844_v44  ;;  %v7920_v44 = vld [vmem:[%s14734_s3 + $0x3d8] sm:$0xf0] }
 0x146   :  { %v7923_v49 = vor.u32 %v9285_v22, %v7920_v44 }
 0x147   :  { %v10750_v8 = vadd.f32 %v2229_v53, %v2037_v43 }
 0x149   :  { %14752 = vst [vmem:[#allocation9_spill] sm:$0xff] %v10750_v8  ;;  %v7931_v8 = vor.u32 %v9286_v29, %v7928_v39 }
 0x14a   :  { %9641 = vset.pattern.permute.xlu2 %v10059_v5  ;;  %9640 = vset.pattern.permute.xlu1 %v10108_v32 }
 0x14b   :  { %v1655_v43 = vpop.f32.mrf.mxu0  ;;  %v1848_v54 = vpop.f32.mrf.mxu1 }
 0x14c   :  { %v2038_v25 = vpop.f32.mrf.mxu2  ;;  %v2231_v41 = vpop.f32.mrf.mxu3  ;;  %v1849_v0 = vadd.f32 %v1848_v54, %v1655_v43  ;;  %v10821_v43 = vperm.slane %v10304_v58, 1 }
 0x14d   :  { %v2039_v53 = vadd.f32 %v2038_v25, %v1846_v1  ;;  %v10789_v1 = vperm.slane %v10786_v9, 0  ;;  %v9291_v25 = vld [vmem:[%s14734_s3 + $0x3f4] sm:$0xf] }
 0x14e   :  { %1694 = vmatmul.bf16.gmra.mxu0 %v7919_v42  ;;  %1887 = vmatmul.bf16.gmra.mxu1 %v7923_v49  ;;  %v9295_v42 = vld [vmem:[%s14734_s3 + $0x40c] sm:$0xf0]  ;;  %v9292_v49 = vld [vmem:[%s14734_s3 + $0x3fc] sm:$0xf] }
 0x14f   :  { %v10782_v26 = vadd.f32 %v2231_v41, %v2039_v53  ;;  %5737 = vperm.xlu0 %9673, %v10789_v1   ;;  %v7950_v41 = vld [vmem:[%s14734_s3 + $0x3f8] sm:$0xf]  ;;  %v7952_v53 = vld [vmem:[%s14734_s3 + $0x410] sm:$0xf0] }
 0x151   :  { %14753 = vst [vmem:[#allocation10_spill] sm:$0xff] %v10782_v26  ;;  %2080 = vmatmul.bf16.gmra.mxu2 %v7927_v57  ;;  %2273 = vmatmul.bf16.gmra.mxu3 %v7931_v8  ;;  %v7942_v8 = vld [vmem:[%s14734_s3 + $0x3f0] sm:$0xf]  ;;  %v7955_v26 = vor.u32 %v9292_v49, %v7952_v53  ;;  %v7974_v49 = vld [vmem:[%s14734_s3 + $0x428] sm:$0xf] }
 0x152   :  { %5640 = vperm.xlu2 %9641, %v10637_v35   ;;  %5634 = vperm.xlu1 %9640, %v10637_v35   ;;  %v9301_v53 = vld [vmem:[%s14734_s3 + $0x43c] sm:$0xf0] }
 0x153   :  { %v1657_v18 = vpop.f32.mrf.mxu0  ;;  %v1850_v23 = vpop.f32.mrf.mxu1 }
 0x154   :  { %v2041_v16 = vpop.f32.mrf.mxu2  ;;  %v2234_v22 = vpop.f32.mrf.mxu3  ;;  %v1851_v29 = vadd.f32 %v1850_v23, %v1657_v18 }
 0x155   :  { %v2042_v44 = vadd.f32 %v2041_v16, %v1849_v0  ;;  %v7944_v0 = vld [vmem:[%s14734_s3 + $0x408] sm:$0xf0]  ;;  %v7943_v16 = vor.u32 %v9294_v40, %v7942_v8 }
 0x157   :  { %v10792_v39 = vadd.f32 %v2234_v22, %v2042_v44  ;;  %v7947_v22 = vor.u32 %v9291_v25, %v7944_v0  ;;  %5889 = vperm.xlu0 %9673, %v10821_v43  }
 0x159   :  { %14754 = vst [vmem:[#allocation11_spill] sm:$0xff] %v10792_v39  ;;  %v7951_v39 = vor.u32 %v9295_v42, %v7950_v41  ;;  %v7966_v42 = vld [vmem:[%s14734_s3 + $0x420] sm:$0xf] }
 0x15a   :  { %9644 = vset.pattern.permute.xlu2 %v10139_v45  ;;  %9643 = vset.pattern.permute.xlu1 %v10142_v46 }
 0x15b   :  { %v1660_v18 = vpop.f32.mrf.mxu0  ;;  %v1853_v23 = vpop.f32.mrf.mxu1 }
 0x15c   :  { %v2043_v54 = vpop.f32.mrf.mxu2  ;;  %v2236_v57 = vpop.f32.mrf.mxu3  ;;  %v1854_v12 = vadd.f32 %v1853_v23, %v1660_v18 }
 0x15d   :  { %v2044_v44 = vadd.f32 %v2043_v54, %v1851_v29  ;;  %v9298_v54 = vld [vmem:[%s14734_s3 + $0x42c] sm:$0xf] }
 0x15e   :  { %1699 = vmatmul.bf16.gmra.mxu0 %v7943_v16  ;;  %1892 = vmatmul.bf16.gmra.mxu1 %v7947_v22 }
 0x15f   :  { %v10824_v19 = vadd.f32 %v2236_v57, %v2044_v44  ;;  %9678 = vset.pattern.permute.xlu0 %v10180_v61  ;;  %v7976_v57 = vld [vmem:[%s14734_s3 + $0x440] sm:$0xf0] }
 0x161   :  { %14755 = vst [vmem:[#allocation12_spill] sm:$0xff] %v10824_v19  ;;  %2085 = vmatmul.bf16.gmra.mxu2 %v7951_v39  ;;  %2278 = vmatmul.bf16.gmra.mxu3 %v7955_v26  ;;  %v9300_v26 = vld [vmem:[%s14734_s3 + $0x434] sm:$0xf0]  ;;  %v9297_v39 = vld [vmem:[%s14734_s3 + $0x424] sm:$0xf] }
 0x162   :  { %5658 = vperm.xlu2 %9644, %v10637_v35   ;;  %5652 = vperm.xlu1 %9643, %v10637_v35   ;;  %v7967_v44 = vor.u32 %v9300_v26, %v7966_v42 }
 0x163   :  { %v1662_v40 = vpop.f32.mrf.mxu0  ;;  %v1855_v25 = vpop.f32.mrf.mxu1 }
 0x164   :  { %v2046_v58 = vpop.f32.mrf.mxu2  ;;  %v2239_v8 = vpop.f32.mrf.mxu3  ;;  %v1856_v0 = vadd.f32 %v1855_v25, %v1662_v40  ;;  %v7979_v40 = vor.u32 %v9298_v54, %v7976_v57  ;;  %v7990_v54 = vld [vmem:[%s14734_s3 + $0x450] sm:$0xf]  ;;  %v9306_v57 = vld [vmem:[%s14734_s3 + $0x464] sm:$0xf0] }
 0x165   :  { %v2047_v29 = vadd.f32 %v2046_v58, %v1854_v12  ;;  %v7968_v12 = vld [vmem:[%s14734_s3 + $0x438] sm:$0xf0] }
 0x166   :  { %v7971_v18 = vor.u32 %v9297_v39, %v7968_v12 }
 0x167   :  { %v10829_v41 = vadd.f32 %v2239_v8, %v2047_v29  ;;  %v7975_v29 = vor.u32 %v9301_v53, %v7974_v49  ;;  %5767 = vperm.xlu0 %9678, %v10789_v1  }
 0x169   :  { %14756 = vst [vmem:[#allocation13_spill] sm:$0xff] %v10829_v41 }
 0x16a   :  { %9646 = vset.pattern.permute.xlu2 %v10180_v61  ;;  %9645 = vset.pattern.permute.xlu1 %v10368_v50 }
 0x16b   :  { %v1665_v58 = vpop.f32.mrf.mxu0  ;;  %v1858_v8 = vpop.f32.mrf.mxu1 }
 0x16c   :  { %v2048_v16 = vpop.f32.mrf.mxu2  ;;  %v2241_v22 = vpop.f32.mrf.mxu3  ;;  %v1859_v25 = vadd.f32 %v1858_v8, %v1665_v58  ;;  %v8000_v58 = vld [vmem:[%s14734_s3 + $0x470] sm:$0xf0] }
 0x16d   :  { %v2049_v23 = vadd.f32 %v2048_v16, %v1856_v0  ;;  %v9303_v16 = vld [vmem:[%s14734_s3 + $0x454] sm:$0xf] }
 0x16e   :  { %1704 = vmatmul.bf16.gmra.mxu0 %v7967_v44  ;;  %1897 = vmatmul.bf16.gmra.mxu1 %v7971_v18  ;;  %v7998_v44 = vld [vmem:[%s14734_s3 + $0x458] sm:$0xf]  ;;  %v9307_v18 = vld [vmem:[%s14734_s3 + $0x46c] sm:$0xf0] }
 0x16f   :  { %v10858_v41 = vadd.f32 %v2241_v22, %v2049_v23  ;;  %5919 = vperm.xlu0 %9678, %v10821_v43   ;;  %v7992_v22 = vld [vmem:[%s14734_s3 + $0x468] sm:$0xf0]  ;;  %v9304_v23 = vld [vmem:[%s14734_s3 + $0x45c] sm:$0xf] }
 0x171   :  { %14757 = vst [vmem:[#allocation14_spill] sm:$0xff] %v10858_v41  ;;  %2090 = vmatmul.bf16.gmra.mxu2 %v7975_v29  ;;  %2283 = vmatmul.bf16.gmra.mxu3 %v7979_v40  ;;  %v7991_v40 = vor.u32 %v9306_v57, %v7990_v54 }
 0x172   :  { %5670 = vperm.xlu2 %9646, %v10637_v35   ;;  %5664 = vperm.xlu1 %9645, %v10637_v35  }
 0x173   :  { %v1667_v39 = vpop.f32.mrf.mxu0  ;;  %v1860_v12 = vpop.f32.mrf.mxu1 }
 0x174   :  { %v2051_v42 = vpop.f32.mrf.mxu2  ;;  %v2244_v26 = vpop.f32.mrf.mxu3  ;;  %v1861_v49 = vadd.f32 %v1860_v12, %v1667_v39  ;;  %v7999_v39 = vor.u32 %v9307_v18, %v7998_v44  ;;  %v8003_v12 = vor.u32 %v9304_v23, %v8000_v58  ;;  %v8014_v23 = vld [vmem:[%s14734_s3 + $0x480] sm:$0xf]  ;;  %v9312_v58 = vld [vmem:[%s14734_s3 + $0x494] sm:$0xf0] }
 0x175   :  { %v2052_v0 = vadd.f32 %v2051_v42, %v1859_v25  ;;  %v7995_v25 = vor.u32 %v9303_v16, %v7992_v22 }
 0x177   :  { %v10863_v53 = vadd.f32 %v2244_v26, %v2052_v0  ;;  %9687 = vset.pattern.permute.xlu0 %v10245_v33 }
 0x179   :  { %14758 = vst [vmem:[#allocation15_spill] sm:$0xff] %v10863_v53 }
 0x17a   :  { %9648 = vset.pattern.permute.xlu2 %v10211_v14  ;;  %9647 = vset.pattern.permute.xlu1 %v10160_v52 }
 0x17b   :  { %v1670_v26 = vpop.f32.mrf.mxu0  ;;  %v1863_v0 = vpop.f32.mrf.mxu1 }
 0x17c   :  { %v2053_v8 = vpop.f32.mrf.mxu2  ;;  %v2246_v29 = vpop.f32.mrf.mxu3  ;;  %v1864_v53 = vadd.f32 %v1863_v0, %v1670_v26 }
 0x17d   :  { %v2054_v42 = vadd.f32 %v2053_v8, %v1861_v49  ;;  %v9309_v8 = vld [vmem:[%s14734_s3 + $0x484] sm:$0xf] }
 0x17e   :  { %1709 = vmatmul.bf16.gmra.mxu0 %v7991_v40  ;;  %1902 = vmatmul.bf16.gmra.mxu1 %v7995_v25  ;;  %v9313_v40 = vld [vmem:[%s14734_s3 + $0x49c] sm:$0xf0]  ;;  %v9310_v25 = vld [vmem:[%s14734_s3 + $0x48c] sm:$0xf] }
 0x17f   :  { %v10892_v41 = vadd.f32 %v2246_v29, %v2054_v42  ;;  %5949 = vperm.xlu0 %9687, %v10821_v43   ;;  %v8022_v29 = vld [vmem:[%s14734_s3 + $0x488] sm:$0xf]  ;;  %v8024_v42 = vld [vmem:[%s14734_s3 + $0x4a0] sm:$0xf0] }
 0x181   :  { %14759 = vst [vmem:[#allocation16_spill] sm:$0xff] %v10892_v41  ;;  %2095 = vmatmul.bf16.gmra.mxu2 %v7999_v39  ;;  %2288 = vmatmul.bf16.gmra.mxu3 %v8003_v12  ;;  %v8015_v39 = vor.u32 %v9312_v58, %v8014_v23  ;;  %v10931_v23 = vperm.slane %v10467_v37, 1  ;;  %v9315_v37 = vld [vmem:[%s14734_s3 + $0x4b4] sm:$0xf] }
 0x182   :  { %5688 = vperm.xlu2 %9648, %v10637_v35   ;;  %5682 = vperm.xlu1 %9647, %v10637_v35  }
 0x183   :  { %v1672_v16 = vpop.f32.mrf.mxu0  ;;  %v1865_v22 = vpop.f32.mrf.mxu1 }
 0x184   :  { %v2056_v54 = vpop.f32.mrf.mxu2  ;;  %v2249_v57 = vpop.f32.mrf.mxu3  ;;  %v1866_v44 = vadd.f32 %v1865_v22, %v1672_v16  ;;  %v8023_v16 = vor.u32 %v9313_v40, %v8022_v29  ;;  %v8027_v22 = vor.u32 %v9310_v25, %v8024_v42  ;;  %v8038_v42 = vld [vmem:[%s14734_s3 + $0x4b0] sm:$0xf] }
 0x185   :  { %v2057_v49 = vadd.f32 %v2056_v54, %v1864_v53  ;;  %v8016_v53 = vld [vmem:[%s14734_s3 + $0x498] sm:$0xf0] }
 0x186   :  { %v8019_v12 = vor.u32 %v9309_v8, %v8016_v53 }
 0x187   :  { %v10897_v18 = vadd.f32 %v2249_v57, %v2057_v49  ;;  %9692 = vset.pattern.permute.xlu0 %v10108_v32 }
 0x189   :  { %14760 = vst [vmem:[#allocation17_spill] sm:$0xff] %v10897_v18 }
 0x18a   :  { %9650 = vset.pattern.permute.xlu2 %v10245_v33  ;;  %9649 = vset.pattern.permute.xlu1 %v10435_v4 }
 0x18b   :  { %v1675_v57 = vpop.f32.mrf.mxu0  ;;  %v1868_v49 = vpop.f32.mrf.mxu1 }
 0x18c   :  { %v2058_v26 = vpop.f32.mrf.mxu2  ;;  %v2251_v0 = vpop.f32.mrf.mxu3  ;;  %v1869_v41 = vadd.f32 %v1868_v49, %v1675_v57 }
 0x18d   :  { %v2059_v54 = vadd.f32 %v2058_v26, %v1866_v44  ;;  %v9318_v26 = vld [vmem:[%s14734_s3 + $0x4c4] sm:$0xf0] }
 0x18e   :  { %1714 = vmatmul.bf16.gmra.mxu0 %v8015_v39  ;;  %1907 = vmatmul.bf16.gmra.mxu1 %v8019_v12  ;;  %v9319_v39 = vld [vmem:[%s14734_s3 + $0x4cc] sm:$0xf0]  ;;  %v9316_v12 = vld [vmem:[%s14734_s3 + $0x4bc] sm:$0xf] }
 0x18f   :  { %v10926_v18 = vadd.f32 %v2251_v0, %v2059_v54  ;;  %5980 = vperm.xlu0 %9692, %v10931_v23   ;;  %v8046_v0 = vld [vmem:[%s14734_s3 + $0x4b8] sm:$0xf]  ;;  %v8048_v54 = vld [vmem:[%s14734_s3 + $0x4d0] sm:$0xf0] }
 0x191   :  { %14761 = vst [vmem:[#allocation18_spill] sm:$0xff] %v10926_v18  ;;  %2100 = vmatmul.bf16.gmra.mxu2 %v8023_v16  ;;  %2293 = vmatmul.bf16.gmra.mxu3 %v8027_v22  ;;  %v8039_v16 = vor.u32 %v9318_v26, %v8038_v42 }
 0x192   :  { %5700 = vperm.xlu2 %9650, %v10637_v35   ;;  %5694 = vperm.xlu1 %9649, %v10637_v35  }
 0x193   :  { %v1677_v53 = vpop.f32.mrf.mxu0  ;;  %v1870_v29 = vpop.f32.mrf.mxu1 }
 0x194   :  { %v2061_v44 = vpop.f32.mrf.mxu2  ;;  %v2254_v58 = vpop.f32.mrf.mxu3  ;;  %v1871_v40 = vadd.f32 %v1870_v29, %v1677_v53  ;;  %v8047_v53 = vor.u32 %v9319_v39, %v8046_v0  ;;  %v8051_v29 = vor.u32 %v9316_v12, %v8048_v54  ;;  %v8062_v12 = vld [vmem:[%s14734_s3 + $0x4e0] sm:$0xf]  ;;  %v9324_v54 = vld [vmem:[%s14734_s3 + $0x4f4] sm:$0xf0] }
 0x195   :  { %v2062_v8 = vadd.f32 %v2061_v44, %v1869_v41  ;;  %v8040_v41 = vld [vmem:[%s14734_s3 + $0x4c8] sm:$0xf0] }
 0x196   :  { %v8043_v22 = vor.u32 %v9315_v37, %v8040_v41 }
 0x197   :  { %v10934_v25 = vadd.f32 %v2254_v58, %v2062_v8  ;;  %9693 = vset.pattern.permute.xlu0 %v10368_v50 }
 0x199   :  { %14762 = vst [vmem:[#allocation19_spill] sm:$0xff] %v10934_v25 }
 0x19a   :  { %9652 = vset.pattern.permute.xlu2 %v10056_v2  ;;  %9651 = vset.pattern.permute.xlu1 %v10276_v48 }
 0x19b   :  { %v1680_v58 = vpop.f32.mrf.mxu0  ;;  %v1873_v8 = vpop.f32.mrf.mxu1 }
 0x19c   :  { %v2063_v57 = vpop.f32.mrf.mxu2  ;;  %v2256_v49 = vpop.f32.mrf.mxu3  ;;  %v1874_v18 = vadd.f32 %v1873_v8, %v1680_v58  ;;  %v8063_v8 = vor.u32 %v9324_v54, %v8062_v12 }
 0x19d   :  { %v2064_v44 = vadd.f32 %v2063_v57, %v1871_v40  ;;  %v8070_v57 = vld [vmem:[%s14734_s3 + $0x4e8] sm:$0xf] }
 0x19e   :  { %1719 = vmatmul.bf16.gmra.mxu0 %v8039_v16  ;;  %1912 = vmatmul.bf16.gmra.mxu1 %v8043_v22  ;;  %v9322_v16 = vld [vmem:[%s14734_s3 + $0x4ec] sm:$0xf]  ;;  %v8072_v22 = vld [vmem:[%s14734_s3 + $0x500] sm:$0xf0] }
 0x19f   :  { %v10963_v25 = vadd.f32 %v2256_v49, %v2064_v44  ;;  %5373 = vperm.xlu0 %9693, %v10100_v30   ;;  %v9325_v49 = vld [vmem:[%s14734_s3 + $0x4fc] sm:$0xf0] }
 0x1a1   :  { %14763 = vst [vmem:[#allocation20_spill] sm:$0xff] %v10963_v25  ;;  %2105 = vmatmul.bf16.gmra.mxu2 %v8047_v53  ;;  %2298 = vmatmul.bf16.gmra.mxu3 %v8051_v29 }
 0x1a2   :  { %5719 = vperm.xlu2 %9652, %v10789_v1   ;;  %5712 = vperm.xlu1 %9651, %v10637_v35   ;;  %v9321_v35 = vld [vmem:[%s14734_s3 + $0x4e4] sm:$0xf] }
 0x1a3   :  { %v1682_v37 = vpop.f32.mrf.mxu0  ;;  %v1875_v41 = vpop.f32.mrf.mxu1 }
 0x1a4   :  { %v2066_v42 = vpop.f32.mrf.mxu2  ;;  %v2259_v26 = vpop.f32.mrf.mxu3  ;;  %v1876_v0 = vadd.f32 %v1875_v41, %v1682_v37  ;;  %v8075_v37 = vor.u32 %v9322_v16, %v8072_v22  ;;  %v8086_v16 = vld [vmem:[%s14734_s3 + $0x510] sm:$0xf]  ;;  %v9330_v22 = vld [vmem:[%s14734_s3 + $0x524] sm:$0xf0] }
 0x1a5   :  { %v2067_v40 = vadd.f32 %v2066_v42, %v1874_v18  ;;  %v8064_v18 = vld [vmem:[%s14734_s3 + $0x4f8] sm:$0xf0] }
 0x1a6   :  { %v8067_v53 = vor.u32 %v9321_v35, %v8064_v18 }
 0x1a7   :  { %v10968_v39 = vadd.f32 %v2259_v26, %v2067_v40  ;;  %v8071_v40 = vor.u32 %v9325_v49, %v8070_v57  ;;  %6010 = vperm.xlu0 %9693, %v10931_v23  }
 0x1a9   :  { %14764 = vst [vmem:[#allocation21_spill] sm:$0xff] %v10968_v39 }
 0x1aa   :  { %9654 = vset.pattern.permute.xlu2 %v10108_v32  ;;  %9653 = vset.pattern.permute.xlu1 %v10062_v6 }
 0x1ab   :  { %v1685_v42 = vpop.f32.mrf.mxu0  ;;  %v1878_v26 = vpop.f32.mrf.mxu1 }
 0x1ac   :  { %v2068_v44 = vpop.f32.mrf.mxu2  ;;  %v2261_v58 = vpop.f32.mrf.mxu3  ;;  %v1879_v41 = vadd.f32 %v1878_v26, %v1685_v42  ;;  %v8096_v42 = vld [vmem:[%s14734_s3 + $0x530] sm:$0xf0] }
 0x1ad   :  { %v2069_v29 = vadd.f32 %v2068_v44, %v1876_v0  ;;  %v9327_v44 = vld [vmem:[%s14734_s3 + $0x514] sm:$0xf] }
 0x1ae   :  { %1724 = vmatmul.bf16.gmra.mxu0 %v8063_v8  ;;  %1917 = vmatmul.bf16.gmra.mxu1 %v8067_v53  ;;  %v8094_v8 = vld [vmem:[%s14734_s3 + $0x518] sm:$0xf]  ;;  %v9331_v53 = vld [vmem:[%s14734_s3 + $0x52c] sm:$0xf0] }
 0x1af   :  { %v10997_v39 = vadd.f32 %v2261_v58, %v2069_v29  ;;  %9698 = vset.pattern.permute.xlu0 %v10435_v4  ;;  %v8088_v58 = vld [vmem:[%s14734_s3 + $0x528] sm:$0xf0]  ;;  %v9328_v29 = vld [vmem:[%s14734_s3 + $0x51c] sm:$0xf] }
 0x1b1   :  { %14765 = vst [vmem:[#allocation22_spill] sm:$0xff] %v10997_v39  ;;  %2110 = vmatmul.bf16.gmra.mxu2 %v8071_v40  ;;  %2303 = vmatmul.bf16.gmra.mxu3 %v8075_v37  ;;  %v8087_v37 = vor.u32 %v9330_v22, %v8086_v16 }
 0x1b2   :  { %5731 = vperm.xlu2 %9654, %v10789_v1   ;;  %5725 = vperm.xlu1 %9653, %v10789_v1  }
 0x1b3   :  { %v1687_v35 = vpop.f32.mrf.mxu0  ;;  %v1880_v18 = vpop.f32.mrf.mxu1 }
 0x1b4   :  { %v2071_v12 = vpop.f32.mrf.mxu2  ;;  %v2264_v54 = vpop.f32.mrf.mxu3  ;;  %v1881_v57 = vadd.f32 %v1880_v18, %v1687_v35  ;;  %v8095_v35 = vor.u32 %v9331_v53, %v8094_v8  ;;  %v8099_v18 = vor.u32 %v9328_v29, %v8096_v42  ;;  %v8110_v29 = vld [vmem:[%s14734_s3 + $0x540] sm:$0xf]  ;;  %v9336_v42 = vld [vmem:[%s14734_s3 + $0x554] sm:$0xf0] }
 0x1b5   :  { %v2072_v0 = vadd.f32 %v2071_v12, %v1879_v41  ;;  %v8091_v41 = vor.u32 %v9327_v44, %v8088_v58 }
 0x1b7   :  { %v11002_v49 = vadd.f32 %v2264_v54, %v2072_v0  ;;  %5403 = vperm.xlu0 %9698, %v10100_v30  }
 0x1b9   :  { %14766 = vst [vmem:[#allocation23_spill] sm:$0xff] %v11002_v49 }
 0x1ba   :  { %9656 = vset.pattern.permute.xlu2 %v10142_v46  ;;  %9655 = vset.pattern.permute.xlu1 %v10105_v31 }
 0x1bb   :  { %v1690_v54 = vpop.f32.mrf.mxu0  ;;  %v1883_v0 = vpop.f32.mrf.mxu1 }
 0x1bc   :  { %v2073_v26 = vpop.f32.mrf.mxu2  ;;  %v2266_v40 = vpop.f32.mrf.mxu3  ;;  %v1884_v49 = vadd.f32 %v1883_v0, %v1690_v54 }
 0x1bd   :  { %v2074_v12 = vadd.f32 %v2073_v26, %v1881_v57  ;;  %v9333_v26 = vld [vmem:[%s14734_s3 + $0x544] sm:$0xf] }
 0x1be   :  { %1729 = vmatmul.bf16.gmra.mxu0 %v8087_v37  ;;  %1922 = vmatmul.bf16.gmra.mxu1 %v8091_v41  ;;  %v9337_v37 = vld [vmem:[%s14734_s3 + $0x55c] sm:$0xf0]  ;;  %v9334_v41 = vld [vmem:[%s14734_s3 + $0x54c] sm:$0xf] }
 0x1bf   :  { %v11031_v39 = vadd.f32 %v2266_v40, %v2074_v12  ;;  %6040 = vperm.xlu0 %9698, %v10931_v23   ;;  %v8118_v40 = vld [vmem:[%s14734_s3 + $0x548] sm:$0xf]  ;;  %v8120_v12 = vld [vmem:[%s14734_s3 + $0x560] sm:$0xf0] }
 0x1c1   :  { %14767 = vst [vmem:[#allocation24_spill] sm:$0xff] %v11031_v39  ;;  %2115 = vmatmul.bf16.gmra.mxu2 %v8095_v35  ;;  %2308 = vmatmul.bf16.gmra.mxu3 %v8099_v18  ;;  %v8111_v35 = vor.u32 %v9336_v42, %v8110_v29 }
 0x1c2   :  { %5749 = vperm.xlu2 %9656, %v10789_v1   ;;  %5743 = vperm.xlu1 %9655, %v10789_v1  }
 0x1c3   :  { %v1692_v44 = vpop.f32.mrf.mxu0  ;;  %v1885_v58 = vpop.f32.mrf.mxu1 }
 0x1c4   :  { %v2076_v16 = vpop.f32.mrf.mxu2  ;;  %v2269_v22 = vpop.f32.mrf.mxu3  ;;  %v1886_v8 = vadd.f32 %v1885_v58, %v1692_v44  ;;  %v8119_v44 = vor.u32 %v9337_v37, %v8118_v40  ;;  %v8123_v58 = vor.u32 %v9334_v41, %v8120_v12  ;;  %v8134_v12 = vld [vmem:[%s14734_s3 + $0x570] sm:$0xf] }
 0x1c5   :  { %v2077_v57 = vadd.f32 %v2076_v16, %v1884_v49  ;;  %v8112_v49 = vld [vmem:[%s14734_s3 + $0x558] sm:$0xf0]  ;;  %v11072_v41 = vpop.permute.xlu0 %5585 }
 0x1c6   :  { %v8115_v18 = vor.u32 %v9333_v26, %v8112_v49  ;;  %14771 = vst [vmem:[#allocation28_spill] sm:$0xff] %v11072_v41 }
 0x1c7   :  { %v11036_v53 = vadd.f32 %v2269_v22, %v2077_v57  ;;  %9703 = vset.pattern.permute.xlu0 %v10062_v6 }
 0x1c9   :  { %14768 = vst [vmem:[#allocation25_spill] sm:$0xff] %v11036_v53 }
 0x1ca   :  { %9658 = vset.pattern.permute.xlu2 %v10368_v50  ;;  %9657 = vset.pattern.permute.xlu1 %v10139_v45 }
 0x1cb   :  { %v1695_v22 = vpop.f32.mrf.mxu0  ;;  %v1888_v57 = vpop.f32.mrf.mxu1 }
 0x1cc   :  { %v2078_v54 = vpop.f32.mrf.mxu2  ;;  %v2271_v0 = vpop.f32.mrf.mxu3  ;;  %v1889_v53 = vadd.f32 %v1888_v57, %v1695_v22  ;;  %v11101_v22 = vperm.slane %v10634_v27, 1 }
 0x1cd   :  { %v2079_v16 = vadd.f32 %v2078_v54, %v1886_v8  ;;  %v8136_v54 = vld [vmem:[%s14734_s3 + $0x588] sm:$0xf0]  ;;  %v11106_v25 = vpop.permute.xlu0 %5615 }
 0x1ce   :  { %1734 = vmatmul.bf16.gmra.mxu0 %v8111_v35  ;;  %1927 = vmatmul.bf16.gmra.mxu1 %v8115_v18  ;;  %v9343_v35 = vld [vmem:[%s14734_s3 + $0x58c] sm:$0xf0]  ;;  %v9340_v18 = vld [vmem:[%s14734_s3 + $0x57c] sm:$0xf]  ;;  %14773 = vst [vmem:[#allocation30_spill] sm:$0xff] %v11106_v25 }
 0x1cf   :  { %v11065_v39 = vadd.f32 %v2271_v0, %v2079_v16  ;;  %5434 = vperm.xlu0 %9703, %v10307_v3   ;;  %v8142_v0 = vld [vmem:[%s14734_s3 + $0x578] sm:$0xf]  ;;  %v8144_v16 = vld [vmem:[%s14734_s3 + $0x590] sm:$0xf0] }
 0x1d0   :  { %v8147_v41 = vor.u32 %v9340_v18, %v8144_v16  ;;  %v9348_v18 = vld [vmem:[%s14734_s3 + $0x5b4] sm:$0xf0]  ;;  %v8160_v16 = vld [vmem:[%s14734_s3 + $0x5b8] sm:$0xf0] }
 0x1d1   :  { %14769 = vst [vmem:[#allocation26_spill] sm:$0xff] %v11065_v39  ;;  %2120 = vmatmul.bf16.gmra.mxu2 %v8119_v44  ;;  %2313 = vmatmul.bf16.gmra.mxu3 %v8123_v58 }
 0x1d2   :  { %5761 = vperm.xlu2 %9658, %v10789_v1   ;;  %5755 = vperm.xlu1 %9657, %v10789_v1   ;;  %v9342_v1 = vld [vmem:[%s14734_s3 + $0x584] sm:$0xf0] }
 0x1d3   :  { %v1697_v26 = vpop.f32.mrf.mxu0  ;;  %v1890_v49 = vpop.f32.mrf.mxu1  ;;  %v8135_v58 = vor.u32 %v9342_v1, %v8134_v12 }
 0x1d4   :  { %v2081_v29 = vpop.f32.mrf.mxu2  ;;  %v2274_v42 = vpop.f32.mrf.mxu3  ;;  %v1891_v40 = vadd.f32 %v1890_v49, %v1697_v26  ;;  %v8143_v49 = vor.u32 %v9343_v35, %v8142_v0 }
 0x1d5   :  { %v2082_v8 = vadd.f32 %v2081_v29, %v1889_v53  ;;  %v9339_v53 = vld [vmem:[%s14734_s3 + $0x574] sm:$0xf]  ;;  %v11113_v35 = vpop.permute.xlu0 %5646 }
 0x1d6   :  { %v8139_v29 = vor.u32 %v9339_v53, %v8136_v54  ;;  %14775 = vst [vmem:[#allocation32_spill] sm:$0xff] %v11113_v35 }
 0x1d7   :  { %v11070_v37 = vadd.f32 %v2274_v42, %v2082_v8  ;;  %6071 = vperm.xlu0 %9703, %v11101_v22  }
 0x1d9   :  { %14770 = vst [vmem:[#allocation27_spill] sm:$0xff] %v11070_v37 }
 0x1da   :  { %9660 = vset.pattern.permute.xlu2 %v10062_v6  ;;  %9659 = vset.pattern.permute.xlu1 %v10056_v2 }
 0x1db   :  { %v1700_v8 = vpop.f32.mrf.mxu0  ;;  %v1893_v26 = vpop.f32.mrf.mxu1 }
 0x1dc   :  { %v2083_v57 = vpop.f32.mrf.mxu2  ;;  %v2276_v44 = vpop.f32.mrf.mxu3  ;;  %v1894_v37 = vadd.f32 %v1893_v26, %v1700_v8 }
 0x1dd   :  { %v2084_v42 = vadd.f32 %v2083_v57, %v1891_v40  ;;  %v8166_v57 = vld [vmem:[%s14734_s3 + $0x5a8] sm:$0xf] }
 0x1de   :  { %1739 = vmatmul.bf16.gmra.mxu0 %v8135_v58  ;;  %1932 = vmatmul.bf16.gmra.mxu1 %v8139_v29  ;;  %v9346_v58 = vld [vmem:[%s14734_s3 + $0x5ac] sm:$0xf]  ;;  %v8168_v29 = vld [vmem:[%s14734_s3 + $0x5c0] sm:$0xf0] }
 0x1df   :  { %v11104_v39 = vadd.f32 %v2276_v44, %v2084_v42  ;;  %9708 = vset.pattern.permute.xlu0 %v10139_v45  ;;  %v9349_v44 = vld [vmem:[%s14734_s3 + $0x5bc] sm:$0xf0] }
 0x1e1   :  { %14772 = vst [vmem:[#allocation29_spill] sm:$0xff] %v11104_v39  ;;  %2125 = vmatmul.bf16.gmra.mxu2 %v8143_v49  ;;  %2318 = vmatmul.bf16.gmra.mxu3 %v8147_v41  ;;  %v8158_v41 = vld [vmem:[%s14734_s3 + $0x5a0] sm:$0xf] }
 0x1e2   :  { %5780 = vperm.xlu2 %9660, %v10645_v63   ;;  %5774 = vperm.xlu1 %9659, %v10645_v63   ;;  %v8159_v26 = vor.u32 %v9348_v18, %v8158_v41 }
 0x1e3   :  { %v1702_v1 = vpop.f32.mrf.mxu0  ;;  %v1895_v53 = vpop.f32.mrf.mxu1 }
 0x1e4   :  { %v2086_v27 = vpop.f32.mrf.mxu2  ;;  %v2279_v40 = vpop.f32.mrf.mxu3  ;;  %v1896_v54 = vadd.f32 %v1895_v53, %v1702_v1  ;;  %v8167_v1 = vor.u32 %v9349_v44, %v8166_v57  ;;  %v8171_v53 = vor.u32 %v9346_v58, %v8168_v29  ;;  %v8182_v29 = vld [vmem:[%s14734_s3 + $0x5d0] sm:$0xf] }
 0x1e5   :  { %v2087_v12 = vadd.f32 %v2086_v27, %v1894_v37  ;;  %v9345_v37 = vld [vmem:[%s14734_s3 + $0x5a4] sm:$0xf] }
 0x1e6   :  { %v8163_v49 = vor.u32 %v9345_v37, %v8160_v16 }
 0x1e7   :  { %v11111_v0 = vadd.f32 %v2279_v40, %v2087_v12  ;;  %5464 = vperm.xlu0 %9708, %v10307_v3  }
 0x1e9   :  { %14774 = vst [vmem:[#allocation31_spill] sm:$0xff] %v11111_v0  ;;  %v11144_v0 = vpop.permute.xlu0 %5798 }
 0x1ea   :  { %9662 = vset.pattern.permute.xlu2 %v10059_v5  ;;  %9661 = vset.pattern.permute.xlu1 %v10108_v32  ;;  %14777 = vst [vmem:[#allocation34_spill] sm:$0xff] %v11144_v0 }
 0x1eb   :  { %v1705_v40 = vpop.f32.mrf.mxu0  ;;  %v1898_v12 = vpop.f32.mrf.mxu1 }
 0x1ec   :  { %v2088_v42 = vpop.f32.mrf.mxu2  ;;  %v2281_v8 = vpop.f32.mrf.mxu3  ;;  %v1899_v35 = vadd.f32 %v1898_v12, %v1705_v40  ;;  %v8192_v40 = vld [vmem:[%s14734_s3 + $0x5f0] sm:$0xf0] }
 0x1ed   :  { %v2089_v27 = vadd.f32 %v2088_v42, %v1896_v54  ;;  %v9354_v42 = vld [vmem:[%s14734_s3 + $0x5e4] sm:$0xf0] }
 0x1ee   :  { %1744 = vmatmul.bf16.gmra.mxu0 %v8159_v26  ;;  %1937 = vmatmul.bf16.gmra.mxu1 %v8163_v49  ;;  %v8190_v26 = vld [vmem:[%s14734_s3 + $0x5d8] sm:$0xf]  ;;  %v9355_v49 = vld [vmem:[%s14734_s3 + $0x5ec] sm:$0xf0] }
 0x1ef   :  { %v11142_v25 = vadd.f32 %v2281_v8, %v2089_v27  ;;  %6101 = vperm.xlu0 %9708, %v11101_v22   ;;  %v8184_v8 = vld [vmem:[%s14734_s3 + $0x5e8] sm:$0xf0]  ;;  %v9352_v27 = vld [vmem:[%s14734_s3 + $0x5dc] sm:$0xf] }
 0x1f0   :  { %v8195_v0 = vor.u32 %v9352_v27, %v8192_v40  ;;  %v9360_v40 = vld [vmem:[%s14734_s3 + $0x614] sm:$0xf0] }
 0x1f1   :  { %14776 = vst [vmem:[#allocation33_spill] sm:$0xff] %v11142_v25  ;;  %2130 = vmatmul.bf16.gmra.mxu2 %v8167_v1  ;;  %2323 = vmatmul.bf16.gmra.mxu3 %v8171_v53  ;;  %v11151_v58 = vpop.permute.xlu0 %5676  ;;  %v8183_v53 = vor.u32 %v9354_v42, %v8182_v29 }
 0x1f2   :  { %5792 = vperm.xlu2 %9662, %v10645_v63   ;;  %5786 = vperm.xlu1 %9661, %v10645_v63   ;;  %14779 = vst [vmem:[#allocation36_spill] sm:$0xff] %v11151_v58 }
 0x1f3   :  { %v1707_v37 = vpop.f32.mrf.mxu0  ;;  %v1900_v16 = vpop.f32.mrf.mxu1 }
 0x1f4   :  { %v2091_v54 = vpop.f32.mrf.mxu2  ;;  %v2284_v41 = vpop.f32.mrf.mxu3  ;;  %v1901_v57 = vadd.f32 %v1900_v16, %v1707_v37  ;;  %v8191_v16 = vor.u32 %v9355_v49, %v8190_v26 }
 0x1f5   :  { %v2092_v18 = vadd.f32 %v2091_v54, %v1899_v35  ;;  %v9351_v35 = vld [vmem:[%s14734_s3 + $0x5d4] sm:$0xf] }
 0x1f6   :  { %v8187_v54 = vor.u32 %v9351_v35, %v8184_v8 }
 0x1f7   :  { %v11149_v44 = vadd.f32 %v2284_v41, %v2092_v18  ;;  %9713 = vset.pattern.permute.xlu0 %v10211_v14 }
 0x1f9   :  { %14778 = vst [vmem:[#allocation35_spill] sm:$0xff] %v11149_v44  ;;  %v11182_v25 = vpop.permute.xlu0 %5828 }
 0x1fa   :  { %9665 = vset.pattern.permute.xlu2 %v10139_v45  ;;  %9664 = vset.pattern.permute.xlu1 %v10142_v46  ;;  %14781 = vst [vmem:[#allocation38_spill] sm:$0xff] %v11182_v25 }
 0x1fb   :  { %v1710_v18 = vpop.f32.mrf.mxu0  ;;  %v1903_v37 = vpop.f32.mrf.mxu1 }
 0x1fc   :  { %v2093_v12 = vpop.f32.mrf.mxu2  ;;  %v2286_v1 = vpop.f32.mrf.mxu3  ;;  %v1904_v58 = vadd.f32 %v1903_v37, %v1710_v18 }
 0x1fd   :  { %v2094_v41 = vadd.f32 %v2093_v12, %v1901_v57  ;;  %v8214_v12 = vld [vmem:[%s14734_s3 + $0x608] sm:$0xf] }
 0x1fe   :  { %1749 = vmatmul.bf16.gmra.mxu0 %v8183_v53  ;;  %1942 = vmatmul.bf16.gmra.mxu1 %v8187_v54  ;;  %v9358_v53 = vld [vmem:[%s14734_s3 + $0x60c] sm:$0xf]  ;;  %v8216_v54 = vld [vmem:[%s14734_s3 + $0x620] sm:$0xf0] }
 0x1ff   :  { %v11180_v44 = vadd.f32 %v2286_v1, %v2094_v41  ;;  %5494 = vperm.xlu0 %9713, %v10307_v3   ;;  %v8208_v3 = vld [vmem:[%s14734_s3 + $0x618] sm:$0xf0]  ;;  %v9361_v1 = vld [vmem:[%s14734_s3 + $0x61c] sm:$0xf0] }
 0x201   :  { %14780 = vst [vmem:[#allocation37_spill] sm:$0xff] %v11180_v44  ;;  %2135 = vmatmul.bf16.gmra.mxu2 %v8191_v16  ;;  %2328 = vmatmul.bf16.gmra.mxu3 %v8195_v0  ;;  %v11189_v27 = vpop.permute.xlu0 %5706  ;;  %v8206_v0 = vld [vmem:[%s14734_s3 + $0x600] sm:$0xf] }
 0x202   :  { %5810 = vperm.xlu2 %9665, %v10645_v63   ;;  %5804 = vperm.xlu1 %9664, %v10645_v63   ;;  %14783 = vst [vmem:[#allocation40_spill] sm:$0xff] %v11189_v27  ;;  %v8207_v37 = vor.u32 %v9360_v40, %v8206_v0 }
 0x203   :  { %v1712_v35 = vpop.f32.mrf.mxu0  ;;  %v1905_v8 = vpop.f32.mrf.mxu1 }
 0x204   :  { %v2096_v57 = vpop.f32.mrf.mxu2  ;;  %v2289_v29 = vpop.f32.mrf.mxu3  ;;  %v1906_v26 = vadd.f32 %v1905_v8, %v1712_v35  ;;  %v8215_v35 = vor.u32 %v9361_v1, %v8214_v12  ;;  %v8219_v8 = vor.u32 %v9358_v53, %v8216_v54 }
 0x205   :  { %v2097_v42 = vadd.f32 %v2096_v57, %v1904_v58  ;;  %v9357_v58 = vld [vmem:[%s14734_s3 + $0x604] sm:$0xf]  ;;  %v11225_v1 = vpop.permute.xlu2 %5349 }
 0x206   :  { %v8211_v16 = vor.u32 %v9357_v58, %v8208_v3  ;;  %14786 = vst [vmem:[#allocation43_spill] sm:$0xff] %v11225_v1 }
 0x207   :  { %v11187_v49 = vadd.f32 %v2289_v29, %v2097_v42  ;;  %6131 = vperm.xlu0 %9713, %v11101_v22  }
 0x209   :  { %14782 = vst [vmem:[#allocation39_spill] sm:$0xff] %v11187_v49  ;;  %v11220_v49 = vpop.permute.xlu0 %5858 }
 0x20a   :  { %9667 = vset.pattern.permute.xlu2 %v10180_v61  ;;  %9666 = vset.pattern.permute.xlu1 %v10368_v50  ;;  %14785 = vst [vmem:[#allocation42_spill] sm:$0xff] %v11220_v49 }
 0x20b   :  { %v1715_v29 = vpop.f32.mrf.mxu0  ;;  %v1908_v42 = vpop.f32.mrf.mxu1 }
 0x20c   :  { %v2098_v41 = vpop.f32.mrf.mxu2  ;;  %v2291_v18 = vpop.f32.mrf.mxu3  ;;  %v1909_v25 = vadd.f32 %v1908_v42, %v1715_v29  ;;  %v9364_v29 = vld [vmem:[%s14734_s3 + $0x63c] sm:$0xf]  ;;  %v8240_v42 = vld [vmem:[%s14734_s3 + $0x650] sm:$0xf0] }
 0x20d   :  { %v2099_v57 = vadd.f32 %v2098_v41, %v1906_v26  ;;  %v8230_v41 = vld [vmem:[%s14734_s3 + $0x630] sm:$0xf] }
 0x20e   :  { %1754 = vmatmul.bf16.gmra.mxu0 %v8207_v37  ;;  %1947 = vmatmul.bf16.gmra.mxu1 %v8211_v16  ;;  %v8232_v37 = vld [vmem:[%s14734_s3 + $0x648] sm:$0xf0]  ;;  %v8238_v16 = vld [vmem:[%s14734_s3 + $0x638] sm:$0xf] }
 0x20f   :  { %v11218_v27 = vadd.f32 %v2291_v18, %v2099_v57  ;;  %9718 = vset.pattern.permute.xlu0 %v10056_v2  ;;  %v9366_v18 = vld [vmem:[%s14734_s3 + $0x644] sm:$0xf0]  ;;  %v9367_v57 = vld [vmem:[%s14734_s3 + $0x64c] sm:$0xf0] }
 0x210   :  { %v8239_v49 = vor.u32 %v9367_v57, %v8238_v16 }
 0x211   :  { %14784 = vst [vmem:[#allocation41_spill] sm:$0xff] %v11218_v27  ;;  %2140 = vmatmul.bf16.gmra.mxu2 %v8215_v35  ;;  %2333 = vmatmul.bf16.gmra.mxu3 %v8219_v8  ;;  %v11229_v54 = vpop.permute.xlu0 %5737  ;;  %v11258_v27 = vpop.permute.xlu2 %5355 }
 0x212   :  { %5822 = vperm.xlu2 %9667, %v10645_v63   ;;  %5816 = vperm.xlu1 %9666, %v10645_v63   ;;  %14788 = vst [vmem:[#allocation45_spill] sm:$0xff] %v11229_v54  ;;  %v8243_v54 = vor.u32 %v9364_v29, %v8240_v42  ;;  %v8256_v42 = vld [vmem:[%s14734_s3 + $0x678] sm:$0xf0] }
 0x213   :  { %v1717_v58 = vpop.f32.mrf.mxu0  ;;  %v1910_v3 = vpop.f32.mrf.mxu1  ;;  %14789 = vst [vmem:[#allocation46_spill] sm:$0xff] %v11258_v27 }
 0x214   :  { %v2101_v26 = vpop.f32.mrf.mxu2  ;;  %v2294_v0 = vpop.f32.mrf.mxu3  ;;  %v1911_v12 = vadd.f32 %v1910_v3, %v1717_v58 }
 0x215   :  { %v2102_v40 = vadd.f32 %v2101_v26, %v1909_v25  ;;  %v9363_v25 = vld [vmem:[%s14734_s3 + $0x634] sm:$0xf]  ;;  %v8231_v26 = vor.u32 %v9366_v18, %v8230_v41 }
 0x217   :  { %v11227_v53 = vadd.f32 %v2294_v0, %v2102_v40  ;;  %v8235_v0 = vor.u32 %v9363_v25, %v8232_v37  ;;  %5331 = vperm.xlu0 %9718, %v10100_v30  }
 0x219   :  { %14787 = vst [vmem:[#allocation44_spill] sm:$0xff] %v11227_v53  ;;  %v11262_v39 = vpop.permute.xlu0 %5889  ;;  %v11267_v16 = vpop.permute.xlu2 %5367 }
 0x21a   :  { %9670 = vset.pattern.permute.xlu2 %v10211_v14  ;;  %9669 = vset.pattern.permute.xlu1 %v10160_v52  ;;  %14791 = vst [vmem:[#allocation48_spill] sm:$0xff] %v11262_v39 }
 0x21b   :  { %v1720_v58 = vpop.f32.mrf.mxu0  ;;  %v1913_v3 = vpop.f32.mrf.mxu1 }
 0x21c   :  { %v2103_v35 = vpop.f32.mrf.mxu2  ;;  %v2296_v8 = vpop.f32.mrf.mxu3  ;;  %v1914_v53 = vadd.f32 %v1913_v3, %v1720_v58 }
 0x21d   :  { %v2104_v40 = vadd.f32 %v2103_v35, %v1911_v12  ;;  %v8262_v35 = vld [vmem:[%s14734_s3 + $0x668] sm:$0xf] }
 0x21e   :  { %1759 = vmatmul.bf16.gmra.mxu0 %v8231_v26  ;;  %1952 = vmatmul.bf16.gmra.mxu1 %v8235_v0  ;;  %v9370_v26 = vld [vmem:[%s14734_s3 + $0x66c] sm:$0xf]  ;;  %v8264_v0 = vld [vmem:[%s14734_s3 + $0x680] sm:$0xf0] }
 0x21f   :  { %v11260_v44 = vadd.f32 %v2296_v8, %v2104_v40  ;;  %5525 = vperm.xlu0 %9718, %v10472_v38   ;;  %v9373_v8 = vld [vmem:[%s14734_s3 + $0x67c] sm:$0xf0]  ;;  %v11300_v40 = vperm.slane %v10786_v9, 1 }
 0x220   :  { %v8263_v39 = vor.u32 %v9373_v8, %v8262_v35  ;;  %v11314_v8 = vpop.permute.xlu1 %5337 }
 0x221   :  { %14790 = vst [vmem:[#allocation47_spill] sm:$0xff] %v11260_v44  ;;  %2145 = vmatmul.bf16.gmra.mxu2 %v8239_v49  ;;  %2338 = vmatmul.bf16.gmra.mxu3 %v8243_v54  ;;  %v11271_v29 = vpop.permute.xlu0 %5767  ;;  %v8254_v49 = vld [vmem:[%s14734_s3 + $0x660] sm:$0xf]  ;;  %v9372_v54 = vld [vmem:[%s14734_s3 + $0x674] sm:$0xf0]  ;;  %v11303_v44 = vpop.permute.xlu2 %5385 }
 0x222   :  { %5840 = vperm.xlu2 %9670, %v10645_v63   ;;  %5834 = vperm.xlu1 %9669, %v10645_v63   ;;  %14793 = vst [vmem:[#allocation50_spill] sm:$0xff] %v11271_v29  ;;  %v8267_v29 = vor.u32 %v9370_v26, %v8264_v0  ;;  %v9375_v0 = vld [vmem:[%s14734_s3 + $0x694] sm:$0xf] }
 0x223   :  { %v1722_v25 = vpop.f32.mrf.mxu0  ;;  %v1915_v30 = vpop.f32.mrf.mxu1 }
 0x224   :  { %v2106_v12 = vpop.f32.mrf.mxu2  ;;  %v2299_v41 = vpop.f32.mrf.mxu3  ;;  %v1916_v37 = vadd.f32 %v1915_v30, %v1722_v25 }
 0x225   :  { %v2107_v18 = vadd.f32 %v2106_v12, %v1914_v53  ;;  %v9369_v53 = vld [vmem:[%s14734_s3 + $0x664] sm:$0xf]  ;;  %v8255_v12 = vor.u32 %v9372_v54, %v8254_v49 }
 0x227   :  { %v11269_v57 = vadd.f32 %v2299_v41, %v2107_v18  ;;  %v8259_v41 = vor.u32 %v9369_v53, %v8256_v42  ;;  %6162 = vperm.xlu0 %9718, %v11300_v40  }
 0x229   :  { %14792 = vst [vmem:[#allocation49_spill] sm:$0xff] %v11269_v57  ;;  %v11307_v1 = vpop.permute.xlu0 %5919  ;;  %v11312_v35 = vpop.permute.xlu2 %5397 }
 0x22a   :  { %9672 = vset.pattern.permute.xlu2 %v10245_v33  ;;  %9671 = vset.pattern.permute.xlu1 %v10435_v4  ;;  %14795 = vst [vmem:[#allocation52_spill] sm:$0xff] %v11307_v1 }
 0x22b   :  { %v1725_v25 = vpop.f32.mrf.mxu0  ;;  %v1918_v30 = vpop.f32.mrf.mxu1  ;;  %14796 = vst [vmem:[#allocation53_spill] sm:$0xff] %v11312_v35 }
 0x22c   :  { %v2108_v58 = vpop.f32.mrf.mxu2  ;;  %v2301_v3 = vpop.f32.mrf.mxu3  ;;  %v1919_v57 = vadd.f32 %v1918_v30, %v1725_v25 }
 0x22d   :  { %v2109_v18 = vadd.f32 %v2108_v58, %v1916_v37  ;;  %v8280_v58 = vld [vmem:[%s14734_s3 + $0x6a8] sm:$0xf0]  ;;  %v11349_v35 = vpop.permute.xlu1 %5343 }
 0x22e   :  { %1764 = vmatmul.bf16.gmra.mxu0 %v8255_v12  ;;  %1957 = vmatmul.bf16.gmra.mxu1 %v8259_v41  ;;  %v9379_v12 = vld [vmem:[%s14734_s3 + $0x6ac] sm:$0xf0]  ;;  %v9376_v41 = vld [vmem:[%s14734_s3 + $0x69c] sm:$0xf]  ;;  %14800 = vst [vmem:[#allocation57_spill] sm:$0xff] %v11349_v35 }
 0x22f   :  { %v11305_v27 = vadd.f32 %v2301_v3, %v2109_v18  ;;  %9723 = vset.pattern.permute.xlu0 %v10142_v46  ;;  %v8286_v3 = vld [vmem:[%s14734_s3 + $0x698] sm:$0xf]  ;;  %v8288_v18 = vld [vmem:[%s14734_s3 + $0x6b0] sm:$0xf0] }
 0x230   :  { %v8291_v1 = vor.u32 %v9376_v41, %v8288_v18 }
 0x231   :  { %14794 = vst [vmem:[#allocation51_spill] sm:$0xff] %v11305_v27  ;;  %2150 = vmatmul.bf16.gmra.mxu2 %v8263_v39  ;;  %2343 = vmatmul.bf16.gmra.mxu3 %v8267_v29  ;;  %v11318_v39 = vpop.permute.xlu0 %5949  ;;  %v8278_v29 = vld [vmem:[%s14734_s3 + $0x690] sm:$0xf]  ;;  %v11347_v27 = vpop.permute.xlu2 %5415 }
 0x232   :  { %5852 = vperm.xlu2 %9672, %v10645_v63   ;;  %5846 = vperm.xlu1 %9671, %v10645_v63   ;;  %14798 = vst [vmem:[#allocation55_spill] sm:$0xff] %v11318_v39  ;;  %v8287_v39 = vor.u32 %v9379_v12, %v8286_v3 }
 0x233   :  { %v1727_v54 = vpop.f32.mrf.mxu0  ;;  %v1920_v53 = vpop.f32.mrf.mxu1  ;;  %14799 = vst [vmem:[#allocation56_spill] sm:$0xff] %v11347_v27 }
 0x234   :  { %v2111_v9 = vpop.f32.mrf.mxu2  ;;  %v2304_v37 = vpop.f32.mrf.mxu3  ;;  %v1921_v42 = vadd.f32 %v1920_v53, %v1727_v54 }
 0x235   :  { %v2112_v49 = vadd.f32 %v2111_v9, %v1919_v57  ;;  %v9378_v57 = vld [vmem:[%s14734_s3 + $0x6a4] sm:$0xf0]  ;;  %v11369_v18 = vpop.permute.xlu1 %5361 }
 0x236   :  { %v8279_v9 = vor.u32 %v9378_v57, %v8278_v29  ;;  %v3851_v29 = vperm.slane %v10078_v15, 5  ;;  %14804 = vst [vmem:[#allocation61_spill] sm:$0xff] %v11369_v18 }
 0x237   :  { %v11316_v26 = vadd.f32 %v2304_v37, %v2112_v49  ;;  %v8283_v37 = vor.u32 %v9375_v0, %v8280_v58  ;;  %5555 = vperm.xlu0 %9723, %v10472_v38   ;;  %v3848_v38 = vperm.slane %v10078_v15, 2 }
 0x238   :  { %4830 = vmatpush.bf16.xpose.msra.mxu3 %v3851_v29 }
 0x239   :  { %14797 = vst [vmem:[#allocation54_spill] sm:$0xff] %v11316_v26  ;;  %v11353_v59 = vpop.permute.xlu0 %5980  ;;  %4251 = vmatpush.bf16.xpose.msra.mxu0 %v3848_v38  ;;  %v11367_v41 = vpop.permute.xlu2 %5428 }
 0x23a   :  { %9675 = vset.pattern.permute.xlu2 %v10056_v2  ;;  %9674 = vset.pattern.permute.xlu1 %v10276_v48  ;;  %14802 = vst [vmem:[#allocation59_spill] sm:$0xff] %v11353_v59 }
 0x23b   :  { %v1730_v54 = vpop.f32.mrf.mxu0  ;;  %v1923_v53 = vpop.f32.mrf.mxu1  ;;  %14803 = vst [vmem:[#allocation60_spill] sm:$0xff] %v11367_v41 }
 0x23c   :  { %v2113_v25 = vpop.f32.mrf.mxu2  ;;  %v2306_v30 = vpop.f32.mrf.mxu3  ;;  %v1924_v26 = vadd.f32 %v1923_v53, %v1730_v54 }
 0x23d   :  { %v2114_v49 = vadd.f32 %v2113_v25, %v1921_v42  ;;  %v3850_v42 = vperm.slane %v10078_v15, 4  ;;  %v11384_v59 = vpop.permute.xlu1 %5379 }
 0x23e   :  { %1769 = vmatmul.bf16.gmra.mxu0 %v8279_v9  ;;  %1962 = vmatmul.bf16.gmra.mxu1 %v8283_v37  ;;  %14808 = vst [vmem:[#allocation65_spill] sm:$0xff] %v11384_v59 }
 0x23f   :  { %v11351_v19 = vadd.f32 %v2306_v30, %v2114_v49  ;;  %4637 = vmatpush.bf16.xpose.msra.mxu2 %v3850_v42  ;;  %6192 = vperm.xlu0 %9723, %v11300_v40  }
 0x241   :  { %14801 = vst [vmem:[#allocation58_spill] sm:$0xff] %v11351_v19  ;;  %2155 = vmatmul.bf16.gmra.mxu2 %v8287_v39  ;;  %2348 = vmatmul.bf16.gmra.mxu3 %v8291_v1  ;;  %v247_v1 = vld [vmem:[%s14734_s3 + $0x6c0] sm:$0x11]  ;;  %v11374_v30 = vpop.permute.xlu0 %5373 }
 0x242   :  { %5871 = vperm.xlu2 %9675, %v10821_v43   ;;  %5864 = vperm.xlu1 %9674, %v10645_v63   ;;  %v248_v63 = vld [vmem:[%s14734_s3 + $0x6c8] sm:$0x11]  ;;  %14806 = vst [vmem:[#allocation63_spill] sm:$0xff] %v11374_v30  ;;  %v1123_v9 = vunpack.c.l.b16 %v247_v1  ;;  %v1124_v37 = vunpack.c.h.b16 %v247_v1  ;;  %v25_v1 = vld [vmem:[%s14736_s1] sm:$0x3] }
 0x243   :  { %v1732_v3 = vpop.f32.mrf.mxu0  ;;  %v1925_v12 = vpop.f32.mrf.mxu1  ;;  %v1125_v49 = vunpack.c.l.b16 %v248_v63  ;;  %v1126_v54 = vunpack.c.h.b16 %v248_v63 }
 0x244   :  { %v2116_v57 = vpop.f32.mrf.mxu2  ;;  %v2309_v0 = vpop.f32.mrf.mxu3  ;;  %v1926_v39 = vadd.f32 %v1925_v12, %v1732_v3  ;;  %v1345_v38 = vpack.c.b16 %v1123_v9, %v1123_v9  ;;  %v1346_v29 = vpack.c.b16 %v1124_v37, %v1124_v37  ;;  %v14739_v12 = vmov 0  }
 0x245   :  { %v2117_v58 = vadd.f32 %v2116_v57, %v1924_v26  ;;  %v3849_v26 = vperm.slane %v10078_v15, 3  ;;  %v1347_v3 = vpack.c.b16 %v1125_v49, %v1125_v49  ;;  %v1348_v15 = vpack.c.b16 %v1126_v54, %v1126_v54 }
 0x247   :  { %v11371_v25 = vadd.f32 %v2309_v0, %v2117_v58  ;;  %4444 = vmatpush.bf16.xpose.msra.mxu1 %v3849_v26  ;;  %9728 = vset.pattern.permute.xlu0 %v14739_v12  ;;  %v11382_v26 = vpop.permute.xlu2 %5446 }
 0x248   :  { %14807 = vst [vmem:[#allocation64_spill] sm:$0xff] %v11382_v26  ;;  %5018 = vperm.xlu0 %9728, %v25_v1   ;;  %v8303_v1 = vld [vmem:[%s14734_s3 + $0x6d8] sm:$0xf] }
 0x249   :  { %14805 = vst [vmem:[#allocation62_spill] sm:$0xff] %v11371_v25 }
 0x24a   :  { %9677 = vset.pattern.permute.xlu2 %v10108_v32  ;;  %9676 = vset.pattern.permute.xlu1 %v10062_v6 }
 0x24b   :  { %v1735_v0 = vpop.f32.mrf.mxu0  ;;  %v1928_v58 = vpop.f32.mrf.mxu1 }
 0x24c   :  { %v2118_v53 = vpop.f32.mrf.mxu2  ;;  %v2311_v42 = vpop.f32.mrf.mxu3  ;;  %v1929_v63 = vadd.f32 %v1928_v58, %v1735_v0 }
 0x24d   :  { %v2119_v57 = vadd.f32 %v2118_v53, %v1926_v39  ;;  %v11388_v39 = vpop.permute.xlu0 %6010 }
 0x24e   :  { %14810 = vst [vmem:[#allocation67_spill] sm:$0xff] %v11388_v39  ;;  %1774 = vmatmul.bf16.gmra.mxu0 %v1345_v38  ;;  %1967 = vmatmul.bf16.gmra.mxu1 %v1346_v29  ;;  %v7454_v38 = vld [vmem:[%s14734_s3 + $0x10] sm:$0xf]  ;;  %v9170_v29 = vld [vmem:[%s14734_s3 + $0x24] sm:$0xf0] }
 0x24f   :  { %v11386_v9 = vadd.f32 %v2311_v42, %v2119_v57  ;;  %v11392_v12 = vpop.permute.xlu2 %5458  ;;  %v11394_v42 = vpop.permute.xlu1 %5391  ;;  %v7455_v39 = vor.u32 %v9170_v29, %v7454_v38 }
 0x250   :  { %14811 = vst [vmem:[#allocation68_spill] sm:$0xff] %v11392_v12 }
 0x251   :  { %14809 = vst [vmem:[#allocation66_spill] sm:$0xff] %v11386_v9  ;;  %2160 = vmatmul.bf16.gmra.mxu2 %v1347_v3  ;;  %2353 = vmatmul.bf16.gmra.mxu3 %v1348_v15  ;;  %v9167_v3 = vld [vmem:[%s14734_s3 + $0x14] sm:$0xf]  ;;  %v7456_v15 = vld [vmem:[%s14734_s3 + $0x28] sm:$0xf0] }
 0x252   :  { %5883 = vperm.xlu2 %9677, %v10821_v43   ;;  %5877 = vperm.xlu1 %9676, %v10821_v43   ;;  %14812 = vst [vmem:[#allocation69_spill] sm:$0xff] %v11394_v42 }
 0x253   :  { %v1737_v53 = vpop.f32.mrf.mxu0  ;;  %v1930_v0 = vpop.f32.mrf.mxu1 }
 0x254   :  { %v2121_v37 = vpop.f32.mrf.mxu2  ;;  %v2314_v49 = vpop.f32.mrf.mxu3  ;;  %v1931_v58 = vadd.f32 %v1930_v0, %v1737_v53 }
 0x255   :  { %v2122_v54 = vadd.f32 %v2121_v37, %v1929_v63  ;;  %v11413_v63 = vpop.permute.xlu0 %5403  ;;  %v9384_v37 = vld [vmem:[%s14734_s3 + $0x6ec] sm:$0xf0] }
 0x256   :  { %v8304_v26 = vor.u32 %v9384_v37, %v8303_v1  ;;  %v8327_v37 = vld [vmem:[%s14734_s3 + $0x708] sm:$0xf] }
 0x257   :  { %v11396_v57 = vadd.f32 %v2314_v49, %v2122_v54  ;;  %v9381_v49 = vld [vmem:[%s14734_s3 + $0x6dc] sm:$0xf]  ;;  %v8305_v54 = vld [vmem:[%s14734_s3 + $0x6f0] sm:$0xf0]  ;;  %v11426_v42 = vpop.permute.xlu2 %5476  ;;  %v11428_v30 = vpop.permute.xlu1 %5409 }
 0x258   :  { %v8308_v41 = vor.u32 %v9381_v49, %v8305_v54  ;;  %14814 = vst [vmem:[#allocation71_spill] sm:$0xff] %v11426_v42  ;;  %v9390_v49 = vld [vmem:[%s14734_s3 + $0x71c] sm:$0xf0]  ;;  %v9387_v54 = vld [vmem:[%s14734_s3 + $0x70c] sm:$0xf] }
 0x259   :  { %14813 = vst [vmem:[#allocation70_spill] sm:$0xff] %v11396_v57  ;;  %v7459_v57 = vor.u32 %v9167_v3, %v7456_v15 }
 0x25a   :  { %9680 = vset.pattern.permute.xlu2 %v10142_v46  ;;  %9679 = vset.pattern.permute.xlu1 %v10105_v31  ;;  %14815 = vst [vmem:[#allocation72_spill] sm:$0xff] %v11428_v30 }
 0x25b   :  { %v1740_v25 = vpop.f32.mrf.mxu0  ;;  %v1933_v19 = vpop.f32.mrf.mxu1 }
 0x25c   :  { %v2123_v53 = vpop.f32.mrf.mxu2  ;;  %v2316_v0 = vpop.f32.mrf.mxu3  ;;  %v1934_v27 = vadd.f32 %v1933_v19, %v1740_v25 }
 0x25d   :  { %v2124_v9 = vadd.f32 %v2123_v53, %v1931_v58  ;;  %v11434_v58 = vpop.permute.xlu0 %6040  ;;  %v8329_v53 = vld [vmem:[%s14734_s3 + $0x720] sm:$0xf0] }
 0x25e   :  { %2366 = vmatmul.bf16.vlgmr.msrb.gmra.mxu0 %v7455_v39  ;;  %2559 = vmatmul.bf16.vlgmr.msrb.gmra.mxu1 %v7459_v57  ;;  %14817 = vst [vmem:[#allocation74_spill] sm:$0xff] %v11434_v58  ;;  %v7480_v57 = vld [vmem:[%s14734_s3 + $0x58] sm:$0xf0] }
 0x25f   :  { %v11430_v59 = vadd.f32 %v2316_v0, %v2124_v9  ;;  %v11436_v1 = vpop.permute.xlu2 %5488  ;;  %v11438_v9 = vpop.permute.xlu1 %5421 }
 0x260   :  { %14818 = vst [vmem:[#allocation75_spill] sm:$0xff] %v11436_v1 }
 0x261   :  { %14816 = vst [vmem:[#allocation73_spill] sm:$0xff] %v11430_v59  ;;  %3866 = vmatmul.bf16.vlgmr.msrb.gmra.mxu2 %v8304_v26  ;;  %4059 = vmatmul.bf16.vlgmr.msrb.gmra.mxu3 %v8308_v41  ;;  %v7478_v41 = vld [vmem:[%s14734_s3 + $0x40] sm:$0xf]  ;;  %v9176_v26 = vld [vmem:[%s14734_s3 + $0x54] sm:$0xf0]  ;;  %v8332_v59 = vor.u32 %v9387_v54, %v8329_v53 }
 0x262   :  { %5901 = vperm.xlu2 %9680, %v10821_v43   ;;  %5895 = vperm.xlu1 %9679, %v10821_v43   ;;  %v7504_v53 = vld [vmem:[%s14734_s3 + $0x88] sm:$0xf0] }
 0x263   :  { %v1742_v19 = vpop.f32.mrf.mxu0  ;;  %v1935_v25 = vpop.f32.mrf.mxu1 }
 0x264   :  { %v2126_v38 = vpop.f32.mrf.mxu2  ;;  %v2319_v29 = vpop.f32.mrf.mxu3  ;;  %v1936_v15 = vadd.f32 %v1935_v25, %v1742_v19 }
 0x265   :  { %v2127_v3 = vadd.f32 %v2126_v38, %v1934_v27  ;;  %v9173_v27 = vld [vmem:[%s14734_s3 + $0x44] sm:$0xf]  ;;  %v11474_v42 = vpop.permute.xlu0 %5434 }
 0x266   :  { %14822 = vst [vmem:[#allocation79_spill] sm:$0xff] %v11474_v42 }
 0x267   :  { %v11440_v39 = vadd.f32 %v2319_v29, %v2127_v3  ;;  %v7479_v29 = vor.u32 %v9176_v26, %v7478_v41  ;;  %v7483_v3 = vor.u32 %v9173_v27, %v7480_v57  ;;  %v11468_v30 = vpop.permute.xlu2 %5506  ;;  %v11470_v18 = vpop.permute.xlu1 %5440 }
 0x268   :  { %14820 = vst [vmem:[#allocation77_spill] sm:$0xff] %v11468_v30 }
 0x269   :  { %14819 = vst [vmem:[#allocation76_spill] sm:$0xff] %v11440_v39  ;;  %v8328_v39 = vor.u32 %v9390_v49, %v8327_v37 }
 0x26a   :  { %9682 = vset.pattern.permute.xlu2 %v10368_v50  ;;  %9681 = vset.pattern.permute.xlu1 %v10139_v45 }
 0x26b   :  { %v1745_v25 = vpop.f32.mrf.mxu0  ;;  %v1938_v58 = vpop.f32.mrf.mxu1 }
 0x26c   :  { %v2128_v0 = vpop.f32.mrf.mxu2  ;;  %v2321_v38 = vpop.f32.mrf.mxu3  ;;  %v1939_v1 = vadd.f32 %v1938_v58, %v1745_v25 }
 0x26d   :  { %v2129_v19 = vadd.f32 %v2128_v0, %v1936_v15  ;;  %v8351_v0 = vld [vmem:[%s14734_s3 + $0x738] sm:$0xf] }
 0x26e   :  { %2371 = vmatmul.bf16.gmra.mxu0 %v7479_v29  ;;  %2564 = vmatmul.bf16.gmra.mxu1 %v7483_v3  ;;  %v9396_v29 = vld [vmem:[%s14734_s3 + $0x74c] sm:$0xf0]  ;;  %v9393_v3 = vld [vmem:[%s14734_s3 + $0x73c] sm:$0xf] }
 0x26f   :  { %v11472_v35 = vadd.f32 %v2321_v38, %v2129_v19  ;;  %v11478_v37 = vpop.permute.xlu2 %5518  ;;  %v11480_v49 = vpop.permute.xlu1 %5452  ;;  %v8353_v19 = vld [vmem:[%s14734_s3 + $0x750] sm:$0xf0] }
 0x270   :  { %14823 = vst [vmem:[#allocation80_spill] sm:$0xff] %v11478_v37  ;;  %v11499_v38 = vpop.permute.xlu0 %6071 }
 0x271   :  { %14821 = vst [vmem:[#allocation78_spill] sm:$0xff] %v11472_v35  ;;  %3871 = vmatmul.bf16.gmra.mxu2 %v8328_v39  ;;  %4064 = vmatmul.bf16.gmra.mxu3 %v8332_v59  ;;  %v7502_v59 = vld [vmem:[%s14734_s3 + $0x70] sm:$0xf]  ;;  %v9182_v39 = vld [vmem:[%s14734_s3 + $0x84] sm:$0xf0]  ;;  %v8356_v35 = vor.u32 %v9393_v3, %v8353_v19 }
 0x272   :  { %5913 = vperm.xlu2 %9682, %v10821_v43   ;;  %5907 = vperm.xlu1 %9681, %v10821_v43   ;;  %14824 = vst [vmem:[#allocation81_spill] sm:$0xff] %v11480_v49 }
 0x273   :  { %v1747_v58 = vpop.f32.mrf.mxu0  ;;  %v1940_v27 = vpop.f32.mrf.mxu1  ;;  %14826 = vst [vmem:[#allocation83_spill] sm:$0xff] %v11499_v38 }
 0x274   :  { %v2131_v15 = vpop.f32.mrf.mxu2  ;;  %v2324_v41 = vpop.f32.mrf.mxu3  ;;  %v1941_v57 = vadd.f32 %v1940_v27, %v1747_v58 }
 0x275   :  { %v2132_v26 = vadd.f32 %v2131_v15, %v1939_v1  ;;  %v9179_v1 = vld [vmem:[%s14734_s3 + $0x74] sm:$0xf] }
 0x277   :  { %v11482_v54 = vadd.f32 %v2324_v41, %v2132_v26  ;;  %v7503_v41 = vor.u32 %v9182_v39, %v7502_v59  ;;  %v7507_v26 = vor.u32 %v9179_v1, %v7504_v53  ;;  %v11512_v30 = vpop.permute.xlu2 %5537  ;;  %v11514_v49 = vpop.permute.xlu1 %5470 }
 0x278   :  { %14827 = vst [vmem:[#allocation84_spill] sm:$0xff] %v11512_v30 }
 0x279   :  { %14825 = vst [vmem:[#allocation82_spill] sm:$0xff] %v11482_v54  ;;  %v8352_v54 = vor.u32 %v9396_v29, %v8351_v0 }
 0x27a   :  { %9684 = vset.pattern.permute.xlu2 %v10160_v52  ;;  %9683 = vset.pattern.permute.xlu1 %v10177_v60  ;;  %14828 = vst [vmem:[#allocation85_spill] sm:$0xff] %v11514_v49 }
 0x27b   :  { %v1750_v27 = vpop.f32.mrf.mxu0  ;;  %v1943_v38 = vpop.f32.mrf.mxu1 }
 0x27c   :  { %v2133_v25 = vpop.f32.mrf.mxu2  ;;  %v2326_v15 = vpop.f32.mrf.mxu3  ;;  %v1944_v37 = vadd.f32 %v1943_v38, %v1750_v27 }
 0x27d   :  { %v2134_v58 = vadd.f32 %v2133_v25, %v1941_v57  ;;  %v11520_v57 = vpop.permute.xlu0 %5464  ;;  %v7528_v25 = vld [vmem:[%s14734_s3 + $0xb8] sm:$0xf0] }
 0x27e   :  { %2376 = vmatmul.bf16.gmra.mxu0 %v7503_v41  ;;  %2569 = vmatmul.bf16.gmra.mxu1 %v7507_v26  ;;  %14830 = vst [vmem:[#allocation87_spill] sm:$0xff] %v11520_v57  ;;  %v9402_v41 = vld [vmem:[%s14734_s3 + $0x77c] sm:$0xf0]  ;;  %v9399_v26 = vld [vmem:[%s14734_s3 + $0x76c] sm:$0xf] }
 0x27f   :  { %v11516_v42 = vadd.f32 %v2326_v15, %v2134_v58  ;;  %v11522_v29 = vpop.permute.xlu2 %5549  ;;  %v11524_v3 = vpop.permute.xlu1 %5482  ;;  %v8375_v15 = vld [vmem:[%s14734_s3 + $0x768] sm:$0xf]  ;;  %v8377_v58 = vld [vmem:[%s14734_s3 + $0x780] sm:$0xf0] }
 0x280   :  { %14831 = vst [vmem:[#allocation88_spill] sm:$0xff] %v11522_v29  ;;  %v8380_v30 = vor.u32 %v9399_v26, %v8377_v58  ;;  %v7552_v58 = vld [vmem:[%s14734_s3 + $0xe8] sm:$0xf0] }
 0x281   :  { %14829 = vst [vmem:[#allocation86_spill] sm:$0xff] %v11516_v42  ;;  %3876 = vmatmul.bf16.gmra.mxu2 %v8352_v54  ;;  %4069 = vmatmul.bf16.gmra.mxu3 %v8356_v35  ;;  %v7526_v35 = vld [vmem:[%s14734_s3 + $0xa0] sm:$0xf]  ;;  %v9188_v54 = vld [vmem:[%s14734_s3 + $0xb4] sm:$0xf0]  ;;  %v8376_v42 = vor.u32 %v9402_v41, %v8375_v15 }
 0x282   :  { %5931 = vperm.xlu2 %9684, %v10821_v43   ;;  %5925 = vperm.xlu1 %9683, %v10821_v43   ;;  %14832 = vst [vmem:[#allocation89_spill] sm:$0xff] %v11524_v3 }
 0x283   :  { %v1752_v53 = vpop.f32.mrf.mxu0  ;;  %v1945_v0 = vpop.f32.mrf.mxu1 }
 0x284   :  { %v2136_v59 = vpop.f32.mrf.mxu2  ;;  %v2329_v39 = vpop.f32.mrf.mxu3  ;;  %v1946_v38 = vadd.f32 %v1945_v0, %v1752_v53 }
 0x285   :  { %v2137_v1 = vadd.f32 %v2136_v59, %v1944_v37  ;;  %v9185_v37 = vld [vmem:[%s14734_s3 + $0xa4] sm:$0xf]  ;;  %v11560_v12 = vpop.permute.xlu0 %6101 }
 0x286   :  { %14837 = vst [vmem:[#allocation94_spill] sm:$0xff] %v11560_v12 }
 0x287   :  { %v11526_v19 = vadd.f32 %v2329_v39, %v2137_v1  ;;  %v7527_v39 = vor.u32 %v9188_v54, %v7526_v35  ;;  %v7531_v1 = vor.u32 %v9185_v37, %v7528_v25  ;;  %v11554_v3 = vpop.permute.xlu2 %5567  ;;  %v11556_v57 = vpop.permute.xlu1 %5500 }
 0x288   :  { %14834 = vst [vmem:[#allocation91_spill] sm:$0xff] %v11554_v3 }
 0x289   :  { %14833 = vst [vmem:[#allocation90_spill] sm:$0xff] %v11526_v19 }
 0x28a   :  { %9686 = vset.pattern.permute.xlu2 %v10435_v4  ;;  %9685 = vset.pattern.permute.xlu1 %v10211_v14  ;;  %14835 = vst [vmem:[#allocation92_spill] sm:$0xff] %v11556_v57 }
 0x28b   :  { %v1755_v0 = vpop.f32.mrf.mxu0  ;;  %v1948_v19 = vpop.f32.mrf.mxu1 }
 0x28c   :  { %v2138_v27 = vpop.f32.mrf.mxu2  ;;  %v2331_v59 = vpop.f32.mrf.mxu3  ;;  %v1949_v29 = vadd.f32 %v1948_v19, %v1755_v0 }
 0x28d   :  { %v2139_v53 = vadd.f32 %v2138_v27, %v1946_v38  ;;  %v8399_v27 = vld [vmem:[%s14734_s3 + $0x798] sm:$0xf] }
 0x28e   :  { %2381 = vmatmul.bf16.gmra.mxu0 %v7527_v39  ;;  %2574 = vmatmul.bf16.gmra.mxu1 %v7531_v1  ;;  %v9408_v39 = vld [vmem:[%s14734_s3 + $0x7ac] sm:$0xf0]  ;;  %v9405_v1 = vld [vmem:[%s14734_s3 + $0x79c] sm:$0xf] }
 0x28f   :  { %v11558_v49 = vadd.f32 %v2331_v59, %v2139_v53  ;;  %v11564_v15 = vpop.permute.xlu2 %5579  ;;  %v11566_v41 = vpop.permute.xlu1 %5512  ;;  %v8401_v53 = vld [vmem:[%s14734_s3 + $0x7b0] sm:$0xf0] }
 0x290   :  { %14838 = vst [vmem:[#allocation95_spill] sm:$0xff] %v11564_v15  ;;  %v11585_v59 = vpop.permute.xlu0 %5494 }
 0x291   :  { %14836 = vst [vmem:[#allocation93_spill] sm:$0xff] %v11558_v49  ;;  %3881 = vmatmul.bf16.gmra.mxu2 %v8376_v42  ;;  %4074 = vmatmul.bf16.gmra.mxu3 %v8380_v30  ;;  %v7550_v30 = vld [vmem:[%s14734_s3 + $0xd0] sm:$0xf]  ;;  %v9194_v42 = vld [vmem:[%s14734_s3 + $0xe4] sm:$0xf0]  ;;  %v8404_v49 = vor.u32 %v9405_v1, %v8401_v53 }
 0x292   :  { %5943 = vperm.xlu2 %9686, %v10821_v43   ;;  %5937 = vperm.xlu1 %9685, %v10821_v43   ;;  %14839 = vst [vmem:[#allocation96_spill] sm:$0xff] %v11566_v41 }
 0x293   :  { %v1757_v19 = vpop.f32.mrf.mxu0  ;;  %v1950_v37 = vpop.f32.mrf.mxu1  ;;  %14841 = vst [vmem:[#allocation98_spill] sm:$0xff] %v11585_v59 }
 0x294   :  { %v2141_v38 = vpop.f32.mrf.mxu2  ;;  %v2334_v35 = vpop.f32.mrf.mxu3  ;;  %v1951_v25 = vadd.f32 %v1950_v37, %v1757_v19 }
 0x295   :  { %v2142_v54 = vadd.f32 %v2141_v38, %v1949_v29  ;;  %v9191_v29 = vld [vmem:[%s14734_s3 + $0xd4] sm:$0xf] }
 0x297   :  { %v11568_v26 = vadd.f32 %v2334_v35, %v2142_v54  ;;  %v7551_v35 = vor.u32 %v9194_v42, %v7550_v30  ;;  %v7555_v54 = vor.u32 %v9191_v29, %v7552_v58  ;;  %v11598_v3 = vpop.permute.xlu2 %5597  ;;  %v11600_v57 = vpop.permute.xlu1 %5531 }
 0x298   :  { %14842 = vst [vmem:[#allocation99_spill] sm:$0xff] %v11598_v3 }
 0x299   :  { %14840 = vst [vmem:[#allocation97_spill] sm:$0xff] %v11568_v26  ;;  %v8400_v26 = vor.u32 %v9408_v39, %v8399_v27 }
 0x29a   :  { %9689 = vset.pattern.permute.xlu2 %v10276_v48  ;;  %9688 = vset.pattern.permute.xlu1 %v10242_v28  ;;  %14843 = vst [vmem:[#allocation100_spill] sm:$0xff] %v11600_v57 }
 0x29b   :  { %v1760_v37 = vpop.f32.mrf.mxu0  ;;  %v1953_v12 = vpop.f32.mrf.mxu1 }
 0x29c   :  { %v2143_v0 = vpop.f32.mrf.mxu2  ;;  %v2336_v38 = vpop.f32.mrf.mxu3  ;;  %v1954_v15 = vadd.f32 %v1953_v12, %v1760_v37 }
 0x29d   :  { %v2144_v19 = vadd.f32 %v2143_v0, %v1951_v25  ;;  %v11606_v25 = vpop.permute.xlu0 %6131  ;;  %v8423_v0 = vld [vmem:[%s14734_s3 + $0x7c8] sm:$0xf] }
 0x29e   :  { %2386 = vmatmul.bf16.gmra.mxu0 %v7551_v35  ;;  %2579 = vmatmul.bf16.gmra.mxu1 %v7555_v54  ;;  %14845 = vst [vmem:[#allocation102_spill] sm:$0xff] %v11606_v25  ;;  %v9411_v35 = vld [vmem:[%s14734_s3 + $0x7cc] sm:$0xf]  ;;  %v8425_v54 = vld [vmem:[%s14734_s3 + $0x7e0] sm:$0xf0] }
 0x29f   :  { %v11602_v41 = vadd.f32 %v2336_v38, %v2144_v19  ;;  %v11608_v39 = vpop.permute.xlu2 %5609  ;;  %v11610_v1 = vpop.permute.xlu1 %5543  ;;  %v9414_v38 = vld [vmem:[%s14734_s3 + $0x7dc] sm:$0xf0] }
 0x2a0   :  { %14846 = vst [vmem:[#allocation103_spill] sm:$0xff] %v11608_v39  ;;  %v8424_v25 = vor.u32 %v9414_v38, %v8423_v0 }
 0x2a1   :  { %14844 = vst [vmem:[#allocation101_spill] sm:$0xff] %v11602_v41  ;;  %3886 = vmatmul.bf16.gmra.mxu2 %v8400_v26  ;;  %4079 = vmatmul.bf16.gmra.mxu3 %v8404_v49  ;;  %v7574_v49 = vld [vmem:[%s14734_s3 + $0x100] sm:$0xf]  ;;  %v7576_v26 = vld [vmem:[%s14734_s3 + $0x118] sm:$0xf0] }
 0x2a2   :  { %5961 = vperm.xlu2 %9689, %v10821_v43   ;;  %5955 = vperm.xlu1 %9688, %v10821_v43   ;;  %14847 = vst [vmem:[#allocation104_spill] sm:$0xff] %v11610_v1  ;;  %v9200_v43 = vld [vmem:[%s14734_s3 + $0x114] sm:$0xf0] }
 0x2a3   :  { %v1762_v12 = vpop.f32.mrf.mxu0  ;;  %v1955_v58 = vpop.f32.mrf.mxu1 }
 0x2a4   :  { %v2146_v30 = vpop.f32.mrf.mxu2  ;;  %v2339_v42 = vpop.f32.mrf.mxu3  ;;  %v1956_v27 = vadd.f32 %v1955_v58, %v1762_v12 }
 0x2a5   :  { %v2147_v29 = vadd.f32 %v2146_v30, %v1954_v15  ;;  %v9197_v15 = vld [vmem:[%s14734_s3 + $0x104] sm:$0xf]  ;;  %v7575_v30 = vor.u32 %v9200_v43, %v7574_v49  ;;  %v11646_v57 = vpop.permute.xlu0 %5331 }
 0x2a7   :  { %v11612_v53 = vadd.f32 %v2339_v42, %v2147_v29  ;;  %v7579_v42 = vor.u32 %v9197_v15, %v7576_v26  ;;  %v11640_v39 = vpop.permute.xlu2 %5628  ;;  %v11642_v3 = vpop.permute.xlu1 %5561 }
 0x2a8   :  { %14849 = vst [vmem:[#allocation106_spill] sm:$0xff] %v11640_v39 }
 0x2a9   :  { %14848 = vst [vmem:[#allocation105_spill] sm:$0xff] %v11612_v53  ;;  %v8428_v53 = vor.u32 %v9411_v35, %v8425_v54 }
 0x2aa   :  { %9691 = vset.pattern.permute.xlu2 %v10062_v6  ;;  %9690 = vset.pattern.permute.xlu1 %v10056_v2  ;;  %14850 = vst [vmem:[#allocation107_spill] sm:$0xff] %v11642_v3 }
 0x2ab   :  { %v1765_v12 = vpop.f32.mrf.mxu0  ;;  %v1958_v58 = vpop.f32.mrf.mxu1 }
 0x2ac   :  { %v2148_v19 = vpop.f32.mrf.mxu2  ;;  %v2341_v37 = vpop.f32.mrf.mxu3  ;;  %v1959_v41 = vadd.f32 %v1958_v58, %v1765_v12  ;;  %v8449_v12 = vld [vmem:[%s14734_s3 + $0x810] sm:$0xf0] }
 0x2ad   :  { %v2149_v29 = vadd.f32 %v2148_v19, %v1956_v27  ;;  %v11662_v19 = vpop.permute.xlu0 %5525 }
 0x2ae   :  { %2391 = vmatmul.bf16.gmra.mxu0 %v7575_v30  ;;  %2584 = vmatmul.bf16.gmra.mxu1 %v7579_v42  ;;  %14855 = vst [vmem:[#allocation112_spill] sm:$0xff] %v11662_v19  ;;  %v8447_v30 = vld [vmem:[%s14734_s3 + $0x7f8] sm:$0xf]  ;;  %v9420_v42 = vld [vmem:[%s14734_s3 + $0x80c] sm:$0xf0] }
 0x2af   :  { %v11644_v1 = vadd.f32 %v2341_v37, %v2149_v29  ;;  %v11650_v38 = vpop.permute.xlu2 %5640  ;;  %v11652_v35 = vpop.permute.xlu1 %5573  ;;  %v7600_v37 = vld [vmem:[%s14734_s3 + $0x148] sm:$0xf0]  ;;  %v9417_v29 = vld [vmem:[%s14734_s3 + $0x7fc] sm:$0xf] }
 0x2b0   :  { %14852 = vst [vmem:[#allocation109_spill] sm:$0xff] %v11650_v38  ;;  %v8452_v38 = vor.u32 %v9417_v29, %v8449_v12 }
 0x2b1   :  { %14851 = vst [vmem:[#allocation108_spill] sm:$0xff] %v11644_v1  ;;  %3891 = vmatmul.bf16.gmra.mxu2 %v8424_v25  ;;  %4084 = vmatmul.bf16.gmra.mxu3 %v8428_v53  ;;  %v7598_v25 = vld [vmem:[%s14734_s3 + $0x130] sm:$0xf]  ;;  %v9206_v53 = vld [vmem:[%s14734_s3 + $0x144] sm:$0xf0]  ;;  %v8448_v1 = vor.u32 %v9420_v42, %v8447_v30 }
 0x2b2   :  { %5974 = vperm.xlu2 %9691, %v10931_v23   ;;  %5968 = vperm.xlu1 %9690, %v10931_v23   ;;  %14853 = vst [vmem:[#allocation110_spill] sm:$0xff] %v11652_v35 }
 0x2b3   :  { %v1767_v15 = vpop.f32.mrf.mxu0  ;;  %v1960_v26 = vpop.f32.mrf.mxu1 }
 0x2b4   :  { %v2151_v27 = vpop.f32.mrf.mxu2  ;;  %v2344_v49 = vpop.f32.mrf.mxu3  ;;  %v1961_v0 = vadd.f32 %v1960_v26, %v1767_v15 }
 0x2b5   :  { %v2152_v43 = vadd.f32 %v2151_v27, %v1959_v41  ;;  %v9203_v41 = vld [vmem:[%s14734_s3 + $0x134] sm:$0xf] }
 0x2b7   :  { %v11654_v54 = vadd.f32 %v2344_v49, %v2152_v43  ;;  %v7599_v49 = vor.u32 %v9206_v53, %v7598_v25  ;;  %v7603_v43 = vor.u32 %v9203_v41, %v7600_v37  ;;  %v11684_v35 = vpop.permute.xlu2 %5658  ;;  %v11686_v3 = vpop.permute.xlu1 %5591 }
 0x2b8   :  { %14856 = vst [vmem:[#allocation113_spill] sm:$0xff] %v11684_v35 }
 0x2b9   :  { %14854 = vst [vmem:[#allocation111_spill] sm:$0xff] %v11654_v54 }
 0x2ba   :  { %9695 = vset.pattern.permute.xlu2 %v10105_v31  ;;  %9694 = vset.pattern.permute.xlu1 %v10059_v5  ;;  %14857 = vst [vmem:[#allocation114_spill] sm:$0xff] %v11686_v3 }
 0x2bb   :  { %v1770_v26 = vpop.f32.mrf.mxu0  ;;  %v1963_v54 = vpop.f32.mrf.mxu1 }
 0x2bc   :  { %v2153_v58 = vpop.f32.mrf.mxu2  ;;  %v2346_v27 = vpop.f32.mrf.mxu3  ;;  %v1964_v39 = vadd.f32 %v1963_v54, %v1770_v26 }
 0x2bd   :  { %v2154_v15 = vadd.f32 %v2153_v58, %v1961_v0  ;;  %v11692_v0 = vpop.permute.xlu0 %6162  ;;  %v7624_v58 = vld [vmem:[%s14734_s3 + $0x178] sm:$0xf0] }
 0x2be   :  { %2396 = vmatmul.bf16.gmra.mxu0 %v7599_v49  ;;  %2589 = vmatmul.bf16.gmra.mxu1 %v7603_v43  ;;  %14859 = vst [vmem:[#allocation116_spill] sm:$0xff] %v11692_v0  ;;  %v9426_v49 = vld [vmem:[%s14734_s3 + $0x83c] sm:$0xf0]  ;;  %v9423_v43 = vld [vmem:[%s14734_s3 + $0x82c] sm:$0xf] }
 0x2bf   :  { %v11688_v19 = vadd.f32 %v2346_v27, %v2154_v15  ;;  %v11694_v42 = vpop.permute.xlu2 %5670  ;;  %v11696_v29 = vpop.permute.xlu1 %5603  ;;  %v8471_v27 = vld [vmem:[%s14734_s3 + $0x828] sm:$0xf]  ;;  %v8473_v15 = vld [vmem:[%s14734_s3 + $0x840] sm:$0xf0] }
 0x2c0   :  { %14860 = vst [vmem:[#allocation117_spill] sm:$0xff] %v11694_v42 }
 0x2c1   :  { %14858 = vst [vmem:[#allocation115_spill] sm:$0xff] %v11688_v19  ;;  %3896 = vmatmul.bf16.gmra.mxu2 %v8448_v1  ;;  %4089 = vmatmul.bf16.gmra.mxu3 %v8452_v38  ;;  %v7622_v1 = vld [vmem:[%s14734_s3 + $0x160] sm:$0xf]  ;;  %v9212_v38 = vld [vmem:[%s14734_s3 + $0x174] sm:$0xf0]  ;;  %v8476_v19 = vor.u32 %v9423_v43, %v8473_v15 }
 0x2c2   :  { %5992 = vperm.xlu2 %9695, %v10931_v23   ;;  %5986 = vperm.xlu1 %9694, %v10931_v23   ;;  %14861 = vst [vmem:[#allocation118_spill] sm:$0xff] %v11696_v29  ;;  %v7648_v15 = vld [vmem:[%s14734_s3 + $0x1a8] sm:$0xf0] }
 0x2c3   :  { %v1772_v54 = vpop.f32.mrf.mxu0  ;;  %v1965_v37 = vpop.f32.mrf.mxu1 }
 0x2c4   :  { %v2156_v25 = vpop.f32.mrf.mxu2  ;;  %v2349_v53 = vpop.f32.mrf.mxu3  ;;  %v1966_v30 = vadd.f32 %v1965_v37, %v1772_v54 }
 0x2c5   :  { %v2157_v41 = vadd.f32 %v2156_v25, %v1964_v39  ;;  %v9209_v39 = vld [vmem:[%s14734_s3 + $0x164] sm:$0xf]  ;;  %v11732_v59 = vpop.permute.xlu0 %5555 }
 0x2c7   :  { %v11698_v12 = vadd.f32 %v2349_v53, %v2157_v41  ;;  %v7623_v53 = vor.u32 %v9212_v38, %v7622_v1  ;;  %v7627_v41 = vor.u32 %v9209_v39, %v7624_v58  ;;  %v11726_v35 = vpop.permute.xlu2 %5688  ;;  %v11728_v29 = vpop.permute.xlu1 %5622 }
 0x2c8   :  { %14863 = vst [vmem:[#allocation120_spill] sm:$0xff] %v11726_v35 }
 0x2c9   :  { %14862 = vst [vmem:[#allocation119_spill] sm:$0xff] %v11698_v12  ;;  %v8472_v12 = vor.u32 %v9426_v49, %v8471_v27 }
 0x2ca   :  { %9697 = vset.pattern.permute.xlu2 %v10139_v45  ;;  %9696 = vset.pattern.permute.xlu1 %v10142_v46 }
 0x2cb   :  { %v1775_v37 = vpop.f32.mrf.mxu0  ;;  %v1968_v0 = vpop.f32.mrf.mxu1 }
 0x2cc   :  { %v2158_v26 = vpop.f32.mrf.mxu2  ;;  %v2351_v25 = vpop.f32.mrf.mxu3  ;;  %v1969_v42 = vadd.f32 %v1968_v0, %v1775_v37 }
 0x2cd   :  { %v2159_v54 = vadd.f32 %v2158_v26, %v1966_v30  ;;  %v11748_v43 = vpop.permute.xlu0 %6192  ;;  %v8495_v26 = vld [vmem:[%s14734_s3 + $0x858] sm:$0xf] }
 0x2ce   :  { %2401 = vmatmul.bf16.gmra.mxu0 %v7623_v53  ;;  %2594 = vmatmul.bf16.gmra.mxu1 %v7627_v41  ;;  %14868 = vst [vmem:[#allocation125_spill] sm:$0xff] %v11748_v43  ;;  %v9429_v53 = vld [vmem:[%s14734_s3 + $0x85c] sm:$0xf]  ;;  %v8497_v41 = vld [vmem:[%s14734_s3 + $0x870] sm:$0xf0] }
 0x2cf   :  { %v11730_v3 = vadd.f32 %v2351_v25, %v2159_v54  ;;  %v11736_v58 = vpop.permute.xlu2 %5700  ;;  %v11738_v27 = vpop.permute.xlu1 %5634  ;;  %v9432_v25 = vld [vmem:[%s14734_s3 + $0x86c] sm:$0xf0]  ;;  %v8500_v43 = vor.u32 %v9429_v53, %v8497_v41 }
 0x2d0   :  { %14865 = vst [vmem:[#allocation122_spill] sm:$0xff] %v11736_v58 }
 0x2d1   :  { %14864 = vst [vmem:[#allocation121_spill] sm:$0xff] %v11730_v3  ;;  %3901 = vmatmul.bf16.gmra.mxu2 %v8472_v12  ;;  %4094 = vmatmul.bf16.gmra.mxu3 %v8476_v19  ;;  %v7646_v12 = vld [vmem:[%s14734_s3 + $0x190] sm:$0xf]  ;;  %v9218_v19 = vld [vmem:[%s14734_s3 + $0x1a4] sm:$0xf0] }
 0x2d2   :  { %6004 = vperm.xlu2 %9697, %v10931_v23   ;;  %5998 = vperm.xlu1 %9696, %v10931_v23   ;;  %14866 = vst [vmem:[#allocation123_spill] sm:$0xff] %v11738_v27 }
 0x2d3   :  { %v1777_v0 = vpop.f32.mrf.mxu0  ;;  %v1970_v39 = vpop.f32.mrf.mxu1 }
 0x2d4   :  { %v2161_v30 = vpop.f32.mrf.mxu2  ;;  %v2354_v1 = vpop.f32.mrf.mxu3  ;;  %v8496_v39 = vor.u32 %v9432_v25, %v8495_v26 }
 0x2d5   :  { %v2162_v38 = vadd.f32 %v2161_v30, %v1969_v42  ;;  %v9215_v42 = vld [vmem:[%s14734_s3 + $0x194] sm:$0xf]  ;;  %v7647_v30 = vor.u32 %v9218_v19, %v7646_v12  ;;  %v11779_v12 = vpop.permute.xlu0 %5018 }
 0x2d6   :  { %14871 = vst [vmem:[#allocation128_spill] sm:$0xff] %v11779_v12 }
 0x2d7   :  { %v11740_v49 = vadd.f32 %v2354_v1, %v2162_v38  ;;  %v7651_v1 = vor.u32 %v9215_v42, %v7648_v15  ;;  %v11771_v3 = vpop.permute.xlu2 %5719  ;;  %v11773_v58 = vpop.permute.xlu1 %5652 }
 0x2d8   :  { %14869 = vst [vmem:[#allocation126_spill] sm:$0xff] %v11771_v3 }
 0x2d9   :  { %14867 = vst [vmem:[#allocation124_spill] sm:$0xff] %v11740_v49 }
 0x2da   :  { %9700 = vset.pattern.permute.xlu2 %v10177_v60  ;;  %9699 = vset.pattern.permute.xlu1 %v10180_v61  ;;  %14870 = vst [vmem:[#allocation127_spill] sm:$0xff] %v11773_v58 }
 0x2db   :  { %v2367_v38 = vpop.f32.mrf.mxu0  ;;  %v2560_v0 = vpop.f32.mrf.mxu1 }
 0x2dc   :  { %v2163_v54 = vpop.f32.mrf.mxu2  ;;  %v2356_v37 = vpop.f32.mrf.mxu3  ;;  %v2368_v49 = vadd.f32 %v2367_v38, %v10370_v51 }
 0x2dd   :  { %v7670_v54 = vld [vmem:[%s14734_s3 + $0x1c0] sm:$0xf]  ;;  %v9224_v37 = vld [vmem:[%s14734_s3 + $0x1d4] sm:$0xf0] }
 0x2de   :  { %v11775_v35 = vadd.f32 %v2560_v0, %v2368_v49  ;;  %2406 = vmatmul.bf16.gmra.mxu0 %v7647_v30  ;;  %2599 = vmatmul.bf16.gmra.mxu1 %v7651_v1  ;;  %v7672_v30 = vld [vmem:[%s14734_s3 + $0x1d8] sm:$0xf0]  ;;  %v8519_v1 = vld [vmem:[%s14734_s3 + $0x888] sm:$0xf]  ;;  %v9438_v0 = vld [vmem:[%s14734_s3 + $0x89c] sm:$0xf0] }
 0x2df   :  { %v11784_v49 = vpop.permute.xlu2 %5731  ;;  %v11786_v53 = vpop.permute.xlu1 %5664 }
 0x2e0   :  { %14873 = vst [vmem:[#allocation130_spill] sm:$0xff] %v11784_v49 }
 0x2e1   :  { %3906 = vmatmul.bf16.gmra.mxu2 %v8496_v39  ;;  %4099 = vmatmul.bf16.gmra.mxu3 %v8500_v43  ;;  %14874 = vst [vmem:[#allocation131_spill] sm:$0xff] %v11786_v53  ;;  %v11789_v43 = vperm.slane %v11779_v12, 0  ;;  %v9435_v39 = vld [vmem:[%s14734_s3 + $0x88c] sm:$0xf] }
 0x2e2   :  { %6022 = vperm.xlu2 %9700, %v10931_v23   ;;  %6016 = vperm.xlu1 %9699, %v10931_v23  }
 0x2e3   :  { %v2369_v51 = vpop.f32.mrf.mxu0  ;;  %v2562_v26 = vpop.f32.mrf.mxu1 }
 0x2e4   :  { %v3867_v19 = vpop.f32.mrf.mxu2  ;;  %v4060_v42 = vpop.f32.mrf.mxu3  ;;  %v2370_v25 = vadd.f32 %v2369_v51, %v10398_v17  ;;  %v9221_v17 = vld [vmem:[%s14734_s3 + $0x1c4] sm:$0xf] }
 0x2e5   :  { %v11781_v15 = vadd.f32 %v4060_v42, %v3867_v19  ;;  %v8521_v19 = vld [vmem:[%s14734_s3 + $0x8a0] sm:$0xf0] }
 0x2e6   :  { %v2563_v41 = vadd.f32 %v2562_v26, %v2370_v25  ;;  %v7671_v26 = vor.u32 %v9224_v37, %v7670_v54  ;;  %v7675_v25 = vor.u32 %v9221_v17, %v7672_v30  ;;  %v8524_v49 = vor.u32 %v9435_v39, %v8521_v19  ;;  %v9227_v39 = vld [vmem:[%s14734_s3 + $0x1f4] sm:$0xf]  ;;  %v8543_v19 = vld [vmem:[%s14734_s3 + $0x8b8] sm:$0xf] }
 0x2e7   :  { %14872 = vst [vmem:[#allocation129_spill] sm:$0xff] %v11781_v15  ;;  %v8520_v15 = vor.u32 %v9438_v0, %v8519_v1  ;;  %v11821_v53 = vpop.permute.xlu2 %5749  ;;  %v11823_v58 = vpop.permute.xlu1 %5682  ;;  %v7694_v0 = vld [vmem:[%s14734_s3 + $0x1f0] sm:$0xf] }
 0x2e8   :  { %v5025_v38 = vadd.f32 %v11789_v43, %v2563_v41  ;;  %14876 = vst [vmem:[#allocation133_spill] sm:$0xff] %v11821_v53 }
 0x2ea   :  { %9702 = vset.pattern.permute.xlu2 %v10211_v14  ;;  %9701 = vset.pattern.permute.xlu1 %v10160_v52  ;;  %9734 = vtanh.f32 %v5025_v38 }
 0x2eb   :  { %v2372_v41 = vpop.f32.mrf.mxu0  ;;  %v2565_v12 = vpop.f32.mrf.mxu1 }
 0x2ec   :  { %v3869_v42 = vpop.f32.mrf.mxu2  ;;  %v4062_v51 = vpop.f32.mrf.mxu3  ;;  %v2373_v3 = vadd.f32 %v2372_v41, %v10402_v24 }
 0x2ed   :  { %v11818_v14 = vadd.f32 %v4062_v51, %v3869_v42  ;;  %v9444_v42 = vld [vmem:[%s14734_s3 + $0x8cc] sm:$0xf0]  ;;  %v9441_v51 = vld [vmem:[%s14734_s3 + $0x8bc] sm:$0xf] }
 0x2ee   :  { %v11825_v27 = vadd.f32 %v2565_v12, %v2373_v3  ;;  %2411 = vmatmul.bf16.gmra.mxu0 %v7671_v26  ;;  %2604 = vmatmul.bf16.gmra.mxu1 %v7675_v25  ;;  %v8545_v26 = vld [vmem:[%s14734_s3 + $0x8d0] sm:$0xf0] }
 0x2ef   :  { %14875 = vst [vmem:[#allocation132_spill] sm:$0xff] %v11818_v14  ;;  %v11833_v12 = vpop.permute.xlu2 %5761 }
 0x2f0   :  { %v9735_v54 = vpop.eup %9734  ;;  %14878 = vst [vmem:[#allocation135_spill] sm:$0xff] %v11833_v12 }
 0x2f1   :  { %3911 = vmatmul.bf16.gmra.mxu2 %v8520_v15  ;;  %4104 = vmatmul.bf16.gmra.mxu3 %v8524_v49  ;;  %v6359_v37 = vmul.f32 %v9735_v54, %v11314_v8  ;;  %v11835_v15 = vpop.permute.xlu1 %5694  ;;  %v9230_v8 = vld [vmem:[%s14734_s3 + $0x204] sm:$0xf0] }
 0x2f2   :  { %6034 = vperm.xlu2 %9702, %v10931_v23   ;;  %6028 = vperm.xlu1 %9701, %v10931_v23   ;;  %v7695_v54 = vor.u32 %v9230_v8, %v7694_v0 }
 0x2f3   :  { %v2374_v1 = vpop.f32.mrf.mxu0  ;;  %v2567_v38 = vpop.f32.mrf.mxu1  ;;  %6654 = vperm.xlu0 %9728, %v6359_v37  }
 0x2f4   :  { %v3872_v17 = vpop.f32.mrf.mxu2  ;;  %v4065_v30 = vpop.f32.mrf.mxu3  ;;  %v2375_v3 = vadd.f32 %v2374_v1, %v10430_v55  ;;  %v7696_v55 = vld [vmem:[%s14734_s3 + $0x208] sm:$0xf0] }
 0x2f5   :  { %v11830_v24 = vadd.f32 %v4065_v30, %v3872_v17  ;;  %v7699_v37 = vor.u32 %v9227_v39, %v7696_v55 }
 0x2f6   :  { %v11837_v49 = vadd.f32 %v2567_v38, %v2375_v3  ;;  %v8544_v38 = vor.u32 %v9444_v42, %v8543_v19  ;;  %v8548_v3 = vor.u32 %v9441_v51, %v8545_v26  ;;  %v7718_v26 = vld [vmem:[%s14734_s3 + $0x220] sm:$0xf] }
 0x2f7   :  { %14877 = vst [vmem:[#allocation134_spill] sm:$0xff] %v11830_v24  ;;  %v11868_v14 = vpop.permute.xlu2 %5780 }
 0x2f8   :  { %14880 = vst [vmem:[#allocation137_spill] sm:$0xff] %v11868_v14 }
 0x2f9   :  { %v11870_v12 = vpop.permute.xlu1 %5712 }
 0x2fa   :  { %9705 = vset.pattern.permute.xlu2 %v10242_v28  ;;  %9704 = vset.pattern.permute.xlu1 %v10245_v33 }
 0x2fb   :  { %v2377_v30 = vpop.f32.mrf.mxu0  ;;  %v2570_v1 = vpop.f32.mrf.mxu1 }
 0x2fc   :  { %v3874_v25 = vpop.f32.mrf.mxu2  ;;  %v4067_v41 = vpop.f32.mrf.mxu3  ;;  %v2378_v24 = vadd.f32 %v2377_v30, %v10437_v7  ;;  %v9447_v30 = vld [vmem:[%s14734_s3 + $0x8ec] sm:$0xf] }
 0x2fd   :  { %v11865_v17 = vadd.f32 %v4067_v41, %v3874_v25  ;;  %v9236_v25 = vld [vmem:[%s14734_s3 + $0x234] sm:$0xf0]  ;;  %v9233_v41 = vld [vmem:[%s14734_s3 + $0x224] sm:$0xf] }
 0x2fe   :  { %v11872_v53 = vadd.f32 %v2570_v1, %v2378_v24  ;;  %2416 = vmatmul.bf16.gmra.mxu0 %v7695_v54  ;;  %2609 = vmatmul.bf16.gmra.mxu1 %v7699_v37  ;;  %v8567_v54 = vld [vmem:[%s14734_s3 + $0x8e8] sm:$0xf]  ;;  %v9450_v37 = vld [vmem:[%s14734_s3 + $0x8fc] sm:$0xf0]  ;;  %v8569_v1 = vld [vmem:[%s14734_s3 + $0x900] sm:$0xf0] }
 0x2ff   :  { %14879 = vst [vmem:[#allocation136_spill] sm:$0xff] %v11865_v17  ;;  %v11879_v42 = vpop.permute.xlu2 %5792 }
 0x300   :  { %14882 = vst [vmem:[#allocation139_spill] sm:$0xff] %v11879_v42  ;;  %v8572_v42 = vor.u32 %v9447_v30, %v8569_v1  ;;  %v9239_v1 = vld [vmem:[%s14734_s3 + $0x254] sm:$0xf] }
 0x301   :  { %3916 = vmatmul.bf16.gmra.mxu2 %v8544_v38  ;;  %4109 = vmatmul.bf16.gmra.mxu3 %v8548_v3  ;;  %v11881_v24 = vpop.permute.xlu1 %5725 }
 0x302   :  { %6052 = vperm.xlu2 %9705, %v10931_v23   ;;  %6046 = vperm.xlu1 %9704, %v10931_v23   ;;  %14883 = vst [vmem:[#allocation140_spill] sm:$0xff] %v11881_v24 }
 0x303   :  { %v2379_v55 = vpop.f32.mrf.mxu0  ;;  %v2572_v7 = vpop.f32.mrf.mxu1 }
 0x304   :  { %v3877_v0 = vpop.f32.mrf.mxu2  ;;  %v4070_v8 = vpop.f32.mrf.mxu3  ;;  %v2380_v19 = vadd.f32 %v2379_v55, %v10465_v36  ;;  %v7720_v36 = vld [vmem:[%s14734_s3 + $0x238] sm:$0xf0] }
 0x305   :  { %v11876_v39 = vadd.f32 %v4070_v8, %v3877_v0  ;;  %v7719_v0 = vor.u32 %v9236_v25, %v7718_v26  ;;  %v7723_v8 = vor.u32 %v9233_v41, %v7720_v36 }
 0x306   :  { %v11883_v51 = vadd.f32 %v2572_v7, %v2380_v19  ;;  %v8568_v19 = vor.u32 %v9450_v37, %v8567_v54 }
 0x307   :  { %14881 = vst [vmem:[#allocation138_spill] sm:$0xff] %v11876_v39  ;;  %v11914_v14 = vpop.permute.xlu2 %5810 }
 0x308   :  { %14885 = vst [vmem:[#allocation142_spill] sm:$0xff] %v11914_v14 }
 0x309   :  { %v11916_v17 = vpop.permute.xlu1 %5743 }
 0x30a   :  { %9707 = vset.pattern.permute.xlu2 %v10056_v2  ;;  %9706 = vset.pattern.permute.xlu1 %v10276_v48  ;;  %14886 = vst [vmem:[#allocation143_spill] sm:$0xff] %v11916_v17 }
 0x30b   :  { %v2382_v2 = vpop.f32.mrf.mxu0  ;;  %v2575_v7 = vpop.f32.mrf.mxu1 }
 0x30c   :  { %v3879_v38 = vpop.f32.mrf.mxu2  ;;  %v4072_v3 = vpop.f32.mrf.mxu3  ;;  %v2383_v39 = vadd.f32 %v2382_v2, %v10475_v47  ;;  %v8593_v2 = vld [vmem:[%s14734_s3 + $0x930] sm:$0xf0] }
 0x30d   :  { %v11911_v55 = vadd.f32 %v4072_v3, %v3879_v38  ;;  %v8591_v38 = vld [vmem:[%s14734_s3 + $0x918] sm:$0xf] }
 0x30e   :  { %v2576_v24 = vadd.f32 %v2575_v7, %v2383_v39  ;;  %2421 = vmatmul.bf16.gmra.mxu0 %v7719_v0  ;;  %2614 = vmatmul.bf16.gmra.mxu1 %v7723_v8  ;;  %v9456_v0 = vld [vmem:[%s14734_s3 + $0x92c] sm:$0xf0]  ;;  %v9453_v8 = vld [vmem:[%s14734_s3 + $0x91c] sm:$0xf] }
 0x30f   :  { %14884 = vst [vmem:[#allocation141_spill] sm:$0xff] %v11911_v55  ;;  %v11924_v39 = vpop.permute.xlu2 %5822  ;;  %v8596_v14 = vor.u32 %v9453_v8, %v8593_v2  ;;  %v8615_v8 = vld [vmem:[%s14734_s3 + $0x948] sm:$0xf] }
 0x310   :  { %v5030_v26 = vadd.f32 %v11789_v43, %v2576_v24  ;;  %14888 = vst [vmem:[#allocation145_spill] sm:$0xff] %v11924_v39  ;;  %v7742_v24 = vld [vmem:[%s14734_s3 + $0x250] sm:$0xf]  ;;  %v8592_v39 = vor.u32 %v9456_v0, %v8591_v38  ;;  %v9245_v0 = vld [vmem:[%s14734_s3 + $0x284] sm:$0xf] }
 0x311   :  { %3921 = vmatmul.bf16.gmra.mxu2 %v8568_v19  ;;  %4114 = vmatmul.bf16.gmra.mxu3 %v8572_v42  ;;  %v11926_v30 = vpop.permute.xlu1 %5755 }
 0x312   :  { %6065 = vperm.xlu2 %9707, %v11101_v22   ;;  %6058 = vperm.xlu1 %9706, %v10931_v23   ;;  %9736 = vtanh.f32 %v5030_v26  ;;  %14889 = vst [vmem:[#allocation146_spill] sm:$0xff] %v11926_v30  ;;  %v9242_v23 = vld [vmem:[%s14734_s3 + $0x264] sm:$0xf0] }
 0x313   :  { %v2384_v47 = vpop.f32.mrf.mxu0  ;;  %v2577_v54 = vpop.f32.mrf.mxu1 }
 0x314   :  { %v3882_v25 = vpop.f32.mrf.mxu2  ;;  %v4075_v41 = vpop.f32.mrf.mxu3  ;;  %v2385_v37 = vadd.f32 %v2384_v47, %v10504_v20  ;;  %v7744_v20 = vld [vmem:[%s14734_s3 + $0x268] sm:$0xf0] }
 0x315   :  { %v11921_v36 = vadd.f32 %v4075_v41, %v3882_v25  ;;  %v7743_v25 = vor.u32 %v9242_v23, %v7742_v24  ;;  %v7747_v41 = vor.u32 %v9239_v1, %v7744_v20 }
 0x316   :  { %v11928_v42 = vadd.f32 %v2577_v54, %v2385_v37 }
 0x317   :  { %14887 = vst [vmem:[#allocation144_spill] sm:$0xff] %v11921_v36  ;;  %v11960_v55 = vpop.permute.xlu2 %5840 }
 0x318   :  { %v9737_v3 = vpop.eup %9736  ;;  %14890 = vst [vmem:[#allocation147_spill] sm:$0xff] %v11960_v55 }
 0x319   :  { %v6364_v7 = vmul.f32 %v9737_v3, %v11267_v16  ;;  %v11962_v30 = vpop.permute.xlu1 %5774 }
 0x31a   :  { %9710 = vset.pattern.permute.xlu2 %v10059_v5  ;;  %9709 = vset.pattern.permute.xlu1 %v10108_v32 }
 0x31b   :  { %v2387_v54 = vpop.f32.mrf.mxu0  ;;  %v2580_v37 = vpop.f32.mrf.mxu1  ;;  %6669 = vperm.xlu0 %9728, %v6364_v7   ;;  %v9462_v7 = vld [vmem:[%s14734_s3 + $0x95c] sm:$0xf0] }
 0x31c   :  { %v3884_v19 = vpop.f32.mrf.mxu2  ;;  %v4077_v26 = vpop.f32.mrf.mxu3  ;;  %v2388_v36 = vadd.f32 %v2387_v54, %v10509_v34 }
 0x31d   :  { %v11957_v47 = vadd.f32 %v4077_v26, %v3884_v19  ;;  %v9459_v19 = vld [vmem:[%s14734_s3 + $0x94c] sm:$0xf]  ;;  %v8617_v26 = vld [vmem:[%s14734_s3 + $0x960] sm:$0xf0] }
 0x31e   :  { %v11964_v17 = vadd.f32 %v2580_v37, %v2388_v36  ;;  %2426 = vmatmul.bf16.gmra.mxu0 %v7743_v25  ;;  %2619 = vmatmul.bf16.gmra.mxu1 %v7747_v41 }
 0x31f   :  { %v11971_v38 = vpop.permute.xlu2 %5852 }
 0x320   :  { %14891 = vst [vmem:[#allocation148_spill] sm:$0xff] %v11971_v38 }
 0x321   :  { %3926 = vmatmul.bf16.gmra.mxu2 %v8592_v39  ;;  %4119 = vmatmul.bf16.gmra.mxu3 %v8596_v14  ;;  %v11973_v36 = vpop.permute.xlu1 %5786  ;;  %v7766_v14 = vld [vmem:[%s14734_s3 + $0x280] sm:$0xf]  ;;  %v9248_v39 = vld [vmem:[%s14734_s3 + $0x294] sm:$0xf0] }
 0x322   :  { %6083 = vperm.xlu2 %9710, %v11101_v22   ;;  %6077 = vperm.xlu1 %9709, %v11101_v22   ;;  %v7767_v54 = vor.u32 %v9248_v39, %v7766_v14 }
 0x323   :  { %v2389_v1 = vpop.f32.mrf.mxu0  ;;  %v2582_v34 = vpop.f32.mrf.mxu1 }
 0x324   :  { %v3887_v16 = vpop.f32.mrf.mxu2  ;;  %v4080_v24 = vpop.f32.mrf.mxu3  ;;  %v2390_v20 = vadd.f32 %v2389_v1, %v10538_v10  ;;  %v7768_v10 = vld [vmem:[%s14734_s3 + $0x298] sm:$0xf0]  ;;  %v8616_v1 = vor.u32 %v9462_v7, %v8615_v8 }
 0x325   :  { %v11968_v23 = vadd.f32 %v4080_v24, %v3887_v16  ;;  %v7771_v37 = vor.u32 %v9245_v0, %v7768_v10 }
 0x326   :  { %v2583_v3 = vadd.f32 %v2582_v34, %v2390_v20  ;;  %v8620_v34 = vor.u32 %v9459_v19, %v8617_v26 }
 0x328   :  { %v5033_v2 = vadd.f32 %v11789_v43, %v2583_v3  ;;  %v12005_v3 = vpop.permute.xlu2 %5871 }
 0x329   :  { %14892 = vst [vmem:[#allocation149_spill] sm:$0xff] %v12005_v3  ;;  %v12007_v38 = vpop.permute.xlu1 %5804 }
 0x32a   :  { %9712 = vset.pattern.permute.xlu2 %v10142_v46  ;;  %9711 = vset.pattern.permute.xlu1 %v10105_v31  ;;  %9738 = vtanh.f32 %v5033_v2 }
 0x32b   :  { %v2392_v16 = vpop.f32.mrf.mxu0  ;;  %v2585_v24 = vpop.f32.mrf.mxu1 }
 0x32c   :  { %v3889_v25 = vpop.f32.mrf.mxu2  ;;  %v4082_v41 = vpop.f32.mrf.mxu3  ;;  %v2393_v20 = vadd.f32 %v2392_v16, %v10542_v21  ;;  %v9468_v16 = vld [vmem:[%s14734_s3 + $0x98c] sm:$0xf0] }
 0x32d   :  { %v12002_v46 = vadd.f32 %v4082_v41, %v3889_v25  ;;  %v7790_v41 = vld [vmem:[%s14734_s3 + $0x2b0] sm:$0xf] }
 0x32e   :  { %v12009_v55 = vadd.f32 %v2585_v24, %v2393_v20  ;;  %2431 = vmatmul.bf16.gmra.mxu0 %v7767_v54  ;;  %2624 = vmatmul.bf16.gmra.mxu1 %v7771_v37  ;;  %v9251_v54 = vld [vmem:[%s14734_s3 + $0x2b4] sm:$0xf]  ;;  %v8639_v37 = vld [vmem:[%s14734_s3 + $0x978] sm:$0xf]  ;;  %v9465_v24 = vld [vmem:[%s14734_s3 + $0x97c] sm:$0xf] }
 0x330   :  { %v9739_v14 = vpop.eup %9738  ;;  %v12017_v19 = vpop.permute.xlu2 %5883 }
 0x331   :  { %3931 = vmatmul.bf16.gmra.mxu2 %v8616_v1  ;;  %4124 = vmatmul.bf16.gmra.mxu3 %v8620_v34  ;;  %v6367_v39 = vmul.f32 %v9739_v14, %v11303_v44  ;;  %14894 = vst [vmem:[#allocation151_spill] sm:$0xff] %v12017_v19  ;;  %v12019_v26 = vpop.permute.xlu1 %5816  ;;  %v9254_v44 = vld [vmem:[%s14734_s3 + $0x2c4] sm:$0xf0]  ;;  %v8641_v1 = vld [vmem:[%s14734_s3 + $0x990] sm:$0xf0] }
 0x332   :  { %6095 = vperm.xlu2 %9712, %v11101_v22   ;;  %6089 = vperm.xlu1 %9711, %v11101_v22   ;;  %14895 = vst [vmem:[#allocation152_spill] sm:$0xff] %v12019_v26  ;;  %v7791_v14 = vor.u32 %v9254_v44, %v7790_v41 }
 0x333   :  { %v2394_v8 = vpop.f32.mrf.mxu0  ;;  %v2587_v2 = vpop.f32.mrf.mxu1  ;;  %6678 = vperm.xlu0 %9728, %v6367_v39  }
 0x334   :  { %v3892_v0 = vpop.f32.mrf.mxu2  ;;  %v4085_v10 = vpop.f32.mrf.mxu3  ;;  %v2395_v7 = vadd.f32 %v2394_v8, %v10570_v62  ;;  %v7792_v62 = vld [vmem:[%s14734_s3 + $0x2c8] sm:$0xf0] }
 0x335   :  { %v12014_v21 = vadd.f32 %v4085_v10, %v3892_v0  ;;  %v7795_v39 = vor.u32 %v9251_v54, %v7792_v62 }
 0x336   :  { %v12021_v25 = vadd.f32 %v2587_v2, %v2395_v7  ;;  %v8640_v2 = vor.u32 %v9468_v16, %v8639_v37  ;;  %v8644_v7 = vor.u32 %v9465_v24, %v8641_v1 }
 0x337   :  { %14893 = vst [vmem:[#allocation150_spill] sm:$0xff] %v12014_v21 }
 0x338   :  { %v12052_v3 = vpop.permute.xlu2 %5901 }
 0x339   :  { %14896 = vst [vmem:[#allocation153_spill] sm:$0xff] %v12052_v3  ;;  %v12054_v21 = vpop.permute.xlu1 %5834 }
 0x33a   :  { %9715 = vset.pattern.permute.xlu2 %v10180_v61  ;;  %9714 = vset.pattern.permute.xlu1 %v10368_v50  ;;  %14897 = vst [vmem:[#allocation154_spill] sm:$0xff] %v12054_v21 }
 0x33b   :  { %v2397_v10 = vpop.f32.mrf.mxu0  ;;  %v2590_v8 = vpop.f32.mrf.mxu1 }
 0x33c   :  { %v3894_v34 = vpop.f32.mrf.mxu2  ;;  %v4087_v20 = vpop.f32.mrf.mxu3  ;;  %v2398_v19 = vadd.f32 %v2397_v10, %v10574_v13  ;;  %v9474_v10 = vld [vmem:[%s14734_s3 + $0x9bc] sm:$0xf0] }
 0x33d   :  { %v12049_v0 = vadd.f32 %v4087_v20, %v3894_v34  ;;  %v9260_v34 = vld [vmem:[%s14734_s3 + $0x2f4] sm:$0xf0]  ;;  %v9257_v20 = vld [vmem:[%s14734_s3 + $0x2e4] sm:$0xf] }
 0x33e   :  { %v2591_v26 = vadd.f32 %v2590_v8, %v2398_v19  ;;  %2436 = vmatmul.bf16.gmra.mxu0 %v7791_v14  ;;  %2629 = vmatmul.bf16.gmra.mxu1 %v7795_v39  ;;  %v8663_v14 = vld [vmem:[%s14734_s3 + $0x9a8] sm:$0xf]  ;;  %v9471_v8 = vld [vmem:[%s14734_s3 + $0x9ac] sm:$0xf] }
 0x340   :  { %v5036_v41 = vadd.f32 %v11789_v43, %v2591_v26  ;;  %v12062_v19 = vpop.permute.xlu2 %5913  ;;  %v7814_v26 = vld [vmem:[%s14734_s3 + $0x2e0] sm:$0xf] }
 0x341   :  { %3936 = vmatmul.bf16.gmra.mxu2 %v8640_v2  ;;  %4129 = vmatmul.bf16.gmra.mxu3 %v8644_v7  ;;  %14899 = vst [vmem:[#allocation156_spill] sm:$0xff] %v12062_v19  ;;  %v12064_v24 = vpop.permute.xlu1 %5846  ;;  %v8665_v2 = vld [vmem:[%s14734_s3 + $0x9c0] sm:$0xf0] }
 0x342   :  { %6113 = vperm.xlu2 %9715, %v11101_v22   ;;  %6107 = vperm.xlu1 %9714, %v11101_v22   ;;  %9740 = vtanh.f32 %v5036_v41  ;;  %14900 = vst [vmem:[#allocation157_spill] sm:$0xff] %v12064_v24  ;;  %v8668_v19 = vor.u32 %v9471_v8, %v8665_v2  ;;  %v9266_v8 = vld [vmem:[%s14734_s3 + $0x324] sm:$0xf0]  ;;  %v9263_v2 = vld [vmem:[%s14734_s3 + $0x314] sm:$0xf] }
 0x343   :  { %v2399_v13 = vpop.f32.mrf.mxu0  ;;  %v2592_v37 = vpop.f32.mrf.mxu1 }
 0x344   :  { %v3897_v44 = vpop.f32.mrf.mxu2  ;;  %v4090_v54 = vpop.f32.mrf.mxu3  ;;  %v2400_v16 = vadd.f32 %v2399_v13, %v10602_v56  ;;  %v7816_v56 = vld [vmem:[%s14734_s3 + $0x2f8] sm:$0xf0] }
 0x345   :  { %v12059_v62 = vadd.f32 %v4090_v54, %v3897_v44  ;;  %v7815_v54 = vor.u32 %v9260_v34, %v7814_v26 }
 0x346   :  { %v12066_v1 = vadd.f32 %v2592_v37, %v2400_v16  ;;  %v8664_v16 = vor.u32 %v9474_v10, %v8663_v14 }
 0x347   :  { %14898 = vst [vmem:[#allocation155_spill] sm:$0xff] %v12059_v62 }
 0x348   :  { %v9741_v39 = vpop.eup %9740  ;;  %v12098_v24 = vpop.permute.xlu2 %5931 }
 0x349   :  { %v6370_v7 = vmul.f32 %v9741_v39, %v11413_v63  ;;  %14902 = vst [vmem:[#allocation159_spill] sm:$0xff] %v12098_v24  ;;  %v12100_v21 = vpop.permute.xlu1 %5864 }
 0x34a   :  { %9717 = vset.pattern.permute.xlu2 %v10160_v52  ;;  %9716 = vset.pattern.permute.xlu1 %v10177_v60  ;;  %v7819_v52 = vor.u32 %v9257_v20, %v7816_v56  ;;  %14903 = vst [vmem:[#allocation160_spill] sm:$0xff] %v12100_v21  ;;  %v14905_v56 = vld [vmem:[#allocation2_spill] sm:$0xff] }
 0x34b   :  { %v2402_v60 = vpop.f32.mrf.mxu0  ;;  %v2595_v37 = vpop.f32.mrf.mxu1  ;;  %6687 = vperm.xlu0 %9728, %v6370_v7   ;;  %v7840_v7 = vld [vmem:[%s14734_s3 + $0x328] sm:$0xf0] }
 0x34c   :  { %v3899_v41 = vpop.f32.mrf.mxu2  ;;  %v4092_v44 = vpop.f32.mrf.mxu3  ;;  %v2403_v3 = vadd.f32 %v2402_v60, %v10606_v11  ;;  %v8689_v60 = vld [vmem:[%s14734_s3 + $0x9f0] sm:$0xf0] }
 0x34d   :  { %v12095_v13 = vadd.f32 %v4092_v44, %v3899_v41  ;;  %v8687_v41 = vld [vmem:[%s14734_s3 + $0x9d8] sm:$0xf] }
 0x34e   :  { %v12102_v62 = vadd.f32 %v2595_v37, %v2403_v3  ;;  %2441 = vmatmul.bf16.gmra.mxu0 %v7815_v54  ;;  %2634 = vmatmul.bf16.gmra.mxu1 %v7819_v52  ;;  %v9480_v54 = vld [vmem:[%s14734_s3 + $0x9ec] sm:$0xf0]  ;;  %v9477_v52 = vld [vmem:[%s14734_s3 + $0x9dc] sm:$0xf] }
 0x34f   :  { %14901 = vst [vmem:[#allocation158_spill] sm:$0xff] %v12095_v13 }
 0x350   :  { %v12109_v39 = vpop.permute.xlu2 %5943 }
 0x351   :  { %3941 = vmatmul.bf16.gmra.mxu2 %v8664_v16  ;;  %4134 = vmatmul.bf16.gmra.mxu3 %v8668_v19  ;;  %14906 = vst [vmem:[#allocation2_spill] sm:$0xff] %v12109_v39  ;;  %v12111_v3 = vpop.permute.xlu1 %5877  ;;  %v7838_v19 = vld [vmem:[%s14734_s3 + $0x310] sm:$0xf] }
 0x352   :  { %6125 = vperm.xlu2 %9717, %v11101_v22   ;;  %6119 = vperm.xlu1 %9716, %v11101_v22   ;;  %14907 = vst [vmem:[#allocation162_spill] sm:$0xff] %v12111_v3  ;;  %v14912_v3 = vlaneseq }
 0x353   :  { %v2404_v20 = vpop.f32.mrf.mxu0  ;;  %v2597_v11 = vpop.f32.mrf.mxu1 }
 0x354   :  { %v3902_v63 = vpop.f32.mrf.mxu2  ;;  %v4095_v26 = vpop.f32.mrf.mxu3  ;;  %v2405_v14 = vadd.f32 %v2404_v20, %v14905_v56  ;;  %v8692_v56 = vor.u32 %v9477_v52, %v8689_v60  ;;  %v12148_v21 = vand.u32 127, %v14912_v3  ;;  %v14914_v60 = vld [vmem:[#allocation4_spill] sm:$0xff] }
 0x355   :  { %v12106_v34 = vadd.f32 %v4095_v26, %v3902_v63  ;;  %v7839_v63 = vor.u32 %v9266_v8, %v7838_v19  ;;  %v7843_v26 = vor.u32 %v9263_v2, %v7840_v7 }
 0x356   :  { %v2598_v10 = vadd.f32 %v2597_v11, %v2405_v14  ;;  %v8688_v11 = vor.u32 %v9480_v54, %v8687_v41  ;;  %v14909_v14 = vld [vmem:[#allocation3_spill] sm:$0xff]  ;;  %v12156_v41 = vadd.s32 4294967288, %v12148_v21 }
 0x357   :  { %14904 = vst [vmem:[#allocation161_spill] sm:$0xff] %v12106_v34 }
 0x358   :  { %v5039_v44 = vadd.f32 %v11789_v43, %v2598_v10  ;;  %v12143_v39 = vpop.permute.xlu2 %5961 }
 0x359   :  { %14910 = vst [vmem:[#allocation3_spill] sm:$0xff] %v12143_v39  ;;  %v12145_v24 = vpop.permute.xlu1 %5895  ;;  %v14918_v39 = vld [vmem:[#allocation5_spill] sm:$0xff] }
 0x35a   :  { %9720 = vset.pattern.permute.xlu2 %v10245_v33  ;;  %9719 = vset.pattern.permute.xlu1 %v10435_v4  ;;  %9742 = vtanh.f32 %v5039_v44  ;;  %14911 = vst [vmem:[#allocation164_spill] sm:$0xff] %v12145_v24 }
 0x35b   :  { %v2407_v4 = vpop.f32.mrf.mxu0  ;;  %v2600_v20 = vpop.f32.mrf.mxu1 }
 0x35c   :  { %v3904_v37 = vpop.f32.mrf.mxu2  ;;  %v4097_v16 = vpop.f32.mrf.mxu3  ;;  %v2408_v10 = vadd.f32 %v2407_v4, %v14909_v14  ;;  %v7864_v14 = vld [vmem:[%s14734_s3 + $0x358] sm:$0xf0] }
 0x35d   :  { %v12140_v33 = vadd.f32 %v4097_v16, %v3904_v37 }
 0x35e   :  { %v12150_v44 = vadd.f32 %v2600_v20, %v2408_v10  ;;  %2446 = vmatmul.bf16.gmra.mxu0 %v7839_v63  ;;  %2639 = vmatmul.bf16.gmra.mxu1 %v7843_v26  ;;  %v7862_v20 = vld [vmem:[%s14734_s3 + $0x340] sm:$0xf]  ;;  %v8711_v10 = vld [vmem:[%s14734_s3 + $0xa08] sm:$0xf] }
 0x35f   :  { %14908 = vst [vmem:[#allocation163_spill] sm:$0xff] %v12140_v33 }
 0x360   :  { %v9743_v19 = vpop.eup %9742  ;;  %v12161_v16 = vpop.permute.xlu2 %5974 }
 0x361   :  { %3946 = vmatmul.bf16.gmra.mxu2 %v8688_v11  ;;  %4139 = vmatmul.bf16.gmra.mxu3 %v8692_v56  ;;  %v6373_v8 = vmul.f32 %v9743_v19, %v11438_v9  ;;  %14915 = vst [vmem:[#allocation4_spill] sm:$0xff] %v12161_v16  ;;  %v12163_v63 = vpop.permute.xlu1 %5907  ;;  %v9272_v11 = vld [vmem:[%s14734_s3 + $0x354] sm:$0xf0]  ;;  %v9269_v56 = vld [vmem:[%s14734_s3 + $0x344] sm:$0xf] }
 0x362   :  { %6143 = vperm.xlu2 %9720, %v11101_v22   ;;  %6137 = vperm.xlu1 %9719, %v11101_v22   ;;  %14916 = vst [vmem:[#allocation166_spill] sm:$0xff] %v12163_v63  ;;  %v9486_v19 = vld [vmem:[%s14734_s3 + $0xa1c] sm:$0xf0] }
 0x363   :  { %v2409_v54 = vpop.f32.mrf.mxu0  ;;  %v2602_v52 = vpop.f32.mrf.mxu1  ;;  %6696 = vperm.xlu0 %9728, %v6373_v8   ;;  %v9483_v8 = vld [vmem:[%s14734_s3 + $0xa0c] sm:$0xf]  ;;  %v8712_v9 = vor.u32 %v9486_v19, %v8711_v10 }
 0x364   :  { %v3907_v2 = vpop.f32.mrf.mxu2  ;;  %v4100_v7 = vpop.f32.mrf.mxu3  ;;  %v2410_v37 = vadd.f32 %v2409_v54, %v14914_v60  ;;  %v7867_v60 = vor.u32 %v9269_v56, %v7864_v14  ;;  %v14922_v19 = vld [vmem:[#allocation6_spill] sm:$0xff] }
 0x365   :  { %v12158_v3 = vadd.f32 %v4100_v7, %v3907_v2  ;;  %v12165_v26 = vpop.permute.xlu0 %6654  ;;  %v8713_v2 = vld [vmem:[%s14734_s3 + $0xa20] sm:$0xf0] }
 0x366   :  { %v12167_v4 = vadd.f32 %v2602_v52, %v2410_v37  ;;  %v7863_v52 = vor.u32 %v9272_v11, %v7862_v20  ;;  %v8716_v16 = vor.u32 %v9483_v8, %v8713_v2 }
 0x367   :  { %14913 = vst [vmem:[#allocation165_spill] sm:$0xff] %v12158_v3 }
 0x368   :  { %v12200_v24 = vpop.permute.xlu2 %5992 }
 0x369   :  { %14919 = vst [vmem:[#allocation5_spill] sm:$0xff] %v12200_v24  ;;  %v12202_v3 = vpop.permute.xlu1 %5925  ;;  %v14926_v24 = vld [vmem:[#allocation7_spill] sm:$0xff] }
 0x36a   :  { %9722 = vset.pattern.permute.xlu2 %v10276_v48  ;;  %9721 = vset.pattern.permute.xlu1 %v10242_v28  ;;  %14920 = vst [vmem:[#allocation168_spill] sm:$0xff] %v12202_v3 }
 0x36b   :  { %v2412_v48 = vpop.f32.mrf.mxu0  ;;  %v2605_v28 = vpop.f32.mrf.mxu1 }
 0x36c   :  { %v3909_v7 = vpop.f32.mrf.mxu2  ;;  %v4102_v54 = vpop.f32.mrf.mxu3  ;;  %v2413_v63 = vadd.f32 %v2412_v48, %v14918_v39  ;;  %v9489_v48 = vld [vmem:[%s14734_s3 + $0xa3c] sm:$0xf] }
 0x36d   :  { %v12197_v37 = vadd.f32 %v4102_v54, %v3909_v7  ;;  %v7888_v7 = vld [vmem:[%s14734_s3 + $0x388] sm:$0xf0]  ;;  %v8735_v54 = vld [vmem:[%s14734_s3 + $0xa38] sm:$0xf] }
 0x36e   :  { %v2606_v33 = vadd.f32 %v2605_v28, %v2413_v63  ;;  %2451 = vmatmul.bf16.gmra.mxu0 %v7863_v52  ;;  %2644 = vmatmul.bf16.gmra.mxu1 %v7867_v60  ;;  %v9492_v60 = vld [vmem:[%s14734_s3 + $0xa4c] sm:$0xf0]  ;;  %v8737_v28 = vld [vmem:[%s14734_s3 + $0xa50] sm:$0xf0] }
 0x36f   :  { %14917 = vst [vmem:[#allocation167_spill] sm:$0xff] %v12197_v37 }
 0x370   :  { %v5042_v20 = vadd.f32 %v11789_v43, %v2606_v33  ;;  %v12210_v63 = vpop.permute.xlu2 %6004  ;;  %v7886_v33 = vld [vmem:[%s14734_s3 + $0x370] sm:$0xf] }
 0x371   :  { %3951 = vmatmul.bf16.gmra.mxu2 %v8712_v9  ;;  %4144 = vmatmul.bf16.gmra.mxu3 %v8716_v16  ;;  %14923 = vst [vmem:[#allocation6_spill] sm:$0xff] %v12210_v63  ;;  %v12212_v2 = vpop.permute.xlu1 %5937  ;;  %v9275_v9 = vld [vmem:[%s14734_s3 + $0x374] sm:$0xf]  ;;  %v8740_v63 = vor.u32 %v9489_v48, %v8737_v28  ;;  %v9281_v48 = vld [vmem:[%s14734_s3 + $0x3a4] sm:$0xf] }
 0x372   :  { %6155 = vperm.xlu2 %9722, %v11101_v22   ;;  %6149 = vperm.xlu1 %9721, %v11101_v22   ;;  %9744 = vtanh.f32 %v5042_v20  ;;  %14924 = vst [vmem:[#allocation170_spill] sm:$0xff] %v12212_v2  ;;  %v9278_v22 = vld [vmem:[%s14734_s3 + $0x384] sm:$0xf0]  ;;  %v7912_v28 = vld [vmem:[%s14734_s3 + $0x3b8] sm:$0xf0] }
 0x373   :  { %v2414_v39 = vpop.f32.mrf.mxu0  ;;  %v2607_v10 = vpop.f32.mrf.mxu1 }
 0x374   :  { %v3912_v11 = vpop.f32.mrf.mxu2  ;;  %v4105_v56 = vpop.f32.mrf.mxu3  ;;  %v2415_v8 = vadd.f32 %v2414_v39, %v14922_v19  ;;  %v7887_v39 = vor.u32 %v9278_v22, %v7886_v33 }
 0x375   :  { %v12207_v14 = vadd.f32 %v4105_v56, %v3912_v11 }
 0x376   :  { %v12214_v16 = vadd.f32 %v2607_v10, %v2415_v8  ;;  %v8736_v8 = vor.u32 %v9492_v60, %v8735_v54  ;;  %v7910_v60 = vld [vmem:[%s14734_s3 + $0x3a0] sm:$0xf] }
 0x377   :  { %14921 = vst [vmem:[#allocation169_spill] sm:$0xff] %v12207_v14 }
 0x378   :  { %v9745_v52 = vpop.eup %9744  ;;  %v12248_v14 = vpop.permute.xlu2 %6022 }
 0x379   :  { %v6376_v20 = vmul.f32 %v9745_v52, %v11470_v18  ;;  %v12246_v3 = vpop.permute.xlu1 %5955  ;;  %14928 = vst [vmem:[#allocation172_spill] sm:$0xff] %v12248_v14 }
 0x37a   :  { %9725 = vset.pattern.permute.xlu2 %v10108_v32  ;;  %9724 = vset.pattern.permute.xlu1 %v10062_v6  ;;  %v7891_v32 = vor.u32 %v9275_v9, %v7888_v7  ;;  %14927 = vst [vmem:[#allocation7_spill] sm:$0xff] %v12246_v3  ;;  %v14930_v7 = vld [vmem:[#allocation8_spill] sm:$0xff] }
 0x37b   :  { %v2417_v6 = vpop.f32.mrf.mxu0  ;;  %v2610_v19 = vpop.f32.mrf.mxu1  ;;  %6705 = vperm.xlu0 %9728, %v6376_v20   ;;  %v8759_v20 = vld [vmem:[%s14734_s3 + $0xa68] sm:$0xf] }
 0x37c   :  { %v3914_v11 = vpop.f32.mrf.mxu2  ;;  %v4107_v56 = vpop.f32.mrf.mxu3  ;;  %v2418_v2 = vadd.f32 %v2417_v6, %v14926_v24  ;;  %v8761_v6 = vld [vmem:[%s14734_s3 + $0xa80] sm:$0xf0] }
 0x37d   :  { %v12243_v10 = vadd.f32 %v4107_v56, %v3914_v11 }
 0x37e   :  { %v12250_v37 = vadd.f32 %v2610_v19, %v2418_v2  ;;  %2456 = vmatmul.bf16.gmra.mxu0 %v7887_v39  ;;  %2649 = vmatmul.bf16.gmra.mxu1 %v7891_v32  ;;  %v9498_v39 = vld [vmem:[%s14734_s3 + $0xa7c] sm:$0xf0]  ;;  %v9495_v32 = vld [vmem:[%s14734_s3 + $0xa6c] sm:$0xf] }
 0x37f   :  { %14925 = vst [vmem:[#allocation171_spill] sm:$0xff] %v12243_v10 }
 0x380   :  { %v12274_v11 = vpop.permute.xlu2 %6034 }
 0x381   :  { %3956 = vmatmul.bf16.gmra.mxu2 %v8736_v8  ;;  %4149 = vmatmul.bf16.gmra.mxu3 %v8740_v63  ;;  %v12257_v52 = vpop.permute.xlu1 %5968  ;;  %v9284_v63 = vld [vmem:[%s14734_s3 + $0x3b4] sm:$0xf0]  ;;  %14932 = vst [vmem:[#allocation174_spill] sm:$0xff] %v12274_v11 }
 0x382   :  { %6174 = vperm.xlu2 %9725, %v11300_v40   ;;  %6168 = vperm.xlu1 %9724, %v11300_v40   ;;  %14931 = vst [vmem:[#allocation8_spill] sm:$0xff] %v12257_v52 }
 0x383   :  { %v2419_v9 = vpop.f32.mrf.mxu0  ;;  %v2612_v24 = vpop.f32.mrf.mxu1 }
 0x384   :  { %v3917_v18 = vpop.f32.mrf.mxu2  ;;  %v4110_v33 = vpop.f32.mrf.mxu3  ;;  %v2420_v54 = vadd.f32 %v2419_v9, %v14930_v7  ;;  %v8760_v7 = vor.u32 %v9498_v39, %v8759_v20 }
 0x385   :  { %v12254_v22 = vadd.f32 %v4110_v33, %v3917_v18  ;;  %v12289_v18 = vadd.s32 4294967248, %v12148_v21 }
 0x386   :  { %v2613_v2 = vadd.f32 %v2612_v24, %v2420_v54  ;;  %v8764_v54 = vor.u32 %v9495_v32, %v8761_v6 }
 0x387   :  { %14929 = vst [vmem:[#allocation173_spill] sm:$0xff] %v12254_v22 }
 0x388   :  { %v5045_v56 = vadd.f32 %v11789_v43, %v2613_v2  ;;  %v14934_v2 = vld [vmem:[#allocation9_spill] sm:$0xff] }
 0x389   :  { %v12294_v14 = vpop.permute.xlu1 %5986 }
 0x38a   :  { %9727 = vset.pattern.permute.xlu2 %v10105_v31  ;;  %9726 = vset.pattern.permute.xlu1 %v10059_v5  ;;  %9746 = vtanh.f32 %v5045_v56  ;;  %v7911_v31 = vor.u32 %v9284_v63, %v7910_v60  ;;  %v7915_v5 = vor.u32 %v9281_v48, %v7912_v28  ;;  %14935 = vst [vmem:[#allocation9_spill] sm:$0xff] %v12294_v14  ;;  %v14936_v63 = vld [vmem:[#allocation68_spill] sm:$0xff]  ;;  %v12305_v28 = vpop.permute.xlu2 %6052 }
 0x38b   :  { %v2422_v9 = vpop.f32.mrf.mxu0  ;;  %v2615_v24 = vpop.f32.mrf.mxu1  ;;  %14937 = vst [vmem:[#allocation68_spill] sm:$0xff] %v12305_v28 }
 0x38c   :  { %v3919_v19 = vpop.f32.mrf.mxu2  ;;  %v4112_v8 = vpop.f32.mrf.mxu3  ;;  %v2423_v11 = vadd.f32 %v2422_v9, %v14934_v2  ;;  %v7934_v9 = vld [vmem:[%s14734_s3 + $0x3d0] sm:$0xf]  ;;  %v8783_v2 = vld [vmem:[%s14734_s3 + $0xa98] sm:$0xf] }
 0x38d   :  { %v12291_v33 = vadd.f32 %v4112_v8, %v3919_v19  ;;  %v12296_v52 = vpop.permute.xlu0 %6669  ;;  %v14939_v19 = vld [vmem:[#allocation10_spill] sm:$0xff] }
 0x38e   :  { %v12298_v56 = vadd.f32 %v2615_v24, %v2423_v11  ;;  %2461 = vmatmul.bf16.gmra.mxu0 %v7911_v31  ;;  %2654 = vmatmul.bf16.gmra.mxu1 %v7915_v5  ;;  %v9290_v24 = vld [vmem:[%s14734_s3 + $0x3e4] sm:$0xf0] }
 0x38f   :  { %14933 = vst [vmem:[#allocation175_spill] sm:$0xff] %v12291_v33 }
 0x390   :  { %v9747_v60 = vpop.eup %9746 }
 0x391   :  { %3961 = vmatmul.bf16.gmra.mxu2 %v8760_v7  ;;  %4154 = vmatmul.bf16.gmra.mxu3 %v8764_v54  ;;  %v6379_v48 = vmul.f32 %v9747_v60, %v14936_v63  ;;  %v12310_v31 = vpop.permute.xlu1 %5998  ;;  %v9287_v7 = vld [vmem:[%s14734_s3 + $0x3d4] sm:$0xf]  ;;  %v7936_v54 = vld [vmem:[%s14734_s3 + $0x3e8] sm:$0xf0]  ;;  %v9504_v60 = vld [vmem:[%s14734_s3 + $0xaac] sm:$0xf0] }
 0x392   :  { %6186 = vperm.xlu2 %9727, %v11300_v40   ;;  %6180 = vperm.xlu1 %9726, %v11300_v40   ;;  %14940 = vst [vmem:[#allocation10_spill] sm:$0xff] %v12310_v31  ;;  %v9501_v63 = vld [vmem:[%s14734_s3 + $0xa9c] sm:$0xf]  ;;  %v8784_v3 = vor.u32 %v9504_v60, %v8783_v2  ;;  %v14942_v31 = vld [vmem:[#allocation11_spill] sm:$0xff]  ;;  %v12347_v33 = vpop.permute.xlu2 %6065 }
 0x393   :  { %v2424_v32 = vpop.f32.mrf.mxu0  ;;  %v2617_v6 = vpop.f32.mrf.mxu1  ;;  %6714 = vperm.xlu0 %9728, %v6379_v48   ;;  %v8785_v48 = vld [vmem:[%s14734_s3 + $0xab0] sm:$0xf0]  ;;  %14944 = vst [vmem:[#allocation178_spill] sm:$0xff] %v12347_v33  ;;  %v14946_v2 = vld [vmem:[#allocation12_spill] sm:$0xff] }
 0x394   :  { %v3922_v20 = vpop.f32.mrf.mxu2  ;;  %v4115_v39 = vpop.f32.mrf.mxu3  ;;  %v2425_v8 = vadd.f32 %v2424_v32, %v14939_v19  ;;  %v8788_v28 = vor.u32 %v9501_v63, %v8785_v48 }
 0x395   :  { %v12307_v11 = vadd.f32 %v4115_v39, %v3922_v20  ;;  %v5024_v20 = vadd.f32 %v11789_v43, %v11775_v35 }
 0x396   :  { %v12312_v5 = vadd.f32 %v2617_v6, %v2425_v8  ;;  %v7939_v6 = vor.u32 %v9287_v7, %v7936_v54  ;;  %v12355_v7 = vadd.s32 4294967224, %v12148_v21 }
 0x397   :  { %14938 = vst [vmem:[#allocation176_spill] sm:$0xff] %v12307_v11  ;;  %9748 = vtanh.f32 %v5024_v20  ;;  %v7958_v20 = vld [vmem:[%s14734_s3 + $0x400] sm:$0xf] }
 0x399   :  { %v12345_v11 = vpop.permute.xlu1 %6016 }
 0x39a   :  { %9730 = vset.pattern.permute.xlu2 %v10368_v50  ;;  %9729 = vset.pattern.permute.xlu1 %v10139_v45  ;;  %v7935_v50 = vor.u32 %v9290_v24, %v7934_v9  ;;  %14943 = vst [vmem:[#allocation11_spill] sm:$0xff] %v12345_v11  ;;  %v5027_v9 = vadd.f32 %v11789_v43, %v11837_v49 }
 0x39b   :  { %v2427_v19 = vpop.f32.mrf.mxu0  ;;  %v2620_v8 = vpop.f32.mrf.mxu1 }
 0x39c   :  { %v3924_v39 = vpop.f32.mrf.mxu2  ;;  %v4117_v32 = vpop.f32.mrf.mxu3  ;;  %v2428_v14 = vadd.f32 %v2427_v19, %v14942_v31  ;;  %v8807_v19 = vld [vmem:[%s14734_s3 + $0xac8] sm:$0xf] }
 0x39d   :  { %v12342_v45 = vadd.f32 %v4117_v32, %v3924_v39  ;;  %v9296_v39 = vld [vmem:[%s14734_s3 + $0x414] sm:$0xf0] }
 0x39e   :  { %v2621_v22 = vadd.f32 %v2620_v8, %v2428_v14  ;;  %2466 = vmatmul.bf16.gmra.mxu0 %v7935_v50  ;;  %2659 = vmatmul.bf16.gmra.mxu1 %v7939_v6  ;;  %v9293_v50 = vld [vmem:[%s14734_s3 + $0x404] sm:$0xf]  ;;  %v7960_v6 = vld [vmem:[%s14734_s3 + $0x418] sm:$0xf0]  ;;  %v12384_v8 = vpop.permute.xlu2 %6083  ;;  %v7959_v49 = vor.u32 %v9296_v39, %v7958_v20  ;;  %v5028_v39 = vadd.f32 %v11789_v43, %v11872_v53  ;;  %v7982_v53 = vld [vmem:[%s14734_s3 + $0x430] sm:$0xf] }
 0x39f   :  { %14941 = vst [vmem:[#allocation177_spill] sm:$0xff] %v12342_v45 }
 0x3a0   :  { %v5048_v35 = vadd.f32 %v11789_v43, %v2621_v22  ;;  %14948 = vst [vmem:[#allocation180_spill] sm:$0xff] %v12384_v8  ;;  %v7963_v8 = vor.u32 %v9293_v50, %v7960_v6  ;;  %v5032_v6 = vadd.f32 %v11789_v43, %v11964_v17  ;;  %v9302_v17 = vld [vmem:[%s14734_s3 + $0x444] sm:$0xf0] }
 0x3a1   :  { %3966 = vmatmul.bf16.gmra.mxu2 %v8784_v3  ;;  %4159 = vmatmul.bf16.gmra.mxu3 %v8788_v28  ;;  %v9749_v28 = vpop.eup %9748  ;;  %v12362_v63 = vpop.permute.xlu1 %6028 }
 0x3a2   :  { %6204 = vperm.xlu2 %9730, %v11300_v40   ;;  %6198 = vperm.xlu1 %9729, %v11300_v40   ;;  %9750 = vtanh.f32 %v5048_v35  ;;  %14947 = vst [vmem:[#allocation12_spill] sm:$0xff] %v12362_v63  ;;  %v6358_v32 = vmul.f32 %v9749_v28, %v11646_v57  ;;  %v9510_v57 = vld [vmem:[%s14734_s3 + $0xadc] sm:$0xf0] }
 0x3a3   :  { %v2429_v54 = vpop.f32.mrf.mxu0  ;;  %v2622_v3 = vpop.f32.mrf.mxu1  ;;  %9752 = vtanh.f32 %v5027_v9  ;;  %v14949_v9 = vmov 0  }
 0x3a4   :  { %v3927_v31 = vpop.f32.mrf.mxu2  ;;  %v4120_v24 = vpop.f32.mrf.mxu3  ;;  %v2430_v22 = vadd.f32 %v2429_v54, %v14946_v2  ;;  %v5026_v54 = vadd.f32 %v11789_v43, %v11825_v27 }
 0x3a5   :  { %v12357_v14 = vadd.f32 %v4120_v24, %v3927_v31  ;;  %v12360_v60 = vpop.permute.xlu0 %6678  ;;  %v9507_v31 = vld [vmem:[%s14734_s3 + $0xacc] sm:$0xf]  ;;  %v8809_v24 = vld [vmem:[%s14734_s3 + $0xae0] sm:$0xf0] }
 0x3a6   :  { %v12364_v48 = vadd.f32 %v2622_v3, %v2430_v22  ;;  %v14950_v3 = vld [vmem:[#allocation71_spill] sm:$0xff]  ;;  %v8812_v45 = vor.u32 %v9507_v31, %v8809_v24  ;;  %9754 = vtanh.f32 %v5026_v54  ;;  %v12414_v50 = vpop.permute.xlu2 %6095  ;;  %v14956_v31 = vld [vmem:[#allocation14_spill] sm:$0xff]  ;;  %v14957_v54 = vld [vmem:[#allocation57_spill] sm:$0xff] }
 0x3a7   :  { %14945 = vst [vmem:[#allocation179_spill] sm:$0xff] %v12357_v14  ;;  %v8808_v14 = vor.u32 %v9510_v57, %v8807_v19 }
 0x3a8   :  { %v9751_v35 = vpop.eup %9750  ;;  %14954 = vst [vmem:[#allocation181_spill] sm:$0xff] %v12414_v50 }
 0x3a9   :  { %v6382_v28 = vmul.f32 %v9751_v35, %v14950_v3  ;;  %v9753_v27 = vpop.eup %9752  ;;  %v12409_v20 = vpop.permute.xlu1 %6046 }
 0x3aa   :  { %9732 = vset.pattern.permute.xlu2 %v14949_v9  ;;  %9731 = vset.pattern.permute.xlu1 %v10180_v61  ;;  %v5029_v61 = vadd.f32 %v11789_v43, %v11883_v51  ;;  %v14952_v51 = vld [vmem:[#allocation43_spill] sm:$0xff] }
 0x3ab   :  { %6651 = vperm.xlu2 %9732, %v6358_v32   ;;  %v12404_v63 = vpop.f32.mrf.mxu0  ;;  %v12406_v11 = vpop.f32.mrf.mxu1  ;;  %6723 = vperm.xlu0 %9728, %v6382_v28   ;;  %v6361_v32 = vmul.f32 %v9753_v27, %v14952_v51  ;;  %14953 = vst [vmem:[#allocation43_spill] sm:$0xff] %v12409_v20  ;;  %v14958_v28 = vld [vmem:[#allocation61_spill] sm:$0xff]  ;;  %v8831_v27 = vld [vmem:[%s14734_s3 + $0xaf8] sm:$0xf] }
 0x3ac   :  { %v3929_v2 = vpop.f32.mrf.mxu2  ;;  %v4122_v22 = vpop.f32.mrf.mxu3  ;;  %9756 = vtanh.f32 %v5029_v61 }
 0x3ad   :  { %v12402_v33 = vadd.f32 %v4122_v22, %v3929_v2  ;;  %9758 = vtanh.f32 %v5028_v39  ;;  %v9299_v2 = vld [vmem:[%s14734_s3 + $0x434] sm:$0xf]  ;;  %v7984_v22 = vld [vmem:[%s14734_s3 + $0x448] sm:$0xf0]  ;;  %v9513_v39 = vld [vmem:[%s14734_s3 + $0xafc] sm:$0xf] }
 0x3ae   :  { %2471 = vmatmul.bf16.gmra.mxu0 %v7959_v49  ;;  %2664 = vmatmul.bf16.gmra.mxu1 %v7963_v8  ;;  %v9755_v8 = vpop.eup %9754  ;;  %9760 = vtanh.f32 %v5032_v6  ;;  %v8833_v6 = vld [vmem:[%s14734_s3 + $0xb10] sm:$0xf0] }
 0x3af   :  { %14951 = vst [vmem:[#allocation71_spill] sm:$0xff] %v12402_v33  ;;  %v6360_v3 = vmul.f32 %v9755_v8, %v14957_v54 }
 0x3b1   :  { %3971 = vmatmul.bf16.gmra.mxu2 %v8808_v14  ;;  %4164 = vmatmul.bf16.gmra.mxu3 %v8812_v45 }
 0x3b2   :  { %6210 = vperm.xlu1 %9731, %v11300_v40   ;;  %v9757_v57 = vpop.eup %9756 }
 0x3b3   :  { %6660 = vperm.xlu2 %9732, %v6361_v32   ;;  %v2434_v45 = vpop.f32.mrf.mxu0  ;;  %v2627_v35 = vpop.f32.mrf.mxu1  ;;  %v6363_v61 = vmul.f32 %v9757_v57, %v14958_v28  ;;  %v9516_v32 = vld [vmem:[%s14734_s3 + $0xb0c] sm:$0xf0]  ;;  %v7983_v57 = vor.u32 %v9302_v17, %v7982_v53  ;;  %v14962_v17 = vld [vmem:[#allocation46_spill] sm:$0xff] }
 0x3b4   :  { %v3932_v19 = vpop.f32.mrf.mxu2  ;;  %v4125_v49 = vpop.f32.mrf.mxu3  ;;  %v2435_v24 = vadd.f32 %v2434_v45, %v14956_v31  ;;  %v7987_v31 = vor.u32 %v9299_v2, %v7984_v22  ;;  %v14963_v22 = vld [vmem:[#allocation65_spill] sm:$0xff] }
 0x3b5   :  { %v12418_v14 = vadd.f32 %v4125_v49, %v3932_v19  ;;  %v5031_v19 = vadd.f32 %v11789_v43, %v11928_v42  ;;  %v5035_v49 = vadd.f32 %v11789_v43, %v12021_v25  ;;  %v8832_v25 = vor.u32 %v9516_v32, %v8831_v27 }
 0x3b6   :  { %v2628_v40 = vadd.f32 %v2627_v35, %v2435_v24  ;;  %v12456_v35 = vadd.s32 4294967200, %v12148_v21  ;;  %v9759_v24 = vpop.eup %9758  ;;  %v5034_v32 = vadd.f32 %v11789_v43, %v12009_v55 }
 0x3b7   :  { %14955 = vst [vmem:[#allocation182_spill] sm:$0xff] %v12418_v14  ;;  %v9761_v28 = vpop.eup %9760  ;;  %v6362_v2 = vmul.f32 %v9759_v24, %v14962_v17  ;;  %v14967_v17 = vld [vmem:[#allocation63_spill] sm:$0xff]  ;;  %v14971_v14 = vld [vmem:[#allocation17_spill] sm:$0xff] }
 0x3b8   :  { %v5051_v51 = vadd.f32 %v11789_v43, %v2628_v40 }
 0x3ba   :  { %9733 = vset.pattern.permute.xlu1 %v14949_v9  ;;  %v12453_v9 = vpop.permute.xlu1 %6058  ;;  %9762 = vtanh.f32 %v5051_v51  ;;  %v12466_v51 = vpop.permute.xlu2 %6113 }
 0x3bb   :  { %6657 = vperm.xlu1 %9733, %v6360_v3   ;;  %6666 = vperm.xlu2 %9732, %v6363_v61   ;;  %14959 = vst [vmem:[#allocation14_spill] sm:$0xff] %v12453_v9  ;;  %v12460_v54 = vpop.f32.mrf.mxu0  ;;  %v12462_v42 = vpop.f32.mrf.mxu1  ;;  %v8836_v3 = vor.u32 %v9513_v39, %v8833_v6  ;;  %9764 = vtanh.f32 %v5031_v19  ;;  %v14964_v39 = vld [vmem:[#allocation98_spill] sm:$0xff]  ;;  %v5038_v19 = vadd.f32 %v11789_v43, %v12102_v62  ;;  %v9308_v62 = vld [vmem:[%s14734_s3 + $0x474] sm:$0xf0] }
 0x3bc   :  { %v3934_v8 = vpop.f32.mrf.mxu2  ;;  %v4127_v45 = vpop.f32.mrf.mxu3  ;;  %14961 = vst [vmem:[#allocation61_spill] sm:$0xff] %v12466_v51  ;;  %9766 = vtanh.f32 %v5035_v49 }
 0x3bd   :  { %v12458_v40 = vadd.f32 %v4127_v45, %v3934_v8  ;;  %v12464_v61 = vpop.permute.xlu0 %6687  ;;  %v6366_v8 = vmul.f32 %v9761_v28, %v14963_v22  ;;  %9768 = vtanh.f32 %v5034_v32  ;;  %v8006_v28 = vld [vmem:[%s14734_s3 + $0x460] sm:$0xf]  ;;  %v8008_v32 = vld [vmem:[%s14734_s3 + $0x478] sm:$0xf0] }
 0x3be   :  { %2476 = vmatmul.bf16.gmra.mxu0 %v7983_v57  ;;  %2669 = vmatmul.bf16.gmra.mxu1 %v7987_v31  ;;  %9770 = vtanh.f32 %v5038_v19  ;;  %v14968_v22 = vld [vmem:[#allocation53_spill] sm:$0xff]  ;;  %v8007_v53 = vor.u32 %v9308_v62, %v8006_v28  ;;  %v14973_v62 = vld [vmem:[#allocation56_spill] sm:$0xff] }
 0x3bf   :  { %14960 = vst [vmem:[#allocation57_spill] sm:$0xff] %v12458_v40  ;;  %v9522_v19 = vld [vmem:[%s14734_s3 + $0xb3c] sm:$0xf0] }
 0x3c0   :  { %v9763_v27 = vpop.eup %9762 }
 0x3c1   :  { %3976 = vmatmul.bf16.gmra.mxu2 %v8832_v25  ;;  %4169 = vmatmul.bf16.gmra.mxu3 %v8836_v3  ;;  %v6385_v6 = vmul.f32 %v9763_v27, %v14964_v39  ;;  %v9765_v57 = vpop.eup %9764  ;;  %v9305_v27 = vld [vmem:[%s14734_s3 + $0x464] sm:$0xf]  ;;  %v8855_v39 = vld [vmem:[%s14734_s3 + $0xb28] sm:$0xf] }
 0x3c2   :  { %v9767_v3 = vpop.eup %9766  ;;  %v12483_v55 = vpop.permute.xlu1 %6077  ;;  %v8856_v20 = vor.u32 %v9522_v19, %v8855_v39  ;;  %v9314_v19 = vld [vmem:[%s14734_s3 + $0x4a4] sm:$0xf0] }
 0x3c3   :  { %6663 = vperm.xlu1 %9733, %v6362_v2   ;;  %6675 = vperm.xlu2 %9732, %v6366_v8   ;;  %v12479_v25 = vpop.f32.mrf.mxu0  ;;  %v12481_v24 = vpop.f32.mrf.mxu1  ;;  %14966 = vst [vmem:[#allocation65_spill] sm:$0xff] %v12483_v55  ;;  %v6365_v2 = vmul.f32 %v9765_v57, %v14967_v17  ;;  %v6369_v8 = vmul.f32 %v9767_v3, %v14968_v22 }
 0x3c4   :  { %v3937_v49 = vpop.f32.mrf.mxu2  ;;  %v4130_v45 = vpop.f32.mrf.mxu3  ;;  %6732 = vperm.xlu0 %9728, %v6385_v6   ;;  %v5037_v57 = vadd.f32 %v11789_v43, %v12066_v1  ;;  %v5041_v3 = vadd.f32 %v11789_v43, %v12167_v4  ;;  %v14972_v4 = vld [vmem:[#allocation69_spill] sm:$0xff] }
 0x3c5   :  { %v12477_v31 = vadd.f32 %v4130_v45, %v3937_v49  ;;  %v12502_v6 = vpop.permute.xlu2 %6125  ;;  %v9519_v49 = vld [vmem:[%s14734_s3 + $0xb2c] sm:$0xf]  ;;  %v8857_v45 = vld [vmem:[%s14734_s3 + $0xb40] sm:$0xf0]  ;;  %v9769_v51 = vpop.eup %9768 }
 0x3c6   :  { %14969 = vst [vmem:[#allocation98_spill] sm:$0xff] %v12502_v6  ;;  %v8011_v6 = vor.u32 %v9305_v27, %v8008_v32  ;;  %v9771_v40 = vpop.eup %9770  ;;  %9772 = vtanh.f32 %v5037_v57  ;;  %v6368_v28 = vmul.f32 %v9769_v51, %v14972_v4  ;;  %v5040_v32 = vadd.f32 %v11789_v43, %v12150_v44  ;;  %v14978_v57 = vld [vmem:[#allocation79_spill] sm:$0xff] }
 0x3c7   :  { %14965 = vst [vmem:[#allocation46_spill] sm:$0xff] %v12477_v31  ;;  %v8860_v31 = vor.u32 %v9519_v49, %v8857_v45  ;;  %9774 = vtanh.f32 %v5041_v3  ;;  %v12532_v51 = vadd.s32 4294967176, %v12148_v21  ;;  %v14977_v49 = vld [vmem:[#allocation72_spill] sm:$0xff] }
 0x3cb   :  { %6672 = vperm.xlu1 %9733, %v6365_v2   ;;  %6684 = vperm.xlu2 %9732, %v6369_v8   ;;  %v2442_v55 = vpop.f32.mrf.mxu0  ;;  %v2635_v9 = vpop.f32.mrf.mxu1  ;;  %v6372_v2 = vmul.f32 %v9771_v40, %v14973_v62  ;;  %v9525_v62 = vld [vmem:[%s14734_s3 + $0xb5c] sm:$0xf] }
 0x3cc   :  { %v3939_v17 = vpop.f32.mrf.mxu2  ;;  %v4132_v22 = vpop.f32.mrf.mxu3  ;;  %v2443_v33 = vadd.f32 %v2442_v55, %v14971_v14 }
 0x3cd   :  { %v12517_v50 = vadd.f32 %v4132_v22, %v3939_v17  ;;  %v12522_v8 = vpop.permute.xlu1 %6089  ;;  %v12527_v14 = vpop.permute.xlu2 %6143  ;;  %v9311_v17 = vld [vmem:[%s14734_s3 + $0x494] sm:$0xf]  ;;  %v8032_v22 = vld [vmem:[%s14734_s3 + $0x4a8] sm:$0xf0] }
 0x3ce   :  { %v2636_v1 = vadd.f32 %v2635_v9, %v2443_v33  ;;  %2481 = vmatmul.bf16.gmra.mxu0 %v8007_v53  ;;  %2674 = vmatmul.bf16.gmra.mxu1 %v8011_v6  ;;  %14974 = vst [vmem:[#allocation53_spill] sm:$0xff] %v12522_v8  ;;  %v5044_v33 = vadd.f32 %v11789_v43, %v12250_v37  ;;  %v9773_v40 = vpop.eup %9772  ;;  %v8030_v6 = vld [vmem:[%s14734_s3 + $0x490] sm:$0xf] }
 0x3cf   :  { %14970 = vst [vmem:[#allocation63_spill] sm:$0xff] %v12517_v50  ;;  %v9775_v44 = vpop.eup %9774  ;;  %v6371_v45 = vmul.f32 %v9773_v40, %v14977_v49  ;;  %v14981_v40 = vld [vmem:[#allocation13_spill] sm:$0xff]  ;;  %v8031_v37 = vor.u32 %v9314_v19, %v8030_v6 }
 0x3d0   :  { %v5054_v27 = vadd.f32 %v11789_v43, %v2636_v1  ;;  %14975 = vst [vmem:[#allocation17_spill] sm:$0xff] %v12527_v14  ;;  %v6375_v3 = vmul.f32 %v9775_v44, %v14978_v57  ;;  %v8879_v1 = vld [vmem:[%s14734_s3 + $0xb58] sm:$0xf]  ;;  %v2433_v44 = vadd.f32 %v12404_v63, %v14981_v40  ;;  %v8035_v14 = vor.u32 %v9311_v17, %v8032_v22  ;;  %v14985_v19 = vld [vmem:[#allocation81_spill] sm:$0xff] }
 0x3d1   :  { %3981 = vmatmul.bf16.gmra.mxu2 %v8856_v20  ;;  %4174 = vmatmul.bf16.gmra.mxu3 %v8860_v31  ;;  %v14984_v63 = vld [vmem:[#allocation60_spill] sm:$0xff]  ;;  %v5046_v22 = vadd.f32 %v11789_v43, %v12298_v56 }
 0x3d2   :  { %9776 = vtanh.f32 %v5054_v27  ;;  %v5043_v27 = vadd.f32 %v11789_v43, %v12214_v16 }
 0x3d3   :  { %6681 = vperm.xlu1 %9733, %v6368_v28   ;;  %6693 = vperm.xlu2 %9732, %v6372_v2   ;;  %v12536_v31 = vpop.f32.mrf.mxu0  ;;  %v12538_v55 = vpop.f32.mrf.mxu1  ;;  %9778 = vtanh.f32 %v5040_v32  ;;  %v9528_v28 = vld [vmem:[%s14734_s3 + $0xb6c] sm:$0xf0]  ;;  %v8881_v2 = vld [vmem:[%s14734_s3 + $0xb70] sm:$0xf0]  ;;  %v14979_v32 = vld [vmem:[#allocation96_spill] sm:$0xff] }
 0x3d4   :  { %v3942_v20 = vpop.f32.mrf.mxu2  ;;  %v4135_v9 = vpop.f32.mrf.mxu3  ;;  %9780 = vtanh.f32 %v5044_v33 }
 0x3d5   :  { %v12534_v53 = vadd.f32 %v4135_v9, %v3942_v20  ;;  %v12540_v39 = vpop.permute.xlu0 %6696  ;;  %v12573_v20 = vpop.permute.xlu1 %6107  ;;  %v5047_v9 = vadd.f32 %v11789_v43, %v12312_v5  ;;  %9782 = vtanh.f32 %v5043_v27  ;;  %v2626_v5 = vadd.f32 %v12406_v11, %v2433_v44 }
 0x3d6   :  { %14980 = vst [vmem:[#allocation56_spill] sm:$0xff] %v12573_v20  ;;  %v12583_v20 = vpop.permute.xlu2 %6155 }
 0x3d7   :  { %14976 = vst [vmem:[#allocation69_spill] sm:$0xff] %v12534_v53  ;;  %9784 = vtanh.f32 %v5047_v9  ;;  %v14988_v9 = vld [vmem:[#allocation20_spill] sm:$0xff] }
 0x3d8   :  { %v9777_v4 = vpop.eup %9776  ;;  %14983 = vst [vmem:[#allocation79_spill] sm:$0xff] %v12583_v20  ;;  %9786 = vtanh.f32 %v5046_v22  ;;  %v9534_v22 = vld [vmem:[%s14734_s3 + $0xb9c] sm:$0xf0] }
 0x3d9   :  { %v6388_v33 = vmul.f32 %v9777_v4, %v14979_v32  ;;  %v9779_v8 = vpop.eup %9778  ;;  %v8884_v4 = vor.u32 %v9525_v62, %v8881_v2  ;;  %v5050_v62 = vadd.f32 %v11789_v43, %v2626_v5 }
 0x3da   :  { %v9781_v32 = vpop.eup %9780  ;;  %v6374_v6 = vmul.f32 %v9779_v8, %v14984_v63 }
 0x3db   :  { %6690 = vperm.xlu1 %9733, %v6371_v45   ;;  %6702 = vperm.xlu2 %9732, %v6375_v3   ;;  %v2447_v16 = vpop.f32.mrf.mxu0  ;;  %v12581_v45 = vpop.f32.mrf.mxu1  ;;  %v8880_v3 = vor.u32 %v9528_v28, %v8879_v1  ;;  %v6378_v17 = vmul.f32 %v9781_v32, %v14985_v19  ;;  %v14986_v1 = vld [vmem:[#allocation16_spill] sm:$0xff]  ;;  %9788 = vtanh.f32 %v5050_v62  ;;  %v14991_v32 = vld [vmem:[#allocation85_spill] sm:$0xff]  ;;  %v8903_v19 = vld [vmem:[%s14734_s3 + $0xb88] sm:$0xf]  ;;  %v5049_v62 = vadd.f32 %v11789_v43, %v12364_v48 }
 0x3dc   :  { %v3944_v49 = vpop.f32.mrf.mxu2  ;;  %v4137_v57 = vpop.f32.mrf.mxu3  ;;  %6741 = vperm.xlu0 %9728, %v6388_v33   ;;  %v2440_v28 = vadd.f32 %v12479_v25, %v14986_v1  ;;  %v9531_v1 = vld [vmem:[%s14734_s3 + $0xb8c] sm:$0xf] }
 0x3dd   :  { %v12579_v53 = vadd.f32 %v4137_v57, %v3944_v49  ;;  %v12597_v44 = vpop.permute.xlu1 %6119  ;;  %v8054_v49 = vld [vmem:[%s14734_s3 + $0x4c0] sm:$0xf]  ;;  %v9320_v57 = vld [vmem:[%s14734_s3 + $0x4d4] sm:$0xf0] }
 0x3de   :  { %2486 = vmatmul.bf16.gmra.mxu0 %v8031_v37  ;;  %2679 = vmatmul.bf16.gmra.mxu1 %v8035_v14  ;;  %v9783_v37 = vpop.eup %9782  ;;  %v2633_v56 = vadd.f32 %v12481_v24, %v2440_v28  ;;  %14989 = vst [vmem:[#allocation13_spill] sm:$0xff] %v12597_v44  ;;  %v12607_v63 = vpop.permute.xlu2 %6174  ;;  %v9317_v24 = vld [vmem:[%s14734_s3 + $0x4c4] sm:$0xf] }
 0x3df   :  { %14982 = vst [vmem:[#allocation72_spill] sm:$0xff] %v12579_v53  ;;  %v9785_v8 = vpop.eup %9784  ;;  %v8905_v28 = vld [vmem:[%s14734_s3 + $0xba0] sm:$0xf0]  ;;  %v15036_v53 = vld [vmem:[#allocation31_spill] sm:$0xff] }
 0x3e0   :  { %v6381_v5 = vmul.f32 %v9785_v8, %v14991_v32  ;;  %14992 = vst [vmem:[#allocation60_spill] sm:$0xff] %v12607_v63  ;;  %v9787_v32 = vpop.eup %9786 }
 0x3e1   :  { %3986 = vmatmul.bf16.gmra.mxu2 %v8880_v3  ;;  %4179 = vmatmul.bf16.gmra.mxu3 %v8884_v4  ;;  %v14990_v3 = vld [vmem:[#allocation64_spill] sm:$0xff] }
 0x3e2   :  { %v6377_v4 = vmul.f32 %v9783_v37, %v14990_v3  ;;  %v5053_v37 = vadd.f32 %v11789_v43, %v2633_v56  ;;  %v8908_v56 = vor.u32 %v9531_v1, %v8905_v28  ;;  %v14999_v1 = vld [vmem:[#allocation18_spill] sm:$0xff] }
 0x3e3   :  { %6699 = vperm.xlu1 %9733, %v6374_v6   ;;  %6711 = vperm.xlu2 %9732, %v6378_v17   ;;  %v2449_v27 = vpop.f32.mrf.mxu0  ;;  %v2642_v33 = vpop.f32.mrf.mxu1  ;;  %v8056_v6 = vld [vmem:[%s14734_s3 + $0x4d8] sm:$0xf0]  ;;  %v2445_v28 = vadd.f32 %v12536_v31, %v14999_v1  ;;  %v9540_v1 = vld [vmem:[%s14734_s3 + $0xbcc] sm:$0xf0] }
 0x3e4   :  { %v3947_v2 = vpop.f32.mrf.mxu2  ;;  %v4140_v11 = vpop.f32.mrf.mxu3  ;;  %v2450_v40 = vadd.f32 %v2449_v27, %v14988_v9  ;;  %v12634_v27 = vadd.s32 4294967280, %v12148_v21  ;;  %v8059_v3 = vor.u32 %v9317_v24, %v8056_v6  ;;  %v14997_v6 = vld [vmem:[#allocation75_spill] sm:$0xff] }
 0x3e5   :  { %v12593_v14 = vadd.f32 %v4140_v11, %v3947_v2  ;;  %v14993_v2 = vld [vmem:[#allocation15_spill] sm:$0xff]  ;;  %v2638_v31 = vadd.f32 %v12538_v55, %v2445_v28  ;;  %v8080_v55 = vld [vmem:[%s14734_s3 + $0x508] sm:$0xf0]  ;;  %v9537_v28 = vld [vmem:[%s14734_s3 + $0xbbc] sm:$0xf] }
 0x3e6   :  { %v2643_v25 = vadd.f32 %v2642_v33, %v2450_v40  ;;  %v2438_v11 = vadd.f32 %v12460_v54, %v14993_v2  ;;  %v14994_v33 = vld [vmem:[#allocation19_spill] sm:$0xff]  ;;  %v8904_v54 = vor.u32 %v9534_v22, %v8903_v19 }
 0x3e7   :  { %14987 = vst [vmem:[#allocation96_spill] sm:$0xff] %v12593_v14  ;;  %v2448_v8 = vadd.f32 %v2447_v16, %v14994_v33 }
 0x3e8   :  { %v5057_v17 = vadd.f32 %v11789_v43, %v2643_v25  ;;  %v8055_v25 = vor.u32 %v9320_v57, %v8054_v49  ;;  %v14996_v57 = vld [vmem:[#allocation87_spill] sm:$0xff] }
 0x3e9   :  { %v2641_v16 = vadd.f32 %v12581_v45, %v2448_v8  ;;  %v6380_v24 = vmul.f32 %v9787_v32, %v14996_v57  ;;  %v15004_v57 = vld [vmem:[#allocation89_spill] sm:$0xff] }
 0x3ea   :  { %9790 = vtanh.f32 %v5057_v17  ;;  %v12649_v17 = vpop.permute.xlu1 %6137 }
 0x3eb   :  { %6708 = vperm.xlu1 %9733, %v6377_v4   ;;  %6720 = vperm.xlu2 %9732, %v6381_v5   ;;  %v2452_v48 = vpop.f32.mrf.mxu0  ;;  %v12639_v20 = vpop.f32.mrf.mxu1  ;;  %9792 = vtanh.f32 %v5049_v62  ;;  %v2631_v5 = vadd.f32 %v12462_v42, %v2438_v11  ;;  %14998 = vst [vmem:[#allocation16_spill] sm:$0xff] %v12649_v17  ;;  %v15001_v62 = vld [vmem:[#allocation100_spill] sm:$0xff] }
 0x3ec   :  { %v3949_v9 = vpop.f32.mrf.mxu2  ;;  %v4142_v40 = vpop.f32.mrf.mxu3  ;;  %9794 = vtanh.f32 %v5053_v37  ;;  %v5056_v37 = vadd.f32 %v11789_v43, %v2641_v16  ;;  %v9326_v16 = vld [vmem:[%s14734_s3 + $0x504] sm:$0xf0] }
 0x3ed   :  { %v12637_v63 = vadd.f32 %v4142_v40, %v3949_v9  ;;  %v9789_v4 = vpop.eup %9788  ;;  %v12642_v2 = vpop.permute.xlu0 %6705  ;;  %v5052_v42 = vadd.f32 %v11789_v43, %v2631_v5  ;;  %v8078_v5 = vld [vmem:[%s14734_s3 + $0x4f0] sm:$0xf] }
 0x3ee   :  { %2491 = vmatmul.bf16.gmra.mxu0 %v8055_v25  ;;  %2684 = vmatmul.bf16.gmra.mxu1 %v8059_v3  ;;  %v6384_v19 = vmul.f32 %v9789_v4, %v14997_v6  ;;  %v12654_v45 = vpop.permute.xlu2 %6186  ;;  %v15005_v6 = vld [vmem:[#allocation77_spill] sm:$0xff] }
 0x3ef   :  { %14995 = vst [vmem:[#allocation81_spill] sm:$0xff] %v12637_v63  ;;  %9796 = vtanh.f32 %v5052_v42  ;;  %v8927_v42 = vld [vmem:[%s14734_s3 + $0xbb8] sm:$0xf] }
 0x3f0   :  { %v9791_v22 = vpop.eup %9790  ;;  %15000 = vst [vmem:[#allocation20_spill] sm:$0xff] %v12654_v45  ;;  %9798 = vtanh.f32 %v5056_v37  ;;  %v8928_v45 = vor.u32 %v9540_v1, %v8927_v42 }
 0x3f1   :  { %3991 = vmatmul.bf16.gmra.mxu2 %v8904_v54  ;;  %4184 = vmatmul.bf16.gmra.mxu3 %v8908_v56  ;;  %v6391_v11 = vmul.f32 %v9791_v22, %v15001_v62  ;;  %v9793_v9 = vpop.eup %9792  ;;  %v15003_v54 = vld [vmem:[#allocation22_spill] sm:$0xff]  ;;  %v9323_v22 = vld [vmem:[%s14734_s3 + $0x4f4] sm:$0xf] }
 0x3f2   :  { %v9795_v32 = vpop.eup %9794  ;;  %v8929_v62 = vld [vmem:[%s14734_s3 + $0xbd0] sm:$0xf0]  ;;  %v12689_v37 = vpop.permute.xlu1 %6149 }
 0x3f3   :  { %6717 = vperm.xlu1 %9733, %v6380_v24   ;;  %6729 = vperm.xlu2 %9732, %v6384_v19   ;;  %v2454_v25 = vpop.f32.mrf.mxu0  ;;  %v2647_v3 = vpop.f32.mrf.mxu1  ;;  %v6383_v24 = vmul.f32 %v9793_v9, %v15004_v57  ;;  %v6387_v19 = vmul.f32 %v9795_v32, %v15005_v6  ;;  %15006 = vst [vmem:[#allocation85_spill] sm:$0xff] %v12689_v37 }
 0x3f4   :  { %v3952_v33 = vpop.f32.mrf.mxu2  ;;  %v4145_v8 = vpop.f32.mrf.mxu3  ;;  %6750 = vperm.xlu0 %9728, %v6391_v11   ;;  %v2455_v56 = vadd.f32 %v2454_v25, %v15003_v54  ;;  %v5055_v11 = vadd.f32 %v11789_v43, %v2638_v31  ;;  %v8079_v32 = vor.u32 %v9326_v16, %v8078_v5  ;;  %v8083_v54 = vor.u32 %v9323_v22, %v8080_v55  ;;  %v15011_v5 = vld [vmem:[#allocation92_spill] sm:$0xff] }
 0x3f5   :  { %v12658_v40 = vadd.f32 %v4145_v8, %v3952_v33  ;;  %v15007_v33 = vld [vmem:[#allocation21_spill] sm:$0xff]  ;;  %v8932_v31 = vor.u32 %v9537_v28, %v8929_v62  ;;  %v15012_v22 = vld [vmem:[#allocation112_spill] sm:$0xff] }
 0x3f6   :  { %v2648_v4 = vadd.f32 %v2647_v3, %v2455_v56  ;;  %v2453_v8 = vadd.f32 %v2452_v48, %v15007_v33  ;;  %v9797_v56 = vpop.eup %9796  ;;  %9800 = vtanh.f32 %v5055_v11 }
 0x3f7   :  { %15002 = vst [vmem:[#allocation64_spill] sm:$0xff] %v12658_v40  ;;  %v6386_v16 = vmul.f32 %v9797_v56, %v15011_v5  ;;  %v15016_v56 = vperm.slane %v12165_v26, %v12156_v41  ;;  %v15017_v5 = vld [vmem:[#allocation80_spill] sm:$0xff]  ;;  %v9329_v26 = vld [vmem:[%s14734_s3 + $0x524] sm:$0xf] }
 0x3f8   :  { %v5059_v9 = vadd.f32 %v11789_v43, %v2648_v4  ;;  %v2646_v48 = vadd.f32 %v12639_v20, %v2453_v8  ;;  %v12704_v20 = vadd.s32 4294967256, %v12148_v21  ;;  %v15014_v8 = vld [vmem:[#allocation24_spill] sm:$0xff] }
 0x3fa   :  { %9802 = vtanh.f32 %v5059_v9 }
 0x3fb   :  { %6726 = vperm.xlu1 %9733, %v6383_v24   ;;  %6738 = vperm.xlu2 %9732, %v6387_v19   ;;  %v2457_v49 = vpop.f32.mrf.mxu0  ;;  %v9799_v24 = vpop.eup %9798  ;;  %v15010_v19 = vld [vmem:[#allocation23_spill] sm:$0xff] }
 0x3fc   :  { %v3954_v25 = vpop.f32.mrf.mxu2  ;;  %v4147_v3 = vpop.f32.mrf.mxu3  ;;  %v2458_v17 = vadd.f32 %v2457_v49, %v15010_v19  ;;  %v6390_v55 = vmul.f32 %v9799_v24, %v15012_v22  ;;  %v5058_v49 = vadd.f32 %v11789_v43, %v2646_v48  ;;  %v8102_v48 = vld [vmem:[%s14734_s3 + $0x520] sm:$0xf]  ;;  %v15018_v22 = vld [vmem:[#allocation104_spill] sm:$0xff] }
 0x3fd   :  { %v12693_v57 = vadd.f32 %v4147_v3, %v3954_v25  ;;  %v12695_v6 = vpop.permute.xlu2 %6204  ;;  %v2650_v37 = vpop.f32.mrf.mxu1 }
 0x3fe   :  { %15009 = vst [vmem:[#allocation19_spill] sm:$0xff] %v12695_v6  ;;  %v2651_v4 = vadd.f32 %v2650_v37, %v2458_v17  ;;  %2496 = vmatmul.bf16.gmra.mxu0 %v8079_v32  ;;  %2689 = vmatmul.bf16.gmra.mxu1 %v8083_v54  ;;  %v9801_v17 = vpop.eup %9800  ;;  %v12712_v32 = vpop.permute.xlu1 %6168  ;;  %v12715_v54 = vadd.s32 4294967272, %v12148_v21 }
 0x3ff   :  { %15008 = vst [vmem:[#allocation15_spill] sm:$0xff] %v12693_v57 }
 0x400   :  { %v5060_v42 = vadd.f32 %v11789_v43, %v2651_v4  ;;  %v9803_v37 = vpop.eup %9802  ;;  %15015 = vst [vmem:[#allocation75_spill] sm:$0xff] %v12712_v32  ;;  %v9332_v4 = vld [vmem:[%s14734_s3 + $0x534] sm:$0xf0] }
 0x401   :  { %3996 = vmatmul.bf16.gmra.mxu2 %v8928_v45  ;;  %4189 = vmatmul.bf16.gmra.mxu3 %v8932_v31 }
 0x402   :  { %9804 = vtanh.f32 %v5060_v42  ;;  %v8104_v42 = vld [vmem:[%s14734_s3 + $0x538] sm:$0xf0] }
 0x403   :  { %6735 = vperm.xlu1 %9733, %v6386_v16   ;;  %6747 = vperm.xlu2 %9732, %v6390_v55   ;;  %v2459_v11 = vpop.f32.mrf.mxu0  ;;  %9806 = vtanh.f32 %v5058_v49  ;;  %v6389_v16 = vmul.f32 %v9801_v17, %v15017_v5  ;;  %v6393_v55 = vmul.f32 %v9803_v37, %v15018_v22  ;;  %v8951_v49 = vld [vmem:[%s14734_s3 + $0xbe8] sm:$0xf]  ;;  %v9543_v17 = vld [vmem:[%s14734_s3 + $0xbec] sm:$0xf] }
 0x404   :  { %v3957_v1 = vpop.f32.mrf.mxu2  ;;  %v4150_v28 = vpop.f32.mrf.mxu3  ;;  %v2460_v9 = vadd.f32 %v2459_v11, %v15014_v8  ;;  %v15019_v11 = vld [vmem:[#allocation88_spill] sm:$0xff] }
 0x405   :  { %v12706_v62 = vadd.f32 %v4150_v28, %v3957_v1  ;;  %v6652_v45 = vpop.permute.xlu2 %6651  ;;  %v2652_v25 = vpop.f32.mrf.mxu1  ;;  %v9546_v28 = vld [vmem:[%s14734_s3 + $0xbfc] sm:$0xf0] }
 0x406   :  { %v7090_v33 = vperm.slane %v6652_v45, %v12148_v21  ;;  %v12710_v3 = vpop.permute.xlu0 %6714  ;;  %v2653_v24 = vadd.f32 %v2652_v25, %v2460_v9  ;;  %v8953_v45 = vld [vmem:[%s14734_s3 + $0xc00] sm:$0xf0]  ;;  %v8103_v25 = vor.u32 %v9332_v4, %v8102_v48  ;;  %v8952_v6 = vor.u32 %v9546_v28, %v8951_v49  ;;  %v15022_v48 = vld [vmem:[#allocation84_spill] sm:$0xff] }
 0x407   :  { %15013 = vst [vmem:[#allocation87_spill] sm:$0xff] %v12706_v62  ;;  %v8956_v32 = vor.u32 %v9543_v17, %v8953_v45  ;;  %v15029_v62 = vld [vmem:[#allocation27_spill] sm:$0xff] }
 0x408   :  { %v12721_v31 = vsel %vm7093_vm0, %v15016_v56, %v7090_v33  ;;  %v9805_v1 = vpop.eup %9804  ;;  %v5061_v33 = vadd.f32 %v11789_v43, %v2653_v24  ;;  %v8107_v56 = vor.u32 %v9329_v26, %v8104_v42  ;;  %v12761_v26 = vpop.permute.xlu1 %6180 }
 0x409   :  { %v6394_v37 = vmul.f32 %v9805_v1, %v15019_v11  ;;  %v9807_v44 = vpop.eup %9806  ;;  %15023 = vst [vmem:[#allocation100_spill] sm:$0xff] %v12761_v26 }
 0x40a   :  { %9808 = vtanh.f32 %v5061_v33  ;;  %v6392_v4 = vmul.f32 %v9807_v44, %v15022_v48 }
 0x40b   :  { %6744 = vperm.xlu1 %9733, %v6389_v16   ;;  %6756 = vperm.xlu2 %9732, %v6393_v55   ;;  %v2462_v19 = vpop.f32.mrf.mxu0  ;;  %v15021_v55 = vld [vmem:[#allocation25_spill] sm:$0xff] }
 0x40c   :  { %v3959_v8 = vpop.f32.mrf.mxu2  ;;  %v4152_v9 = vpop.f32.mrf.mxu3  ;;  %6759 = vperm.xlu0 %9728, %v6394_v37   ;;  %v2463_v1 = vadd.f32 %v2462_v19, %v15021_v55 }
 0x40d   :  { %v12753_v5 = vadd.f32 %v4152_v9, %v3959_v8  ;;  %v12755_v22 = vpop.permute.xlu2 %6660  ;;  %v2655_v11 = vpop.f32.mrf.mxu1  ;;  %v12772_v9 = vadd.s32 4294967232, %v12148_v21 }
 0x40e   :  { %v2656_v24 = vadd.f32 %v2655_v11, %v2463_v1  ;;  %2501 = vmatmul.bf16.gmra.mxu0 %v8103_v25  ;;  %2694 = vmatmul.bf16.gmra.mxu1 %v8107_v56  ;;  %v8126_v25 = vld [vmem:[%s14734_s3 + $0x550] sm:$0xf]  ;;  %v9338_v56 = vld [vmem:[%s14734_s3 + $0x564] sm:$0xf0]  ;;  %v9335_v1 = vld [vmem:[%s14734_s3 + $0x554] sm:$0xf] }
 0x40f   :  { %15020 = vst [vmem:[#allocation18_spill] sm:$0xff] %v12753_v5  ;;  %v8128_v11 = vld [vmem:[%s14734_s3 + $0x568] sm:$0xf0] }
 0x410   :  { %v5062_v42 = vadd.f32 %v11789_v43, %v2656_v24  ;;  %v9809_v37 = vpop.eup %9808  ;;  %v8975_v24 = vld [vmem:[%s14734_s3 + $0xc18] sm:$0xf] }
 0x411   :  { %4001 = vmatmul.bf16.gmra.mxu2 %v8952_v6  ;;  %4194 = vmatmul.bf16.gmra.mxu3 %v8956_v32  ;;  %v15025_v32 = vld [vmem:[#allocation26_spill] sm:$0xff]  ;;  %v6395_v55 = vmul.f32 %v9809_v37, %v11732_v59  ;;  %v9549_v59 = vld [vmem:[%s14734_s3 + $0xc1c] sm:$0xf] }
 0x412   :  { %9810 = vtanh.f32 %v5062_v42  ;;  %v9552_v42 = vld [vmem:[%s14734_s3 + $0xc2c] sm:$0xf0] }
 0x413   :  { %6753 = vperm.xlu1 %9733, %v6392_v4   ;;  %v2464_v45 = vpop.f32.mrf.mxu0 }
 0x414   :  { %v3962_v49 = vpop.f32.mrf.mxu2  ;;  %v4155_v28 = vpop.f32.mrf.mxu3  ;;  %v2465_v33 = vadd.f32 %v2464_v45, %v15025_v32  ;;  %v15027_v45 = vld [vmem:[#allocation107_spill] sm:$0xff] }
 0x415   :  { %v12764_v17 = vadd.f32 %v4155_v28, %v3962_v49  ;;  %v12766_v19 = vpop.permute.xlu2 %6666  ;;  %v2657_v44 = vpop.f32.mrf.mxu1  ;;  %v8977_v49 = vld [vmem:[%s14734_s3 + $0xc30] sm:$0xf0] }
 0x416   :  { %v2658_v8 = vadd.f32 %v2657_v44, %v2465_v33  ;;  %v12800_v28 = vpop.permute.xlu1 %6198  ;;  %v8127_v44 = vor.u32 %v9338_v56, %v8126_v25  ;;  %v8980_v5 = vor.u32 %v9549_v59, %v8977_v49 }
 0x417   :  { %15024 = vst [vmem:[#allocation22_spill] sm:$0xff] %v12764_v17  ;;  %v8976_v17 = vor.u32 %v9552_v42, %v8975_v24  ;;  %v15030_v24 = vld [vmem:[#allocation91_spill] sm:$0xff] }
 0x418   :  { %v9811_v48 = vpop.eup %9810  ;;  %v5063_v4 = vadd.f32 %v11789_v43, %v2658_v8  ;;  %15026 = vst [vmem:[#allocation89_spill] sm:$0xff] %v12800_v28  ;;  %v8131_v8 = vor.u32 %v9335_v1, %v8128_v11  ;;  %v12816_v11 = vadd.s32 4294967208, %v12148_v21 }
 0x419   :  { %v6396_v37 = vmul.f32 %v9811_v48, %v15027_v45  ;;  %v15033_v45 = vld [vmem:[#allocation29_spill] sm:$0xff] }
 0x41a   :  { %9812 = vtanh.f32 %v5063_v4 }
 0x41b   :  { %6762 = vperm.xlu1 %9733, %v6395_v55   ;;  %v2467_v26 = vpop.f32.mrf.mxu0  ;;  %6765 = vperm.xlu2 %9732, %v6396_v37  }
 0x41c   :  { %v3964_v32 = vpop.f32.mrf.mxu2  ;;  %v4157_v33 = vpop.f32.mrf.mxu3  ;;  %v2468_v28 = vadd.f32 %v2467_v26, %v15029_v62 }
 0x41d   :  { %v12803_v6 = vadd.f32 %v4157_v33, %v3964_v32  ;;  %v12805_v16 = vpop.permute.xlu2 %6675  ;;  %v2660_v57 = vpop.f32.mrf.mxu1  ;;  %v12829_v32 = vadd.s32 4294967184, %v12148_v21  ;;  %v8150_v33 = vld [vmem:[%s14734_s3 + $0x580] sm:$0xf] }
 0x41e   :  { %v12810_v48 = vpop.permute.xlu0 %6723  ;;  %v2661_v4 = vadd.f32 %v2660_v57, %v2468_v28  ;;  %2506 = vmatmul.bf16.gmra.mxu0 %v8127_v44  ;;  %2699 = vmatmul.bf16.gmra.mxu1 %v8131_v8  ;;  %v9344_v44 = vld [vmem:[%s14734_s3 + $0x594] sm:$0xf0] }
 0x41f   :  { %15028 = vst [vmem:[#allocation77_spill] sm:$0xff] %v12803_v6 }
 0x420   :  { %v9813_v56 = vpop.eup %9812  ;;  %v5064_v1 = vadd.f32 %v11789_v43, %v2661_v4  ;;  %v9341_v4 = vld [vmem:[%s14734_s3 + $0x584] sm:$0xf] }
 0x421   :  { %4006 = vmatmul.bf16.gmra.mxu2 %v8976_v17  ;;  %4199 = vmatmul.bf16.gmra.mxu3 %v8980_v5  ;;  %v6397_v42 = vmul.f32 %v9813_v56, %v15030_v24  ;;  %v8152_v56 = vld [vmem:[%s14734_s3 + $0x598] sm:$0xf0]  ;;  %v8151_v5 = vor.u32 %v9344_v44, %v8150_v33 }
 0x422   :  { %9814 = vtanh.f32 %v5064_v1  ;;  %v8999_v1 = vld [vmem:[%s14734_s3 + $0xc48] sm:$0xf]  ;;  %v8155_v55 = vor.u32 %v9341_v4, %v8152_v56  ;;  %v15037_v4 = vperm.slane %v12755_v22, %v12715_v54  ;;  %v12872_v56 = vadd.s32 4294967264, %v12148_v21 }
 0x423   :  { %6768 = vperm.xlu0 %9728, %v6397_v42   ;;  %v2469_v17 = vpop.f32.mrf.mxu0  ;;  %v9558_v42 = vld [vmem:[%s14734_s3 + $0xc5c] sm:$0xf0] }
 0x424   :  { %v3967_v62 = vpop.f32.mrf.mxu2  ;;  %v4160_v26 = vpop.f32.mrf.mxu3  ;;  %v2470_v37 = vadd.f32 %v2469_v17, %v15033_v45  ;;  %v9000_v40 = vor.u32 %v9558_v42, %v8999_v1 }
 0x425   :  { %v12819_v59 = vadd.f32 %v4160_v26, %v3967_v62  ;;  %v12821_v57 = vpop.permute.xlu1 %6210  ;;  %v12823_v49 = vpop.permute.xlu2 %6684  ;;  %v9555_v62 = vld [vmem:[%s14734_s3 + $0xc4c] sm:$0xf]  ;;  %v9001_v26 = vld [vmem:[%s14734_s3 + $0xc60] sm:$0xf0] }
 0x426   :  { %15032 = vst [vmem:[#allocation23_spill] sm:$0xff] %v12821_v57  ;;  %v2662_v28 = vpop.f32.mrf.mxu1  ;;  %v9004_v63 = vor.u32 %v9555_v62, %v9001_v26  ;;  %v15038_v26 = vld [vmem:[#allocation95_spill] sm:$0xff] }
 0x427   :  { %15031 = vst [vmem:[#allocation21_spill] sm:$0xff] %v12819_v59  ;;  %v2663_v8 = vadd.f32 %v2662_v28, %v2470_v37  ;;  %v15034_v28 = vld [vmem:[#allocation110_spill] sm:$0xff] }
 0x428   :  { %v9815_v24 = vpop.eup %9814 }
 0x429   :  { %v5065_v17 = vadd.f32 %v11789_v43, %v2663_v8  ;;  %v6398_v45 = vmul.f32 %v9815_v24, %v15034_v28 }
 0x42b   :  { %9816 = vtanh.f32 %v5065_v17  ;;  %6771 = vperm.xlu1 %9733, %v6398_v45   ;;  %v2472_v24 = vpop.f32.mrf.mxu0  ;;  %v15040_v45 = vld [vmem:[#allocation33_spill] sm:$0xff] }
 0x42c   :  { %v3969_v37 = vpop.f32.mrf.mxu2  ;;  %v4162_v25 = vpop.f32.mrf.mxu3  ;;  %v2473_v33 = vadd.f32 %v2472_v24, %v15036_v53 }
 0x42d   :  { %v12857_v57 = vadd.f32 %v4162_v25, %v3969_v37  ;;  %v6658_v59 = vpop.permute.xlu1 %6657  ;;  %v12859_v6 = vpop.permute.xlu2 %6693 }
 0x42e   :  { %v7096_v14 = vperm.slane %v6658_v59, %v12634_v27  ;;  %v2665_v28 = vpop.f32.mrf.mxu1  ;;  %2511 = vmatmul.bf16.gmra.mxu0 %v8151_v5  ;;  %2704 = vmatmul.bf16.gmra.mxu1 %v8155_v55 }
 0x42f   :  { %15035 = vst [vmem:[#allocation92_spill] sm:$0xff] %v12857_v57  ;;  %v2666_v44 = vadd.f32 %v2665_v28, %v2473_v33 }
 0x430   :  { %v7098_v25 = vsel %vm7097_vm1, %v7096_v14, %v12721_v31 }
 0x431   :  { %4011 = vmatmul.bf16.gmra.mxu2 %v9000_v40  ;;  %4204 = vmatmul.bf16.gmra.mxu3 %v9004_v63  ;;  %v7102_v59 = vsel %vm7101_vm2, %v15037_v4, %v7098_v25  ;;  %v9817_v1 = vpop.eup %9816  ;;  %v5066_v42 = vadd.f32 %v11789_v43, %v2666_v44  ;;  %v12890_v25 = vadd.s32 4294967240, %v12148_v21  ;;  %v8174_v44 = vld [vmem:[%s14734_s3 + $0x5b0] sm:$0xf]  ;;  %v9350_v4 = vld [vmem:[%s14734_s3 + $0x5c4] sm:$0xf0] }
 0x432   :  { %v6399_v14 = vmul.f32 %v9817_v1, %v15038_v26  ;;  %v15041_v1 = vperm.slane %v12766_v19, %v12704_v20  ;;  %v9023_v26 = vld [vmem:[%s14734_s3 + $0xc78] sm:$0xf] }
 0x433   :  { %9818 = vtanh.f32 %v5066_v42  ;;  %v2474_v5 = vpop.f32.mrf.mxu0 }
 0x434   :  { %v3972_v53 = vpop.f32.mrf.mxu2  ;;  %v4165_v62 = vpop.f32.mrf.mxu3  ;;  %6774 = vperm.xlu2 %9732, %v6399_v14   ;;  %v2475_v37 = vadd.f32 %v2474_v5, %v15040_v45  ;;  %v15042_v14 = vperm.slane %v12296_v52, %v12289_v18  ;;  %v9025_v5 = vld [vmem:[%s14734_s3 + $0xc90] sm:$0xf0]  ;;  %v15043_v52 = vld [vmem:[#allocation28_spill] sm:$0xff] }
 0x435   :  { %v12876_v31 = vadd.f32 %v4165_v62, %v3972_v53  ;;  %v6664_v63 = vpop.permute.xlu1 %6663  ;;  %v12878_v40 = vpop.permute.xlu2 %6702  ;;  %v9347_v53 = vld [vmem:[%s14734_s3 + $0x5b4] sm:$0xf]  ;;  %v8176_v62 = vld [vmem:[%s14734_s3 + $0x5c8] sm:$0xf0] }
 0x436   :  { %v7104_v22 = vperm.slane %v6664_v63, %v12872_v56  ;;  %v2667_v17 = vpop.f32.mrf.mxu1  ;;  %v12884_v24 = vpop.permute.xlu0 %6732  ;;  %v9564_v63 = vld [vmem:[%s14734_s3 + $0xc8c] sm:$0xf0] }
 0x437   :  { %15039 = vst [vmem:[#allocation112_spill] sm:$0xff] %v12876_v31  ;;  %v9024_v31 = vor.u32 %v9564_v63, %v9023_v26  ;;  %v15047_v63 = vperm.slane %v12360_v60, %v12355_v7 }
 0x438   :  { %v7106_v28 = vsel %vm7105_vm3, %v7104_v22, %v7102_v59  ;;  %v2668_v59 = vadd.f32 %v2667_v17, %v2475_v37  ;;  %v9561_v22 = vld [vmem:[%s14734_s3 + $0xc7c] sm:$0xf] }
 0x439   :  { %v7110_v42 = vsel %vm7109_vm4, %v15041_v1, %v7106_v28  ;;  %v9819_v17 = vpop.eup %9818  ;;  %v9028_v57 = vor.u32 %v9561_v22, %v9025_v5 }
 0x43a   :  { %v7114_v19 = vsel %vm7113_vm5, %v15042_v14, %v7110_v42  ;;  %v5067_v45 = vadd.f32 %v11789_v43, %v2668_v59  ;;  %v6400_v1 = vmul.f32 %v9819_v17, %v15043_v52  ;;  %v8175_v42 = vor.u32 %v9350_v4, %v8174_v44  ;;  %v15045_v17 = vld [vmem:[#allocation35_spill] sm:$0xff] }
 0x43b   :  { %v8179_v14 = vor.u32 %v9347_v53, %v8176_v62  ;;  %v2477_v10 = vpop.f32.mrf.mxu0  ;;  %v15046_v53 = vperm.slane %v12805_v16, %v12772_v9 }
 0x43c   :  { %v3974_v37 = vpop.f32.mrf.mxu2  ;;  %v4167_v28 = vpop.f32.mrf.mxu3  ;;  %9820 = vtanh.f32 %v5067_v45  ;;  %6777 = vperm.xlu0 %9728, %v6400_v1   ;;  %v2478_v44 = vadd.f32 %v2477_v10, %v15045_v17  ;;  %v15048_v45 = vld [vmem:[#allocation114_spill] sm:$0xff]  ;;  %v15050_v1 = vld [vmem:[#allocation37_spill] sm:$0xff]  ;;  %v12958_v17 = vadd.s32 4294967192, %v12148_v21 }
 0x43d   :  { %v12926_v33 = vadd.f32 %v4167_v28, %v3974_v37  ;;  %v6673_v55 = vpop.permute.xlu1 %6672  ;;  %v12928_v8 = vpop.permute.xlu2 %6711 }
 0x43e   :  { %v7116_v50 = vperm.slane %v6673_v55, %v12890_v25  ;;  %v2670_v34 = vpop.f32.mrf.mxu1  ;;  %2516 = vmatmul.bf16.gmra.mxu0 %v8175_v42  ;;  %2709 = vmatmul.bf16.gmra.mxu1 %v8179_v14  ;;  %v12940_v55 = vadd.s32 4294967216, %v12148_v21 }
 0x43f   :  { %15044 = vst [vmem:[#allocation24_spill] sm:$0xff] %v12926_v33  ;;  %v2671_v26 = vadd.f32 %v2670_v34, %v2478_v44  ;;  %v8198_v44 = vld [vmem:[%s14734_s3 + $0x5e0] sm:$0xf] }
 0x440   :  { %v7118_v4 = vsel %vm14744_vm6, %v7116_v50, %v7114_v19 }
 0x441   :  { %v7122_v62 = vsel %vm7121_vm7, %v15046_v53, %v7118_v4  ;;  %4016 = vmatmul.bf16.gmra.mxu2 %v9024_v31  ;;  %4209 = vmatmul.bf16.gmra.mxu3 %v9028_v57  ;;  %v5068_v50 = vadd.f32 %v11789_v43, %v2671_v26  ;;  %v9356_v4 = vld [vmem:[%s14734_s3 + $0x5f4] sm:$0xf0]  ;;  %v15051_v53 = vperm.slane %v12823_v49, %v12816_v11 }
 0x442   :  { %v7126_v10 = vsel %vm7125_vm8, %v15047_v63, %v7122_v62  ;;  %v9821_v22 = vpop.eup %9820  ;;  %v9353_v63 = vld [vmem:[%s14734_s3 + $0x5e4] sm:$0xf] }
 0x443   :  { %v6401_v16 = vmul.f32 %v9821_v22, %v15048_v45  ;;  %9822 = vtanh.f32 %v5068_v50  ;;  %v2479_v28 = vpop.f32.mrf.mxu0  ;;  %v9047_v22 = vld [vmem:[%s14734_s3 + $0xca8] sm:$0xf]  ;;  %v15052_v50 = vperm.slane %v12464_v61, %v12456_v35  ;;  %v9049_v45 = vld [vmem:[%s14734_s3 + $0xcc0] sm:$0xf0]  ;;  %v15053_v61 = vld [vmem:[#allocation99_spill] sm:$0xff] }
 0x444   :  { %v3977_v19 = vpop.f32.mrf.mxu2  ;;  %v4170_v5 = vpop.f32.mrf.mxu3  ;;  %v2480_v42 = vadd.f32 %v2479_v28, %v15050_v1  ;;  %v8199_v1 = vor.u32 %v9356_v4, %v8198_v44 }
 0x445   :  { %v12948_v37 = vadd.f32 %v4170_v5, %v3977_v19  ;;  %v6682_v34 = vpop.permute.xlu1 %6681  ;;  %v12950_v57 = vpop.permute.xlu2 %6720  ;;  %6780 = vperm.xlu1 %9733, %v6401_v16   ;;  %v9570_v19 = vld [vmem:[%s14734_s3 + $0xcbc] sm:$0xf0]  ;;  %v9567_v5 = vld [vmem:[%s14734_s3 + $0xcac] sm:$0xf] }
 0x446   :  { %v7128_v31 = vperm.slane %v6682_v34, %v12940_v55  ;;  %v2672_v52 = vpop.f32.mrf.mxu1  ;;  %v9052_v60 = vor.u32 %v9567_v5, %v9049_v45 }
 0x447   :  { %15049 = vst [vmem:[#allocation80_spill] sm:$0xff] %v12948_v37  ;;  %v2673_v26 = vadd.f32 %v2672_v52, %v2480_v42 }
 0x448   :  { %v7130_v14 = vsel %vm7129_vm9, %v7128_v31, %v7126_v10  ;;  %v8200_v10 = vld [vmem:[%s14734_s3 + $0x5f8] sm:$0xf0] }
 0x449   :  { %v7134_v62 = vsel %vm14743_vm10, %v15051_v53, %v7130_v14  ;;  %v9823_v16 = vpop.eup %9822  ;;  %v5069_v34 = vadd.f32 %v11789_v43, %v2673_v26  ;;  %v8203_v42 = vor.u32 %v9353_v63, %v8200_v10 }
 0x44a   :  { %v7138_v49 = vsel %vm14742_vm11, %v15052_v50, %v7134_v62  ;;  %v6402_v52 = vmul.f32 %v9823_v16, %v15053_v61  ;;  %v9048_v50 = vor.u32 %v9570_v19, %v9047_v22  ;;  %v15055_v16 = vld [vmem:[#allocation39_spill] sm:$0xff]  ;;  %v15056_v22 = vperm.slane %v12859_v6, %v12829_v32 }
 0x44b   :  { %9824 = vtanh.f32 %v5069_v34  ;;  %v2482_v37 = vpop.f32.mrf.mxu0 }
 0x44c   :  { %v3979_v31 = vpop.f32.mrf.mxu2  ;;  %v4172_v28 = vpop.f32.mrf.mxu3  ;;  %6783 = vperm.xlu2 %9732, %v6402_v52   ;;  %v2483_v44 = vadd.f32 %v2482_v37, %v15055_v16  ;;  %v15057_v37 = vperm.slane %v12540_v39, %v12532_v51  ;;  %v15062_v16 = vperm.slane %v12878_v40, %v12156_v41  ;;  %v9359_v40 = vld [vmem:[%s14734_s3 + $0x614] sm:$0xf] }
 0x44d   :  { %v12994_v14 = vadd.f32 %v4172_v28, %v3979_v31  ;;  %v6691_v53 = vpop.permute.xlu1 %6690  ;;  %v12996_v62 = vpop.permute.xlu2 %6729  ;;  %v15059_v28 = vld [vmem:[#allocation118_spill] sm:$0xff] }
 0x44e   :  { %v7140_v59 = vperm.slane %v6691_v53, %v12958_v17  ;;  %v2675_v33 = vpop.f32.mrf.mxu1  ;;  %v13002_v4 = vpop.permute.xlu0 %6741  ;;  %2521 = vmatmul.bf16.gmra.mxu0 %v8199_v1  ;;  %2714 = vmatmul.bf16.gmra.mxu1 %v8203_v42  ;;  %v15061_v53 = vld [vmem:[#allocation41_spill] sm:$0xff] }
 0x44f   :  { %15054 = vst [vmem:[#allocation104_spill] sm:$0xff] %v12994_v14  ;;  %v2676_v5 = vadd.f32 %v2675_v33, %v2483_v44 }
 0x450   :  { %v7142_v63 = vsel %vm7141_vm12, %v7140_v59, %v7138_v49 }
 0x451   :  { %v7146_v19 = vsel %vm7145_vm13, %v15056_v22, %v7142_v63  ;;  %4021 = vmatmul.bf16.gmra.mxu2 %v9048_v50  ;;  %4214 = vmatmul.bf16.gmra.mxu3 %v9052_v60  ;;  %v9825_v59 = vpop.eup %9824  ;;  %v5070_v49 = vadd.f32 %v11789_v43, %v2676_v5  ;;  %v8222_v63 = vld [vmem:[%s14734_s3 + $0x610] sm:$0xf]  ;;  %v9362_v22 = vld [vmem:[%s14734_s3 + $0x624] sm:$0xf0]  ;;  %v15063_v5 = vperm.slane %v12642_v2, %v12634_v27  ;;  %v9573_v2 = vld [vmem:[%s14734_s3 + $0xcdc] sm:$0xf] }
 0x452   :  { %v13015_v45 = vsel %vm7149_vm14, %v15057_v37, %v7146_v19  ;;  %v6403_v61 = vmul.f32 %v9825_v59, %v15059_v28  ;;  %v8224_v59 = vld [vmem:[%s14734_s3 + $0x628] sm:$0xf0] }
 0x453   :  { %15058 = vst [vmem:[#allocation88_spill] sm:$0xff] %v13015_v45  ;;  %9826 = vtanh.f32 %v5070_v49  ;;  %v2484_v1 = vpop.f32.mrf.mxu0  ;;  %v9071_v49 = vld [vmem:[%s14734_s3 + $0xcd8] sm:$0xf] }
 0x454   :  { %v3982_v34 = vpop.f32.mrf.mxu2  ;;  %v4175_v31 = vpop.f32.mrf.mxu3  ;;  %6786 = vperm.xlu0 %9728, %v6403_v61   ;;  %v2485_v50 = vadd.f32 %v2484_v1, %v15061_v53  ;;  %v15064_v1 = vld [vmem:[#allocation103_spill] sm:$0xff]  ;;  %v8223_v53 = vor.u32 %v9362_v22, %v8222_v63  ;;  %v15066_v63 = vperm.slane %v12928_v8, %v12872_v56 }
 0x455   :  { %v13019_v6 = vadd.f32 %v4175_v31, %v3982_v34  ;;  %v6700_v52 = vpop.permute.xlu1 %6699  ;;  %v13021_v33 = vpop.permute.xlu2 %6738  ;;  %v9576_v34 = vld [vmem:[%s14734_s3 + $0xcec] sm:$0xf0]  ;;  %v9073_v31 = vld [vmem:[%s14734_s3 + $0xcf0] sm:$0xf0] }
 0x456   :  { %v7151_v60 = vperm.slane %v6700_v52, %v12148_v21  ;;  %v2677_v42 = vpop.f32.mrf.mxu1  ;;  %v9072_v10 = vor.u32 %v9576_v34, %v9071_v49  ;;  %v9076_v39 = vor.u32 %v9573_v2, %v9073_v31 }
 0x457   :  { %15060 = vst [vmem:[#allocation25_spill] sm:$0xff] %v13019_v6  ;;  %v2678_v19 = vadd.f32 %v2677_v42, %v2485_v50  ;;  %v8227_v50 = vor.u32 %v9359_v40, %v8224_v59  ;;  %v15067_v59 = vperm.slane %v12710_v3, %v12704_v20 }
 0x458   :  { %v7153_v44 = vsel %vm7093_vm0, %v15062_v16, %v7151_v60 }
 0x459   :  { %v7155_v37 = vsel %vm7097_vm1, %v15063_v5, %v7153_v44  ;;  %v9827_v28 = vpop.eup %9826  ;;  %v5071_v61 = vadd.f32 %v11789_v43, %v2678_v19  ;;  %v15065_v19 = vld [vmem:[#allocation44_spill] sm:$0xff] }
 0x45a   :  { %v6404_v42 = vmul.f32 %v9827_v28, %v15064_v1 }
 0x45b   :  { %9828 = vtanh.f32 %v5071_v61  ;;  %v2487_v14 = vpop.f32.mrf.mxu0 }
 0x45c   :  { %v3984_v52 = vpop.f32.mrf.mxu2  ;;  %v4177_v60 = vpop.f32.mrf.mxu3  ;;  %6789 = vperm.xlu1 %9733, %v6404_v42   ;;  %v2488_v13 = vadd.f32 %v2487_v14, %v15065_v19 }
 0x45d   :  { %v13061_v16 = vadd.f32 %v4177_v60, %v3984_v52  ;;  %v6709_v44 = vpop.permute.xlu1 %6708  ;;  %v6748_v5 = vpop.permute.xlu2 %6747 }
 0x45e   :  { %v7156_v26 = vperm.slane %v6709_v44, %v12715_v54  ;;  %v7182_v6 = vperm.slane %v6748_v5, %v12148_v21  ;;  %v2680_v45 = vpop.f32.mrf.mxu1  ;;  %2526 = vmatmul.bf16.gmra.mxu0 %v8223_v53  ;;  %2719 = vmatmul.bf16.gmra.mxu1 %v8227_v50  ;;  %v8246_v50 = vld [vmem:[%s14734_s3 + $0x640] sm:$0xf]  ;;  %v9368_v44 = vld [vmem:[%s14734_s3 + $0x654] sm:$0xf0]  ;;  %v15070_v5 = vperm.slane %v12950_v57, %v12890_v25 }
 0x45f   :  { %v2681_v40 = vadd.f32 %v2680_v45, %v2488_v13  ;;  %v15071_v57 = vperm.slane %v12810_v48, %v12772_v9 }
 0x460   :  { %v7157_v28 = vsel %vm7101_vm2, %v7156_v26, %v7155_v37  ;;  %v15068_v37 = vld [vmem:[#allocation30_spill] sm:$0xff] }
 0x461   :  { %v7159_v22 = vsel %vm7105_vm3, %v15066_v63, %v7157_v28  ;;  %4026 = vmatmul.bf16.gmra.mxu2 %v9072_v10  ;;  %4219 = vmatmul.bf16.gmra.mxu3 %v9076_v39  ;;  %v9829_v34 = vpop.eup %9828  ;;  %v5072_v14 = vadd.f32 %v11789_v43, %v2681_v40  ;;  %v15069_v39 = vld [vmem:[#allocation47_spill] sm:$0xff]  ;;  %v9365_v63 = vld [vmem:[%s14734_s3 + $0x644] sm:$0xf]  ;;  %v9095_v40 = vld [vmem:[%s14734_s3 + $0xd08] sm:$0xf] }
 0x462   :  { %v7161_v49 = vsel %vm7109_vm4, %v15067_v59, %v7159_v22  ;;  %v6405_v31 = vmul.f32 %v9829_v34, %v15068_v37  ;;  %v8248_v22 = vld [vmem:[%s14734_s3 + $0x658] sm:$0xf0]  ;;  %v9582_v34 = vld [vmem:[%s14734_s3 + $0xd1c] sm:$0xf0] }
 0x463   :  { %9830 = vtanh.f32 %v5072_v14  ;;  %v2489_v10 = vpop.f32.mrf.mxu0  ;;  %v9579_v14 = vld [vmem:[%s14734_s3 + $0xd0c] sm:$0xf] }
 0x464   :  { %v3987_v2 = vpop.f32.mrf.mxu2  ;;  %v4180_v26 = vpop.f32.mrf.mxu3  ;;  %6792 = vperm.xlu2 %9732, %v6405_v31   ;;  %v2490_v60 = vadd.f32 %v2489_v10, %v15069_v39  ;;  %v9096_v39 = vor.u32 %v9582_v34, %v9095_v40 }
 0x465   :  { %v13077_v61 = vadd.f32 %v4180_v26, %v3987_v2  ;;  %v6718_v8 = vpop.permute.xlu1 %6717  ;;  %v13079_v52 = vpop.permute.xlu2 %6756  ;;  %v9097_v2 = vld [vmem:[%s14734_s3 + $0xd20] sm:$0xf0] }
 0x466   :  { %v7162_v13 = vperm.slane %v6718_v8, %v12289_v18  ;;  %v7187_v3 = vperm.slane %v13079_v52, %v12715_v54  ;;  %v2682_v45 = vpop.f32.mrf.mxu1  ;;  %v6751_v1 = vpop.permute.xlu0 %6750  ;;  %v8247_v8 = vor.u32 %v9368_v44, %v8246_v50  ;;  %v9594_v52 = vld [vmem:[%s14734_s3 + $0xd7c] sm:$0xf0] }
 0x467   :  { %v7183_v53 = vperm.slane %v6751_v1, %v12156_v41  ;;  %v2683_v28 = vadd.f32 %v2682_v45, %v2490_v60  ;;  %v9100_v60 = vor.u32 %v9579_v14, %v9097_v2  ;;  %v15075_v14 = vld [vmem:[#allocation106_spill] sm:$0xff] }
 0x468   :  { %v7163_v42 = vsel %vm7113_vm5, %v7162_v13, %v7161_v49  ;;  %v8251_v13 = vor.u32 %v9365_v63, %v8248_v22  ;;  %v15074_v63 = vperm.slane %v12884_v24, %v12816_v11 }
 0x469   :  { %v7165_v19 = vsel %vm14744_vm6, %v15070_v5, %v7163_v42  ;;  %v13107_v59 = vsel %vm7093_vm0, %v7183_v53, %v7182_v6  ;;  %v9831_v26 = vpop.eup %9830  ;;  %v5073_v6 = vadd.f32 %v11789_v43, %v2683_v28  ;;  %v15072_v5 = vld [vmem:[#allocation49_spill] sm:$0xff] }
 0x46a   :  { %v7167_v49 = vsel %vm7121_vm7, %v15071_v57, %v7165_v19  ;;  %v6406_v48 = vmul.f32 %v9831_v26, %v11728_v29  ;;  %v15073_v29 = vperm.slane %v12996_v62, %v12940_v55 }
 0x46b   :  { %9832 = vtanh.f32 %v5073_v6  ;;  %v2492_v42 = vpop.f32.mrf.mxu0 }
 0x46c   :  { %v3989_v37 = vpop.f32.mrf.mxu2  ;;  %v4182_v31 = vpop.f32.mrf.mxu3  ;;  %6795 = vperm.xlu0 %9728, %v6406_v48   ;;  %v2493_v19 = vadd.f32 %v2492_v42, %v15072_v5  ;;  %v15076_v48 = vld [vmem:[#allocation51_spill] sm:$0xff] }
 0x46d   :  { %v13124_v10 = vadd.f32 %v4182_v31, %v3989_v37  ;;  %v6727_v45 = vpop.permute.xlu1 %6726  ;;  %v9371_v5 = vld [vmem:[%s14734_s3 + $0x674] sm:$0xf] }
 0x46e   :  { %v7168_v1 = vperm.slane %v6727_v45, %v12355_v7  ;;  %v2685_v53 = vpop.f32.mrf.mxu1  ;;  %2531 = vmatmul.bf16.gmra.mxu0 %v8247_v8  ;;  %2724 = vmatmul.bf16.gmra.mxu1 %v8251_v13 }
 0x46f   :  { %v2686_v44 = vadd.f32 %v2685_v53, %v2493_v19  ;;  %v8272_v19 = vld [vmem:[%s14734_s3 + $0x688] sm:$0xf0] }
 0x470   :  { %v7169_v28 = vsel %vm7125_vm8, %v7168_v1, %v7167_v49  ;;  %v15077_v1 = vperm.slane %v13021_v33, %v12958_v17 }
 0x471   :  { %v7171_v50 = vsel %vm7129_vm9, %v15073_v29, %v7169_v28  ;;  %4031 = vmatmul.bf16.gmra.mxu2 %v9096_v39  ;;  %4224 = vmatmul.bf16.gmra.mxu3 %v9100_v60  ;;  %v9833_v40 = vpop.eup %9832  ;;  %v5074_v57 = vadd.f32 %v11789_v43, %v2686_v44  ;;  %v8270_v39 = vld [vmem:[%s14734_s3 + $0x670] sm:$0xf]  ;;  %v9374_v60 = vld [vmem:[%s14734_s3 + $0x684] sm:$0xf0]  ;;  %v9119_v28 = vld [vmem:[%s14734_s3 + $0xd38] sm:$0xf]  ;;  %v15078_v29 = vperm.slane %v13002_v4, %v12829_v32 }
 0x472   :  { %v7173_v22 = vsel %vm14743_vm10, %v15074_v63, %v7171_v50  ;;  %v6407_v2 = vmul.f32 %v9833_v40, %v15075_v14  ;;  %v9588_v50 = vld [vmem:[%s14734_s3 + $0xd4c] sm:$0xf0]  ;;  %v9585_v44 = vld [vmem:[%s14734_s3 + $0xd3c] sm:$0xf]  ;;  %v9121_v63 = vld [vmem:[%s14734_s3 + $0xd50] sm:$0xf0]  ;;  %v8271_v14 = vor.u32 %v9374_v60, %v8270_v39 }
 0x473   :  { %9834 = vtanh.f32 %v5074_v57  ;;  %v2494_v37 = vpop.f32.mrf.mxu0  ;;  %v15079_v4 = vld [vmem:[#allocation123_spill] sm:$0xff] }
 0x474   :  { %v3992_v34 = vpop.f32.mrf.mxu2  ;;  %v4185_v49 = vpop.f32.mrf.mxu3  ;;  %6798 = vperm.xlu1 %9733, %v6407_v2   ;;  %v2495_v24 = vadd.f32 %v2494_v37, %v15076_v48  ;;  %v8275_v2 = vor.u32 %v9371_v5, %v8272_v19  ;;  %v9120_v37 = vor.u32 %v9588_v50, %v9119_v28 }
 0x475   :  { %v13139_v26 = vadd.f32 %v4185_v49, %v3992_v34  ;;  %v6736_v62 = vpop.permute.xlu1 %6735  ;;  %v13143_v8 = vpop.permute.xlu2 %6765 }
 0x476   :  { %v7174_v6 = vperm.slane %v6736_v62, %v12456_v35  ;;  %v2687_v31 = vpop.f32.mrf.mxu1  ;;  %v7193_v45 = vperm.slane %v13143_v8, %v12289_v18  ;;  %v466_v8 = vld [vmem:[%s14734_s3 + $0xd98] sm:$0x11] }
 0x477   :  { %v2688_v53 = vadd.f32 %v2687_v31, %v2495_v24  ;;  %v9124_v31 = vor.u32 %v9585_v44, %v9121_v63  ;;  %v15081_v44 = vld [vmem:[#allocation109_spill] sm:$0xff] }
 0x478   :  { %v7175_v13 = vsel %vm14742_vm11, %v7174_v6, %v7173_v22 }
 0x479   :  { %v7177_v42 = vsel %vm7141_vm12, %v15077_v1, %v7175_v13  ;;  %v9835_v22 = vpop.eup %9834  ;;  %v5075_v40 = vadd.f32 %v11789_v43, %v2688_v53  ;;  %v15080_v1 = vld [vmem:[#allocation54_spill] sm:$0xff] }
 0x47a   :  { %v7179_v33 = vsel %vm7145_vm13, %v15078_v29, %v7177_v42  ;;  %v6408_v49 = vmul.f32 %v9835_v22, %v15079_v4  ;;  %v15082_v4 = vld [vmem:[#allocation58_spill] sm:$0xff] }
 0x47b   :  { %9836 = vtanh.f32 %v5075_v40  ;;  %v2497_v24 = vpop.f32.mrf.mxu0 }
 0x47c   :  { %v3994_v57 = vpop.f32.mrf.mxu2  ;;  %v4187_v34 = vpop.f32.mrf.mxu3  ;;  %6801 = vperm.xlu2 %9732, %v6408_v49   ;;  %v2498_v42 = vadd.f32 %v2497_v24, %v15080_v1  ;;  %v9143_v24 = vld [vmem:[%s14734_s3 + $0xd68] sm:$0xf]  ;;  %v9145_v1 = vld [vmem:[%s14734_s3 + $0xd80] sm:$0xf0] }
 0x47d   :  { %v13182_v62 = vadd.f32 %v4187_v34, %v3994_v57  ;;  %v6745_v6 = vpop.permute.xlu1 %6744 }
 0x47e   :  { %v7180_v48 = vperm.slane %v6745_v6, %v12532_v51  ;;  %v2690_v13 = vpop.f32.mrf.mxu1  ;;  %v6760_v53 = vpop.permute.xlu0 %6759  ;;  %2536 = vmatmul.bf16.gmra.mxu0 %v8271_v14  ;;  %2729 = vmatmul.bf16.gmra.mxu1 %v8275_v2  ;;  %v8294_v2 = vld [vmem:[%s14734_s3 + $0x6a0] sm:$0xf]  ;;  %v9380_v6 = vld [vmem:[%s14734_s3 + $0x6b4] sm:$0xf0] }
 0x47f   :  { %v7189_v39 = vperm.slane %v6760_v53, %v12872_v56  ;;  %v2691_v60 = vadd.f32 %v2690_v13, %v2498_v42 }
 0x480   :  { %v13187_v29 = vsel %vm7149_vm14, %v7180_v48, %v7179_v33  ;;  %v9377_v48 = vld [vmem:[%s14734_s3 + $0x6a4] sm:$0xf] }
 0x481   :  { %4036 = vmatmul.bf16.gmra.mxu2 %v9120_v37  ;;  %4229 = vmatmul.bf16.gmra.mxu3 %v9124_v31  ;;  %v9837_v5 = vpop.eup %9836  ;;  %v5076_v19 = vadd.f32 %v11789_v43, %v2691_v60 }
 0x482   :  { %v6409_v63 = vmul.f32 %v9837_v5, %v15081_v44 }
 0x483   :  { %9838 = vtanh.f32 %v5076_v19  ;;  %v2499_v57 = vpop.f32.mrf.mxu0  ;;  %v15083_v19 = vld [vmem:[#allocation32_spill] sm:$0xff] }
 0x484   :  { %v3997_v28 = vpop.f32.mrf.mxu2  ;;  %v4190_v50 = vpop.f32.mrf.mxu3  ;;  %6804 = vperm.xlu0 %9728, %v6409_v63   ;;  %v2500_v49 = vadd.f32 %v2499_v57, %v15082_v4 }
 0x485   :  { %v13192_v22 = vadd.f32 %v4190_v50, %v3997_v28  ;;  %v6754_v40 = vpop.permute.xlu1 %6753 }
 0x486   :  { %v7185_v33 = vperm.slane %v6754_v40, %v12634_v27  ;;  %v2692_v34 = vpop.f32.mrf.mxu1  ;;  %v9144_v40 = vor.u32 %v9594_v52, %v9143_v24 }
 0x487   :  { %v2693_v31 = vadd.f32 %v2692_v34, %v2500_v49  ;;  %v15084_v49 = vld [vmem:[#allocation62_spill] sm:$0xff] }
 0x488   :  { %v7186_v14 = vsel %vm7097_vm1, %v7185_v33, %v13107_v59  ;;  %v8296_v59 = vld [vmem:[%s14734_s3 + $0x6b8] sm:$0xf0] }
 0x489   :  { %v7188_v37 = vsel %vm7101_vm2, %v7187_v3, %v7186_v14  ;;  %v9591_v3 = vld [vmem:[%s14734_s3 + $0xd6c] sm:$0xf]  ;;  %v9839_v42 = vpop.eup %9838  ;;  %v5077_v53 = vadd.f32 %v11789_v43, %v2693_v31  ;;  %v8299_v50 = vor.u32 %v9377_v48, %v8296_v59 }
 0x48a   :  { %v7190_v13 = vsel %vm7105_vm3, %v7189_v39, %v7188_v37  ;;  %v6410_v28 = vmul.f32 %v9839_v42, %v15083_v19  ;;  %v8295_v39 = vor.u32 %v9380_v6, %v8294_v2  ;;  %v9148_v33 = vor.u32 %v9591_v3, %v9145_v1  ;;  %v15085_v1 = vld [vmem:[#allocation127_spill] sm:$0xff] }
 0x48b   :  { %9840 = vtanh.f32 %v5077_v53  ;;  %v2502_v34 = vpop.f32.mrf.mxu0  ;;  %v249_v53 = vld [vmem:[%s14734_s3 + $0x6d0] sm:$0x11] }
 0x48c   :  { %v3999_v60 = vpop.f32.mrf.mxu2  ;;  %v4192_v5 = vpop.f32.mrf.mxu3  ;;  %6807 = vperm.xlu1 %9733, %v6410_v28   ;;  %v2503_v14 = vadd.f32 %v2502_v34, %v15084_v49 }
 0x48d   :  { %v13229_v44 = vadd.f32 %v4192_v5, %v3999_v60  ;;  %v6763_v63 = vpop.permute.xlu1 %6762 }
 0x48e   :  { %v7191_v57 = vperm.slane %v6763_v63, %v12704_v20  ;;  %v2695_v4 = vpop.f32.mrf.mxu1  ;;  %v6775_v31 = vpop.permute.xlu2 %6774  ;;  %2541 = vmatmul.bf16.gmra.mxu0 %v8295_v39  ;;  %2734 = vmatmul.bf16.gmra.mxu1 %v8299_v50  ;;  %v1127_v50 = vunpack.c.l.b16 %v249_v53  ;;  %v1128_v63 = vunpack.c.h.b16 %v249_v53 }
 0x48f   :  { %v2696_v2 = vadd.f32 %v2695_v4, %v2503_v14  ;;  %v7199_v6 = vperm.slane %v6775_v31, %v12355_v7  ;;  %v15087_v31 = vld [vmem:[#allocation113_spill] sm:$0xff] }
 0x490   :  { %v7192_v37 = vsel %vm7109_vm4, %v7191_v57, %v7190_v13  ;;  %v3396_v57 = vunpack.c.h.b16 %v466_v8 }
 0x491   :  { %4041 = vmatmul.bf16.gmra.mxu2 %v9144_v40  ;;  %4234 = vmatmul.bf16.gmra.mxu3 %v9148_v33  ;;  %v7194_v48 = vsel %vm7113_vm5, %v7193_v45, %v7192_v37  ;;  %v9841_v59 = vpop.eup %9840  ;;  %v5078_v24 = vadd.f32 %v11789_v43, %v2696_v2  ;;  %v15086_v45 = vld [vmem:[#allocation66_spill] sm:$0xff]  ;;  %v3395_v33 = vunpack.c.l.b16 %v466_v8 }
 0x492   :  { %v6411_v13 = vmul.f32 %v9841_v59, %v15085_v1  ;;  %v1349_v59 = vpack.c.b16 %v1127_v50, %v1127_v50  ;;  %v3618_v1 = vpack.c.b16 %v3396_v57, %v3396_v57 }
 0x493   :  { %9842 = vtanh.f32 %v5078_v24  ;;  %v2504_v60 = vpop.f32.mrf.mxu0  ;;  %v1350_v24 = vpack.c.b16 %v1128_v63, %v1128_v63 }
 0x494   :  { %v4002_v52 = vpop.f32.mrf.mxu2  ;;  %v4195_v3 = vpop.f32.mrf.mxu3  ;;  %6810 = vperm.xlu2 %9732, %v6411_v13   ;;  %v2505_v19 = vadd.f32 %v2504_v60, %v15086_v45  ;;  %v15089_v60 = vld [vmem:[#allocation70_spill] sm:$0xff] }
 0x495   :  { %v13241_v42 = vadd.f32 %v4195_v3, %v4002_v52  ;;  %v6769_v28 = vpop.permute.xlu0 %6768  ;;  %v3617_v3 = vpack.c.b16 %v3395_v33, %v3395_v33  ;;  %v15090_v33 = vld [vmem:[#allocation131_spill] sm:$0xff] }
 0x496   :  { %v2697_v5 = vpop.f32.mrf.mxu1  ;;  %v7195_v39 = vperm.slane %v6769_v28, %v12890_v25 }
 0x497   :  { %v2698_v40 = vadd.f32 %v2697_v5, %v2505_v19 }
 0x498   :  { %v7196_v34 = vsel %vm14744_vm6, %v7195_v39, %v7194_v48 }
 0x499   :  { %v9843_v4 = vpop.eup %9842  ;;  %v5079_v49 = vadd.f32 %v11789_v43, %v2698_v40 }
 0x49a   :  { %v6412_v2 = vmul.f32 %v9843_v4, %v15087_v31 }
 0x49b   :  { %9844 = vtanh.f32 %v5079_v49  ;;  %v2507_v13 = vpop.f32.mrf.mxu0 }
 0x49c   :  { %v4004_v14 = vpop.f32.mrf.mxu2  ;;  %v4197_v37 = vpop.f32.mrf.mxu3  ;;  %6813 = vperm.xlu0 %9728, %v6412_v2   ;;  %v2508_v5 = vadd.f32 %v2507_v13, %v15089_v60  ;;  %v8319_v13 = vld [vmem:[%s14734_s3 + $0x6e8] sm:$0xf]  ;;  %v9383_v60 = vld [vmem:[%s14734_s3 + $0x6ec] sm:$0xf] }
 0x49d   :  { %v13254_v52 = vadd.f32 %v4197_v37, %v4004_v14  ;;  %v6772_v48 = vpop.permute.xlu1 %6771  ;;  %v15092_v37 = vld [vmem:[#allocation73_spill] sm:$0xff] }
 0x49e   :  { %v2700_v53 = vpop.f32.mrf.mxu1  ;;  %v7197_v8 = vperm.slane %v6772_v48, %v12772_v9  ;;  %2546 = vmatmul.bf16.gmra.mxu0 %v1349_v59  ;;  %2739 = vmatmul.bf16.gmra.mxu1 %v1350_v24 }
 0x49f   :  { %15088 = vst [vmem:[#allocation84_spill] sm:$0xff] %v13254_v52  ;;  %v2701_v45 = vadd.f32 %v2700_v53, %v2508_v5  ;;  %v9386_v53 = vld [vmem:[%s14734_s3 + $0x6fc] sm:$0xf0]  ;;  %v8321_v5 = vld [vmem:[%s14734_s3 + $0x700] sm:$0xf0] }
 0x4a0   :  { %v7198_v19 = vsel %vm7121_vm7, %v7197_v8, %v7196_v34  ;;  %v8311_v34 = vld [vmem:[%s14734_s3 + $0x6e0] sm:$0xf] }
 0x4a1   :  { %4046 = vmatmul.bf16.gmra.mxu2 %v3617_v3  ;;  %4239 = vmatmul.bf16.gmra.mxu3 %v3618_v1  ;;  %v9845_v28 = vpop.eup %9844  ;;  %v5080_v39 = vadd.f32 %v11789_v43, %v2701_v45  ;;  %v7200_v50 = vsel %vm7125_vm8, %v7199_v6, %v7198_v19  ;;  %v9385_v6 = vld [vmem:[%s14734_s3 + $0x6f4] sm:$0xf0]  ;;  %v9382_v3 = vld [vmem:[%s14734_s3 + $0x6e4] sm:$0xf]  ;;  %v8313_v1 = vld [vmem:[%s14734_s3 + $0x6f8] sm:$0xf0] }
 0x4a2   :  { %v6413_v57 = vmul.f32 %v9845_v28, %v15090_v33  ;;  %v15093_v28 = vld [vmem:[#allocation117_spill] sm:$0xff] }
 0x4a3   :  { %9846 = vtanh.f32 %v5080_v39  ;;  %v2509_v49 = vpop.f32.mrf.mxu0 }
 0x4a4   :  { %v4007_v63 = vpop.f32.mrf.mxu2  ;;  %v4200_v40 = vpop.f32.mrf.mxu3  ;;  %6816 = vperm.xlu1 %9733, %v6413_v57   ;;  %v2510_v31 = vadd.f32 %v2509_v49, %v15092_v37  ;;  %v8320_v57 = vor.u32 %v9386_v53, %v8319_v13  ;;  %v8324_v49 = vor.u32 %v9383_v60, %v8321_v5  ;;  %v15096_v53 = vld [vmem:[#allocation36_spill] sm:$0xff] }
 0x4a5   :  { %v13262_v4 = vadd.f32 %v4200_v40, %v4007_v63  ;;  %v8312_v63 = vor.u32 %v9385_v6, %v8311_v34  ;;  %v8316_v40 = vor.u32 %v9382_v3, %v8313_v1 }
 0x4a6   :  { %v2702_v14 = vpop.f32.mrf.mxu1  ;;  %v13265_v2 = vpop.permute.xlu2 %6783 }
 0x4a7   :  { %15091 = vst [vmem:[#allocation26_spill] sm:$0xff] %v13262_v4  ;;  %v2703_v59 = vadd.f32 %v2702_v14, %v2510_v31  ;;  %v7205_v24 = vperm.slane %v13265_v2, %v12456_v35  ;;  %v15095_v31 = vld [vmem:[#allocation76_spill] sm:$0xff] }
 0x4a9   :  { %v9847_v48 = vpop.eup %9846  ;;  %v5081_v8 = vadd.f32 %v11789_v43, %v2703_v59 }
 0x4aa   :  { %v6414_v39 = vmul.f32 %v9847_v48, %v15093_v28  ;;  %v8335_v28 = vld [vmem:[%s14734_s3 + $0x710] sm:$0xf] }
 0x4ab   :  { %9848 = vtanh.f32 %v5081_v8  ;;  %v2512_v14 = vpop.f32.mrf.mxu0 }
 0x4ac   :  { %v4009_v45 = vpop.f32.mrf.mxu2  ;;  %v4202_v19 = vpop.f32.mrf.mxu3  ;;  %6819 = vperm.xlu2 %9732, %v6414_v39   ;;  %v2513_v2 = vadd.f32 %v2512_v14, %v15095_v31  ;;  %v9389_v14 = vld [vmem:[%s14734_s3 + $0x71c] sm:$0xf] }
 0x4ad   :  { %v13295_v33 = vadd.f32 %v4202_v19, %v4009_v45  ;;  %v15098_v45 = vld [vmem:[#allocation78_spill] sm:$0xff] }
 0x4ae   :  { %v2705_v37 = vpop.f32.mrf.mxu1  ;;  %v6778_v4 = vpop.permute.xlu0 %6777  ;;  %4252 = vmatmul.bf16.vlgmr.msra.gmra.mxu0 %v8312_v63  ;;  %4445 = vmatmul.bf16.vlgmr.msra.gmra.mxu1 %v8316_v40  ;;  %v9388_v63 = vld [vmem:[%s14734_s3 + $0x714] sm:$0xf]  ;;  %v8337_v40 = vld [vmem:[%s14734_s3 + $0x728] sm:$0xf0] }
 0x4af   :  { %15094 = vst [vmem:[#allocation107_spill] sm:$0xff] %v13295_v33  ;;  %v2706_v59 = vadd.f32 %v2705_v37, %v2513_v2  ;;  %v7201_v52 = vperm.slane %v6778_v4, %v12940_v55  ;;  %v8345_v37 = vld [vmem:[%s14734_s3 + $0x730] sm:$0xf0] }
 0x4b1   :  { %4638 = vmatmul.bf16.vlgmr.msra.gmra.mxu2 %v8320_v57  ;;  %4831 = vmatmul.bf16.vlgmr.msra.gmra.mxu3 %v8324_v49  ;;  %v9849_v34 = vpop.eup %9848  ;;  %v5082_v6 = vadd.f32 %v11789_v43, %v2706_v59  ;;  %v7202_v3 = vsel %vm7129_vm9, %v7201_v52, %v7200_v50  ;;  %v9391_v52 = vld [vmem:[%s14734_s3 + $0x724] sm:$0xf0]  ;;  %v8343_v57 = vld [vmem:[%s14734_s3 + $0x718] sm:$0xf]  ;;  %v9392_v49 = vld [vmem:[%s14734_s3 + $0x72c] sm:$0xf0] }
 0x4b2   :  { %v6415_v60 = vmul.f32 %v9849_v34, %v15096_v53  ;;  %v8340_v53 = vor.u32 %v9388_v63, %v8337_v40  ;;  %v15100_v63 = vld [vmem:[#allocation120_spill] sm:$0xff] }
 0x4b3   :  { %9850 = vtanh.f32 %v5082_v6  ;;  %v2514_v48 = vpop.f32.mrf.mxu0 }
 0x4b4   :  { %v4012_v1 = vpop.f32.mrf.mxu2  ;;  %v4205_v13 = vpop.f32.mrf.mxu3  ;;  %6822 = vperm.xlu0 %9728, %v6415_v60   ;;  %v2515_v19 = vadd.f32 %v2514_v48, %v15098_v45  ;;  %v8348_v45 = vor.u32 %v9389_v14, %v8345_v37  ;;  %v15102_v14 = vld [vmem:[#allocation86_spill] sm:$0xff] }
 0x4b5   :  { %v13302_v5 = vadd.f32 %v4205_v13, %v4012_v1  ;;  %v8336_v13 = vor.u32 %v9391_v52, %v8335_v28 }
 0x4b6   :  { %v2707_v8 = vpop.f32.mrf.mxu1 }
 0x4b7   :  { %15097 = vst [vmem:[#allocation27_spill] sm:$0xff] %v13302_v5  ;;  %v6781_v4 = vpop.permute.xlu1 %6780  ;;  %v2708_v50 = vadd.f32 %v2707_v8, %v2515_v19  ;;  %v8344_v8 = vor.u32 %v9392_v49, %v8343_v57  ;;  %v15099_v5 = vld [vmem:[#allocation82_spill] sm:$0xff] }
 0x4b8   :  { %v7203_v39 = vperm.slane %v6781_v4, %v12816_v11 }
 0x4b9   :  { %v9851_v31 = vpop.eup %9850  ;;  %v5083_v2 = vadd.f32 %v11789_v43, %v2708_v50 }
 0x4ba   :  { %v7204_v59 = vsel %vm14743_vm10, %v7203_v39, %v7202_v3  ;;  %v6416_v1 = vmul.f32 %v9851_v31, %v11823_v58 }
 0x4bb   :  { %v7206_v60 = vsel %vm14742_vm11, %v7205_v24, %v7204_v59  ;;  %9852 = vtanh.f32 %v5083_v2  ;;  %v2517_v19 = vpop.f32.mrf.mxu0  ;;  %v9397_v2 = vld [vmem:[%s14734_s3 + $0x754] sm:$0xf0] }
 0x4bc   :  { %v4014_v34 = vpop.f32.mrf.mxu2  ;;  %v4207_v6 = vpop.f32.mrf.mxu3  ;;  %6825 = vperm.xlu1 %9733, %v6416_v1   ;;  %v2518_v50 = vadd.f32 %v2517_v19, %v15099_v5  ;;  %v8361_v1 = vld [vmem:[%s14734_s3 + $0x758] sm:$0xf0] }
 0x4bd   :  { %v13334_v48 = vadd.f32 %v4207_v6, %v4014_v34  ;;  %v9394_v6 = vld [vmem:[%s14734_s3 + $0x744] sm:$0xf] }
 0x4be   :  { %v2710_v4 = vpop.f32.mrf.mxu1  ;;  %v6793_v33 = vpop.permute.xlu2 %6792  ;;  %4257 = vmatmul.bf16.gmra.mxu0 %v8336_v13  ;;  %4450 = vmatmul.bf16.gmra.mxu1 %v8340_v53  ;;  %v8367_v13 = vld [vmem:[%s14734_s3 + $0x748] sm:$0xf]  ;;  %v9398_v53 = vld [vmem:[%s14734_s3 + $0x75c] sm:$0xf0] }
 0x4bf   :  { %v2711_v3 = vadd.f32 %v2710_v4, %v2518_v50  ;;  %v7211_v58 = vperm.slane %v6793_v33, %v12532_v51  ;;  %v8359_v33 = vld [vmem:[%s14734_s3 + $0x740] sm:$0xf] }
 0x4c1   :  { %4643 = vmatmul.bf16.gmra.mxu2 %v8344_v8  ;;  %4836 = vmatmul.bf16.gmra.mxu3 %v8348_v45  ;;  %v9853_v28 = vpop.eup %9852  ;;  %v5084_v24 = vadd.f32 %v11789_v43, %v2711_v3  ;;  %v9395_v8 = vld [vmem:[%s14734_s3 + $0x74c] sm:$0xf]  ;;  %v8369_v45 = vld [vmem:[%s14734_s3 + $0x760] sm:$0xf0] }
 0x4c2   :  { %v6417_v40 = vmul.f32 %v9853_v28, %v15100_v63 }
 0x4c3   :  { %9854 = vtanh.f32 %v5084_v24  ;;  %v2519_v49 = vpop.f32.mrf.mxu0 }
 0x4c4   :  { %v4017_v52 = vpop.f32.mrf.mxu2  ;;  %v4210_v39 = vpop.f32.mrf.mxu3  ;;  %6828 = vperm.xlu2 %9732, %v6417_v40   ;;  %v2520_v37 = vadd.f32 %v2519_v49, %v15102_v14  ;;  %v8368_v40 = vor.u32 %v9398_v53, %v8367_v13  ;;  %v8372_v49 = vor.u32 %v9395_v8, %v8369_v45  ;;  %v15106_v13 = vld [vmem:[#allocation122_spill] sm:$0xff] }
 0x4c5   :  { %v13340_v57 = vadd.f32 %v4210_v39, %v4017_v52  ;;  %v8360_v52 = vor.u32 %v9397_v2, %v8359_v33  ;;  %v8364_v39 = vor.u32 %v9394_v6, %v8361_v1 }
 0x4c6   :  { %v2712_v5 = vpop.f32.mrf.mxu1  ;;  %v6787_v31 = vpop.permute.xlu0 %6786 }
 0x4c7   :  { %15101 = vst [vmem:[#allocation91_spill] sm:$0xff] %v13340_v57  ;;  %v2713_v59 = vadd.f32 %v2712_v5, %v2520_v37  ;;  %v7207_v34 = vperm.slane %v6787_v31, %v12958_v17  ;;  %v15104_v37 = vld [vmem:[#allocation90_spill] sm:$0xff] }
 0x4c9   :  { %v9855_v19 = vpop.eup %9854  ;;  %v5085_v4 = vadd.f32 %v11789_v43, %v2713_v59  ;;  %v7208_v50 = vsel %vm7141_vm12, %v7207_v34, %v7206_v60 }
 0x4ca   :  { %v6418_v24 = vmul.f32 %v9855_v19, %v11835_v15 }
 0x4cb   :  { %9856 = vtanh.f32 %v5085_v4  ;;  %v2522_v5 = vpop.f32.mrf.mxu0 }
 0x4cc   :  { %v4019_v3 = vpop.f32.mrf.mxu2  ;;  %v4212_v28 = vpop.f32.mrf.mxu3  ;;  %6831 = vperm.xlu0 %9728, %v6418_v24   ;;  %v2523_v31 = vadd.f32 %v2522_v5, %v15104_v37  ;;  %v9401_v5 = vld [vmem:[%s14734_s3 + $0x77c] sm:$0xf] }
 0x4cd   :  { %v13371_v63 = vadd.f32 %v4212_v28, %v4019_v3 }
 0x4ce   :  { %v2715_v14 = vpop.f32.mrf.mxu1  ;;  %v6790_v57 = vpop.permute.xlu1 %6789  ;;  %4262 = vmatmul.bf16.gmra.mxu0 %v8360_v52  ;;  %4455 = vmatmul.bf16.gmra.mxu1 %v8364_v39  ;;  %v9400_v52 = vld [vmem:[%s14734_s3 + $0x774] sm:$0xf]  ;;  %v8385_v39 = vld [vmem:[%s14734_s3 + $0x788] sm:$0xf0] }
 0x4cf   :  { %15103 = vst [vmem:[#allocation29_spill] sm:$0xff] %v13371_v63  ;;  %v2716_v60 = vadd.f32 %v2715_v14, %v2523_v31  ;;  %v7209_v59 = vperm.slane %v6790_v57, %v12829_v32  ;;  %v15108_v57 = vld [vmem:[#allocation93_spill] sm:$0xff]  ;;  %v8393_v14 = vld [vmem:[%s14734_s3 + $0x790] sm:$0xf0] }
 0x4d1   :  { %4648 = vmatmul.bf16.gmra.mxu2 %v8368_v40  ;;  %4841 = vmatmul.bf16.gmra.mxu3 %v8372_v49  ;;  %v9857_v15 = vpop.eup %9856  ;;  %v5086_v33 = vadd.f32 %v11789_v43, %v2716_v60  ;;  %v7210_v2 = vsel %vm7145_vm13, %v7209_v59, %v7208_v50  ;;  %v8383_v50 = vld [vmem:[%s14734_s3 + $0x770] sm:$0xf]  ;;  %v8391_v40 = vld [vmem:[%s14734_s3 + $0x778] sm:$0xf] }
 0x4d2   :  { %v13378_v34 = vsel %vm7149_vm14, %v7211_v58, %v7210_v2  ;;  %v6419_v53 = vmul.f32 %v9857_v15, %v15106_v13  ;;  %v9403_v58 = vld [vmem:[%s14734_s3 + $0x784] sm:$0xf0]  ;;  %v9404_v49 = vld [vmem:[%s14734_s3 + $0x78c] sm:$0xf0]  ;;  %v15109_v15 = vld [vmem:[#allocation40_spill] sm:$0xff] }
 0x4d3   :  { %15105 = vst [vmem:[#allocation110_spill] sm:$0xff] %v13378_v34  ;;  %9858 = vtanh.f32 %v5086_v33  ;;  %v2524_v45 = vpop.f32.mrf.mxu0  ;;  %v8384_v2 = vor.u32 %v9403_v58, %v8383_v50  ;;  %v8392_v13 = vor.u32 %v9404_v49, %v8391_v40 }
 0x4d4   :  { %v4022_v6 = vpop.f32.mrf.mxu2  ;;  %v4215_v1 = vpop.f32.mrf.mxu3  ;;  %6834 = vperm.xlu1 %9733, %v6419_v53   ;;  %v2525_v4 = vadd.f32 %v2524_v45, %v15108_v57  ;;  %v8396_v53 = vor.u32 %v9401_v5, %v8393_v14  ;;  %v15111_v57 = vld [vmem:[#allocation97_spill] sm:$0xff] }
 0x4d5   :  { %v13381_v8 = vadd.f32 %v4215_v1, %v4022_v6  ;;  %v8388_v6 = vor.u32 %v9400_v52, %v8385_v39 }
 0x4d6   :  { %v2717_v19 = vpop.f32.mrf.mxu1  ;;  %v13384_v3 = vpop.permute.xlu2 %6801 }
 0x4d7   :  { %15107 = vst [vmem:[#allocation31_spill] sm:$0xff] %v13381_v8  ;;  %v2718_v28 = vadd.f32 %v2717_v19, %v2525_v4  ;;  %v7216_v24 = vperm.slane %v13384_v3, %v12634_v27 }
 0x4d9   :  { %v9859_v37 = vpop.eup %9858  ;;  %v5087_v31 = vadd.f32 %v11789_v43, %v2718_v28 }
 0x4da   :  { %v6420_v33 = vmul.f32 %v9859_v37, %v15109_v15  ;;  %v15113_v37 = vld [vmem:[#allocation101_spill] sm:$0xff]  ;;  %v9409_v15 = vld [vmem:[%s14734_s3 + $0x7b4] sm:$0xf0] }
 0x4db   :  { %9860 = vtanh.f32 %v5087_v31  ;;  %v2527_v45 = vpop.f32.mrf.mxu0 }
 0x4dc   :  { %v4024_v60 = vpop.f32.mrf.mxu2  ;;  %v4217_v59 = vpop.f32.mrf.mxu3  ;;  %6837 = vperm.xlu2 %9732, %v6420_v33   ;;  %v2528_v4 = vadd.f32 %v2527_v45, %v15111_v57  ;;  %v9407_v45 = vld [vmem:[%s14734_s3 + $0x7ac] sm:$0xf] }
 0x4dd   :  { %v13414_v1 = vadd.f32 %v4217_v59, %v4024_v60  ;;  %v8407_v59 = vld [vmem:[%s14734_s3 + $0x7a0] sm:$0xf] }
 0x4de   :  { %v2720_v19 = vpop.f32.mrf.mxu1  ;;  %v6796_v3 = vpop.permute.xlu0 %6795  ;;  %4267 = vmatmul.bf16.gmra.mxu0 %v8384_v2  ;;  %4460 = vmatmul.bf16.gmra.mxu1 %v8388_v6  ;;  %v9406_v2 = vld [vmem:[%s14734_s3 + $0x7a4] sm:$0xf]  ;;  %v8409_v6 = vld [vmem:[%s14734_s3 + $0x7b8] sm:$0xf0] }
 0x4df   :  { %15110 = vst [vmem:[#allocation95_spill] sm:$0xff] %v13414_v1  ;;  %v2721_v28 = vadd.f32 %v2720_v19, %v2528_v4  ;;  %v7213_v34 = vperm.slane %v6796_v3, %v12148_v21  ;;  %v8417_v19 = vld [vmem:[%s14734_s3 + $0x7c0] sm:$0xf0] }
 0x4e0   :  { %v15116_v1 = vld [vmem:[#allocation105_spill] sm:$0xff] }
 0x4e1   :  { %4653 = vmatmul.bf16.gmra.mxu2 %v8392_v13  ;;  %4846 = vmatmul.bf16.gmra.mxu3 %v8396_v53  ;;  %v9861_v50 = vpop.eup %9860  ;;  %v5088_v58 = vadd.f32 %v11789_v43, %v2721_v28  ;;  %v8415_v13 = vld [vmem:[%s14734_s3 + $0x7a8] sm:$0xf]  ;;  %v9410_v53 = vld [vmem:[%s14734_s3 + $0x7bc] sm:$0xf0] }
 0x4e2   :  { %v6421_v40 = vmul.f32 %v9861_v50, %v11870_v12 }
 0x4e3   :  { %9862 = vtanh.f32 %v5088_v58  ;;  %v2529_v5 = vpop.f32.mrf.mxu0  ;;  %v15114_v58 = vld [vmem:[#allocation126_spill] sm:$0xff] }
 0x4e4   :  { %v4027_v52 = vpop.f32.mrf.mxu2  ;;  %v4220_v39 = vpop.f32.mrf.mxu3  ;;  %6840 = vperm.xlu0 %9728, %v6421_v40   ;;  %v2530_v31 = vadd.f32 %v2529_v5, %v15113_v37  ;;  %v8412_v40 = vor.u32 %v9406_v2, %v8409_v6  ;;  %v8416_v37 = vor.u32 %v9410_v53, %v8415_v13  ;;  %v15117_v6 = vld [vmem:[#allocation140_spill] sm:$0xff] }
 0x4e5   :  { %v13420_v49 = vadd.f32 %v4220_v39, %v4027_v52  ;;  %v8408_v39 = vor.u32 %v9409_v15, %v8407_v59 }
 0x4e6   :  { %v2722_v14 = vpop.f32.mrf.mxu1  ;;  %v6799_v60 = vpop.permute.xlu1 %6798 }
 0x4e7   :  { %15112 = vst [vmem:[#allocation33_spill] sm:$0xff] %v13420_v49  ;;  %v2723_v33 = vadd.f32 %v2722_v14, %v2530_v31  ;;  %v7214_v12 = vperm.slane %v6799_v60, %v12156_v41  ;;  %v8420_v31 = vor.u32 %v9407_v45, %v8417_v19  ;;  %v15119_v19 = vld [vmem:[#allocation108_spill] sm:$0xff] }
 0x4e9   :  { %v9863_v57 = vpop.eup %9862  ;;  %v5089_v4 = vadd.f32 %v11789_v43, %v2723_v33  ;;  %v7215_v3 = vsel %vm7093_vm0, %v7214_v12, %v7213_v34 }
 0x4ea   :  { %v6422_v52 = vmul.f32 %v9863_v57, %v15114_v58  ;;  %v7217_v5 = vsel %vm7097_vm1, %v7216_v24, %v7215_v3  ;;  %v8433_v58 = vld [vmem:[%s14734_s3 + $0x7e8] sm:$0xf0] }
 0x4eb   :  { %9864 = vtanh.f32 %v5089_v4  ;;  %v2532_v60 = vpop.f32.mrf.mxu0  ;;  %v9415_v4 = vld [vmem:[%s14734_s3 + $0x7e4] sm:$0xf0] }
 0x4ec   :  { %v4029_v28 = vpop.f32.mrf.mxu2  ;;  %v4222_v50 = vpop.f32.mrf.mxu3  ;;  %6843 = vperm.xlu1 %9733, %v6422_v52   ;;  %v2533_v33 = vadd.f32 %v2532_v60, %v15116_v1  ;;  %v8439_v52 = vld [vmem:[%s14734_s3 + $0x7d8] sm:$0xf] }
 0x4ed   :  { %v13452_v14 = vadd.f32 %v4222_v50, %v4029_v28  ;;  %v9412_v50 = vld [vmem:[%s14734_s3 + $0x7d4] sm:$0xf] }
 0x4ee   :  { %v2725_v49 = vpop.f32.mrf.mxu1  ;;  %v6811_v8 = vpop.permute.xlu2 %6810  ;;  %4272 = vmatmul.bf16.gmra.mxu0 %v8408_v39  ;;  %4465 = vmatmul.bf16.gmra.mxu1 %v8412_v40  ;;  %v9416_v39 = vld [vmem:[%s14734_s3 + $0x7ec] sm:$0xf0]  ;;  %v9413_v40 = vld [vmem:[%s14734_s3 + $0x7dc] sm:$0xf] }
 0x4ef   :  { %15115 = vst [vmem:[#allocation28_spill] sm:$0xff] %v13452_v14  ;;  %v2726_v34 = vadd.f32 %v2725_v49, %v2533_v33  ;;  %v7222_v12 = vperm.slane %v6811_v8, %v12704_v20  ;;  %v8431_v8 = vld [vmem:[%s14734_s3 + $0x7d0] sm:$0xf] }
 0x4f1   :  { %4658 = vmatmul.bf16.gmra.mxu2 %v8416_v37  ;;  %4851 = vmatmul.bf16.gmra.mxu3 %v8420_v31  ;;  %v9865_v59 = vpop.eup %9864  ;;  %v5090_v24 = vadd.f32 %v11789_v43, %v2726_v34  ;;  %v8441_v37 = vld [vmem:[%s14734_s3 + $0x7f0] sm:$0xf0] }
 0x4f2   :  { %v6423_v13 = vmul.f32 %v9865_v59, %v15117_v6  ;;  %v8436_v6 = vor.u32 %v9412_v50, %v8433_v58 }
 0x4f3   :  { %9866 = vtanh.f32 %v5090_v24  ;;  %v2534_v45 = vpop.f32.mrf.mxu0  ;;  %v15120_v24 = vld [vmem:[#allocation130_spill] sm:$0xff] }
 0x4f4   :  { %v4032_v15 = vpop.f32.mrf.mxu2  ;;  %v4225_v2 = vpop.f32.mrf.mxu3  ;;  %6846 = vperm.xlu2 %9732, %v6423_v13   ;;  %v2535_v57 = vadd.f32 %v2534_v45, %v15119_v19  ;;  %v8440_v45 = vor.u32 %v9416_v39, %v8439_v52  ;;  %v15123_v52 = vld [vmem:[#allocation45_spill] sm:$0xff] }
 0x4f5   :  { %v13458_v53 = vadd.f32 %v4225_v2, %v4032_v15  ;;  %v8432_v2 = vor.u32 %v9415_v4, %v8431_v8 }
 0x4f6   :  { %v2727_v1 = vpop.f32.mrf.mxu1  ;;  %v6805_v49 = vpop.permute.xlu0 %6804 }
 0x4f7   :  { %15118 = vst [vmem:[#allocation35_spill] sm:$0xff] %v13458_v53  ;;  %v2728_v3 = vadd.f32 %v2727_v1, %v2535_v57  ;;  %v7218_v28 = vperm.slane %v6805_v49, %v12715_v54  ;;  %v8444_v1 = vor.u32 %v9413_v40, %v8441_v37  ;;  %v15122_v49 = vld [vmem:[#allocation111_spill] sm:$0xff] }
 0x4f9   :  { %v9867_v31 = vpop.eup %9866  ;;  %v5091_v60 = vadd.f32 %v11789_v43, %v2728_v3  ;;  %v7219_v33 = vsel %vm7101_vm2, %v7218_v28, %v7217_v5 }
 0x4fa   :  { %v6424_v15 = vmul.f32 %v9867_v31, %v15120_v24 }
 0x4fb   :  { %9868 = vtanh.f32 %v5091_v60  ;;  %v2537_v19 = vpop.f32.mrf.mxu0 }
 0x4fc   :  { %v4034_v34 = vpop.f32.mrf.mxu2  ;;  %v4227_v59 = vpop.f32.mrf.mxu3  ;;  %6849 = vperm.xlu0 %9728, %v6424_v15   ;;  %v2538_v53 = vadd.f32 %v2537_v19, %v15122_v49  ;;  %v9418_v15 = vld [vmem:[%s14734_s3 + $0x804] sm:$0xf] }
 0x4fd   :  { %v13489_v13 = vadd.f32 %v4227_v59, %v4034_v34  ;;  %v9421_v59 = vld [vmem:[%s14734_s3 + $0x814] sm:$0xf0]  ;;  %v8465_v19 = vld [vmem:[%s14734_s3 + $0x820] sm:$0xf0] }
 0x4fe   :  { %v2730_v57 = vpop.f32.mrf.mxu1  ;;  %v6808_v14 = vpop.permute.xlu1 %6807  ;;  %4277 = vmatmul.bf16.gmra.mxu0 %v8432_v2  ;;  %4470 = vmatmul.bf16.gmra.mxu1 %v8436_v6  ;;  %v8457_v2 = vld [vmem:[%s14734_s3 + $0x818] sm:$0xf0]  ;;  %v8463_v6 = vld [vmem:[%s14734_s3 + $0x808] sm:$0xf] }
 0x4ff   :  { %15121 = vst [vmem:[#allocation114_spill] sm:$0xff] %v13489_v13  ;;  %v2731_v5 = vadd.f32 %v2730_v57, %v2538_v53  ;;  %v7220_v3 = vperm.slane %v6808_v14, %v12872_v56  ;;  %v15125_v14 = vld [vmem:[#allocation115_spill] sm:$0xff] }
 0x501   :  { %4663 = vmatmul.bf16.gmra.mxu2 %v8440_v45  ;;  %4856 = vmatmul.bf16.gmra.mxu3 %v8444_v1  ;;  %v9869_v8 = vpop.eup %9868  ;;  %v5092_v4 = vadd.f32 %v11789_v43, %v2731_v5  ;;  %v7221_v28 = vsel %vm7105_vm3, %v7220_v3, %v7219_v33  ;;  %v8455_v33 = vld [vmem:[%s14734_s3 + $0x800] sm:$0xf]  ;;  %v9419_v1 = vld [vmem:[%s14734_s3 + $0x80c] sm:$0xf] }
 0x502   :  { %v6425_v39 = vmul.f32 %v9869_v8, %v15123_v52  ;;  %v7223_v40 = vsel %vm7109_vm4, %v7222_v12, %v7221_v28  ;;  %v9422_v45 = vld [vmem:[%s14734_s3 + $0x81c] sm:$0xf0]  ;;  %v15126_v8 = vld [vmem:[#allocation143_spill] sm:$0xff]  ;;  %v8456_v28 = vor.u32 %v9421_v59, %v8455_v33 }
 0x503   :  { %9870 = vtanh.f32 %v5092_v4  ;;  %v2539_v31 = vpop.f32.mrf.mxu0  ;;  %v8464_v52 = vor.u32 %v9422_v45, %v8463_v6  ;;  %v15129_v45 = vld [vmem:[#allocation133_spill] sm:$0xff] }
 0x504   :  { %v4037_v50 = vpop.f32.mrf.mxu2  ;;  %v4230_v58 = vpop.f32.mrf.mxu3  ;;  %6852 = vperm.xlu1 %9733, %v6425_v39   ;;  %v2540_v60 = vadd.f32 %v2539_v31, %v15125_v14  ;;  %v8468_v39 = vor.u32 %v9419_v1, %v8465_v19  ;;  %v15128_v14 = vld [vmem:[#allocation119_spill] sm:$0xff] }
 0x505   :  { %v13497_v37 = vadd.f32 %v4230_v58, %v4037_v50  ;;  %v8460_v50 = vor.u32 %v9418_v15, %v8457_v2 }
 0x506   :  { %v2732_v53 = vpop.f32.mrf.mxu1  ;;  %v13500_v34 = vpop.permute.xlu2 %6819 }
 0x507   :  { %15124 = vst [vmem:[#allocation37_spill] sm:$0xff] %v13497_v37  ;;  %v2733_v24 = vadd.f32 %v2732_v53, %v2540_v60  ;;  %v7228_v12 = vperm.slane %v13500_v34, %v12772_v9 }
 0x509   :  { %v9871_v57 = vpop.eup %9870  ;;  %v5093_v49 = vadd.f32 %v11789_v43, %v2733_v24 }
 0x50a   :  { %v6426_v4 = vmul.f32 %v9871_v57, %v15126_v8 }
 0x50b   :  { %9872 = vtanh.f32 %v5093_v49  ;;  %v2542_v31 = vpop.f32.mrf.mxu0 }
 0x50c   :  { %v4039_v5 = vpop.f32.mrf.mxu2  ;;  %v4232_v3 = vpop.f32.mrf.mxu3  ;;  %6855 = vperm.xlu2 %9732, %v6426_v4   ;;  %v2543_v60 = vadd.f32 %v2542_v31, %v15128_v14  ;;  %v8479_v4 = vld [vmem:[%s14734_s3 + $0x830] sm:$0xf]  ;;  %v8489_v14 = vld [vmem:[%s14734_s3 + $0x850] sm:$0xf0] }
 0x50d   :  { %v13530_v58 = vadd.f32 %v4232_v3, %v4039_v5  ;;  %v15131_v5 = vld [vmem:[#allocation121_spill] sm:$0xff]  ;;  %v9428_v31 = vld [vmem:[%s14734_s3 + $0x84c] sm:$0xf0] }
 0x50e   :  { %v2735_v53 = vpop.f32.mrf.mxu1  ;;  %v6814_v34 = vpop.permute.xlu0 %6813  ;;  %4282 = vmatmul.bf16.gmra.mxu0 %v8456_v28  ;;  %4475 = vmatmul.bf16.gmra.mxu1 %v8460_v50  ;;  %v9424_v50 = vld [vmem:[%s14734_s3 + $0x834] sm:$0xf] }
 0x50f   :  { %15127 = vst [vmem:[#allocation99_spill] sm:$0xff] %v13530_v58  ;;  %v2736_v24 = vadd.f32 %v2735_v53, %v2543_v60  ;;  %v7224_v37 = vperm.slane %v6814_v34, %v12289_v18  ;;  %v9425_v53 = vld [vmem:[%s14734_s3 + $0x83c] sm:$0xf] }
 0x510   :  { %v15134_v58 = vld [vmem:[#allocation124_spill] sm:$0xff] }
 0x511   :  { %4668 = vmatmul.bf16.gmra.mxu2 %v8464_v52  ;;  %4861 = vmatmul.bf16.gmra.mxu3 %v8468_v39  ;;  %v9873_v33 = vpop.eup %9872  ;;  %v5094_v59 = vadd.f32 %v11789_v43, %v2736_v24  ;;  %v7225_v15 = vsel %vm7113_vm5, %v7224_v37, %v7223_v40  ;;  %v9427_v40 = vld [vmem:[%s14734_s3 + $0x844] sm:$0xf0]  ;;  %v8481_v52 = vld [vmem:[%s14734_s3 + $0x848] sm:$0xf0]  ;;  %v8487_v39 = vld [vmem:[%s14734_s3 + $0x838] sm:$0xf] }
 0x512   :  { %v6427_v1 = vmul.f32 %v9873_v33, %v15129_v45  ;;  %v8480_v45 = vor.u32 %v9427_v40, %v8479_v4 }
 0x513   :  { %9874 = vtanh.f32 %v5094_v59  ;;  %v2544_v57 = vpop.f32.mrf.mxu0 }
 0x514   :  { %v4042_v2 = vpop.f32.mrf.mxu2  ;;  %v4235_v6 = vpop.f32.mrf.mxu3  ;;  %6858 = vperm.xlu0 %9728, %v6427_v1   ;;  %v2545_v3 = vadd.f32 %v2544_v57, %v15131_v5  ;;  %v8484_v1 = vor.u32 %v9424_v50, %v8481_v52  ;;  %v8488_v5 = vor.u32 %v9428_v31, %v8487_v39  ;;  %v15135_v52 = vld [vmem:[#allocation135_spill] sm:$0xff] }
 0x515   :  { %v13537_v19 = vadd.f32 %v4235_v6, %v4042_v2  ;;  %v15132_v2 = vld [vmem:[#allocation146_spill] sm:$0xff] }
 0x516   :  { %v2737_v49 = vpop.f32.mrf.mxu1  ;;  %v6817_v8 = vpop.permute.xlu1 %6816 }
 0x517   :  { %15130 = vst [vmem:[#allocation39_spill] sm:$0xff] %v13537_v19  ;;  %v2738_v37 = vadd.f32 %v2737_v49, %v2545_v3  ;;  %v7226_v28 = vperm.slane %v6817_v8, %v12890_v25  ;;  %v8492_v3 = vor.u32 %v9425_v53, %v8489_v14 }
 0x519   :  { %v9875_v60 = vpop.eup %9874  ;;  %v5095_v34 = vadd.f32 %v11789_v43, %v2738_v37  ;;  %v7227_v24 = vsel %vm14744_vm6, %v7226_v28, %v7225_v15 }
 0x51a   :  { %v6428_v6 = vmul.f32 %v9875_v60, %v15132_v2  ;;  %v7229_v57 = vsel %vm7121_vm7, %v7228_v12, %v7227_v24  ;;  %v9430_v60 = vld [vmem:[%s14734_s3 + $0x864] sm:$0xf]  ;;  %v8511_v24 = vld [vmem:[%s14734_s3 + $0x868] sm:$0xf] }
 0x51b   :  { %9876 = vtanh.f32 %v5095_v34  ;;  %v2547_v8 = vpop.f32.mrf.mxu0  ;;  %v8505_v34 = vld [vmem:[%s14734_s3 + $0x878] sm:$0xf0]  ;;  %v8513_v2 = vld [vmem:[%s14734_s3 + $0x880] sm:$0xf0] }
 0x51c   :  { %v4044_v33 = vpop.f32.mrf.mxu2  ;;  %v4237_v59 = vpop.f32.mrf.mxu3  ;;  %6861 = vperm.xlu1 %9733, %v6428_v6   ;;  %v2548_v37 = vadd.f32 %v2547_v8, %v15134_v58 }
 0x51d   :  { %v13569_v49 = vadd.f32 %v4237_v59, %v4044_v33  ;;  %v9434_v33 = vld [vmem:[%s14734_s3 + $0x87c] sm:$0xf0]  ;;  %v9431_v59 = vld [vmem:[%s14734_s3 + $0x86c] sm:$0xf] }
 0x51e   :  { %v2740_v19 = vpop.f32.mrf.mxu1  ;;  %v6829_v13 = vpop.permute.xlu2 %6828  ;;  %4287 = vmatmul.bf16.gmra.mxu0 %v8480_v45  ;;  %4480 = vmatmul.bf16.gmra.mxu1 %v8484_v1 }
 0x51f   :  { %15133 = vst [vmem:[#allocation118_spill] sm:$0xff] %v13569_v49  ;;  %v2741_v15 = vadd.f32 %v2740_v19, %v2548_v37  ;;  %v7234_v28 = vperm.slane %v6829_v13, %v12816_v11  ;;  %v8503_v13 = vld [vmem:[%s14734_s3 + $0x860] sm:$0xf]  ;;  %v9433_v19 = vld [vmem:[%s14734_s3 + $0x874] sm:$0xf0] }
 0x520   :  { %v8504_v37 = vor.u32 %v9433_v19, %v8503_v13 }
 0x521   :  { %4673 = vmatmul.bf16.gmra.mxu2 %v8488_v5  ;;  %4866 = vmatmul.bf16.gmra.mxu3 %v8492_v3  ;;  %v9877_v4 = vpop.eup %9876  ;;  %v5096_v12 = vadd.f32 %v11789_v43, %v2741_v15  ;;  %v15137_v3 = vld [vmem:[#allocation50_spill] sm:$0xff]  ;;  %v8508_v15 = vor.u32 %v9430_v60, %v8505_v34  ;;  %v15139_v60 = vld [vmem:[#allocation128_spill] sm:$0xff] }
 0x522   :  { %v6429_v39 = vmul.f32 %v9877_v4, %v15135_v52  ;;  %v8512_v4 = vor.u32 %v9434_v33, %v8511_v24  ;;  %v15138_v52 = vld [vmem:[#allocation129_spill] sm:$0xff]  ;;  %v13609_v34 = vperm.slane %v15139_v60, 1 }
 0x523   :  { %9878 = vtanh.f32 %v5096_v12  ;;  %v2549_v53 = vpop.f32.mrf.mxu0  ;;  %v8516_v12 = vor.u32 %v9431_v59, %v8513_v2 }
 0x524   :  { %v4047_v40 = vpop.f32.mrf.mxu2  ;;  %v4240_v50 = vpop.f32.mrf.mxu3  ;;  %6864 = vperm.xlu2 %9732, %v6429_v39  }
 0x525   :  { %v13575_v31 = vadd.f32 %v4240_v50, %v4047_v40 }
 0x526   :  { %v2742_v58 = vpop.f32.mrf.mxu1  ;;  %v6823_v14 = vpop.permute.xlu0 %6822 }
 0x527   :  { %15136 = vst [vmem:[#allocation41_spill] sm:$0xff] %v13575_v31  ;;  %v7230_v43 = vperm.slane %v6823_v14, %v12355_v7 }
 0x529   :  { %v9879_v6 = vpop.eup %9878  ;;  %v7231_v45 = vsel %vm7125_vm8, %v7230_v43, %v7229_v57 }
 0x52a   :  { %v6430_v8 = vmul.f32 %v9879_v6, %v15137_v3  ;;  %v15140_v6 = vld [vmem:[#allocation132_spill] sm:$0xff]  ;;  %v8527_v3 = vld [vmem:[%s14734_s3 + $0x890] sm:$0xf] }
 0x52b   :  { %v4253_v40 = vpop.f32.mrf.mxu0 }
 0x52c   :  { %v4049_v1 = vpop.f32.mrf.mxu2  ;;  %v4242_v5 = vpop.f32.mrf.mxu3  ;;  %6867 = vperm.xlu0 %9728, %v6430_v8   ;;  %v4254_v39 = vadd.f32 %v4253_v40, %v15138_v52  ;;  %v9437_v40 = vld [vmem:[%s14734_s3 + $0x89c] sm:$0xf] }
 0x52e   :  { %v4446_v50 = vpop.f32.mrf.mxu1  ;;  %v6826_v53 = vpop.permute.xlu1 %6825  ;;  %4292 = vmatmul.bf16.gmra.mxu0 %v8504_v37  ;;  %4485 = vmatmul.bf16.gmra.mxu1 %v8508_v15  ;;  %v9436_v37 = vld [vmem:[%s14734_s3 + $0x894] sm:$0xf]  ;;  %v8529_v15 = vld [vmem:[%s14734_s3 + $0x8a8] sm:$0xf0] }
 0x52f   :  { %v7232_v58 = vperm.slane %v6826_v53, %v12940_v55  ;;  %v4447_v57 = vadd.f32 %v4446_v50, %v4254_v39  ;;  %v8537_v50 = vld [vmem:[%s14734_s3 + $0x8b0] sm:$0xf0] }
 0x531   :  { %4678 = vmatmul.bf16.gmra.mxu2 %v8512_v4  ;;  %4871 = vmatmul.bf16.gmra.mxu3 %v8516_v12  ;;  %v7233_v14 = vsel %vm7129_vm9, %v7232_v58, %v7231_v45  ;;  %v9439_v45 = vld [vmem:[%s14734_s3 + $0x8a4] sm:$0xf0]  ;;  %v8535_v4 = vld [vmem:[%s14734_s3 + $0x898] sm:$0xf]  ;;  %v9440_v12 = vld [vmem:[%s14734_s3 + $0x8ac] sm:$0xf0] }
 0x532   :  { %v7235_v19 = vsel %vm14743_vm10, %v7234_v28, %v7233_v14  ;;  %v8528_v58 = vor.u32 %v9439_v45, %v8527_v3 }
 0x533   :  { %v4255_v33 = vpop.f32.mrf.mxu0 }
 0x534   :  { %v4639_v43 = vpop.f32.mrf.mxu2  ;;  %v4832_v13 = vpop.f32.mrf.mxu3  ;;  %v4256_v1 = vadd.f32 %v4255_v33, %v15140_v6 }
 0x535   :  { %v4640_v24 = vadd.f32 %v4639_v43, %v4447_v57  ;;  %v8532_v57 = vor.u32 %v9436_v37, %v8529_v15  ;;  %v8536_v43 = vor.u32 %v9440_v12, %v8535_v4 }
 0x536   :  { %v4448_v59 = vpop.f32.mrf.mxu1  ;;  %v13612_v5 = vpop.permute.xlu2 %6837 }
 0x537   :  { %v4833_v2 = vadd.f32 %v4832_v13, %v4640_v24  ;;  %v7240_v8 = vperm.slane %v13612_v5, %v12829_v32  ;;  %v4449_v52 = vadd.f32 %v4448_v59, %v4256_v1  ;;  %v8540_v13 = vor.u32 %v9437_v40, %v8537_v50  ;;  %v15142_v50 = vld [vmem:[#allocation136_spill] sm:$0xff] }
 0x539   :  { %v5097_v28 = vadd.f32 %v13609_v34, %v4833_v2  ;;  %v15141_v2 = vld [vmem:[#allocation134_spill] sm:$0xff] }
 0x53b   :  { %9880 = vtanh.f32 %v5097_v28  ;;  %v4258_v60 = vpop.f32.mrf.mxu0 }
 0x53c   :  { %v4641_v39 = vpop.f32.mrf.mxu2  ;;  %v4834_v53 = vpop.f32.mrf.mxu3  ;;  %v4259_v6 = vadd.f32 %v4258_v60, %v15141_v2  ;;  %v9446_v60 = vld [vmem:[%s14734_s3 + $0x8dc] sm:$0xf0] }
 0x53d   :  { %v4642_v14 = vadd.f32 %v4641_v39, %v4449_v52 }
 0x53e   :  { %v4451_v24 = vpop.f32.mrf.mxu1  ;;  %v6832_v5 = vpop.permute.xlu0 %6831  ;;  %4297 = vmatmul.bf16.gmra.mxu0 %v8528_v58  ;;  %4490 = vmatmul.bf16.gmra.mxu1 %v8532_v57  ;;  %v9442_v58 = vld [vmem:[%s14734_s3 + $0x8c4] sm:$0xf]  ;;  %v8553_v57 = vld [vmem:[%s14734_s3 + $0x8d8] sm:$0xf0] }
 0x53f   :  { %v4835_v33 = vadd.f32 %v4834_v53, %v4642_v14  ;;  %v7236_v59 = vperm.slane %v6832_v5, %v12456_v35  ;;  %v4452_v3 = vadd.f32 %v4451_v24, %v4259_v6  ;;  %v8551_v53 = vld [vmem:[%s14734_s3 + $0x8c0] sm:$0xf]  ;;  %v8559_v14 = vld [vmem:[%s14734_s3 + $0x8c8] sm:$0xf]  ;;  %v9443_v24 = vld [vmem:[%s14734_s3 + $0x8cc] sm:$0xf] }
 0x541   :  { %v9881_v31 = vpop.eup %9880  ;;  %v5098_v49 = vadd.f32 %v13609_v34, %v4835_v33  ;;  %4683 = vmatmul.bf16.gmra.mxu2 %v8536_v43  ;;  %4876 = vmatmul.bf16.gmra.mxu3 %v8540_v13  ;;  %v7237_v45 = vsel %vm14742_vm11, %v7236_v59, %v7235_v19  ;;  %v15143_v43 = vld [vmem:[#allocation137_spill] sm:$0xff] }
 0x542   :  { %v6431_v1 = vmul.f32 %v9881_v31, %v11962_v30  ;;  %v9445_v30 = vld [vmem:[%s14734_s3 + $0x8d4] sm:$0xf0]  ;;  %v8561_v33 = vld [vmem:[%s14734_s3 + $0x8e0] sm:$0xf0] }
 0x543   :  { %9882 = vtanh.f32 %v5098_v49  ;;  %v4260_v4 = vpop.f32.mrf.mxu0 }
 0x544   :  { %v4644_v28 = vpop.f32.mrf.mxu2  ;;  %v4837_v37 = vpop.f32.mrf.mxu3  ;;  %6870 = vperm.xlu1 %9733, %v6431_v1   ;;  %v4261_v52 = vadd.f32 %v4260_v4, %v15142_v50  ;;  %v8552_v1 = vor.u32 %v9445_v30, %v8551_v53  ;;  %v8564_v4 = vor.u32 %v9443_v24, %v8561_v33 }
 0x545   :  { %v4645_v15 = vadd.f32 %v4644_v28, %v4452_v3  ;;  %v8556_v3 = vor.u32 %v9442_v58, %v8553_v57 }
 0x546   :  { %v4453_v12 = vpop.f32.mrf.mxu1  ;;  %v6835_v39 = vpop.permute.xlu1 %6834 }
 0x547   :  { %v4838_v40 = vadd.f32 %v4837_v37, %v4645_v15  ;;  %v7238_v19 = vperm.slane %v6835_v39, %v12958_v17  ;;  %v4454_v2 = vadd.f32 %v4453_v12, %v4261_v52  ;;  %v8560_v15 = vor.u32 %v9446_v60, %v8559_v14 }
 0x549   :  { %v9883_v49 = vpop.eup %9882  ;;  %v5099_v31 = vadd.f32 %v13609_v34, %v4838_v40  ;;  %v7239_v6 = vsel %vm7141_vm12, %v7238_v19, %v7237_v45 }
 0x54a   :  { %v6432_v13 = vmul.f32 %v9883_v49, %v15143_v43  ;;  %v7241_v28 = vsel %vm7145_vm13, %v7240_v8, %v7239_v6  ;;  %v15144_v49 = vld [vmem:[#allocation138_spill] sm:$0xff] }
 0x54b   :  { %9884 = vtanh.f32 %v5099_v31  ;;  %v4263_v40 = vpop.f32.mrf.mxu0 }
 0x54c   :  { %v4646_v5 = vpop.f32.mrf.mxu2  ;;  %v4839_v59 = vpop.f32.mrf.mxu3  ;;  %6873 = vperm.xlu2 %9732, %v6432_v13   ;;  %v4264_v43 = vadd.f32 %v4263_v40, %v15144_v49  ;;  %v15145_v13 = vld [vmem:[#allocation141_spill] sm:$0xff]  ;;  %v8585_v40 = vld [vmem:[%s14734_s3 + $0x910] sm:$0xf0] }
 0x54d   :  { %v4647_v37 = vadd.f32 %v4646_v5, %v4454_v2  ;;  %v9448_v5 = vld [vmem:[%s14734_s3 + $0x8f4] sm:$0xf] }
 0x54e   :  { %v4456_v50 = vpop.f32.mrf.mxu1  ;;  %v6847_v63 = vpop.permute.xlu2 %6846  ;;  %4302 = vmatmul.bf16.gmra.mxu0 %v8552_v1  ;;  %4495 = vmatmul.bf16.gmra.mxu1 %v8556_v3  ;;  %v8583_v1 = vld [vmem:[%s14734_s3 + $0x8f8] sm:$0xf]  ;;  %v15146_v3 = vld [vmem:[#allocation139_spill] sm:$0xff] }
 0x54f   :  { %v4840_v39 = vadd.f32 %v4839_v59, %v4647_v37  ;;  %v7245_v52 = vperm.slane %v6847_v63, %v12156_v41  ;;  %v4457_v53 = vadd.f32 %v4456_v50, %v4264_v43  ;;  %v8575_v63 = vld [vmem:[%s14734_s3 + $0x8f0] sm:$0xf]  ;;  %v8577_v59 = vld [vmem:[%s14734_s3 + $0x908] sm:$0xf0] }
 0x551   :  { %v9885_v12 = vpop.eup %9884  ;;  %v5100_v45 = vadd.f32 %v13609_v34, %v4840_v39  ;;  %4688 = vmatmul.bf16.gmra.mxu2 %v8560_v15  ;;  %4881 = vmatmul.bf16.gmra.mxu3 %v8564_v4  ;;  %v9452_v15 = vld [vmem:[%s14734_s3 + $0x90c] sm:$0xf0]  ;;  %v9449_v4 = vld [vmem:[%s14734_s3 + $0x8fc] sm:$0xf] }
 0x552   :  { %v6433_v8 = vmul.f32 %v9885_v12, %v11973_v36  ;;  %v9451_v36 = vld [vmem:[%s14734_s3 + $0x904] sm:$0xf0] }
 0x553   :  { %9886 = vtanh.f32 %v5100_v45  ;;  %v4265_v58 = vpop.f32.mrf.mxu0  ;;  %v8576_v12 = vor.u32 %v9451_v36, %v8575_v63  ;;  %v8580_v45 = vor.u32 %v9448_v5, %v8577_v59  ;;  %v15148_v63 = vld [vmem:[#allocation34_spill] sm:$0xff] }
 0x554   :  { %v4649_v30 = vpop.f32.mrf.mxu2  ;;  %v4842_v31 = vpop.f32.mrf.mxu3  ;;  %6876 = vperm.xlu0 %9728, %v6433_v8   ;;  %v4266_v60 = vadd.f32 %v4265_v58, %v15145_v13 }
 0x555   :  { %v4650_v19 = vadd.f32 %v4649_v30, %v4457_v53  ;;  %v8584_v53 = vor.u32 %v9452_v15, %v8583_v1  ;;  %v8588_v30 = vor.u32 %v9449_v4, %v8585_v40  ;;  %v8599_v40 = vld [vmem:[%s14734_s3 + $0x920] sm:$0xf] }
 0x556   :  { %v4458_v57 = vpop.f32.mrf.mxu1  ;;  %v6841_v24 = vpop.permute.xlu0 %6840 }
 0x557   :  { %v4843_v14 = vadd.f32 %v4842_v31, %v4650_v19  ;;  %v7242_v6 = vperm.slane %v6841_v24, %v12532_v51  ;;  %v4459_v50 = vadd.f32 %v4458_v57, %v4266_v60 }
 0x559   :  { %v9887_v33 = vpop.eup %9886  ;;  %v5101_v2 = vadd.f32 %v13609_v34, %v4843_v14  ;;  %v13709_v39 = vsel %vm7149_vm14, %v7242_v6, %v7241_v28  ;;  %v15147_v14 = vld [vmem:[#allocation144_spill] sm:$0xff] }
 0x55a   :  { %v6434_v37 = vmul.f32 %v9887_v33, %v15146_v3 }
 0x55b   :  { %9888 = vtanh.f32 %v5101_v2  ;;  %v4268_v31 = vpop.f32.mrf.mxu0 }
 0x55c   :  { %v4651_v49 = vpop.f32.mrf.mxu2  ;;  %v4844_v43 = vpop.f32.mrf.mxu3  ;;  %6879 = vperm.xlu1 %9733, %v6434_v37   ;;  %v4269_v13 = vadd.f32 %v4268_v31, %v15147_v14  ;;  %v8609_v31 = vld [vmem:[%s14734_s3 + $0x940] sm:$0xf0] }
 0x55d   :  { %v4652_v8 = vadd.f32 %v4651_v49, %v4459_v50  ;;  %v9457_v50 = vld [vmem:[%s14734_s3 + $0x934] sm:$0xf0] }
 0x55e   :  { %v4461_v19 = vpop.f32.mrf.mxu1  ;;  %v6844_v24 = vpop.permute.xlu1 %6843  ;;  %4307 = vmatmul.bf16.gmra.mxu0 %v8576_v12  ;;  %4500 = vmatmul.bf16.gmra.mxu1 %v8580_v45  ;;  %v8601_v12 = vld [vmem:[%s14734_s3 + $0x938] sm:$0xf0]  ;;  %v8607_v45 = vld [vmem:[%s14734_s3 + $0x928] sm:$0xf] }
 0x55f   :  { %v4845_v58 = vadd.f32 %v4844_v43, %v4652_v8  ;;  %v7244_v60 = vperm.slane %v6844_v24, %v12148_v21  ;;  %v4462_v33 = vadd.f32 %v4461_v19, %v4269_v13  ;;  %v8600_v13 = vor.u32 %v9457_v50, %v8599_v40 }
 0x561   :  { %v9889_v57 = vpop.eup %9888  ;;  %v5102_v28 = vadd.f32 %v13609_v34, %v4845_v58  ;;  %4693 = vmatmul.bf16.gmra.mxu2 %v8584_v53  ;;  %4886 = vmatmul.bf16.gmra.mxu3 %v8588_v30  ;;  %v7246_v2 = vsel %vm7093_vm0, %v7245_v52, %v7244_v60  ;;  %v9458_v53 = vld [vmem:[%s14734_s3 + $0x93c] sm:$0xf0]  ;;  %v9455_v30 = vld [vmem:[%s14734_s3 + $0x92c] sm:$0xf] }
 0x562   :  { %v6435_v36 = vmul.f32 %v9889_v57, %v15148_v63  ;;  %v8608_v57 = vor.u32 %v9458_v53, %v8607_v45  ;;  %v8623_v53 = vld [vmem:[%s14734_s3 + $0x950] sm:$0xf] }
 0x563   :  { %9890 = vtanh.f32 %v5102_v28  ;;  %v4270_v1 = vpop.f32.mrf.mxu0  ;;  %v8612_v28 = vor.u32 %v9455_v30, %v8609_v31  ;;  %v9463_v30 = vld [vmem:[%s14734_s3 + $0x964] sm:$0xf0] }
 0x564   :  { %v4654_v6 = vpop.f32.mrf.mxu2  ;;  %v4847_v5 = vpop.f32.mrf.mxu3  ;;  %6882 = vperm.xlu2 %9732, %v6435_v36   ;;  %v4271_v15 = vadd.f32 %v4270_v1, %v11957_v47  ;;  %v9454_v47 = vld [vmem:[%s14734_s3 + $0x924] sm:$0xf] }
 0x565   :  { %v4655_v59 = vadd.f32 %v4654_v6, %v4462_v33  ;;  %v8604_v24 = vor.u32 %v9454_v47, %v8601_v12 }
 0x566   :  { %v4463_v3 = vpop.f32.mrf.mxu1  ;;  %v13717_v4 = vpop.permute.xlu2 %6855 }
 0x567   :  { %v4848_v37 = vadd.f32 %v4847_v5, %v4655_v59  ;;  %v7251_v43 = vperm.slane %v13717_v4, %v12872_v56  ;;  %v4464_v19 = vadd.f32 %v4463_v3, %v4271_v15  ;;  %v15149_v3 = vld [vmem:[#allocation142_spill] sm:$0xff] }
 0x569   :  { %v9891_v52 = vpop.eup %9890  ;;  %v5103_v49 = vadd.f32 %v13609_v34, %v4848_v37 }
 0x56a   :  { %v6436_v8 = vmul.f32 %v9891_v52, %v12007_v38 }
 0x56b   :  { %9892 = vtanh.f32 %v5103_v49  ;;  %v4273_v60 = vpop.f32.mrf.mxu0 }
 0x56c   :  { %v4656_v58 = vpop.f32.mrf.mxu2  ;;  %v4849_v14 = vpop.f32.mrf.mxu3  ;;  %6885 = vperm.xlu0 %9728, %v6436_v8   ;;  %v4274_v33 = vadd.f32 %v4273_v60, %v11968_v23 }
 0x56d   :  { %v4657_v38 = vadd.f32 %v4656_v58, %v4464_v19  ;;  %v9460_v58 = vld [vmem:[%s14734_s3 + $0x954] sm:$0xf] }
 0x56e   :  { %v4466_v63 = vpop.f32.mrf.mxu1  ;;  %v6850_v6 = vpop.permute.xlu0 %6849  ;;  %4312 = vmatmul.bf16.gmra.mxu0 %v8600_v13  ;;  %4505 = vmatmul.bf16.gmra.mxu1 %v8604_v24  ;;  %v15150_v13 = vld [vmem:[#allocation152_spill] sm:$0xff] }
 0x56f   :  { %v4850_v36 = vadd.f32 %v4849_v14, %v4657_v38  ;;  %v7247_v1 = vperm.slane %v6850_v6, %v12634_v27  ;;  %v4467_v15 = vadd.f32 %v4466_v63, %v4274_v33  ;;  %v8631_v14 = vld [vmem:[%s14734_s3 + $0x958] sm:$0xf]  ;;  %v9464_v38 = vld [vmem:[%s14734_s3 + $0x96c] sm:$0xf0]  ;;  %v8624_v6 = vor.u32 %v9463_v30, %v8623_v53 }
 0x571   :  { %v9893_v5 = vpop.eup %9892  ;;  %v5104_v59 = vadd.f32 %v13609_v34, %v4850_v36  ;;  %4698 = vmatmul.bf16.gmra.mxu2 %v8608_v57  ;;  %4891 = vmatmul.bf16.gmra.mxu3 %v8612_v28  ;;  %v7248_v40 = vsel %vm7097_vm1, %v7247_v1, %v7246_v2  ;;  %v9461_v57 = vld [vmem:[%s14734_s3 + $0x95c] sm:$0xf]  ;;  %v8633_v28 = vld [vmem:[%s14734_s3 + $0x970] sm:$0xf0] }
 0x572   :  { %v6437_v37 = vmul.f32 %v9893_v5, %v15149_v3  ;;  %v8632_v3 = vor.u32 %v9464_v38, %v8631_v14 }
 0x573   :  { %9894 = vtanh.f32 %v5104_v59  ;;  %v4275_v49 = vpop.f32.mrf.mxu0 }
 0x574   :  { %v4659_v50 = vpop.f32.mrf.mxu2  ;;  %v4852_v52 = vpop.f32.mrf.mxu3  ;;  %6888 = vperm.xlu1 %9733, %v6437_v37   ;;  %v4276_v45 = vadd.f32 %v4275_v49, %v12002_v46  ;;  %v8625_v46 = vld [vmem:[%s14734_s3 + $0x968] sm:$0xf0]  ;;  %v8636_v37 = vor.u32 %v9461_v57, %v8633_v28 }
 0x575   :  { %v4660_v23 = vadd.f32 %v4659_v50, %v4467_v15  ;;  %v8628_v5 = vor.u32 %v9460_v58, %v8625_v46 }
 0x576   :  { %v4468_v47 = vpop.f32.mrf.mxu1  ;;  %v6853_v8 = vpop.permute.xlu1 %6852 }
 0x577   :  { %v4853_v12 = vadd.f32 %v4852_v52, %v4660_v23  ;;  %v7249_v19 = vperm.slane %v6853_v8, %v12715_v54  ;;  %v4469_v60 = vadd.f32 %v4468_v47, %v4276_v45  ;;  %v15151_v23 = vld [vmem:[#allocation150_spill] sm:$0xff] }
 0x579   :  { %v9895_v31 = vpop.eup %9894  ;;  %v5105_v2 = vadd.f32 %v13609_v34, %v4853_v12  ;;  %v7250_v63 = vsel %vm7101_vm2, %v7249_v19, %v7248_v40 }
 0x57a   :  { %v6438_v24 = vmul.f32 %v9895_v31, %v15150_v13  ;;  %v7252_v59 = vsel %vm7105_vm3, %v7251_v43, %v7250_v63  ;;  %v15152_v43 = vld [vmem:[#allocation145_spill] sm:$0xff]  ;;  %v8655_v63 = vld [vmem:[%s14734_s3 + $0x988] sm:$0xf] }
 0x57b   :  { %9896 = vtanh.f32 %v5105_v2  ;;  %v4278_v15 = vpop.f32.mrf.mxu0  ;;  %v8647_v13 = vld [vmem:[%s14734_s3 + $0x980] sm:$0xf] }
 0x57c   :  { %v4661_v36 = vpop.f32.mrf.mxu2  ;;  %v4854_v33 = vpop.f32.mrf.mxu3  ;;  %6891 = vperm.xlu2 %9732, %v6438_v24   ;;  %v4279_v49 = vadd.f32 %v4278_v15, %v15151_v23  ;;  %v9469_v24 = vld [vmem:[%s14734_s3 + $0x994] sm:$0xf0] }
 0x57d   :  { %v4662_v1 = vadd.f32 %v4661_v36, %v4469_v60  ;;  %v9466_v60 = vld [vmem:[%s14734_s3 + $0x984] sm:$0xf]  ;;  %v15153_v36 = vld [vmem:[#allocation38_spill] sm:$0xff] }
 0x57e   :  { %v4471_v50 = vpop.f32.mrf.mxu1  ;;  %v13786_v47 = vpop.permute.xlu2 %6864  ;;  %4317 = vmatmul.bf16.gmra.mxu0 %v8624_v6  ;;  %4510 = vmatmul.bf16.gmra.mxu1 %v8628_v5  ;;  %v9470_v6 = vld [vmem:[%s14734_s3 + $0x99c] sm:$0xf0]  ;;  %v9467_v5 = vld [vmem:[%s14734_s3 + $0x98c] sm:$0xf] }
 0x57f   :  { %v4855_v52 = vadd.f32 %v4854_v33, %v4662_v1  ;;  %v7257_v4 = vperm.slane %v13786_v47, %v12890_v25  ;;  %v4472_v8 = vadd.f32 %v4471_v50, %v4279_v49  ;;  %v8657_v1 = vld [vmem:[%s14734_s3 + $0x9a0] sm:$0xf0]  ;;  %v8656_v47 = vor.u32 %v9470_v6, %v8655_v63  ;;  %v15156_v63 = vld [vmem:[#allocation158_spill] sm:$0xff] }
 0x580   :  { %v9475_v6 = vld [vmem:[%s14734_s3 + $0x9c4] sm:$0xf0] }
 0x581   :  { %v9897_v40 = vpop.eup %9896  ;;  %v5106_v12 = vadd.f32 %v13609_v34, %v4855_v52  ;;  %4703 = vmatmul.bf16.gmra.mxu2 %v8632_v3  ;;  %4896 = vmatmul.bf16.gmra.mxu3 %v8636_v37  ;;  %v8648_v52 = vor.u32 %v9469_v24, %v8647_v13 }
 0x582   :  { %v6439_v45 = vmul.f32 %v9897_v40, %v15152_v43  ;;  %v8660_v40 = vor.u32 %v9467_v5, %v8657_v1 }
 0x583   :  { %9898 = vtanh.f32 %v5106_v12  ;;  %v4280_v2 = vpop.f32.mrf.mxu0 }
 0x584   :  { %v4664_v53 = vpop.f32.mrf.mxu2  ;;  %v4857_v30 = vpop.f32.mrf.mxu3  ;;  %6894 = vperm.xlu0 %9728, %v6439_v45   ;;  %v4281_v46 = vadd.f32 %v4280_v2, %v12049_v0  ;;  %v8649_v0 = vld [vmem:[%s14734_s3 + $0x998] sm:$0xf0] }
 0x585   :  { %v4665_v31 = vadd.f32 %v4664_v53, %v4472_v8  ;;  %v8652_v23 = vor.u32 %v9466_v60, %v8649_v0  ;;  %v15154_v8 = vld [vmem:[#allocation155_spill] sm:$0xff] }
 0x586   :  { %v4473_v19 = vpop.f32.mrf.mxu1  ;;  %v6859_v14 = vpop.permute.xlu0 %6858 }
 0x587   :  { %v4858_v58 = vadd.f32 %v4857_v30, %v4665_v31  ;;  %v7253_v28 = vperm.slane %v6859_v14, %v12704_v20  ;;  %v4474_v3 = vadd.f32 %v4473_v19, %v4281_v46  ;;  %v15155_v19 = vld [vmem:[#allocation154_spill] sm:$0xff] }
 0x589   :  { %v9899_v38 = vpop.eup %9898  ;;  %v5107_v57 = vadd.f32 %v13609_v34, %v4858_v58  ;;  %v7254_v37 = vsel %vm7109_vm4, %v7253_v28, %v7252_v59 }
 0x58a   :  { %v6440_v33 = vmul.f32 %v9899_v38, %v15153_v36 }
 0x58b   :  { %9900 = vtanh.f32 %v5107_v57  ;;  %v4283_v12 = vpop.f32.mrf.mxu0 }
 0x58c   :  { %v4666_v15 = vpop.f32.mrf.mxu2  ;;  %v4859_v50 = vpop.f32.mrf.mxu3  ;;  %6897 = vperm.xlu1 %9733, %v6440_v33   ;;  %v4284_v53 = vadd.f32 %v4283_v12, %v15154_v8  ;;  %v8671_v33 = vld [vmem:[%s14734_s3 + $0x9b0] sm:$0xf] }
 0x58d   :  { %v4667_v49 = vadd.f32 %v4666_v15, %v4474_v3  ;;  %v8673_v3 = vld [vmem:[%s14734_s3 + $0x9c8] sm:$0xf0]  ;;  %v15157_v15 = vld [vmem:[#allocation147_spill] sm:$0xff] }
 0x58e   :  { %v4476_v43 = vpop.f32.mrf.mxu1  ;;  %v6862_v30 = vpop.permute.xlu1 %6861  ;;  %4322 = vmatmul.bf16.gmra.mxu0 %v8648_v52  ;;  %4515 = vmatmul.bf16.gmra.mxu1 %v8652_v23  ;;  %v9476_v52 = vld [vmem:[%s14734_s3 + $0x9cc] sm:$0xf0]  ;;  %v9473_v23 = vld [vmem:[%s14734_s3 + $0x9bc] sm:$0xf] }
 0x58f   :  { %v4860_v45 = vadd.f32 %v4859_v50, %v4667_v49  ;;  %v7255_v59 = vperm.slane %v6862_v30, %v12289_v18  ;;  %v4477_v46 = vadd.f32 %v4476_v43, %v4284_v53  ;;  %v8681_v49 = vld [vmem:[%s14734_s3 + $0x9d0] sm:$0xf0]  ;;  %v8672_v43 = vor.u32 %v9475_v6, %v8671_v33 }
 0x590   :  { %v8684_v30 = vor.u32 %v9473_v23, %v8681_v49  ;;  %v9478_v49 = vld [vmem:[%s14734_s3 + $0x9e4] sm:$0xf] }
 0x591   :  { %v9901_v31 = vpop.eup %9900  ;;  %v5108_v2 = vadd.f32 %v13609_v34, %v4860_v45  ;;  %4708 = vmatmul.bf16.gmra.mxu2 %v8656_v47  ;;  %4901 = vmatmul.bf16.gmra.mxu3 %v8660_v40  ;;  %v7256_v14 = vsel %vm7113_vm5, %v7255_v59, %v7254_v37  ;;  %v8679_v37 = vld [vmem:[%s14734_s3 + $0x9b8] sm:$0xf] }
 0x592   :  { %v6441_v58 = vmul.f32 %v9901_v31, %v15155_v19  ;;  %v7258_v38 = vsel %vm14744_vm6, %v7257_v4, %v7256_v14  ;;  %v9472_v4 = vld [vmem:[%s14734_s3 + $0x9b4] sm:$0xf]  ;;  %v8680_v53 = vor.u32 %v9476_v52, %v8679_v37  ;;  %v15158_v19 = vld [vmem:[#allocation161_spill] sm:$0xff] }
 0x593   :  { %9902 = vtanh.f32 %v5108_v2  ;;  %v4285_v28 = vpop.f32.mrf.mxu0  ;;  %v8676_v45 = vor.u32 %v9472_v4, %v8673_v3  ;;  %v15160_v4 = vld [vmem:[#allocation163_spill] sm:$0xff] }
 0x594   :  { %v4669_v13 = vpop.f32.mrf.mxu2  ;;  %v4862_v24 = vpop.f32.mrf.mxu3  ;;  %6900 = vperm.xlu2 %9732, %v6441_v58   ;;  %v4286_v36 = vadd.f32 %v4285_v28, %v15156_v63 }
 0x595   :  { %v4670_v57 = vadd.f32 %v4669_v13, %v4477_v46 }
 0x596   :  { %v4478_v60 = vpop.f32.mrf.mxu1 }
 0x597   :  { %v4863_v0 = vadd.f32 %v4862_v24, %v4670_v57  ;;  %v4479_v47 = vadd.f32 %v4478_v60, %v4286_v36  ;;  %v15159_v57 = vld [vmem:[#allocation157_spill] sm:$0xff] }
 0x599   :  { %v9903_v5 = vpop.eup %9902  ;;  %v5109_v1 = vadd.f32 %v13609_v34, %v4863_v0 }
 0x59a   :  { %v6442_v50 = vmul.f32 %v9903_v5, %v15157_v15 }
 0x59b   :  { %9904 = vtanh.f32 %v5109_v1  ;;  %v4288_v31 = vpop.f32.mrf.mxu0 }
 0x59c   :  { %v4671_v40 = vpop.f32.mrf.mxu2  ;;  %v4864_v12 = vpop.f32.mrf.mxu3  ;;  %6903 = vperm.xlu0 %9728, %v6442_v50   ;;  %v4289_v58 = vadd.f32 %v4288_v31, %v15158_v19  ;;  %v8695_v50 = vld [vmem:[%s14734_s3 + $0x9e0] sm:$0xf] }
 0x59d   :  { %v4672_v8 = vadd.f32 %v4671_v40, %v4479_v47  ;;  %v8697_v47 = vld [vmem:[%s14734_s3 + $0x9f8] sm:$0xf0]  ;;  %v8703_v40 = vld [vmem:[%s14734_s3 + $0x9e8] sm:$0xf] }
 0x59e   :  { %v4481_v2 = vpop.f32.mrf.mxu1  ;;  %v6868_v46 = vpop.permute.xlu0 %6867  ;;  %4327 = vmatmul.bf16.gmra.mxu0 %v8672_v43  ;;  %4520 = vmatmul.bf16.gmra.mxu1 %v8676_v45  ;;  %v9482_v45 = vld [vmem:[%s14734_s3 + $0x9fc] sm:$0xf0]  ;;  %v8700_v19 = vor.u32 %v9478_v49, %v8697_v47 }
 0x59f   :  { %v4865_v59 = vadd.f32 %v4864_v12, %v4672_v8  ;;  %v7259_v24 = vperm.slane %v6868_v46, %v12772_v9  ;;  %v4482_v60 = vadd.f32 %v4481_v2, %v4289_v58  ;;  %v15161_v12 = vld [vmem:[#allocation148_spill] sm:$0xff]  ;;  %v9479_v8 = vld [vmem:[%s14734_s3 + $0x9ec] sm:$0xf]  ;;  %v8704_v46 = vor.u32 %v9482_v45, %v8703_v40  ;;  %v8719_v40 = vld [vmem:[%s14734_s3 + $0xa10] sm:$0xf] }
 0x5a1   :  { %v9905_v14 = vpop.eup %9904  ;;  %v5110_v13 = vadd.f32 %v13609_v34, %v4865_v59  ;;  %4713 = vmatmul.bf16.gmra.mxu2 %v8680_v53  ;;  %4906 = vmatmul.bf16.gmra.mxu3 %v8684_v30  ;;  %v13859_v0 = vsel %vm7121_vm7, %v7259_v24, %v7258_v38  ;;  %v9481_v38 = vld [vmem:[%s14734_s3 + $0x9f4] sm:$0xf0]  ;;  %v8705_v53 = vld [vmem:[%s14734_s3 + $0xa00] sm:$0xf0] }
 0x5a2   :  { %v6443_v28 = vmul.f32 %v9905_v14, %v15159_v57  ;;  %v8696_v59 = vor.u32 %v9481_v38, %v8695_v50  ;;  %v8708_v14 = vor.u32 %v9479_v8, %v8705_v53  ;;  %v9484_v8 = vld [vmem:[%s14734_s3 + $0xa14] sm:$0xf]  ;;  %v8721_v53 = vld [vmem:[%s14734_s3 + $0xa28] sm:$0xf0] }
 0x5a3   :  { %9906 = vtanh.f32 %v5110_v13  ;;  %v4290_v6 = vpop.f32.mrf.mxu0 }
 0x5a4   :  { %v4674_v63 = vpop.f32.mrf.mxu2  ;;  %v4867_v36 = vpop.f32.mrf.mxu3  ;;  %6906 = vperm.xlu1 %9733, %v6443_v28   ;;  %v4291_v3 = vadd.f32 %v4290_v6, %v15160_v4  ;;  %v15162_v28 = vld [vmem:[#allocation165_spill] sm:$0xff] }
 0x5a5   :  { %v4675_v33 = vadd.f32 %v4674_v63, %v4482_v60 }
 0x5a6   :  { %v4483_v5 = vpop.f32.mrf.mxu1  ;;  %v6874_v37 = vpop.permute.xlu2 %6873 }
 0x5a7   :  { %v4868_v1 = vadd.f32 %v4867_v36, %v4675_v33  ;;  %v7262_v15 = vperm.slane %v6874_v37, %v12156_v41  ;;  %v4484_v30 = vadd.f32 %v4483_v5, %v4291_v3  ;;  %v15163_v33 = vld [vmem:[#allocation42_spill] sm:$0xff] }
 0x5a9   :  { %v9907_v52 = vpop.eup %9906  ;;  %v5111_v23 = vadd.f32 %v13609_v34, %v4868_v1 }
 0x5aa   :  { %v6444_v43 = vmul.f32 %v9907_v52, %v15161_v12  ;;  %v15164_v52 = vld [vmem:[#allocation167_spill] sm:$0xff]  ;;  %v9487_v12 = vld [vmem:[%s14734_s3 + $0xa24] sm:$0xf0] }
 0x5ab   :  { %9908 = vtanh.f32 %v5111_v23  ;;  %v4293_v13 = vpop.f32.mrf.mxu0 }
 0x5ac   :  { %v4676_v31 = vpop.f32.mrf.mxu2  ;;  %v4869_v2 = vpop.f32.mrf.mxu3  ;;  %6909 = vperm.xlu2 %9732, %v6444_v43   ;;  %v4294_v60 = vadd.f32 %v4293_v13, %v15162_v28 }
 0x5ad   :  { %v4677_v58 = vadd.f32 %v4676_v31, %v4484_v30  ;;  %v8727_v30 = vld [vmem:[%s14734_s3 + $0xa18] sm:$0xf] }
 0x5ae   :  { %v4486_v24 = vpop.f32.mrf.mxu1  ;;  %4332 = vmatmul.bf16.gmra.mxu0 %v8696_v59  ;;  %4525 = vmatmul.bf16.gmra.mxu1 %v8700_v19  ;;  %v9488_v19 = vld [vmem:[%s14734_s3 + $0xa2c] sm:$0xf0] }
 0x5af   :  { %v4870_v57 = vadd.f32 %v4869_v2, %v4677_v58  ;;  %v4487_v5 = vadd.f32 %v4486_v24, %v4294_v60  ;;  %v15165_v2 = vld [vmem:[#allocation160_spill] sm:$0xff]  ;;  %v8728_v60 = vor.u32 %v9488_v19, %v8727_v30 }
 0x5b0   :  { %v9485_v58 = vld [vmem:[%s14734_s3 + $0xa1c] sm:$0xf]  ;;  %v9493_v19 = vld [vmem:[%s14734_s3 + $0xa54] sm:$0xf0] }
 0x5b1   :  { %v9909_v63 = vpop.eup %9908  ;;  %v5112_v36 = vadd.f32 %v13609_v34, %v4870_v57  ;;  %4718 = vmatmul.bf16.gmra.mxu2 %v8704_v46  ;;  %4911 = vmatmul.bf16.gmra.mxu3 %v8708_v14  ;;  %v8729_v46 = vld [vmem:[%s14734_s3 + $0xa30] sm:$0xf0]  ;;  %v8724_v57 = vor.u32 %v9484_v8, %v8721_v53 }
 0x5b2   :  { %v6445_v6 = vmul.f32 %v9909_v63, %v15163_v33  ;;  %v8732_v63 = vor.u32 %v9485_v58, %v8729_v46  ;;  %v15168_v8 = vld [vmem:[#allocation171_spill] sm:$0xff] }
 0x5b3   :  { %9910 = vtanh.f32 %v5112_v36  ;;  %v4295_v37 = vpop.f32.mrf.mxu0 }
 0x5b4   :  { %v4679_v1 = vpop.f32.mrf.mxu2  ;;  %v4872_v4 = vpop.f32.mrf.mxu3  ;;  %6912 = vperm.xlu0 %9728, %v6445_v6   ;;  %v4296_v23 = vadd.f32 %v4295_v37, %v15164_v52 }
 0x5b5   :  { %v4680_v3 = vadd.f32 %v4679_v1, %v4487_v5  ;;  %v15166_v5 = vld [vmem:[#allocation169_spill] sm:$0xff] }
 0x5b6   :  { %v4488_v50 = vpop.f32.mrf.mxu1  ;;  %v6871_v49 = vpop.permute.xlu1 %6870 }
 0x5b7   :  { %v4873_v38 = vadd.f32 %v4872_v4, %v4680_v3  ;;  %v7261_v47 = vperm.slane %v6871_v49, %v12148_v21  ;;  %v4489_v14 = vadd.f32 %v4488_v50, %v4296_v23 }
 0x5b9   :  { %v9911_v43 = vpop.eup %9910  ;;  %v5113_v45 = vadd.f32 %v13609_v34, %v4873_v38  ;;  %v7263_v31 = vsel %vm7093_vm0, %v7262_v15, %v7261_v47  ;;  %v8720_v15 = vor.u32 %v9487_v12, %v8719_v40  ;;  %v15167_v38 = vld [vmem:[#allocation149_spill] sm:$0xff] }
 0x5ba   :  { %v6446_v59 = vmul.f32 %v9911_v43, %v15165_v2 }
 0x5bb   :  { %9912 = vtanh.f32 %v5113_v45  ;;  %v4298_v36 = vpop.f32.mrf.mxu0 }
 0x5bc   :  { %v4681_v13 = vpop.f32.mrf.mxu2  ;;  %v4874_v24 = vpop.f32.mrf.mxu3  ;;  %6915 = vperm.xlu1 %9733, %v6446_v59   ;;  %v4299_v1 = vadd.f32 %v4298_v36, %v15166_v5  ;;  %v8743_v59 = vld [vmem:[%s14734_s3 + $0xa40] sm:$0xf]  ;;  %v8753_v36 = vld [vmem:[%s14734_s3 + $0xa60] sm:$0xf0] }
 0x5bd   :  { %v4682_v28 = vadd.f32 %v4681_v13, %v4489_v14  ;;  %v9490_v14 = vld [vmem:[%s14734_s3 + $0xa44] sm:$0xf]  ;;  %v8745_v13 = vld [vmem:[%s14734_s3 + $0xa58] sm:$0xf0] }
 0x5be   :  { %v4491_v33 = vpop.f32.mrf.mxu1  ;;  %v6883_v4 = vpop.permute.xlu2 %6882  ;;  %4337 = vmatmul.bf16.gmra.mxu0 %v8720_v15  ;;  %4530 = vmatmul.bf16.gmra.mxu1 %v8724_v57  ;;  %v15169_v57 = vld [vmem:[#allocation162_spill] sm:$0xff] }
 0x5bf   :  { %v4875_v6 = vadd.f32 %v4874_v24, %v4682_v28  ;;  %v7268_v3 = vperm.slane %v6883_v4, %v12872_v56  ;;  %v4492_v23 = vadd.f32 %v4491_v33, %v4299_v1  ;;  %v8751_v24 = vld [vmem:[%s14734_s3 + $0xa48] sm:$0xf]  ;;  %v8748_v1 = vor.u32 %v9490_v14, %v8745_v13 }
 0x5c1   :  { %v9913_v37 = vpop.eup %9912  ;;  %v5114_v50 = vadd.f32 %v13609_v34, %v4875_v6  ;;  %4723 = vmatmul.bf16.gmra.mxu2 %v8728_v60  ;;  %4916 = vmatmul.bf16.gmra.mxu3 %v8732_v63  ;;  %v9494_v60 = vld [vmem:[%s14734_s3 + $0xa5c] sm:$0xf0]  ;;  %v9491_v63 = vld [vmem:[%s14734_s3 + $0xa4c] sm:$0xf] }
 0x5c2   :  { %v6447_v52 = vmul.f32 %v9913_v37, %v15167_v38  ;;  %v8752_v37 = vor.u32 %v9494_v60, %v8751_v24 }
 0x5c3   :  { %9914 = vtanh.f32 %v5114_v50  ;;  %v4300_v12 = vpop.f32.mrf.mxu0  ;;  %v8756_v50 = vor.u32 %v9491_v63, %v8753_v36  ;;  %v8767_v63 = vld [vmem:[%s14734_s3 + $0xa70] sm:$0xf] }
 0x5c4   :  { %v4684_v49 = vpop.f32.mrf.mxu2  ;;  %v4877_v47 = vpop.f32.mrf.mxu3  ;;  %6918 = vperm.xlu2 %9732, %v6447_v52   ;;  %v4301_v53 = vadd.f32 %v4300_v12, %v15168_v8 }
 0x5c5   :  { %v4685_v40 = vadd.f32 %v4684_v49, %v4492_v23  ;;  %v15170_v49 = vld [vmem:[#allocation173_spill] sm:$0xff] }
 0x5c6   :  { %v4493_v43 = vpop.f32.mrf.mxu1  ;;  %v6877_v30 = vpop.permute.xlu0 %6876 }
 0x5c7   :  { %v4878_v45 = vadd.f32 %v4877_v47, %v4685_v40  ;;  %v7264_v2 = vperm.slane %v6877_v30, %v12634_v27  ;;  %v4494_v33 = vadd.f32 %v4493_v43, %v4301_v53  ;;  %v15171_v53 = vld [vmem:[#allocation151_spill] sm:$0xff] }
 0x5c9   :  { %v9915_v58 = vpop.eup %9914  ;;  %v5115_v46 = vadd.f32 %v13609_v34, %v4878_v45  ;;  %v7265_v15 = vsel %vm7097_vm1, %v7264_v2, %v7263_v31  ;;  %v8744_v31 = vor.u32 %v9493_v19, %v8743_v59 }
 0x5ca   :  { %v6448_v28 = vmul.f32 %v9915_v58, %v15169_v57  ;;  %v15172_v57 = vld [vmem:[#allocation175_spill] sm:$0xff] }
 0x5cb   :  { %9916 = vtanh.f32 %v5115_v46  ;;  %v4303_v38 = vpop.f32.mrf.mxu0 }
 0x5cc   :  { %v4686_v6 = vpop.f32.mrf.mxu2  ;;  %v4879_v5 = vpop.f32.mrf.mxu3  ;;  %6921 = vperm.xlu0 %9728, %v6448_v28   ;;  %v4304_v47 = vadd.f32 %v4303_v38, %v15170_v49  ;;  %v8777_v38 = vld [vmem:[%s14734_s3 + $0xa90] sm:$0xf0] }
 0x5cd   :  { %v4687_v4 = vadd.f32 %v4686_v6, %v4494_v33  ;;  %v9496_v6 = vld [vmem:[%s14734_s3 + $0xa74] sm:$0xf] }
 0x5ce   :  { %v4496_v52 = vpop.f32.mrf.mxu1  ;;  %v6880_v40 = vpop.permute.xlu1 %6879  ;;  %4342 = vmatmul.bf16.gmra.mxu0 %v8744_v31  ;;  %4535 = vmatmul.bf16.gmra.mxu1 %v8748_v1  ;;  %v8775_v31 = vld [vmem:[%s14734_s3 + $0xa78] sm:$0xf] }
 0x5cf   :  { %v4880_v23 = vadd.f32 %v4879_v5, %v4687_v4  ;;  %v7266_v12 = vperm.slane %v6880_v40, %v12715_v54  ;;  %v4497_v2 = vadd.f32 %v4496_v52, %v4304_v47  ;;  %v8769_v5 = vld [vmem:[%s14734_s3 + $0xa88] sm:$0xf0]  ;;  %v15173_v1 = vld [vmem:[#allocation48_spill] sm:$0xff] }
 0x5d0   :  { %v8772_v40 = vor.u32 %v9496_v6, %v8769_v5 }
 0x5d1   :  { %v9917_v45 = vpop.eup %9916  ;;  %v5116_v43 = vadd.f32 %v13609_v34, %v4880_v23  ;;  %4728 = vmatmul.bf16.gmra.mxu2 %v8752_v37  ;;  %4921 = vmatmul.bf16.gmra.mxu3 %v8756_v50  ;;  %v7267_v8 = vsel %vm7101_vm2, %v7266_v12, %v7265_v15  ;;  %v9500_v37 = vld [vmem:[%s14734_s3 + $0xa8c] sm:$0xf0]  ;;  %v9497_v50 = vld [vmem:[%s14734_s3 + $0xa7c] sm:$0xf] }
 0x5d2   :  { %v6449_v30 = vmul.f32 %v9917_v45, %v15171_v53  ;;  %v7269_v59 = vsel %vm7105_vm3, %v7268_v3, %v7267_v8  ;;  %v9499_v3 = vld [vmem:[%s14734_s3 + $0xa84] sm:$0xf0]  ;;  %v8776_v45 = vor.u32 %v9500_v37, %v8775_v31 }
 0x5d3   :  { %9918 = vtanh.f32 %v5116_v43  ;;  %v4305_v14 = vpop.f32.mrf.mxu0  ;;  %v8768_v47 = vor.u32 %v9499_v3, %v8767_v63  ;;  %v8780_v43 = vor.u32 %v9497_v50, %v8777_v38  ;;  %v9505_v38 = vld [vmem:[%s14734_s3 + $0xab4] sm:$0xf0] }
 0x5d4   :  { %v4689_v19 = vpop.f32.mrf.mxu2  ;;  %v4882_v58 = vpop.f32.mrf.mxu3  ;;  %6924 = vperm.xlu1 %9733, %v6449_v30   ;;  %v4306_v28 = vadd.f32 %v4305_v14, %v15172_v57  ;;  %v15175_v57 = vld [vmem:[#allocation164_spill] sm:$0xff] }
 0x5d5   :  { %v4690_v46 = vadd.f32 %v4689_v19, %v4497_v2  ;;  %v15174_v2 = vld [vmem:[#allocation176_spill] sm:$0xff] }
 0x5d6   :  { %v4498_v13 = vpop.f32.mrf.mxu1  ;;  %v13961_v60 = vpop.permute.xlu2 %6891 }
 0x5d7   :  { %v4883_v24 = vadd.f32 %v4882_v58, %v4690_v46  ;;  %v7274_v15 = vperm.slane %v13961_v60, %v12890_v25  ;;  %v4499_v52 = vadd.f32 %v4498_v13, %v4306_v28 }
 0x5d9   :  { %v9919_v36 = vpop.eup %9918  ;;  %v5117_v33 = vadd.f32 %v13609_v34, %v4883_v24 }
 0x5da   :  { %v6450_v4 = vmul.f32 %v9919_v36, %v15173_v1  ;;  %v15176_v1 = vld [vmem:[#allocation177_spill] sm:$0xff] }
 0x5db   :  { %9920 = vtanh.f32 %v5117_v33  ;;  %v4308_v8 = vpop.f32.mrf.mxu0 }
 0x5dc   :  { %v4691_v23 = vpop.f32.mrf.mxu2  ;;  %v4884_v49 = vpop.f32.mrf.mxu3  ;;  %6927 = vperm.xlu2 %9732, %v6450_v4   ;;  %v4309_v19 = vadd.f32 %v4308_v8, %v15174_v2  ;;  %v9506_v8 = vld [vmem:[%s14734_s3 + $0xabc] sm:$0xf0] }
 0x5dd   :  { %v4692_v12 = vadd.f32 %v4691_v23, %v4499_v52 }
 0x5de   :  { %v4501_v53 = vpop.f32.mrf.mxu1  ;;  %v6886_v58 = vpop.permute.xlu0 %6885  ;;  %4347 = vmatmul.bf16.gmra.mxu0 %v8768_v47  ;;  %4540 = vmatmul.bf16.gmra.mxu1 %v8772_v40  ;;  %v8793_v47 = vld [vmem:[%s14734_s3 + $0xab8] sm:$0xf0]  ;;  %v8799_v40 = vld [vmem:[%s14734_s3 + $0xaa8] sm:$0xf] }
 0x5df   :  { %v4885_v30 = vadd.f32 %v4884_v49, %v4692_v12  ;;  %v7270_v46 = vperm.slane %v6886_v58, %v12704_v20  ;;  %v4502_v63 = vadd.f32 %v4501_v53, %v4309_v19  ;;  %v9502_v49 = vld [vmem:[%s14734_s3 + $0xaa4] sm:$0xf]  ;;  %v9503_v53 = vld [vmem:[%s14734_s3 + $0xaac] sm:$0xf] }
 0x5e1   :  { %v9921_v14 = vpop.eup %9920  ;;  %v5118_v13 = vadd.f32 %v13609_v34, %v4885_v30  ;;  %4733 = vmatmul.bf16.gmra.mxu2 %v8776_v45  ;;  %4926 = vmatmul.bf16.gmra.mxu3 %v8780_v43  ;;  %v7271_v24 = vsel %vm7109_vm4, %v7270_v46, %v7269_v59  ;;  %v8791_v59 = vld [vmem:[%s14734_s3 + $0xaa0] sm:$0xf]  ;;  %v8801_v30 = vld [vmem:[%s14734_s3 + $0xac0] sm:$0xf0] }
 0x5e2   :  { %v6451_v28 = vmul.f32 %v9921_v14, %v15175_v57  ;;  %v15177_v45 = vld [vmem:[#allocation153_spill] sm:$0xff]  ;;  %v8792_v14 = vor.u32 %v9505_v38, %v8791_v59  ;;  %v8800_v57 = vor.u32 %v9506_v8, %v8799_v40  ;;  %v9511_v8 = vld [vmem:[%s14734_s3 + $0xae4] sm:$0xf0] }
 0x5e3   :  { %9922 = vtanh.f32 %v5118_v13  ;;  %v4310_v6 = vpop.f32.mrf.mxu0  ;;  %v8796_v13 = vor.u32 %v9502_v49, %v8793_v47  ;;  %v15180_v47 = vld [vmem:[#allocation71_spill] sm:$0xff] }
 0x5e4   :  { %v4694_v3 = vpop.f32.mrf.mxu2  ;;  %v4887_v36 = vpop.f32.mrf.mxu3  ;;  %6930 = vperm.xlu0 %9728, %v6451_v28   ;;  %v4311_v4 = vadd.f32 %v4310_v6, %v15176_v1  ;;  %v8804_v28 = vor.u32 %v9503_v53, %v8801_v30  ;;  %v15179_v1 = vld [vmem:[#allocation166_spill] sm:$0xff] }
 0x5e5   :  { %v4695_v33 = vadd.f32 %v4694_v3, %v4502_v63 }
 0x5e6   :  { %v4503_v5 = vpop.f32.mrf.mxu1  ;;  %v6889_v37 = vpop.permute.xlu1 %6888 }
 0x5e7   :  { %v4888_v31 = vadd.f32 %v4887_v36, %v4695_v33  ;;  %v7272_v50 = vperm.slane %v6889_v37, %v12289_v18  ;;  %v4504_v2 = vadd.f32 %v4503_v5, %v4311_v4  ;;  %v15178_v33 = vld [vmem:[#allocation179_spill] sm:$0xff] }
 0x5e9   :  { %v9923_v52 = vpop.eup %9922  ;;  %v5119_v23 = vadd.f32 %v13609_v34, %v4888_v31  ;;  %v7273_v12 = vsel %vm7113_vm5, %v7272_v50, %v7271_v24 }
 0x5ea   :  { %v6452_v43 = vmul.f32 %v9923_v52, %v15177_v45  ;;  %v7275_v19 = vsel %vm14744_vm6, %v7274_v15, %v7273_v12 }
 0x5eb   :  { %9924 = vtanh.f32 %v5119_v23  ;;  %v4313_v63 = vpop.f32.mrf.mxu0 }
 0x5ec   :  { %v4696_v58 = vpop.f32.mrf.mxu2  ;;  %v4889_v46 = vpop.f32.mrf.mxu3  ;;  %6933 = vperm.xlu1 %9733, %v6452_v43   ;;  %v4314_v6 = vadd.f32 %v4313_v63, %v15178_v33  ;;  %v8815_v43 = vld [vmem:[%s14734_s3 + $0xad0] sm:$0xf]  ;;  %v8825_v63 = vld [vmem:[%s14734_s3 + $0xaf0] sm:$0xf0] }
 0x5ed   :  { %v4697_v24 = vadd.f32 %v4696_v58, %v4504_v2  ;;  %v9508_v2 = vld [vmem:[%s14734_s3 + $0xad4] sm:$0xf]  ;;  %v8817_v58 = vld [vmem:[%s14734_s3 + $0xae8] sm:$0xf0] }
 0x5ee   :  { %v4506_v3 = vpop.f32.mrf.mxu1  ;;  %v6901_v31 = vpop.permute.xlu2 %6900  ;;  %4352 = vmatmul.bf16.gmra.mxu0 %v8792_v14  ;;  %4545 = vmatmul.bf16.gmra.mxu1 %v8796_v13  ;;  %v15181_v13 = vld [vmem:[#allocation156_spill] sm:$0xff] }
 0x5ef   :  { %v4890_v36 = vadd.f32 %v4889_v46, %v4697_v24  ;;  %v7280_v5 = vperm.slane %v6901_v31, %v12940_v55  ;;  %v4507_v37 = vadd.f32 %v4506_v3, %v4314_v6  ;;  %v8823_v46 = vld [vmem:[%s14734_s3 + $0xad8] sm:$0xf]  ;;  %v8820_v6 = vor.u32 %v9508_v2, %v8817_v58 }
 0x5f1   :  { %v9925_v60 = vpop.eup %9924  ;;  %v5120_v15 = vadd.f32 %v13609_v34, %v4890_v36  ;;  %4738 = vmatmul.bf16.gmra.mxu2 %v8800_v57  ;;  %4931 = vmatmul.bf16.gmra.mxu3 %v8804_v28  ;;  %v9512_v57 = vld [vmem:[%s14734_s3 + $0xaec] sm:$0xf0]  ;;  %v9509_v28 = vld [vmem:[%s14734_s3 + $0xadc] sm:$0xf] }
 0x5f2   :  { %v6453_v4 = vmul.f32 %v9925_v60, %v15179_v1  ;;  %v8824_v60 = vor.u32 %v9512_v57, %v8823_v46 }
 0x5f3   :  { %9926 = vtanh.f32 %v5120_v15  ;;  %v4315_v52 = vpop.f32.mrf.mxu0  ;;  %v8828_v15 = vor.u32 %v9509_v28, %v8825_v63  ;;  %v8839_v28 = vld [vmem:[%s14734_s3 + $0xb00] sm:$0xf] }
 0x5f4   :  { %v4699_v50 = vpop.f32.mrf.mxu2  ;;  %v4892_v59 = vpop.f32.mrf.mxu3  ;;  %6936 = vperm.xlu2 %9732, %v6453_v4   ;;  %v4316_v40 = vadd.f32 %v4315_v52, %v15180_v47 }
 0x5f5   :  { %v4700_v38 = vadd.f32 %v4699_v50, %v4507_v37  ;;  %v15182_v50 = vld [vmem:[#allocation182_spill] sm:$0xff] }
 0x5f6   :  { %v4508_v23 = vpop.f32.mrf.mxu1  ;;  %v6895_v12 = vpop.permute.xlu0 %6894 }
 0x5f7   :  { %v4893_v49 = vadd.f32 %v4892_v59, %v4700_v38  ;;  %v7276_v45 = vperm.slane %v6895_v12, %v12772_v9  ;;  %v4509_v3 = vadd.f32 %v4508_v23, %v4316_v40  ;;  %v15183_v40 = vld [vmem:[#allocation52_spill] sm:$0xff] }
 0x5f9   :  { %v9927_v53 = vpop.eup %9926  ;;  %v5121_v30 = vadd.f32 %v13609_v34, %v4893_v49  ;;  %v7277_v14 = vsel %vm7121_vm7, %v7276_v45, %v7275_v19  ;;  %v8816_v19 = vor.u32 %v9511_v8, %v8815_v43 }
 0x5fa   :  { %v6454_v24 = vmul.f32 %v9927_v53, %v15181_v13  ;;  %v15184_v13 = vld [vmem:[#allocation57_spill] sm:$0xff] }
 0x5fb   :  { %9928 = vtanh.f32 %v5121_v30  ;;  %v4318_v1 = vpop.f32.mrf.mxu0 }
 0x5fc   :  { %v4701_v36 = vpop.f32.mrf.mxu2  ;;  %v4894_v33 = vpop.f32.mrf.mxu3  ;;  %6939 = vperm.xlu0 %9728, %v6454_v24   ;;  %v4319_v59 = vadd.f32 %v4318_v1, %v15182_v50  ;;  %v8849_v1 = vld [vmem:[%s14734_s3 + $0xb20] sm:$0xf0] }
 0x5fd   :  { %v4702_v31 = vadd.f32 %v4701_v36, %v4509_v3  ;;  %v9514_v36 = vld [vmem:[%s14734_s3 + $0xb04] sm:$0xf] }
 0x5fe   :  { %v4511_v4 = vpop.f32.mrf.mxu1  ;;  %v6898_v38 = vpop.permute.xlu1 %6897  ;;  %4357 = vmatmul.bf16.gmra.mxu0 %v8816_v19  ;;  %4550 = vmatmul.bf16.gmra.mxu1 %v8820_v6  ;;  %v8847_v19 = vld [vmem:[%s14734_s3 + $0xb08] sm:$0xf]  ;;  %v15185_v6 = vld [vmem:[#allocation168_spill] sm:$0xff] }
 0x5ff   :  { %v4895_v37 = vadd.f32 %v4894_v33, %v4702_v31  ;;  %v7278_v52 = vperm.slane %v6898_v38, %v12355_v7  ;;  %v4512_v45 = vadd.f32 %v4511_v4, %v4319_v59  ;;  %v8841_v33 = vld [vmem:[%s14734_s3 + $0xb18] sm:$0xf0] }
 0x600   :  { %v8844_v38 = vor.u32 %v9514_v36, %v8841_v33 }
 0x601   :  { %v9929_v49 = vpop.eup %9928  ;;  %v5122_v23 = vadd.f32 %v13609_v34, %v4895_v37  ;;  %4743 = vmatmul.bf16.gmra.mxu2 %v8824_v60  ;;  %4936 = vmatmul.bf16.gmra.mxu3 %v8828_v15  ;;  %v7279_v47 = vsel %vm7125_vm8, %v7278_v52, %v7277_v14  ;;  %v9518_v60 = vld [vmem:[%s14734_s3 + $0xb1c] sm:$0xf0]  ;;  %v9515_v15 = vld [vmem:[%s14734_s3 + $0xb0c] sm:$0xf] }
 0x602   :  { %v6455_v12 = vmul.f32 %v9929_v49, %v15183_v40  ;;  %v7281_v43 = vsel %vm7129_vm9, %v7280_v5, %v7279_v47  ;;  %v9517_v5 = vld [vmem:[%s14734_s3 + $0xb14] sm:$0xf0]  ;;  %v8848_v49 = vor.u32 %v9518_v60, %v8847_v19 }
 0x603   :  { %9930 = vtanh.f32 %v5122_v23  ;;  %v4320_v2 = vpop.f32.mrf.mxu0  ;;  %v8840_v59 = vor.u32 %v9517_v5, %v8839_v28  ;;  %v8852_v23 = vor.u32 %v9515_v15, %v8849_v1  ;;  %v9523_v1 = vld [vmem:[%s14734_s3 + $0xb44] sm:$0xf0] }
 0x604   :  { %v4704_v8 = vpop.f32.mrf.mxu2  ;;  %v4897_v53 = vpop.f32.mrf.mxu3  ;;  %6942 = vperm.xlu1 %9733, %v6455_v12   ;;  %v4321_v24 = vadd.f32 %v4320_v2, %v15184_v13  ;;  %v15187_v13 = vld [vmem:[#allocation159_spill] sm:$0xff] }
 0x605   :  { %v4705_v30 = vadd.f32 %v4704_v8, %v4512_v45  ;;  %v15186_v45 = vld [vmem:[#allocation46_spill] sm:$0xff] }
 0x606   :  { %v4513_v58 = vpop.f32.mrf.mxu1  ;;  %v14069_v57 = vpop.permute.xlu2 %6909 }
 0x607   :  { %v4898_v46 = vadd.f32 %v4897_v53, %v4705_v30  ;;  %v7286_v14 = vperm.slane %v14069_v57, %v12958_v17  ;;  %v4514_v4 = vadd.f32 %v4513_v58, %v4321_v24 }
 0x609   :  { %v9931_v63 = vpop.eup %9930  ;;  %v5123_v3 = vadd.f32 %v13609_v34, %v4898_v46 }
 0x60a   :  { %v6456_v31 = vmul.f32 %v9931_v63, %v15185_v6  ;;  %v15188_v6 = vld [vmem:[#allocation63_spill] sm:$0xff] }
 0x60b   :  { %9932 = vtanh.f32 %v5123_v3  ;;  %v4323_v47 = vpop.f32.mrf.mxu0 }
 0x60c   :  { %v4706_v37 = vpop.f32.mrf.mxu2  ;;  %v4899_v50 = vpop.f32.mrf.mxu3  ;;  %6945 = vperm.xlu2 %9732, %v6456_v31   ;;  %v4324_v8 = vadd.f32 %v4323_v47, %v15186_v45  ;;  %v9524_v47 = vld [vmem:[%s14734_s3 + $0xb4c] sm:$0xf0] }
 0x60d   :  { %v4707_v52 = vadd.f32 %v4706_v37, %v4514_v4 }
 0x60e   :  { %v4516_v40 = vpop.f32.mrf.mxu1  ;;  %v6904_v53 = vpop.permute.xlu0 %6903  ;;  %4362 = vmatmul.bf16.gmra.mxu0 %v8840_v59  ;;  %4555 = vmatmul.bf16.gmra.mxu1 %v8844_v38  ;;  %v8865_v59 = vld [vmem:[%s14734_s3 + $0xb48] sm:$0xf0]  ;;  %v8871_v38 = vld [vmem:[%s14734_s3 + $0xb38] sm:$0xf] }
 0x60f   :  { %v4900_v12 = vadd.f32 %v4899_v50, %v4707_v52  ;;  %v7282_v30 = vperm.slane %v6904_v53, %v12816_v11  ;;  %v4517_v28 = vadd.f32 %v4516_v40, %v4324_v8  ;;  %v9520_v50 = vld [vmem:[%s14734_s3 + $0xb34] sm:$0xf]  ;;  %v9521_v40 = vld [vmem:[%s14734_s3 + $0xb3c] sm:$0xf] }
 0x611   :  { %v9933_v2 = vpop.eup %9932  ;;  %v5124_v58 = vadd.f32 %v13609_v34, %v4900_v12  ;;  %4748 = vmatmul.bf16.gmra.mxu2 %v8848_v49  ;;  %4941 = vmatmul.bf16.gmra.mxu3 %v8852_v23  ;;  %v7283_v46 = vsel %vm14743_vm10, %v7282_v30, %v7281_v43  ;;  %v8863_v43 = vld [vmem:[%s14734_s3 + $0xb30] sm:$0xf]  ;;  %v15189_v49 = vld [vmem:[#allocation170_spill] sm:$0xff]  ;;  %v8873_v12 = vld [vmem:[%s14734_s3 + $0xb50] sm:$0xf0] }
 0x612   :  { %v6457_v24 = vmul.f32 %v9933_v2, %v15187_v13  ;;  %v8864_v2 = vor.u32 %v9523_v1, %v8863_v43  ;;  %v8872_v13 = vor.u32 %v9524_v47, %v8871_v38  ;;  %v9529_v47 = vld [vmem:[%s14734_s3 + $0xb74] sm:$0xf0] }
 0x613   :  { %9934 = vtanh.f32 %v5124_v58  ;;  %v4325_v36 = vpop.f32.mrf.mxu0  ;;  %v8868_v58 = vor.u32 %v9520_v50, %v8865_v59  ;;  %v15192_v59 = vld [vmem:[#allocation72_spill] sm:$0xff] }
 0x614   :  { %v4709_v5 = vpop.f32.mrf.mxu2  ;;  %v4902_v63 = vpop.f32.mrf.mxu3  ;;  %6948 = vperm.xlu0 %9728, %v6457_v24   ;;  %v4326_v31 = vadd.f32 %v4325_v36, %v15188_v6  ;;  %v8876_v24 = vor.u32 %v9521_v40, %v8873_v12  ;;  %v15191_v6 = vld [vmem:[#allocation2_spill] sm:$0xff] }
 0x615   :  { %v4710_v3 = vadd.f32 %v4709_v5, %v4517_v28 }
 0x616   :  { %v4518_v33 = vpop.f32.mrf.mxu1  ;;  %v6907_v60 = vpop.permute.xlu1 %6906 }
 0x617   :  { %v4903_v19 = vadd.f32 %v4902_v63, %v4710_v3  ;;  %v7284_v15 = vperm.slane %v6907_v60, %v12456_v35  ;;  %v4519_v45 = vadd.f32 %v4518_v33, %v4326_v31  ;;  %v15190_v3 = vld [vmem:[#allocation69_spill] sm:$0xff] }
 0x619   :  { %v9935_v4 = vpop.eup %9934  ;;  %v5125_v37 = vadd.f32 %v13609_v34, %v4903_v19  ;;  %v7285_v52 = vsel %vm14742_vm11, %v7284_v15, %v7283_v46 }
 0x61a   :  { %v6458_v23 = vmul.f32 %v9935_v4, %v15189_v49  ;;  %v7287_v8 = vsel %vm7141_vm12, %v7286_v14, %v7285_v52 }
 0x61b   :  { %9936 = vtanh.f32 %v5125_v37  ;;  %v4328_v28 = vpop.f32.mrf.mxu0 }
 0x61c   :  { %v4711_v53 = vpop.f32.mrf.mxu2  ;;  %v4904_v30 = vpop.f32.mrf.mxu3  ;;  %6951 = vperm.xlu1 %9733, %v6458_v23   ;;  %v4329_v36 = vadd.f32 %v4328_v28, %v15190_v3  ;;  %v8887_v23 = vld [vmem:[%s14734_s3 + $0xb60] sm:$0xf]  ;;  %v8897_v28 = vld [vmem:[%s14734_s3 + $0xb80] sm:$0xf0] }
 0x61d   :  { %v4712_v46 = vadd.f32 %v4711_v53, %v4519_v45  ;;  %v9526_v45 = vld [vmem:[%s14734_s3 + $0xb64] sm:$0xf]  ;;  %v8889_v53 = vld [vmem:[%s14734_s3 + $0xb78] sm:$0xf0] }
 0x61e   :  { %v4521_v5 = vpop.f32.mrf.mxu1  ;;  %v14138_v19 = vpop.permute.xlu2 %6918  ;;  %4367 = vmatmul.bf16.gmra.mxu0 %v8864_v2  ;;  %4560 = vmatmul.bf16.gmra.mxu1 %v8868_v58  ;;  %v15193_v58 = vld [vmem:[#allocation55_spill] sm:$0xff] }
 0x61f   :  { %v4905_v63 = vadd.f32 %v4904_v30, %v4712_v46  ;;  %v7292_v57 = vperm.slane %v14138_v19, %v12148_v21  ;;  %v4522_v60 = vadd.f32 %v4521_v5, %v4329_v36  ;;  %v8895_v30 = vld [vmem:[%s14734_s3 + $0xb68] sm:$0xf]  ;;  %v8892_v36 = vor.u32 %v9526_v45, %v8889_v53  ;;  %v8935_v19 = vld [vmem:[%s14734_s3 + $0xbc0] sm:$0xf] }
 0x621   :  { %v9937_v14 = vpop.eup %9936  ;;  %v5126_v33 = vadd.f32 %v13609_v34, %v4905_v63  ;;  %4753 = vmatmul.bf16.gmra.mxu2 %v8872_v13  ;;  %4946 = vmatmul.bf16.gmra.mxu3 %v8876_v24  ;;  %v9530_v13 = vld [vmem:[%s14734_s3 + $0xb7c] sm:$0xf0]  ;;  %v9527_v24 = vld [vmem:[%s14734_s3 + $0xb6c] sm:$0xf] }
 0x622   :  { %v6459_v31 = vmul.f32 %v9937_v14, %v15191_v6  ;;  %v8900_v6 = vor.u32 %v9527_v24, %v8897_v28 }
 0x623   :  { %9938 = vtanh.f32 %v5126_v33  ;;  %v4330_v4 = vpop.f32.mrf.mxu0  ;;  %v8896_v33 = vor.u32 %v9530_v13, %v8895_v30  ;;  %v15197_v13 = vld [vmem:[#allocation81_spill] sm:$0xff] }
 0x624   :  { %v4714_v15 = vpop.f32.mrf.mxu2  ;;  %v4907_v43 = vpop.f32.mrf.mxu3  ;;  %6954 = vperm.xlu2 %9732, %v6459_v31   ;;  %v4331_v38 = vadd.f32 %v4330_v4, %v15192_v59 }
 0x625   :  { %v4715_v1 = vadd.f32 %v4714_v15, %v4522_v60 }
 0x626   :  { %v4523_v37 = vpop.f32.mrf.mxu1  ;;  %v6913_v52 = vpop.permute.xlu0 %6912 }
 0x627   :  { %v4908_v50 = vadd.f32 %v4907_v43, %v4715_v1  ;;  %v7288_v49 = vperm.slane %v6913_v52, %v12829_v32  ;;  %v4524_v5 = vadd.f32 %v4523_v37, %v4331_v38  ;;  %v15194_v43 = vld [vmem:[#allocation96_spill] sm:$0xff]  ;;  %v15195_v52 = vld [vmem:[#allocation7_spill] sm:$0xff] }
 0x629   :  { %v9939_v40 = vpop.eup %9938  ;;  %v5127_v12 = vadd.f32 %v13609_v34, %v4908_v50  ;;  %v7289_v2 = vsel %vm7145_vm13, %v7288_v49, %v7287_v8  ;;  %v8888_v8 = vor.u32 %v9529_v47, %v8887_v23  ;;  %v15196_v47 = vld [vmem:[#allocation88_spill] sm:$0xff] }
 0x62a   :  { %v6460_v46 = vmul.f32 %v9939_v40, %v15193_v58 }
 0x62b   :  { %9940 = vtanh.f32 %v5127_v12  ;;  %v4333_v31 = vpop.f32.mrf.mxu0 }
 0x62c   :  { %v4716_v63 = vpop.f32.mrf.mxu2  ;;  %v4909_v3 = vpop.f32.mrf.mxu3  ;;  %6957 = vperm.xlu0 %9728, %v6460_v46   ;;  %v4334_v1 = vadd.f32 %v4333_v31, %v15194_v43  ;;  %v8921_v43 = vld [vmem:[%s14734_s3 + $0xbb0] sm:$0xf0] }
 0x62d   :  { %v4717_v14 = vadd.f32 %v4716_v63, %v4524_v5  ;;  %v8911_v5 = vld [vmem:[%s14734_s3 + $0xb90] sm:$0xf]  ;;  %v9535_v63 = vld [vmem:[%s14734_s3 + $0xba4] sm:$0xf0] }
 0x62e   :  { %v4526_v60 = vpop.f32.mrf.mxu1  ;;  %v6916_v4 = vpop.permute.xlu1 %6915  ;;  %4372 = vmatmul.bf16.gmra.mxu0 %v8888_v8  ;;  %4565 = vmatmul.bf16.gmra.mxu1 %v8892_v36  ;;  %v9532_v36 = vld [vmem:[%s14734_s3 + $0xb94] sm:$0xf] }
 0x62f   :  { %v4910_v15 = vadd.f32 %v4909_v3, %v4717_v14  ;;  %v7290_v50 = vperm.slane %v6916_v4, %v12532_v51  ;;  %v4527_v23 = vadd.f32 %v4526_v60, %v4334_v1  ;;  %v8913_v14 = vld [vmem:[%s14734_s3 + $0xba8] sm:$0xf0]  ;;  %v9536_v60 = vld [vmem:[%s14734_s3 + $0xbac] sm:$0xf0] }
 0x631   :  { %v9941_v37 = vpop.eup %9940  ;;  %v5128_v59 = vadd.f32 %v13609_v34, %v4910_v15  ;;  %4758 = vmatmul.bf16.gmra.mxu2 %v8896_v33  ;;  %4951 = vmatmul.bf16.gmra.mxu3 %v8900_v6  ;;  %v7291_v38 = vsel %vm7149_vm14, %v7290_v50, %v7289_v2  ;;  %v8919_v33 = vld [vmem:[%s14734_s3 + $0xb98] sm:$0xf]  ;;  %v15198_v6 = vld [vmem:[#allocation3_spill] sm:$0xff]  ;;  %v9533_v15 = vld [vmem:[%s14734_s3 + $0xb9c] sm:$0xf] }
 0x632   :  { %v6461_v49 = vmul.f32 %v9941_v37, %v15195_v52  ;;  %v14180_v40 = vsel %vm7402_vm15, %v7291_v38, %v15196_v47  ;;  %v8912_v37 = vor.u32 %v9535_v63, %v8911_v5  ;;  %v8920_v52 = vor.u32 %v9536_v60, %v8919_v33  ;;  %v15200_v5 = vld [vmem:[#allocation8_spill] sm:$0xff]  ;;  %v15201_v60 = vld [vmem:[#allocation15_spill] sm:$0xff] }
 0x633   :  { %9942 = vtanh.f32 %v5128_v59  ;;  %v4335_v30 = vpop.f32.mrf.mxu0  ;;  %v8916_v59 = vor.u32 %v9532_v36, %v8913_v14 }
 0x634   :  { %v4719_v12 = vpop.f32.mrf.mxu2  ;;  %v4912_v45 = vpop.f32.mrf.mxu3  ;;  %6960 = vperm.xlu1 %9733, %v6461_v49   ;;  %v4336_v24 = vadd.f32 %v4335_v30, %v15197_v13  ;;  %v8924_v49 = vor.u32 %v9533_v15, %v8921_v43 }
 0x635   :  { %v4720_v53 = vadd.f32 %v4719_v12, %v4527_v23 }
 0x636   :  { %v4528_v58 = vpop.f32.mrf.mxu1  ;;  %v14183_v28 = vpop.permute.xlu2 %6927 }
 0x637   :  { %v4913_v46 = vadd.f32 %v4912_v45, %v4720_v53  ;;  %v7297_v2 = vperm.slane %v14183_v28, %v12715_v54  ;;  %v4529_v1 = vadd.f32 %v4528_v58, %v4336_v24  ;;  %v15199_v45 = vld [vmem:[#allocation64_spill] sm:$0xff] }
 0x639   :  { %v9943_v3 = vpop.eup %9942  ;;  %v5129_v8 = vadd.f32 %v13609_v34, %v4913_v46 }
 0x63a   :  { %v6462_v31 = vmul.f32 %v9943_v3, %v15198_v6 }
 0x63b   :  { %9944 = vtanh.f32 %v5129_v8  ;;  %v4338_v23 = vpop.f32.mrf.mxu0 }
 0x63c   :  { %v4721_v4 = vpop.f32.mrf.mxu2  ;;  %v4914_v50 = vpop.f32.mrf.mxu3  ;;  %6963 = vperm.xlu2 %9732, %v6462_v31   ;;  %v4339_v53 = vadd.f32 %v4338_v23, %v15199_v45  ;;  %v8945_v45 = vld [vmem:[%s14734_s3 + $0xbe0] sm:$0xf0] }
 0x63d   :  { %v4722_v38 = vadd.f32 %v4721_v4, %v4529_v1 }
 0x63e   :  { %v4531_v47 = vpop.f32.mrf.mxu1  ;;  %v6922_v30 = vpop.permute.xlu0 %6921  ;;  %4377 = vmatmul.bf16.gmra.mxu0 %v8912_v37  ;;  %4570 = vmatmul.bf16.gmra.mxu1 %v8916_v59  ;;  %v9538_v37 = vld [vmem:[%s14734_s3 + $0xbc4] sm:$0xf]  ;;  %v8937_v59 = vld [vmem:[%s14734_s3 + $0xbd8] sm:$0xf0] }
 0x63f   :  { %v4915_v12 = vadd.f32 %v4914_v50, %v4722_v38  ;;  %v7293_v46 = vperm.slane %v6922_v30, %v12156_v41  ;;  %v4532_v3 = vadd.f32 %v4531_v47, %v4339_v53  ;;  %v8943_v38 = vld [vmem:[%s14734_s3 + $0xbc8] sm:$0xf]  ;;  %v9542_v47 = vld [vmem:[%s14734_s3 + $0xbdc] sm:$0xf0] }
 0x641   :  { %v9945_v13 = vpop.eup %9944  ;;  %v5130_v58 = vadd.f32 %v13609_v34, %v4915_v12  ;;  %4763 = vmatmul.bf16.gmra.mxu2 %v8920_v52  ;;  %4956 = vmatmul.bf16.gmra.mxu3 %v8924_v49  ;;  %v7294_v24 = vsel %vm7093_vm0, %v7293_v46, %v7292_v57  ;;  %v9541_v57 = vld [vmem:[%s14734_s3 + $0xbd4] sm:$0xf0]  ;;  %v9539_v12 = vld [vmem:[%s14734_s3 + $0xbcc] sm:$0xf] }
 0x642   :  { %v6463_v63 = vmul.f32 %v9945_v13, %v15200_v5  ;;  %v15202_v49 = vld [vmem:[#allocation4_spill] sm:$0xff] }
 0x643   :  { %9946 = vtanh.f32 %v5130_v58  ;;  %v4340_v33 = vpop.f32.mrf.mxu0  ;;  %v8936_v58 = vor.u32 %v9541_v57, %v8935_v19 }
 0x644   :  { %v4724_v8 = vpop.f32.mrf.mxu2  ;;  %v4917_v36 = vpop.f32.mrf.mxu3  ;;  %6966 = vperm.xlu0 %9728, %v6463_v63   ;;  %v4341_v15 = vadd.f32 %v4340_v33, %v15201_v60  ;;  %v8944_v63 = vor.u32 %v9542_v47, %v8943_v38  ;;  %v15203_v33 = vld [vmem:[#allocation87_spill] sm:$0xff]  ;;  %v15205_v38 = vld [vmem:[#allocation18_spill] sm:$0xff] }
 0x645   :  { %v4725_v14 = vadd.f32 %v4724_v8, %v4532_v3  ;;  %v8948_v3 = vor.u32 %v9539_v12, %v8945_v45  ;;  %v8959_v47 = vld [vmem:[%s14734_s3 + $0xbf0] sm:$0xf]  ;;  %v9547_v12 = vld [vmem:[%s14734_s3 + $0xc04] sm:$0xf0] }
 0x646   :  { %v4533_v6 = vpop.f32.mrf.mxu1  ;;  %v6925_v43 = vpop.permute.xlu1 %6924 }
 0x647   :  { %v4918_v31 = vadd.f32 %v4917_v36, %v4725_v14  ;;  %v7295_v1 = vperm.slane %v6925_v43, %v12634_v27  ;;  %v4534_v53 = vadd.f32 %v4533_v6, %v4341_v15  ;;  %v15204_v15 = vld [vmem:[#allocation59_spill] sm:$0xff] }
 0x649   :  { %v9947_v4 = vpop.eup %9946  ;;  %v5131_v50 = vadd.f32 %v13609_v34, %v4918_v31  ;;  %v7296_v52 = vsel %vm7097_vm1, %v7295_v1, %v7294_v24  ;;  %v8940_v24 = vor.u32 %v9538_v37, %v8937_v59 }
 0x64a   :  { %v6464_v23 = vmul.f32 %v9947_v4, %v15202_v49  ;;  %v7298_v30 = vsel %vm7101_vm2, %v7297_v2, %v7296_v52 }
 0x64b   :  { %9948 = vtanh.f32 %v5131_v50  ;;  %v4343_v8 = vpop.f32.mrf.mxu0 }
 0x64c   :  { %v4726_v46 = vpop.f32.mrf.mxu2  ;;  %v4919_v13 = vpop.f32.mrf.mxu3  ;;  %6969 = vperm.xlu1 %9733, %v6464_v23   ;;  %v4344_v31 = vadd.f32 %v4343_v8, %v15203_v33  ;;  %v9545_v8 = vld [vmem:[%s14734_s3 + $0xbfc] sm:$0xf] }
 0x64d   :  { %v4727_v5 = vadd.f32 %v4726_v46, %v4534_v53  ;;  %v9544_v46 = vld [vmem:[%s14734_s3 + $0xbf4] sm:$0xf] }
 0x64e   :  { %v4536_v36 = vpop.f32.mrf.mxu1  ;;  %v6937_v60 = vpop.permute.xlu2 %6936  ;;  %4382 = vmatmul.bf16.gmra.mxu0 %v8936_v58  ;;  %4575 = vmatmul.bf16.gmra.mxu1 %v8940_v24  ;;  %v8967_v58 = vld [vmem:[%s14734_s3 + $0xbf8] sm:$0xf] }
 0x64f   :  { %v4920_v14 = vadd.f32 %v4919_v13, %v4727_v5  ;;  %v7303_v6 = vperm.slane %v6937_v60, %v12289_v18  ;;  %v4537_v1 = vadd.f32 %v4536_v36, %v4344_v31  ;;  %v8961_v13 = vld [vmem:[%s14734_s3 + $0xc08] sm:$0xf0]  ;;  %v15206_v5 = vld [vmem:[#allocation9_spill] sm:$0xff]  ;;  %v8969_v36 = vld [vmem:[%s14734_s3 + $0xc10] sm:$0xf0] }
 0x650   :  { %v8964_v60 = vor.u32 %v9544_v46, %v8961_v13 }
 0x651   :  { %v9949_v28 = vpop.eup %9948  ;;  %v5132_v2 = vadd.f32 %v13609_v34, %v4920_v14  ;;  %4768 = vmatmul.bf16.gmra.mxu2 %v8944_v63  ;;  %4961 = vmatmul.bf16.gmra.mxu3 %v8948_v3  ;;  %v9548_v3 = vld [vmem:[%s14734_s3 + $0xc0c] sm:$0xf0] }
 0x652   :  { %v6465_v43 = vmul.f32 %v9949_v28, %v15204_v15  ;;  %v8972_v15 = vor.u32 %v9545_v8, %v8969_v36  ;;  %v8983_v36 = vld [vmem:[%s14734_s3 + $0xc20] sm:$0xf] }
 0x653   :  { %9950 = vtanh.f32 %v5132_v2  ;;  %v4345_v50 = vpop.f32.mrf.mxu0  ;;  %v8968_v2 = vor.u32 %v9548_v3, %v8967_v58 }
 0x654   :  { %v4729_v19 = vpop.f32.mrf.mxu2  ;;  %v4922_v57 = vpop.f32.mrf.mxu3  ;;  %6972 = vperm.xlu2 %9732, %v6465_v43   ;;  %v4346_v52 = vadd.f32 %v4345_v50, %v15205_v38 }
 0x655   :  { %v4730_v4 = vadd.f32 %v4729_v19, %v4537_v1 }
 0x656   :  { %v4538_v37 = vpop.f32.mrf.mxu1  ;;  %v6931_v49 = vpop.permute.xlu0 %6930 }
 0x657   :  { %v4923_v59 = vadd.f32 %v4922_v57, %v4730_v4  ;;  %v7299_v23 = vperm.slane %v6931_v49, %v12872_v56  ;;  %v4539_v14 = vadd.f32 %v4538_v37, %v4346_v52  ;;  %v15207_v57 = vld [vmem:[#allocation22_spill] sm:$0xff]  ;;  %v15208_v49 = vld [vmem:[#allocation5_spill] sm:$0xff] }
 0x659   :  { %v9951_v45 = vpop.eup %9950  ;;  %v5133_v53 = vadd.f32 %v13609_v34, %v4923_v59  ;;  %v7300_v24 = vsel %vm7105_vm3, %v7299_v23, %v7298_v30  ;;  %v8960_v30 = vor.u32 %v9547_v12, %v8959_v47 }
 0x65a   :  { %v6466_v63 = vmul.f32 %v9951_v45, %v15206_v5 }
 0x65b   :  { %9952 = vtanh.f32 %v5133_v53  ;;  %v4348_v43 = vpop.f32.mrf.mxu0 }
 0x65c   :  { %v4731_v33 = vpop.f32.mrf.mxu2  ;;  %v4924_v31 = vpop.f32.mrf.mxu3  ;;  %6975 = vperm.xlu0 %9728, %v6466_v63   ;;  %v4349_v4 = vadd.f32 %v4348_v43, %v15207_v57  ;;  %v15209_v63 = vld [vmem:[#allocation77_spill] sm:$0xff]  ;;  %v9551_v43 = vld [vmem:[%s14734_s3 + $0xc2c] sm:$0xf] }
 0x65d   :  { %v4732_v28 = vadd.f32 %v4731_v33, %v4539_v14 }
 0x65e   :  { %v4541_v1 = vpop.f32.mrf.mxu1  ;;  %v6934_v50 = vpop.permute.xlu1 %6933  ;;  %4387 = vmatmul.bf16.gmra.mxu0 %v8960_v30  ;;  %4580 = vmatmul.bf16.gmra.mxu1 %v8964_v60  ;;  %v8985_v30 = vld [vmem:[%s14734_s3 + $0xc38] sm:$0xf0]  ;;  %v8991_v60 = vld [vmem:[%s14734_s3 + $0xc28] sm:$0xf] }
 0x65f   :  { %v4925_v19 = vadd.f32 %v4924_v31, %v4732_v28  ;;  %v7301_v59 = vperm.slane %v6934_v50, %v12704_v20  ;;  %v4542_v47 = vadd.f32 %v4541_v1, %v4349_v4  ;;  %v9550_v31 = vld [vmem:[%s14734_s3 + $0xc24] sm:$0xf]  ;;  %v15210_v28 = vld [vmem:[#allocation10_spill] sm:$0xff] }
 0x660   :  { %v8993_v1 = vld [vmem:[%s14734_s3 + $0xc40] sm:$0xf0] }
 0x661   :  { %v9953_v38 = vpop.eup %9952  ;;  %v5134_v37 = vadd.f32 %v13609_v34, %v4925_v19  ;;  %4773 = vmatmul.bf16.gmra.mxu2 %v8968_v2  ;;  %4966 = vmatmul.bf16.gmra.mxu3 %v8972_v15  ;;  %v7302_v52 = vsel %vm7109_vm4, %v7301_v59, %v7300_v24  ;;  %v9554_v15 = vld [vmem:[%s14734_s3 + $0xc3c] sm:$0xf0]  ;;  %v8988_v59 = vor.u32 %v9550_v31, %v8985_v30 }
 0x662   :  { %v6467_v23 = vmul.f32 %v9953_v38, %v15208_v49  ;;  %v7304_v12 = vsel %vm7113_vm5, %v7303_v6, %v7302_v52  ;;  %v9553_v6 = vld [vmem:[%s14734_s3 + $0xc34] sm:$0xf0]  ;;  %v8996_v52 = vor.u32 %v9551_v43, %v8993_v1 }
 0x663   :  { %9954 = vtanh.f32 %v5134_v37  ;;  %v4350_v13 = vpop.f32.mrf.mxu0  ;;  %v8984_v50 = vor.u32 %v9553_v6, %v8983_v36  ;;  %v8992_v37 = vor.u32 %v9554_v15, %v8991_v60 }
 0x664   :  { %v4734_v45 = vpop.f32.mrf.mxu2  ;;  %v4927_v53 = vpop.f32.mrf.mxu3  ;;  %6978 = vperm.xlu1 %9733, %v6467_v23   ;;  %v4351_v3 = vadd.f32 %v4350_v13, %v15209_v63 }
 0x665   :  { %v4735_v46 = vadd.f32 %v4734_v45, %v4542_v47  ;;  %v15211_v45 = vld [vmem:[#allocation21_spill] sm:$0xff] }
 0x666   :  { %v4543_v58 = vpop.f32.mrf.mxu1  ;;  %v14294_v8 = vpop.permute.xlu2 %6945 }
 0x667   :  { %v4928_v5 = vadd.f32 %v4927_v53, %v4735_v46  ;;  %v7309_v24 = vperm.slane %v14294_v8, %v12355_v7  ;;  %v4544_v19 = vadd.f32 %v4543_v58, %v4351_v3  ;;  %v15212_v3 = vld [vmem:[#allocation6_spill] sm:$0xff] }
 0x669   :  { %v9955_v14 = vpop.eup %9954  ;;  %v5135_v33 = vadd.f32 %v13609_v34, %v4928_v5 }
 0x66a   :  { %v6468_v2 = vmul.f32 %v9955_v14, %v15210_v28 }
 0x66b   :  { %9956 = vtanh.f32 %v5135_v33  ;;  %v4353_v49 = vpop.f32.mrf.mxu0 }
 0x66c   :  { %v4736_v57 = vpop.f32.mrf.mxu2  ;;  %v4929_v4 = vpop.f32.mrf.mxu3  ;;  %6981 = vperm.xlu2 %9732, %v6468_v2   ;;  %v4354_v53 = vadd.f32 %v4353_v49, %v15211_v45  ;;  %v15213_v2 = vld [vmem:[#allocation92_spill] sm:$0xff]  ;;  %v9017_v45 = vld [vmem:[%s14734_s3 + $0xc70] sm:$0xf0] }
 0x66d   :  { %v4737_v38 = vadd.f32 %v4736_v57, %v4544_v19  ;;  %v9559_v19 = vld [vmem:[%s14734_s3 + $0xc64] sm:$0xf0] }
 0x66e   :  { %v4546_v23 = vpop.f32.mrf.mxu1  ;;  %v6940_v46 = vpop.permute.xlu0 %6939  ;;  %4392 = vmatmul.bf16.gmra.mxu0 %v8984_v50  ;;  %4585 = vmatmul.bf16.gmra.mxu1 %v8988_v59  ;;  %v9556_v50 = vld [vmem:[%s14734_s3 + $0xc54] sm:$0xf]  ;;  %v9009_v59 = vld [vmem:[%s14734_s3 + $0xc68] sm:$0xf0] }
 0x66f   :  { %v4930_v47 = vadd.f32 %v4929_v4, %v4737_v38  ;;  %v7305_v13 = vperm.slane %v6940_v46, %v12890_v25  ;;  %v4547_v6 = vadd.f32 %v4546_v23, %v4354_v53  ;;  %v9015_v38 = vld [vmem:[%s14734_s3 + $0xc58] sm:$0xf]  ;;  %v9560_v23 = vld [vmem:[%s14734_s3 + $0xc6c] sm:$0xf0] }
 0x671   :  { %v9957_v5 = vpop.eup %9956  ;;  %v5136_v58 = vadd.f32 %v13609_v34, %v4930_v47  ;;  %4778 = vmatmul.bf16.gmra.mxu2 %v8992_v37  ;;  %4971 = vmatmul.bf16.gmra.mxu3 %v8996_v52  ;;  %v7306_v63 = vsel %vm14744_vm6, %v7305_v13, %v7304_v12  ;;  %v9007_v12 = vld [vmem:[%s14734_s3 + $0xc50] sm:$0xf]  ;;  %v9557_v47 = vld [vmem:[%s14734_s3 + $0xc5c] sm:$0xf] }
 0x672   :  { %v6469_v36 = vmul.f32 %v9957_v5, %v15212_v3  ;;  %v15214_v52 = vld [vmem:[#allocation67_spill] sm:$0xff] }
 0x673   :  { %9958 = vtanh.f32 %v5136_v58  ;;  %v4355_v30 = vpop.f32.mrf.mxu0  ;;  %v9008_v58 = vor.u32 %v9559_v19, %v9007_v12 }
 0x674   :  { %v4739_v14 = vpop.f32.mrf.mxu2  ;;  %v4932_v33 = vpop.f32.mrf.mxu3  ;;  %6984 = vperm.xlu0 %9728, %v6469_v36   ;;  %v4356_v15 = vadd.f32 %v4355_v30, %v15213_v2  ;;  %v9016_v36 = vor.u32 %v9560_v23, %v9015_v38  ;;  %v15215_v30 = vld [vmem:[#allocation112_spill] sm:$0xff]  ;;  %v9031_v23 = vld [vmem:[%s14734_s3 + $0xc80] sm:$0xf] }
 0x675   :  { %v4740_v31 = vadd.f32 %v4739_v14, %v4547_v6  ;;  %v9020_v6 = vor.u32 %v9557_v47, %v9017_v45  ;;  %v15217_v38 = vld [vmem:[#allocation24_spill] sm:$0xff] }
 0x676   :  { %v4548_v60 = vpop.f32.mrf.mxu1  ;;  %v6943_v43 = vpop.permute.xlu1 %6942  ;;  %v9565_v47 = vld [vmem:[%s14734_s3 + $0xc94] sm:$0xf0] }
 0x677   :  { %v4933_v28 = vadd.f32 %v4932_v33, %v4740_v31  ;;  %v7307_v1 = vperm.slane %v6943_v43, %v12772_v9  ;;  %v4549_v53 = vadd.f32 %v4548_v60, %v4356_v15  ;;  %v15216_v15 = vld [vmem:[#allocation11_spill] sm:$0xff] }
 0x679   :  { %v9959_v57 = vpop.eup %9958  ;;  %v5137_v4 = vadd.f32 %v13609_v34, %v4933_v28  ;;  %v7308_v37 = vsel %vm7121_vm7, %v7307_v1, %v7306_v63  ;;  %v9012_v63 = vor.u32 %v9556_v50, %v9009_v59 }
 0x67a   :  { %v6470_v49 = vmul.f32 %v9959_v57, %v15214_v52  ;;  %v7310_v46 = vsel %vm7125_vm8, %v7309_v24, %v7308_v37 }
 0x67b   :  { %9960 = vtanh.f32 %v5137_v4  ;;  %v4358_v14 = vpop.f32.mrf.mxu0 }
 0x67c   :  { %v4741_v13 = vpop.f32.mrf.mxu2  ;;  %v4934_v5 = vpop.f32.mrf.mxu3  ;;  %6987 = vperm.xlu1 %9733, %v6470_v49   ;;  %v4359_v28 = vadd.f32 %v4358_v14, %v15215_v30  ;;  %v9563_v14 = vld [vmem:[%s14734_s3 + $0xc8c] sm:$0xf] }
 0x67d   :  { %v4742_v3 = vadd.f32 %v4741_v13, %v4549_v53  ;;  %v9562_v13 = vld [vmem:[%s14734_s3 + $0xc84] sm:$0xf] }
 0x67e   :  { %v4551_v33 = vpop.f32.mrf.mxu1  ;;  %v6955_v2 = vpop.permute.xlu2 %6954  ;;  %4397 = vmatmul.bf16.gmra.mxu0 %v9008_v58  ;;  %4590 = vmatmul.bf16.gmra.mxu1 %v9012_v63  ;;  %v9039_v58 = vld [vmem:[%s14734_s3 + $0xc88] sm:$0xf] }
 0x67f   :  { %v4935_v31 = vadd.f32 %v4934_v5, %v4742_v3  ;;  %v7315_v60 = vperm.slane %v6955_v2, %v12456_v35  ;;  %v4552_v1 = vadd.f32 %v4551_v33, %v4359_v28  ;;  %v9033_v5 = vld [vmem:[%s14734_s3 + $0xc98] sm:$0xf0]  ;;  %v9041_v33 = vld [vmem:[%s14734_s3 + $0xca0] sm:$0xf0] }
 0x680   :  { %v15218_v3 = vld [vmem:[#allocation172_spill] sm:$0xff]  ;;  %v9036_v2 = vor.u32 %v9562_v13, %v9033_v5 }
 0x681   :  { %v9961_v8 = vpop.eup %9960  ;;  %v5138_v24 = vadd.f32 %v13609_v34, %v4935_v31  ;;  %4783 = vmatmul.bf16.gmra.mxu2 %v9016_v36  ;;  %4976 = vmatmul.bf16.gmra.mxu3 %v9020_v6  ;;  %v9566_v6 = vld [vmem:[%s14734_s3 + $0xc9c] sm:$0xf0] }
 0x682   :  { %v6471_v43 = vmul.f32 %v9961_v8, %v15216_v15  ;;  %v9044_v15 = vor.u32 %v9563_v14, %v9041_v33  ;;  %v9055_v33 = vld [vmem:[%s14734_s3 + $0xcb0] sm:$0xf] }
 0x683   :  { %9962 = vtanh.f32 %v5138_v24  ;;  %v4360_v4 = vpop.f32.mrf.mxu0  ;;  %v9040_v24 = vor.u32 %v9566_v6, %v9039_v58 }
 0x684   :  { %v4744_v12 = vpop.f32.mrf.mxu2  ;;  %v4937_v19 = vpop.f32.mrf.mxu3  ;;  %6990 = vperm.xlu2 %9732, %v6471_v43   ;;  %v4361_v37 = vadd.f32 %v4360_v4, %v15217_v38 }
 0x685   :  { %v4745_v57 = vadd.f32 %v4744_v12, %v4552_v1 }
 0x686   :  { %v4553_v50 = vpop.f32.mrf.mxu1  ;;  %v6949_v52 = vpop.permute.xlu0 %6948 }
 0x687   :  { %v4938_v59 = vadd.f32 %v4937_v19, %v4745_v57  ;;  %v7311_v49 = vperm.slane %v6949_v52, %v12940_v55  ;;  %v4554_v31 = vadd.f32 %v4553_v50, %v4361_v37  ;;  %v15219_v19 = vld [vmem:[#allocation80_spill] sm:$0xff] }
 0x688   :  { %v15220_v52 = vld [vmem:[#allocation12_spill] sm:$0xff] }
 0x689   :  { %v9963_v45 = vpop.eup %9962  ;;  %v5139_v53 = vadd.f32 %v13609_v34, %v4938_v59  ;;  %v7312_v63 = vsel %vm7129_vm9, %v7311_v49, %v7310_v46  ;;  %v9032_v46 = vor.u32 %v9565_v47, %v9031_v23 }
 0x68a   :  { %v6472_v36 = vmul.f32 %v9963_v45, %v15218_v3 }
 0x68b   :  { %9964 = vtanh.f32 %v5139_v53  ;;  %v4363_v43 = vpop.f32.mrf.mxu0 }
 0x68c   :  { %v4746_v30 = vpop.f32.mrf.mxu2  ;;  %v4939_v28 = vpop.f32.mrf.mxu3  ;;  %6993 = vperm.xlu0 %9728, %v6472_v36   ;;  %v4364_v57 = vadd.f32 %v4363_v43, %v15219_v19  ;;  %v15221_v36 = vld [vmem:[#allocation104_spill] sm:$0xff] }
 0x68d   :  { %v4747_v8 = vadd.f32 %v4746_v30, %v4554_v31  ;;  %v9569_v43 = vld [vmem:[%s14734_s3 + $0xcbc] sm:$0xf] }
 0x68e   :  { %v4556_v1 = vpop.f32.mrf.mxu1  ;;  %v6952_v4 = vpop.permute.xlu1 %6951  ;;  %4402 = vmatmul.bf16.gmra.mxu0 %v9032_v46  ;;  %4595 = vmatmul.bf16.gmra.mxu1 %v9036_v2  ;;  %v9057_v46 = vld [vmem:[%s14734_s3 + $0xcc8] sm:$0xf0]  ;;  %v9063_v2 = vld [vmem:[%s14734_s3 + $0xcb8] sm:$0xf] }
 0x68f   :  { %v4940_v12 = vadd.f32 %v4939_v28, %v4747_v8  ;;  %v7313_v59 = vperm.slane %v6952_v4, %v12816_v11  ;;  %v4557_v23 = vadd.f32 %v4556_v1, %v4364_v57  ;;  %v9568_v28 = vld [vmem:[%s14734_s3 + $0xcb4] sm:$0xf]  ;;  %v15222_v8 = vld [vmem:[#allocation174_spill] sm:$0xff] }
 0x690   :  { %v9065_v1 = vld [vmem:[%s14734_s3 + $0xcd0] sm:$0xf0] }
 0x691   :  { %v9965_v38 = vpop.eup %9964  ;;  %v5140_v50 = vadd.f32 %v13609_v34, %v4940_v12  ;;  %4788 = vmatmul.bf16.gmra.mxu2 %v9040_v24  ;;  %4981 = vmatmul.bf16.gmra.mxu3 %v9044_v15  ;;  %v7314_v37 = vsel %vm14743_vm10, %v7313_v59, %v7312_v63  ;;  %v9572_v15 = vld [vmem:[%s14734_s3 + $0xccc] sm:$0xf0]  ;;  %v9060_v59 = vor.u32 %v9568_v28, %v9057_v46 }
 0x692   :  { %v6473_v49 = vmul.f32 %v9965_v38, %v15220_v52  ;;  %v7316_v47 = vsel %vm14742_vm11, %v7315_v60, %v7314_v37  ;;  %v9571_v60 = vld [vmem:[%s14734_s3 + $0xcc4] sm:$0xf0]  ;;  %v9068_v37 = vor.u32 %v9569_v43, %v9065_v1  ;;  %vm7413_vm11 = vcmask 1041408   ;;  %v9577_v1 = vld [vmem:[%s14734_s3 + $0xcf4] sm:$0xf0] }
 0x693   :  { %9966 = vtanh.f32 %v5140_v50  ;;  %v4365_v5 = vpop.f32.mrf.mxu0  ;;  %v9056_v4 = vor.u32 %v9571_v60, %v9055_v33  ;;  %v9064_v50 = vor.u32 %v9572_v15, %v9063_v2 }
 0x694   :  { %v4749_v45 = vpop.f32.mrf.mxu2  ;;  %v4942_v53 = vpop.f32.mrf.mxu3  ;;  %6996 = vperm.xlu1 %9733, %v6473_v49   ;;  %v4366_v6 = vadd.f32 %v4365_v5, %v15221_v36 }
 0x695   :  { %v4750_v13 = vadd.f32 %v4749_v45, %v4557_v23  ;;  %v15223_v45 = vld [vmem:[#allocation25_spill] sm:$0xff] }
 0x696   :  { %v4558_v58 = vpop.f32.mrf.mxu1  ;;  %v14402_v14 = vpop.permute.xlu2 %6963 }
 0x697   :  { %v4943_v3 = vadd.f32 %v4942_v53, %v4750_v13  ;;  %v7321_v63 = vperm.slane %v14402_v14, %v12532_v51  ;;  %v4559_v12 = vadd.f32 %v4558_v58, %v4366_v6  ;;  %v15224_v6 = vld [vmem:[#allocation74_spill] sm:$0xff] }
 0x699   :  { %v9967_v31 = vpop.eup %9966  ;;  %v5141_v30 = vadd.f32 %v13609_v34, %v4943_v3 }
 0x69a   :  { %v6474_v24 = vmul.f32 %v9967_v31, %v15222_v8 }
 0x69b   :  { %9968 = vtanh.f32 %v5141_v30  ;;  %v4368_v52 = vpop.f32.mrf.mxu0 }
 0x69c   :  { %v4751_v19 = vpop.f32.mrf.mxu2  ;;  %v4944_v57 = vpop.f32.mrf.mxu3  ;;  %6999 = vperm.xlu2 %9732, %v6474_v24   ;;  %v4369_v53 = vadd.f32 %v4368_v52, %v15223_v45  ;;  %v9575_v52 = vld [vmem:[%s14734_s3 + $0xcec] sm:$0xf] }
 0x69d   :  { %v4752_v38 = vadd.f32 %v4751_v19, %v4559_v12 }
 0x69e   :  { %v4561_v49 = vpop.f32.mrf.mxu1  ;;  %v6958_v13 = vpop.permute.xlu0 %6957  ;;  %4407 = vmatmul.bf16.gmra.mxu0 %v9056_v4  ;;  %4600 = vmatmul.bf16.gmra.mxu1 %v9060_v59  ;;  %v9087_v4 = vld [vmem:[%s14734_s3 + $0xce8] sm:$0xf] }
 0x69f   :  { %v4945_v23 = vadd.f32 %v4944_v57, %v4752_v38  ;;  %v7317_v5 = vperm.slane %v6958_v13, %v12958_v17  ;;  %v4562_v60 = vadd.f32 %v4561_v49, %v4369_v53  ;;  %v9574_v57 = vld [vmem:[%s14734_s3 + $0xce4] sm:$0xf]  ;;  %v15225_v38 = vld [vmem:[#allocation43_spill] sm:$0xff]  ;;  %v7414_v53 = vsel %vm7413_vm11, %v14180_v40, 0.0 }
 0x6a0   :  { %v9089_v49 = vld [vmem:[%s14734_s3 + $0xd00] sm:$0xf0] }
 0x6a1   :  { %v9969_v3 = vpop.eup %9968  ;;  %v5142_v58 = vadd.f32 %v13609_v34, %v4945_v23  ;;  %4793 = vmatmul.bf16.gmra.mxu2 %v9064_v50  ;;  %4986 = vmatmul.bf16.gmra.mxu3 %v9068_v37  ;;  %v7318_v36 = vsel %vm7141_vm12, %v7317_v5, %v7316_v47  ;;  %v9079_v47 = vld [vmem:[%s14734_s3 + $0xce0] sm:$0xf] }
 0x6a2   :  { %v6475_v33 = vmul.f32 %v9969_v3, %v15224_v6  ;;  %v9578_v37 = vld [vmem:[%s14734_s3 + $0xcfc] sm:$0xf0] }
 0x6a3   :  { %9970 = vtanh.f32 %v5142_v58  ;;  %v4370_v46 = vpop.f32.mrf.mxu0  ;;  %v9080_v58 = vor.u32 %v9577_v1, %v9079_v47 }
 0x6a4   :  { %v4754_v31 = vpop.f32.mrf.mxu2  ;;  %v4947_v30 = vpop.f32.mrf.mxu3  ;;  %7002 = vperm.xlu0 %9728, %v6475_v33   ;;  %v4371_v24 = vadd.f32 %v4370_v46, %v13061_v16  ;;  %v9081_v16 = vld [vmem:[%s14734_s3 + $0xcf8] sm:$0xf0] }
 0x6a5   :  { %v4755_v28 = vadd.f32 %v4754_v31, %v4562_v60  ;;  %v9088_v60 = vor.u32 %v9578_v37, %v9087_v4  ;;  %v9092_v31 = vor.u32 %v9575_v52, %v9089_v49  ;;  %v9580_v49 = vld [vmem:[%s14734_s3 + $0xd14] sm:$0xf] }
 0x6a6   :  { %v4563_v2 = vpop.f32.mrf.mxu1  ;;  %v6961_v15 = vpop.permute.xlu1 %6960 }
 0x6a7   :  { %v4948_v8 = vadd.f32 %v4947_v30, %v4755_v28  ;;  %v7319_v43 = vperm.slane %v6961_v15, %v12829_v32  ;;  %v4564_v23 = vadd.f32 %v4563_v2, %v4371_v24  ;;  %v15226_v24 = vld [vmem:[#allocation68_spill] sm:$0xff] }
 0x6a9   :  { %v9971_v12 = vpop.eup %9970  ;;  %v5143_v19 = vadd.f32 %v13609_v34, %v4948_v8  ;;  %v7320_v59 = vsel %vm7145_vm13, %v7319_v43, %v7318_v36  ;;  %v9084_v36 = vor.u32 %v9574_v57, %v9081_v16 }
 0x6aa   :  { %v6476_v50 = vmul.f32 %v9971_v12, %v15225_v38  ;;  %v7322_v45 = vsel %vm7149_vm14, %v7321_v63, %v7320_v59  ;;  %v9103_v38 = vld [vmem:[%s14734_s3 + $0xd10] sm:$0xf] }
 0x6ab   :  { %9972 = vtanh.f32 %v5143_v19  ;;  %v7404_v13 = vsel %vm7402_vm15, %v7322_v45, %v13187_v29  ;;  %v4373_v30 = vpop.f32.mrf.mxu0  ;;  %v15227_v45 = vld [vmem:[#allocation14_spill] sm:$0xff] }
 0x6ac   :  { %v4756_v5 = vpop.f32.mrf.mxu2  ;;  %v4949_v3 = vpop.f32.mrf.mxu3  ;;  %7005 = vperm.xlu1 %9733, %v6476_v50   ;;  %v7415_v6 = vsel %vm7413_vm11, %v7404_v13, 0.0  ;;  %v4374_v40 = vadd.f32 %v4373_v30, %v13077_v61  ;;  %v9583_v50 = vld [vmem:[%s14734_s3 + $0xd24] sm:$0xf0]  ;;  %v9584_v13 = vld [vmem:[%s14734_s3 + $0xd2c] sm:$0xf0] }
 0x6ad   :  { %v4757_v33 = vadd.f32 %v4756_v5, %v4564_v23  ;;  %v14475_v28 = vadd.f32 %v7415_v6, %v7414_v53  ;;  %v9111_v23 = vld [vmem:[%s14734_s3 + $0xd18] sm:$0xf]  ;;  %v9581_v5 = vld [vmem:[%s14734_s3 + $0xd1c] sm:$0xf] }
 0x6ae   :  { %v4566_v14 = vpop.f32.mrf.mxu1  ;;  %v6973_v46 = vpop.permute.xlu2 %6972  ;;  %4412 = vmatmul.bf16.gmra.mxu0 %v9080_v58  ;;  %4605 = vmatmul.bf16.gmra.mxu1 %v9084_v36  ;;  %v9112_v30 = vor.u32 %v9584_v13, %v9111_v23  ;;  %v15229_v13 = vld [vmem:[#allocation83_spill] sm:$0xff] }
 0x6af   :  { %v4950_v63 = vadd.f32 %v4949_v3, %v4757_v33  ;;  %v7326_v29 = vperm.slane %v6973_v46, %v12634_v27  ;;  %v4567_v43 = vadd.f32 %v4566_v14, %v4374_v40  ;;  %v9113_v3 = vld [vmem:[%s14734_s3 + $0xd30] sm:$0xf0]  ;;  %v9104_v33 = vor.u32 %v9583_v50, %v9103_v38 }
 0x6b0   :  { %v9116_v14 = vor.u32 %v9581_v5, %v9113_v3  ;;  %v9590_v3 = vld [vmem:[%s14734_s3 + $0xd5c] sm:$0xf0] }
 0x6b1   :  { %v9973_v2 = vpop.eup %9972  ;;  %v5144_v8 = vadd.f32 %v13609_v34, %v4950_v63  ;;  %4798 = vmatmul.bf16.gmra.mxu2 %v9088_v60  ;;  %4991 = vmatmul.bf16.gmra.mxu3 %v9092_v31 }
 0x6b2   :  { %v6477_v15 = vmul.f32 %v9973_v2, %v15226_v24 }
 0x6b3   :  { %9974 = vtanh.f32 %v5144_v8  ;;  %v4375_v19 = vpop.f32.mrf.mxu0 }
 0x6b4   :  { %v4759_v47 = vpop.f32.mrf.mxu2  ;;  %v4952_v1 = vpop.f32.mrf.mxu3  ;;  %7008 = vperm.xlu2 %9732, %v6477_v15   ;;  %v4376_v16 = vadd.f32 %v4375_v19, %v13124_v10  ;;  %v9105_v10 = vld [vmem:[%s14734_s3 + $0xd28] sm:$0xf0] }
 0x6b5   :  { %v4760_v12 = vadd.f32 %v4759_v47, %v4567_v43  ;;  %v9108_v60 = vor.u32 %v9580_v49, %v9105_v10  ;;  %v9127_v49 = vld [vmem:[%s14734_s3 + $0xd40] sm:$0xf] }
 0x6b6   :  { %v4568_v61 = vpop.f32.mrf.mxu1  ;;  %v6967_v4 = vpop.permute.xlu0 %6966 }
 0x6b7   :  { %v4953_v57 = vadd.f32 %v4952_v1, %v4760_v12  ;;  %v7323_v59 = vperm.slane %v6967_v4, %v12148_v21  ;;  %v4569_v58 = vadd.f32 %v4568_v61, %v4376_v16  ;;  %v15228_v1 = vld [vmem:[#allocation178_spill] sm:$0xff] }
 0x6b9   :  { %v9975_v37 = vpop.eup %9974  ;;  %v5145_v52 = vadd.f32 %v13609_v34, %v4953_v57 }
 0x6ba   :  { %v6478_v53 = vmul.f32 %v9975_v37, %v15227_v45  ;;  %v9129_v45 = vld [vmem:[%s14734_s3 + $0xd58] sm:$0xf0] }
 0x6bb   :  { %9976 = vtanh.f32 %v5145_v52  ;;  %v4378_v63 = vpop.f32.mrf.mxu0 }
 0x6bc   :  { %v4761_v36 = vpop.f32.mrf.mxu2  ;;  %v4954_v6 = vpop.f32.mrf.mxu3  ;;  %7011 = vperm.xlu0 %9728, %v6478_v53   ;;  %v4379_v2 = vadd.f32 %v4378_v63, %v13139_v26  ;;  %v9135_v53 = vld [vmem:[%s14734_s3 + $0xd48] sm:$0xf] }
 0x6bd   :  { %v4762_v31 = vadd.f32 %v4761_v36, %v4569_v58  ;;  %v9587_v58 = vld [vmem:[%s14734_s3 + $0xd4c] sm:$0xf]  ;;  %v9137_v36 = vld [vmem:[%s14734_s3 + $0xd60] sm:$0xf0]  ;;  %v9136_v63 = vor.u32 %v9590_v3, %v9135_v53  ;;  %v9592_v53 = vld [vmem:[%s14734_s3 + $0xd74] sm:$0xf] }
 0x6be   :  { %v4571_v40 = vpop.f32.mrf.mxu1  ;;  %v6970_v8 = vpop.permute.xlu1 %6969  ;;  %4417 = vmatmul.bf16.gmra.mxu0 %v9104_v33  ;;  %4610 = vmatmul.bf16.gmra.mxu1 %v9108_v60  ;;  %v15231_v3 = vld [vmem:[#allocation180_spill] sm:$0xff] }
 0x6bf   :  { %v4955_v46 = vadd.f32 %v4954_v6, %v4762_v31  ;;  %v7324_v24 = vperm.slane %v6970_v8, %v12156_v41  ;;  %v4572_v19 = vadd.f32 %v4571_v40, %v4379_v2  ;;  %v9140_v40 = vor.u32 %v9587_v58, %v9137_v36  ;;  %v9596_v36 = vld [vmem:[%s14734_s3 + $0xd8c] sm:$0xf0] }
 0x6c1   :  { %v9977_v15 = vpop.eup %9976  ;;  %v5146_v43 = vadd.f32 %v13609_v34, %v4955_v46  ;;  %4803 = vmatmul.bf16.gmra.mxu2 %v9112_v30  ;;  %4996 = vmatmul.bf16.gmra.mxu3 %v9116_v14  ;;  %v7325_v47 = vsel %vm7093_vm0, %v7324_v24, %v7323_v59 }
 0x6c2   :  { %v6479_v12 = vmul.f32 %v9977_v15, %v15228_v1  ;;  %v7327_v61 = vsel %vm7097_vm1, %v7326_v29, %v7325_v47  ;;  %v9589_v29 = vld [vmem:[%s14734_s3 + $0xd54] sm:$0xf0] }
 0x6c3   :  { %9978 = vtanh.f32 %v5146_v43  ;;  %v4380_v4 = vpop.f32.mrf.mxu0  ;;  %v9128_v31 = vor.u32 %v9589_v29, %v9127_v49 }
 0x6c4   :  { %v4764_v57 = vpop.f32.mrf.mxu2  ;;  %v4957_v26 = vpop.f32.mrf.mxu3  ;;  %7014 = vperm.xlu1 %9733, %v6479_v12   ;;  %v4381_v37 = vadd.f32 %v4380_v4, %v13182_v62  ;;  %v9586_v62 = vld [vmem:[%s14734_s3 + $0xd44] sm:$0xf] }
 0x6c5   :  { %v4765_v16 = vadd.f32 %v4764_v57, %v4572_v19  ;;  %v9132_v30 = vor.u32 %v9586_v62, %v9129_v45  ;;  %v15230_v19 = vld [vmem:[#allocation65_spill] sm:$0xff] }
 0x6c6   :  { %v4573_v38 = vpop.f32.mrf.mxu1  ;;  %v14516_v52 = vpop.permute.xlu2 %6981 }
 0x6c7   :  { %v4958_v50 = vadd.f32 %v4957_v26, %v4765_v16  ;;  %v7332_v59 = vperm.slane %v14516_v52, %v12704_v20  ;;  %v4574_v6 = vadd.f32 %v4573_v38, %v4381_v37 }
 0x6c9   :  { %v9979_v10 = vpop.eup %9978  ;;  %v5147_v23 = vadd.f32 %v13609_v34, %v4958_v50 }
 0x6ca   :  { %v6480_v5 = vmul.f32 %v9979_v10, %v15229_v13  ;;  %v9159_v13 = vld [vmem:[%s14734_s3 + $0xd78] sm:$0xf] }
 0x6cb   :  { %9980 = vtanh.f32 %v5147_v23  ;;  %v4383_v46 = vpop.f32.mrf.mxu0  ;;  %v9595_v23 = vld [vmem:[%s14734_s3 + $0xd84] sm:$0xf0] }
 0x6cc   :  { %v4766_v33 = vpop.f32.mrf.mxu2  ;;  %v4959_v60 = vpop.f32.mrf.mxu3  ;;  %7017 = vperm.xlu2 %9732, %v6480_v5   ;;  %v4384_v24 = vadd.f32 %v4383_v46, %v13192_v22 }
 0x6cd   :  { %v4767_v14 = vadd.f32 %v4766_v33, %v4574_v6  ;;  %v9593_v6 = vld [vmem:[%s14734_s3 + $0xd7c] sm:$0xf]  ;;  %v9161_v33 = vld [vmem:[%s14734_s3 + $0xd90] sm:$0xf0] }
 0x6ce   :  { %v4576_v2 = vpop.f32.mrf.mxu1  ;;  %v6976_v15 = vpop.permute.xlu0 %6975  ;;  %4422 = vmatmul.bf16.gmra.mxu0 %v9128_v31  ;;  %4615 = vmatmul.bf16.gmra.mxu1 %v9132_v30 }
 0x6cf   :  { %v4960_v8 = vadd.f32 %v4959_v60, %v4767_v14  ;;  %v7328_v43 = vperm.slane %v6976_v15, %v12715_v54  ;;  %v4577_v26 = vadd.f32 %v4576_v2, %v4384_v24  ;;  %v9160_v2 = vor.u32 %v9596_v36, %v9159_v13 }
 0x6d1   :  { %v9981_v47 = vpop.eup %9980  ;;  %v5148_v1 = vadd.f32 %v13609_v34, %v4960_v8  ;;  %4808 = vmatmul.bf16.gmra.mxu2 %v9136_v63  ;;  %5001 = vmatmul.bf16.gmra.mxu3 %v9140_v40  ;;  %v7329_v12 = vsel %vm7101_vm2, %v7328_v43, %v7327_v61  ;;  %v9151_v61 = vld [vmem:[%s14734_s3 + $0xd70] sm:$0xf]  ;;  %v9164_v8 = vor.u32 %v9593_v6, %v9161_v33 }
 0x6d2   :  { %v6481_v57 = vmul.f32 %v9981_v47, %v15230_v19  ;;  %v9152_v63 = vor.u32 %v9595_v23, %v9151_v61  ;;  %v15232_v19 = vld [vmem:[#allocation53_spill] sm:$0xff] }
 0x6d3   :  { %9982 = vtanh.f32 %v5148_v1  ;;  %v4385_v38 = vpop.f32.mrf.mxu0 }
 0x6d4   :  { %v4769_v16 = vpop.f32.mrf.mxu2  ;;  %v4962_v4 = vpop.f32.mrf.mxu3  ;;  %7020 = vperm.xlu0 %9728, %v6481_v57   ;;  %v4386_v49 = vadd.f32 %v4385_v38, %v13229_v44  ;;  %v9153_v44 = vld [vmem:[%s14734_s3 + $0xd88] sm:$0xf0] }
 0x6d5   :  { %v4770_v22 = vadd.f32 %v4769_v16, %v4577_v26  ;;  %v9156_v40 = vor.u32 %v9592_v53, %v9153_v44 }
 0x6d6   :  { %v4578_v50 = vpop.f32.mrf.mxu1  ;;  %v6979_v29 = vpop.permute.xlu1 %6978 }
 0x6d7   :  { %v4963_v37 = vadd.f32 %v4962_v4, %v4770_v22  ;;  %v7330_v10 = vperm.slane %v6979_v29, %v12872_v56  ;;  %v4579_v60 = vadd.f32 %v4578_v50, %v4386_v49  ;;  %v15233_v29 = vld [vmem:[#allocation84_spill] sm:$0xff] }
 0x6d9   :  { %v9983_v62 = vpop.eup %9982  ;;  %v5149_v45 = vadd.f32 %v13609_v34, %v4963_v37  ;;  %v7331_v5 = vsel %vm7105_vm3, %v7330_v10, %v7329_v12  ;;  %v468_v37 = vld [vmem:[%s14734_s3 + $0xda8] sm:$0x11] }
 0x6da   :  { %v6482_v58 = vmul.f32 %v9983_v62, %v15231_v3  ;;  %v7333_v31 = vsel %vm7109_vm4, %v7332_v59, %v7331_v5  ;;  %v3399_v13 = vunpack.c.l.b16 %v468_v37  ;;  %v3400_v5 = vunpack.c.h.b16 %v468_v37 }
 0x6db   :  { %9984 = vtanh.f32 %v5149_v45  ;;  %v4388_v24 = vpop.f32.mrf.mxu0 }
 0x6dc   :  { %v4771_v30 = vpop.f32.mrf.mxu2  ;;  %v4964_v14 = vpop.f32.mrf.mxu3  ;;  %7023 = vperm.xlu1 %9733, %v6482_v58   ;;  %v4389_v47 = vadd.f32 %v4388_v24, %v13241_v42  ;;  %v467_v42 = vld [vmem:[%s14734_s3 + $0xda0] sm:$0x11] }
 0x6dd   :  { %v4772_v46 = vadd.f32 %v4771_v30, %v4579_v60  ;;  %v3397_v62 = vunpack.c.l.b16 %v467_v42  ;;  %v3398_v45 = vunpack.c.h.b16 %v467_v42  ;;  %v15234_v58 = vld [vmem:[#allocation181_spill] sm:$0xff] }
 0x6de   :  { %v4581_v15 = vpop.f32.mrf.mxu1  ;;  %v6991_v1 = vpop.permute.xlu2 %6990  ;;  %4427 = vmatmul.bf16.gmra.mxu0 %v9152_v63  ;;  %4620 = vmatmul.bf16.gmra.mxu1 %v9156_v40  ;;  %v3621_v40 = vpack.c.b16 %v3399_v13, %v3399_v13 }
 0x6df   :  { %v4965_v43 = vadd.f32 %v4964_v14, %v4772_v46  ;;  %v7338_v12 = vperm.slane %v6991_v1, %v12772_v9  ;;  %v4582_v26 = vadd.f32 %v4581_v15, %v4389_v47  ;;  %v3619_v30 = vpack.c.b16 %v3397_v62, %v3397_v62  ;;  %v15235_v15 = vld [vmem:[#allocation26_spill] sm:$0xff] }
 0x6e0   :  { %v3620_v14 = vpack.c.b16 %v3398_v45, %v3398_v45  ;;  %v3622_v46 = vpack.c.b16 %v3400_v5, %v3400_v5  ;;  %v15238_v45 = vld [vmem:[#allocation56_spill] sm:$0xff] }
 0x6e1   :  { %v9985_v52 = vpop.eup %9984  ;;  %v5150_v59 = vadd.f32 %v13609_v34, %v4965_v43  ;;  %4813 = vmatmul.bf16.gmra.mxu2 %v9160_v2  ;;  %5006 = vmatmul.bf16.gmra.mxu3 %v9164_v8 }
 0x6e2   :  { %v6483_v57 = vmul.f32 %v9985_v52, %v15232_v19  ;;  %v15236_v19 = vld [vmem:[#allocation94_spill] sm:$0xff] }
 0x6e3   :  { %9986 = vtanh.f32 %v5150_v59  ;;  %v4390_v38 = vpop.f32.mrf.mxu0 }
 0x6e4   :  { %v4774_v16 = vpop.f32.mrf.mxu2  ;;  %v4967_v4 = vpop.f32.mrf.mxu3  ;;  %7026 = vperm.xlu2 %9732, %v6483_v57   ;;  %v4391_v10 = vadd.f32 %v4390_v38, %v15233_v29 }
 0x6e5   :  { %v4775_v22 = vadd.f32 %v4774_v16, %v4582_v26 }
 0x6e6   :  { %v4583_v50 = vpop.f32.mrf.mxu1  ;;  %v6985_v61 = vpop.permute.xlu0 %6984 }
 0x6e7   :  { %v4968_v49 = vadd.f32 %v4967_v4, %v4775_v22  ;;  %v7334_v23 = vperm.slane %v6985_v61, %v12289_v18  ;;  %v4584_v6 = vadd.f32 %v4583_v50, %v4391_v10 }
 0x6e9   :  { %v9987_v53 = vpop.eup %9986  ;;  %v5151_v44 = vadd.f32 %v13609_v34, %v4968_v49  ;;  %v7335_v3 = vsel %vm7113_vm5, %v7334_v23, %v7333_v31  ;;  %v15237_v49 = vld [vmem:[#allocation107_spill] sm:$0xff] }
 0x6ea   :  { %v6484_v36 = vmul.f32 %v9987_v53, %v15234_v58 }
 0x6eb   :  { %9988 = vtanh.f32 %v5151_v44  ;;  %v4393_v2 = vpop.f32.mrf.mxu0 }
 0x6ec   :  { %v4776_v33 = vpop.f32.mrf.mxu2  ;;  %v4969_v60 = vpop.f32.mrf.mxu3  ;;  %7029 = vperm.xlu0 %9728, %v6484_v36   ;;  %v4394_v43 = vadd.f32 %v4393_v2, %v15235_v15 }
 0x6ed   :  { %v4777_v63 = vadd.f32 %v4776_v33, %v4584_v6  ;;  %v15239_v6 = vld [vmem:[#allocation27_spill] sm:$0xff] }
 0x6ee   :  { %v4586_v8 = vpop.f32.mrf.mxu1  ;;  %v6988_v47 = vpop.permute.xlu1 %6987  ;;  %4432 = vmatmul.bf16.gmra.mxu0 %v3619_v30  ;;  %4625 = vmatmul.bf16.gmra.mxu1 %v3620_v14 }
 0x6ef   :  { %v4970_v24 = vadd.f32 %v4969_v60, %v4777_v63  ;;  %v7336_v31 = vperm.slane %v6988_v47, %v12890_v25  ;;  %v4587_v26 = vadd.f32 %v4586_v8, %v4394_v43 }
 0x6f1   :  { %v9989_v1 = vpop.eup %9988  ;;  %v5152_v52 = vadd.f32 %v13609_v34, %v4970_v24  ;;  %4818 = vmatmul.bf16.gmra.mxu2 %v3621_v40  ;;  %5011 = vmatmul.bf16.gmra.mxu3 %v3622_v46  ;;  %v7337_v59 = vsel %vm14744_vm6, %v7336_v31, %v7335_v3  ;;  %v15240_v46 = vld [vmem:[#allocation61_spill] sm:$0xff] }
 0x6f2   :  { %v6485_v57 = vmul.f32 %v9989_v1, %v15236_v19  ;;  %v7339_v16 = vsel %vm7121_vm7, %v7338_v12, %v7337_v59 }
 0x6f3   :  { %9990 = vtanh.f32 %v5152_v52  ;;  %v4395_v38 = vpop.f32.mrf.mxu0 }
 0x6f4   :  { %v4779_v4 = vpop.f32.mrf.mxu2  ;;  %v4972_v22 = vpop.f32.mrf.mxu3  ;;  %7032 = vperm.xlu1 %9733, %v6485_v57   ;;  %v4396_v29 = vadd.f32 %v4395_v38, %v15237_v49 }
 0x6f5   :  { %v4780_v42 = vadd.f32 %v4779_v4, %v4587_v26  ;;  %v15241_v4 = vld [vmem:[#allocation13_spill] sm:$0xff] }
 0x6f6   :  { %v4588_v50 = vpop.f32.mrf.mxu1  ;;  %v7000_v10 = vpop.permute.xlu2 %6999 }
 0x6f7   :  { %v4973_v37 = vadd.f32 %v4972_v22, %v4780_v42  ;;  %v7344_v61 = vperm.slane %v7000_v10, %v12816_v11  ;;  %v4589_v44 = vadd.f32 %v4588_v50, %v4396_v29 }
 0x6f9   :  { %v9991_v23 = vpop.eup %9990  ;;  %v5153_v62 = vadd.f32 %v13609_v34, %v4973_v37 }
 0x6fa   :  { %v6486_v53 = vmul.f32 %v9991_v23, %v15238_v45  ;;  %v15242_v23 = vld [vmem:[#allocation91_spill] sm:$0xff] }
 0x6fb   :  { %9992 = vtanh.f32 %v5153_v62  ;;  %v4398_v3 = vpop.f32.mrf.mxu0 }
 0x6fc   :  { %v4781_v12 = vpop.f32.mrf.mxu2  ;;  %v4974_v13 = vpop.f32.mrf.mxu3  ;;  %7035 = vperm.xlu2 %9732, %v6486_v53   ;;  %v4399_v33 = vadd.f32 %v4398_v3, %v15239_v6 }
 0x6fd   :  { %v4782_v5 = vadd.f32 %v4781_v12, %v4589_v44  ;;  %v15243_v44 = vld [vmem:[#allocation98_spill] sm:$0xff] }
 0x6fe   :  { %v4591_v58 = vpop.f32.mrf.mxu1  ;;  %v6994_v60 = vpop.permute.xlu0 %6993 }
 0x6ff   :  { %v4975_v36 = vadd.f32 %v4974_v13, %v4782_v5  ;;  %v7340_v30 = vperm.slane %v6994_v60, %v12355_v7  ;;  %v4592_v8 = vadd.f32 %v4591_v58, %v4399_v33  ;;  %v15244_v33 = vld [vmem:[#allocation29_spill] sm:$0xff] }
 0x701   :  { %v9993_v14 = vpop.eup %9992  ;;  %v5154_v63 = vadd.f32 %v13609_v34, %v4975_v36  ;;  %v7341_v40 = vsel %vm7125_vm8, %v7340_v30, %v7339_v16 }
 0x702   :  { %v6487_v2 = vmul.f32 %v9993_v14, %v15240_v46 }
 0x703   :  { %9994 = vtanh.f32 %v5154_v63  ;;  %v4400_v47 = vpop.f32.mrf.mxu0 }
 0x704   :  { %v4784_v24 = vpop.f32.mrf.mxu2  ;;  %v4977_v15 = vpop.f32.mrf.mxu3  ;;  %7038 = vperm.xlu0 %9728, %v6487_v2   ;;  %v4401_v52 = vadd.f32 %v4400_v47, %v13334_v48  ;;  %v15246_v2 = vld [vmem:[#allocation102_spill] sm:$0xff] }
 0x705   :  { %v4785_v43 = vadd.f32 %v4784_v24, %v4592_v8 }
 0x706   :  { %v4593_v31 = vpop.f32.mrf.mxu1  ;;  %v6997_v59 = vpop.permute.xlu1 %6996 }
 0x707   :  { %v4978_v1 = vadd.f32 %v4977_v15, %v4785_v43  ;;  %v7342_v19 = vperm.slane %v6997_v59, %v12940_v55  ;;  %v4594_v42 = vadd.f32 %v4593_v31, %v4401_v52 }
 0x709   :  { %v9995_v57 = vpop.eup %9994  ;;  %v5155_v26 = vadd.f32 %v13609_v34, %v4978_v1  ;;  %v7343_v16 = vsel %vm7129_vm9, %v7342_v19, %v7341_v40  ;;  %v15247_v19 = vld [vmem:[#allocation31_spill] sm:$0xff] }
 0x70a   :  { %v6488_v22 = vmul.f32 %v9995_v57, %v15241_v4  ;;  %v7345_v38 = vsel %vm14743_vm10, %v7344_v61, %v7343_v16  ;;  %vm15245_vm10 = vcmask 851712  }
 0x70b   :  { %9996 = vtanh.f32 %v5155_v26  ;;  %v4403_v29 = vpop.f32.mrf.mxu0 }
 0x70c   :  { %v4786_v50 = vpop.f32.mrf.mxu2  ;;  %v4979_v37 = vpop.f32.mrf.mxu3  ;;  %7041 = vperm.xlu1 %9733, %v6488_v22   ;;  %v4404_v62 = vadd.f32 %v4403_v29, %v15242_v23 }
 0x70d   :  { %v4787_v49 = vadd.f32 %v4786_v50, %v4594_v42  ;;  %v15248_v50 = vld [vmem:[#allocation16_spill] sm:$0xff] }
 0x70e   :  { %v4596_v48 = vpop.f32.mrf.mxu1  ;;  %v7009_v47 = vpop.permute.xlu2 %7008 }
 0x70f   :  { %v4980_v10 = vadd.f32 %v4979_v37, %v4787_v49  ;;  %v4597_v13 = vadd.f32 %v4596_v48, %v4404_v62  ;;  %v7350_v22 = vperm.slane %v7009_v47, %v12829_v32 }
 0x711   :  { %v9997_v45 = vpop.eup %9996  ;;  %v5156_v53 = vadd.f32 %v13609_v34, %v4980_v10 }
 0x712   :  { %v6489_v12 = vmul.f32 %v9997_v45, %v15243_v44  ;;  %v15249_v44 = vld [vmem:[#allocation95_spill] sm:$0xff] }
 0x713   :  { %9998 = vtanh.f32 %v5156_v53  ;;  %v4405_v58 = vpop.f32.mrf.mxu0 }
 0x714   :  { %v4789_v5 = vpop.f32.mrf.mxu2  ;;  %v4982_v3 = vpop.f32.mrf.mxu3  ;;  %7044 = vperm.xlu2 %9732, %v6489_v12   ;;  %v4406_v60 = vadd.f32 %v4405_v58, %v15244_v33 }
 0x715   :  { %v4790_v61 = vadd.f32 %v4789_v5, %v4597_v13 }
 0x716   :  { %v4598_v36 = vpop.f32.mrf.mxu1  ;;  %v7003_v30 = vpop.permute.xlu0 %7002 }
 0x717   :  { %v4983_v6 = vadd.f32 %v4982_v3, %v4790_v61  ;;  %v7346_v14 = vperm.slane %v7003_v30, %v12456_v35  ;;  %v4599_v24 = vadd.f32 %v4598_v36, %v4406_v60  ;;  %v15250_v3 = vld [vmem:[#allocation17_spill] sm:$0xff] }
 0x719   :  { %v9999_v63 = vpop.eup %9998  ;;  %v5157_v40 = vadd.f32 %v13609_v34, %v4983_v6  ;;  %v7347_v46 = vsel %vm15245_vm10, %v7346_v14, %v7345_v38  ;;  %vm15272_vm10 = vcmask 786112  }
 0x71a   :  { %v6490_v8 = vmul.f32 %v9999_v63, %v15246_v2  ;;  %v15251_v63 = vld [vmem:[#allocation33_spill] sm:$0xff] }
 0x71b   :  { %10000 = vtanh.f32 %v5157_v40  ;;  %v4408_v1 = vpop.f32.mrf.mxu0 }
 0x71c   :  { %v4791_v15 = vpop.f32.mrf.mxu2  ;;  %v4984_v43 = vpop.f32.mrf.mxu3  ;;  %7047 = vperm.xlu0 %9728, %v6490_v8   ;;  %v4409_v57 = vadd.f32 %v4408_v1, %v15247_v19  ;;  %v15253_v1 = vld [vmem:[#allocation110_spill] sm:$0xff] }
 0x71d   :  { %v4792_v31 = vadd.f32 %v4791_v15, %v4599_v24 }
 0x71e   :  { %v4601_v52 = vpop.f32.mrf.mxu1  ;;  %v7006_v26 = vpop.permute.xlu1 %7005 }
 0x71f   :  { %v4985_v59 = vadd.f32 %v4984_v43, %v4792_v31  ;;  %v7348_v16 = vperm.slane %v7006_v26, %v12958_v17  ;;  %v4602_v49 = vadd.f32 %v4601_v52, %v4409_v57  ;;  %v15252_v43 = vld [vmem:[#allocation85_spill] sm:$0xff] }
 0x721   :  { %v10001_v4 = vpop.eup %10000  ;;  %v5158_v42 = vadd.f32 %v13609_v34, %v4985_v59  ;;  %v7349_v38 = vsel %vm7141_vm12, %v7348_v16, %v7347_v46 }
 0x722   :  { %v6491_v37 = vmul.f32 %v10001_v4, %v15248_v50  ;;  %v7351_v29 = vsel %vm7145_vm13, %v7350_v22, %v7349_v38  ;;  %v15254_v38 = vld [vmem:[#allocation28_spill] sm:$0xff] }
 0x723   :  { %10002 = vtanh.f32 %v5158_v42  ;;  %v4410_v62 = vpop.f32.mrf.mxu0 }
 0x724   :  { %v4794_v48 = vpop.f32.mrf.mxu2  ;;  %v4987_v10 = vpop.f32.mrf.mxu3  ;;  %7050 = vperm.xlu1 %9733, %v6491_v37   ;;  %v4411_v12 = vadd.f32 %v4410_v62, %v15249_v44 }
 0x725   :  { %v4795_v23 = vadd.f32 %v4794_v48, %v4602_v49 }
 0x726   :  { %v4603_v45 = vpop.f32.mrf.mxu1 }
 0x727   :  { %v4988_v53 = vadd.f32 %v4987_v10, %v4795_v23  ;;  %v4604_v58 = vadd.f32 %v4603_v45, %v4411_v12  ;;  %v15256_v12 = vld [vmem:[#allocation35_spill] sm:$0xff] }
 0x729   :  { %v10003_v13 = vpop.eup %10002  ;;  %v5159_v5 = vadd.f32 %v13609_v34, %v4988_v53 }
 0x72a   :  { %v6492_v61 = vmul.f32 %v10003_v13, %v15250_v3 }
 0x72b   :  { %10004 = vtanh.f32 %v5159_v5  ;;  %v4413_v60 = vpop.f32.mrf.mxu0 }
 0x72c   :  { %v4796_v36 = vpop.f32.mrf.mxu2  ;;  %v4989_v6 = vpop.f32.mrf.mxu3  ;;  %7053 = vperm.xlu0 %9728, %v6492_v61   ;;  %v4414_v40 = vadd.f32 %v4413_v60, %v15251_v63  ;;  %v15257_v61 = vld [vmem:[#allocation116_spill] sm:$0xff] }
 0x72d   :  { %v4797_v33 = vadd.f32 %v4796_v36, %v4604_v58 }
 0x72e   :  { %v4606_v30 = vpop.f32.mrf.mxu1  ;;  %v7012_v46 = vpop.permute.xlu0 %7011 }
 0x72f   :  { %v4990_v14 = vadd.f32 %v4989_v6, %v4797_v33  ;;  %v7352_v2 = vperm.slane %v7012_v46, %v12532_v51  ;;  %v4607_v31 = vadd.f32 %v4606_v30, %v4414_v40  ;;  %v15258_v40 = vld [vmem:[#allocation114_spill] sm:$0xff] }
 0x731   :  { %v10005_v8 = vpop.eup %10004  ;;  %v5160_v24 = vadd.f32 %v13609_v34, %v4990_v14  ;;  %v7353_v15 = vsel %vm7149_vm14, %v7352_v2, %v7351_v29  ;;  %v15255_v29 = vld [vmem:[#allocation79_spill] sm:$0xff] }
 0x732   :  { %v6493_v47 = vmul.f32 %v10005_v8, %v15252_v43  ;;  %v7405_v52 = vsel %vm7402_vm15, %v7353_v15, %v15253_v1 }
 0x733   :  { %10006 = vtanh.f32 %v5160_v24  ;;  %v7417_v59 = vsel %vm7413_vm11, %v7405_v52, 0.0  ;;  %v4415_v4 = vpop.f32.mrf.mxu0  ;;  %v15259_v24 = vld [vmem:[#allocation75_spill] sm:$0xff] }
 0x734   :  { %v4799_v19 = vpop.f32.mrf.mxu2  ;;  %v4992_v57 = vpop.f32.mrf.mxu3  ;;  %7056 = vperm.xlu2 %9732, %v6493_v47   ;;  %v14647_v16 = vadd.f32 %v7417_v59, %v14475_v28  ;;  %v4416_v50 = vadd.f32 %v4415_v4, %v15254_v38 }
 0x735   :  { %v4800_v26 = vadd.f32 %v4799_v19, %v4607_v31 }
 0x736   :  { %v4608_v22 = vpop.f32.mrf.mxu1 }
 0x737   :  { %v4993_v42 = vadd.f32 %v4992_v57, %v4800_v26  ;;  %v4609_v10 = vadd.f32 %v4608_v22, %v4416_v50  ;;  %v15260_v57 = vld [vmem:[#allocation37_spill] sm:$0xff] }
 0x739   :  { %v10007_v37 = vpop.eup %10006  ;;  %v5161_v49 = vadd.f32 %v13609_v34, %v4993_v42  ;;  %v15261_v42 = vld [vmem:[#allocation60_spill] sm:$0xff] }
 0x73a   :  { %v6494_v48 = vmul.f32 %v10007_v37, %v15255_v29 }
 0x73b   :  { %10008 = vtanh.f32 %v5161_v49  ;;  %v4418_v53 = vpop.f32.mrf.mxu0 }
 0x73c   :  { %v4801_v23 = vpop.f32.mrf.mxu2  ;;  %v4994_v62 = vpop.f32.mrf.mxu3  ;;  %7059 = vperm.xlu1 %9733, %v6494_v48   ;;  %v4419_v13 = vadd.f32 %v4418_v53, %v15256_v12 }
 0x73d   :  { %v4802_v45 = vadd.f32 %v4801_v23, %v4609_v10 }
 0x73e   :  { %v4611_v44 = vpop.f32.mrf.mxu1 }
 0x73f   :  { %v4995_v28 = vadd.f32 %v4994_v62, %v4802_v45  ;;  %v4612_v36 = vadd.f32 %v4611_v44, %v4419_v13  ;;  %v15262_v62 = vld [vmem:[#allocation99_spill] sm:$0xff] }
 0x741   :  { %v10009_v5 = vpop.eup %10008  ;;  %v5162_v3 = vadd.f32 %v13609_v34, %v4995_v28  ;;  %v15263_v28 = vld [vmem:[#allocation100_spill] sm:$0xff] }
 0x742   :  { %v6495_v58 = vmul.f32 %v10009_v5, %v15257_v61 }
 0x743   :  { %10010 = vtanh.f32 %v5162_v3  ;;  %v4420_v30 = vpop.f32.mrf.mxu0 }
 0x744   :  { %v4804_v6 = vpop.f32.mrf.mxu2  ;;  %v4997_v33 = vpop.f32.mrf.mxu3  ;;  %7062 = vperm.xlu1 %9733, %v6495_v58   ;;  %v4421_v46 = vadd.f32 %v4420_v30, %v15258_v40 }
 0x745   :  { %v4805_v60 = vadd.f32 %v4804_v6, %v4612_v36 }
 0x746   :  { %v4613_v14 = vpop.f32.mrf.mxu1 }
 0x747   :  { %v4998_v63 = vadd.f32 %v4997_v33, %v4805_v60  ;;  %v4614_v43 = vadd.f32 %v4613_v14, %v4421_v46  ;;  %v15264_v33 = vld [vmem:[#allocation39_spill] sm:$0xff] }
 0x749   :  { %v10011_v2 = vpop.eup %10010  ;;  %v5163_v8 = vadd.f32 %v13609_v34, %v4998_v63  ;;  %v15265_v63 = vld [vmem:[#allocation20_spill] sm:$0xff] }
 0x74a   :  { %v6496_v15 = vmul.f32 %v10011_v2, %v15259_v24 }
 0x74b   :  { %10012 = vtanh.f32 %v5163_v8  ;;  %v4423_v52 = vpop.f32.mrf.mxu0 }
 0x74c   :  { %v4806_v47 = vpop.f32.mrf.mxu2  ;;  %v4999_v31 = vpop.f32.mrf.mxu3  ;;  %7065 = vperm.xlu2 %9732, %v6496_v15   ;;  %v4424_v26 = vadd.f32 %v4423_v52, %v15260_v57 }
 0x74d   :  { %v4807_v1 = vadd.f32 %v4806_v47, %v4614_v43 }
 0x74e   :  { %v4616_v59 = vpop.f32.mrf.mxu1 }
 0x74f   :  { %v5000_v19 = vadd.f32 %v4999_v31, %v4807_v1  ;;  %v4617_v50 = vadd.f32 %v4616_v59, %v4424_v26  ;;  %v15266_v31 = vld [vmem:[#allocation118_spill] sm:$0xff] }
 0x751   :  { %v10013_v4 = vpop.eup %10012  ;;  %v5164_v22 = vadd.f32 %v13609_v34, %v5000_v19  ;;  %v15267_v19 = vld [vmem:[#allocation125_spill] sm:$0xff] }
 0x752   :  { %v6497_v38 = vmul.f32 %v10013_v4, %v15261_v42 }
 0x753   :  { %10014 = vtanh.f32 %v5164_v22  ;;  %v4425_v48 = vpop.f32.mrf.mxu0 }
 0x754   :  { %v4809_v37 = vpop.f32.mrf.mxu2  ;;  %v5002_v49 = vpop.f32.mrf.mxu3  ;;  %7068 = vperm.xlu0 %9728, %v6497_v38   ;;  %v4426_v45 = vadd.f32 %v4425_v48, %v15262_v62 }
 0x755   :  { %v4810_v29 = vadd.f32 %v4809_v37, %v4617_v50 }
 0x756   :  { %v4618_v10 = vpop.f32.mrf.mxu1 }
 0x757   :  { %v5003_v23 = vadd.f32 %v5002_v49, %v4810_v29  ;;  %v4619_v13 = vadd.f32 %v4618_v10, %v4426_v45  ;;  %v15268_v49 = vld [vmem:[#allocation41_spill] sm:$0xff] }
 0x759   :  { %v10015_v53 = vpop.eup %10014  ;;  %v5165_v44 = vadd.f32 %v13609_v34, %v5003_v23  ;;  %v15269_v23 = vld [vmem:[#allocation89_spill] sm:$0xff] }
 0x75a   :  { %v6498_v12 = vmul.f32 %v10015_v53, %v15263_v28 }
 0x75b   :  { %10016 = vtanh.f32 %v5165_v44  ;;  %v4428_v58 = vpop.f32.mrf.mxu0 }
 0x75c   :  { %v4811_v5 = vpop.f32.mrf.mxu2  ;;  %v5004_v3 = vpop.f32.mrf.mxu3  ;;  %7071 = vperm.xlu2 %9732, %v6498_v12   ;;  %v4429_v60 = vadd.f32 %v4428_v58, %v15264_v33  ;;  %v15270_v58 = vld [vmem:[#allocation19_spill] sm:$0xff] }
 0x75d   :  { %v4812_v61 = vadd.f32 %v4811_v5, %v4619_v13 }
 0x75e   :  { %v4621_v36 = vpop.f32.mrf.mxu1 }
 0x75f   :  { %v5005_v6 = vadd.f32 %v5004_v3, %v4812_v61  ;;  %v4622_v46 = vadd.f32 %v4621_v36, %v4429_v60 }
 0x761   :  { %v10017_v30 = vpop.eup %10016  ;;  %v5166_v14 = vadd.f32 %v13609_v34, %v5005_v6 }
 0x762   :  { %v6499_v40 = vmul.f32 %v10017_v30, %v15265_v63  ;;  %v15271_v30 = vld [vmem:[#allocation23_spill] sm:$0xff]  ;;  %v7015_v63 = vpop.permute.xlu1 %7014 }
 0x763   :  { %10018 = vtanh.f32 %v5166_v14  ;;  %v4430_v15 = vpop.f32.mrf.mxu0 }
 0x764   :  { %v4814_v2 = vpop.f32.mrf.mxu2  ;;  %v5007_v8 = vpop.f32.mrf.mxu3  ;;  %7074 = vperm.xlu1 %9733, %v6499_v40   ;;  %v4431_v1 = vadd.f32 %v4430_v15, %v15266_v31 }
 0x765   :  { %v4815_v24 = vadd.f32 %v4814_v2, %v4622_v46  ;;  %v7021_v40 = vpop.permute.xlu0 %7020  ;;  %v7018_v46 = vpop.permute.xlu2 %7017 }
 0x766   :  { %v4623_v43 = vpop.f32.mrf.mxu1  ;;  %v7355_v31 = vperm.slane %v7018_v46, %v12156_v41 }
 0x767   :  { %v5008_v47 = vadd.f32 %v5007_v8, %v4815_v24  ;;  %v4624_v26 = vadd.f32 %v4623_v43, %v4431_v1 }
 0x769   :  { %v10019_v52 = vpop.eup %10018  ;;  %v5167_v59 = vadd.f32 %v13609_v34, %v5008_v47  ;;  %v7357_v47 = vperm.slane %v7021_v40, %v12634_v27 }
 0x76a   :  { %v6500_v57 = vmul.f32 %v10019_v52, %v15267_v19  ;;  %v7024_v2 = vpop.permute.xlu1 %7023 }
 0x76b   :  { %10020 = vtanh.f32 %v5167_v59  ;;  %v4433_v38 = vpop.f32.mrf.mxu0  ;;  %v7359_v1 = vperm.slane %v7024_v2, %v12715_v54 }
 0x76c   :  { %v4816_v4 = vpop.f32.mrf.mxu2  ;;  %v5009_v22 = vpop.f32.mrf.mxu3  ;;  %7077 = vperm.xlu0 %9728, %v6500_v57   ;;  %v4434_v29 = vadd.f32 %v4433_v38, %v15268_v49 }
 0x76d   :  { %v4817_v42 = vadd.f32 %v4816_v4, %v4624_v26  ;;  %v7030_v8 = vpop.permute.xlu0 %7029  ;;  %v7027_v24 = vpop.permute.xlu2 %7026 }
 0x76e   :  { %v4626_v50 = vpop.f32.mrf.mxu1  ;;  %v7363_v26 = vperm.slane %v7030_v8, %v12704_v20 }
 0x76f   :  { %v5010_v37 = vadd.f32 %v5009_v22, %v4817_v42  ;;  %v4627_v45 = vadd.f32 %v4626_v50, %v4434_v29  ;;  %v7361_v22 = vperm.slane %v7027_v24, %v12872_v56 }
 0x771   :  { %v10021_v48 = vpop.eup %10020  ;;  %v5168_v10 = vadd.f32 %v13609_v34, %v5010_v37 }
 0x772   :  { %v6501_v62 = vmul.f32 %v10021_v48, %v15269_v23  ;;  %v7033_v15 = vpop.permute.xlu1 %7032 }
 0x773   :  { %10022 = vtanh.f32 %v5168_v10  ;;  %v4435_v12 = vpop.f32.mrf.mxu0  ;;  %v7365_v42 = vperm.slane %v7033_v15, %v12289_v18 }
 0x774   :  { %v4819_v53 = vpop.f32.mrf.mxu2  ;;  %v5012_v44 = vpop.f32.mrf.mxu3  ;;  %7080 = vperm.xlu2 %9732, %v6501_v62  }
 0x775   :  { %v4820_v28 = vadd.f32 %v4819_v53, %v4627_v45  ;;  %v7036_v59 = vpop.permute.xlu2 %7035 }
 0x776   :  { %v4628_v13 = vpop.f32.mrf.mxu1  ;;  %v7039_v43 = vpop.permute.xlu0 %7038  ;;  %v7367_v48 = vperm.slane %v7036_v59, %v12890_v25 }
 0x777   :  { %v5013_v5 = vadd.f32 %v5012_v44, %v4820_v28  ;;  %v7369_v29 = vperm.slane %v7039_v43, %v12772_v9 }
 0x779   :  { %v10023_v3 = vpop.eup %10022  ;;  %v5169_v61 = vadd.f32 %v13609_v34, %v5013_v5  ;;  %v7354_v34 = vperm.slane %v7015_v63, %v12148_v21 }
 0x77a   :  { %v6502_v36 = vmul.f32 %v10023_v3, %v15270_v58 }
 0x77b   :  { %10024 = vtanh.f32 %v5169_v61  ;;  %v7356_v52 = vsel %vm7093_vm0, %v7355_v31, %v7354_v34 }
 0x77c   :  { %v4821_v6 = vpop.f32.mrf.mxu2  ;;  %v5014_v33 = vpop.f32.mrf.mxu3  ;;  %7083 = vperm.xlu0 %9728, %v6502_v36   ;;  %v7358_v19 = vsel %vm7097_vm1, %v7357_v47, %v7356_v52 }
 0x77d   :  { %v7360_v57 = vsel %vm7101_vm2, %v7359_v1, %v7358_v19  ;;  %v7045_v10 = vpop.permute.xlu2 %7044 }
 0x77e   :  { %v7042_v4 = vpop.permute.xlu1 %7041  ;;  %v7362_v50 = vsel %vm7105_vm3, %v7361_v22, %v7360_v57  ;;  %v7373_v13 = vperm.slane %v7045_v10, %v12940_v55 }
 0x77f   :  { %v7364_v37 = vsel %vm7109_vm4, %v7363_v26, %v7362_v50  ;;  %v7371_v23 = vperm.slane %v7042_v4, %v12355_v7 }
 0x780   :  { %v7366_v49 = vsel %vm7113_vm5, %v7365_v42, %v7364_v37 }
 0x781   :  { %v10025_v60 = vpop.eup %10024  ;;  %v7368_v62 = vsel %vm14744_vm6, %v7367_v48, %v7366_v49  ;;  %vm15273_vm6 = vcmask 851712  }
 0x782   :  { %v6503_v14 = vmul.f32 %v10025_v60, %v15271_v30  ;;  %v7370_v53 = vsel %vm7121_vm7, %v7369_v29, %v7368_v62 }
 0x783   :  { %v7372_v28 = vsel %vm7125_vm8, %v7371_v23, %v7370_v53 }
 0x784   :  { %7086 = vperm.xlu1 %9733, %v6503_v14   ;;  %v7374_v61 = vsel %vm7129_vm9, %v7373_v13, %v7372_v28 }
 0x78e   :  { %v7048_v38 = vpop.permute.xlu0 %7047  ;;  %v7057_v58 = vpop.permute.xlu2 %7056 }
 0x78f   :  { %v7375_v12 = vperm.slane %v7048_v38, %v12816_v11  ;;  %v7381_v33 = vperm.slane %v7057_v58, %v12829_v32 }
 0x791   :  { %v7376_v7 = vsel %vm15272_vm10, %v7375_v12, %v7374_v61 }
 0x796   :  { %v7051_v45 = vpop.permute.xlu1 %7050 }
 0x797   :  { %v7377_v5 = vperm.slane %v7051_v45, %v12456_v35 }
 0x799   :  { %v7378_v36 = vsel %vm15273_vm6, %v7377_v5, %v7376_v7 }
 0x79e   :  { %v7054_v44 = vpop.permute.xlu0 %7053 }
 0x79f   :  { %v7379_v3 = vperm.slane %v7054_v44, %v12958_v17 }
 0x7a1   :  { %v7380_v6 = vsel %vm7141_vm12, %v7379_v3, %v7378_v36 }
 0x7a2   :  { %v7382_v55 = vsel %vm7145_vm13, %v7381_v33, %v7380_v6 }
 0x7a6   :  { %v7066_v40 = vpop.permute.xlu2 %7065 }
 0x7a7   :  { %v7386_v24 = vperm.slane %v7066_v40, %v12156_v41 }
 0x7ae   :  { %v7060_v60 = vpop.permute.xlu1 %7059 }
 0x7af   :  { %v7383_v11 = vperm.slane %v7060_v60, %v12532_v51 }
 0x7b1   :  { %v7384_v35 = vsel %vm7149_vm14, %v7383_v11, %v7382_v55 }
 0x7b2   :  { %v7406_v17 = vsel %vm7402_vm15, %v7384_v35, %v13709_v39 }
 0x7b3   :  { %v7419_v30 = vsel %vm7413_vm11, %v7406_v17, 0.0 }
 0x7b4   :  { %v7420_v14 = vadd.f32 %v7419_v30, %v14647_v16 }
 0x7b6   :  { %v7063_v46 = vpop.permute.xlu1 %7062  ;;  %v7072_v8 = vpop.permute.xlu2 %7071 }
 0x7b7   :  { %v7385_v32 = vperm.slane %v7063_v46, %v12148_v21  ;;  %v7390_v16 = vperm.slane %v7072_v8, %v12715_v54 }
 0x7b9   :  { %v7387_v43 = vsel %vm7093_vm0, %v7386_v24, %v7385_v32  ;;  %vm15274_vm0 = vcmask 523712  }
 0x7c6   :  { %v7069_v63 = vpop.permute.xlu0 %7068 }
 0x7c7   :  { %v7388_v51 = vperm.slane %v7069_v63, %v12634_v27 }
 0x7c9   :  { %v7389_v39 = vsel %vm7097_vm1, %v7388_v51, %v7387_v43  ;;  %vm7421_vm1 = vcmask 525312  }
 0x7ca   :  { %v7391_v52 = vsel %vm7101_vm2, %v7390_v16, %v7389_v39  ;;  %vm7426_vm2 = vcmask 1024  }
 0x7ce   :  { %v7081_v1 = vpop.permute.xlu2 %7080 }
 0x7cf   :  { %v7396_v59 = vperm.slane %v7081_v1, %v12289_v18 }
 0x7d6   :  { %v7075_v15 = vpop.permute.xlu1 %7074 }
 0x7d7   :  { %v7392_v34 = vperm.slane %v7075_v15, %v12872_v56 }
 0x7d9   :  { %v7393_v21 = vsel %vm7105_vm3, %v7392_v34, %v7391_v52 }
 0x7de   :  { %v7078_v2 = vpop.permute.xlu0 %7077 }
 0x7df   :  { %v7394_v47 = vperm.slane %v7078_v2, %v12704_v20 }
 0x7e1   :  { %v7395_v27 = vsel %vm7109_vm4, %v7394_v47, %v7393_v21 }
 0x7e2   :  { %v7397_v57 = vsel %vm7113_vm5, %v7396_v59, %v7395_v27 }
 0x7ee   :  { %v7084_v31 = vpop.permute.xlu0 %7083 }
 0x7ef   :  { %v7398_v41 = vperm.slane %v7084_v31, %v12890_v25 }
 0x7f1   :  { %v7399_v54 = vsel %vm15274_vm0, %v7398_v41, %v7397_v57 }
 0x7f6   :  { %v7087_v19 = vpop.permute.xlu1 %7086 }
 0x7f7   :  { %v7400_v56 = vperm.slane %v7087_v19, %v12772_v9 }
 0x7f9   :  { %v7401_v20 = vsel %vm7121_vm7, %v7400_v56, %v7399_v54 }
 0x7fa   :  { %v7407_v26 = vsel %vm7402_vm15, %v7401_v20, %v13859_v0 }
 0x7fb   :  { %v7422_v4 = vsel %vm7421_vm1, %v7407_v26, 0.0 }
 0x7fc   :  { %v7423_v22 = vadd.f32 %v7422_v4, %v7420_v14 }
 0x7fe   :  { %7424 = vadd.xlane.f32.xlu2 %v7423_v22 }
 0x871   :  { %v7425_v25 = vpop.xlane.xlu2 %7424 }
 0x872   :  { %7427 = vst.msk [vmem:[%s14737_s4] sm:$0x3] %vm7426_vm2, %v7425_v25 }

</bundles_post_ra>
